<compile_context>
chip_gen: v7x
topology: tpu7x:2x2x1
jax: 0.10.0
libtpu: 0.0.40
codegen_flags: <defaults>
</compile_context>

<pallas_src>
import functools

import jax
import jax.numpy as jnp
import numpy as np
from jax.experimental import pallas as pl
from jax.experimental.pallas import tpu as pltpu


def _round_up(n, m):
    return (n + m - 1) // m * m


_PROJ_VMEM_LIMIT = 48 * 1024 * 1024          # headroom under v7x's 64 MiB VMEM
_GATE_SRC = (0, 1, 3, 2)                     # padded layout [i,f,o,g] <- torch [i,f,g,o]


def _pick_time_chunk(T, Bp, Hp, budget_bytes=4 << 20):
    """Largest divisor of T (<=128) whose per-chunk gx footprint fits budget."""
    per_t = Bp * 4 * Hp * 2 * 2              # two direction halves, bf16
    cap = max(1, budget_bytes // per_t)
    best = 1
    for tc in range(1, min(T, 128) + 1):
        if T % tc == 0 and tc <= cap:
            best = tc
    return best


def _pick_m_tile(T, Bp, cap_rows=1024):
    """M tile (multiple of Bp, divisor of T*Bp) of at most ~cap_rows rows."""
    c = 1
    for t in range(1, T + 1):
        if T % t == 0 and Bp * t <= cap_rows:
            c = t
    return Bp * c


# ---------------------------------------------------------------------------
# Kernel 1: input projection.  gates_x = x @ W + bias, both directions fused
# into the N axis (W is (Din, 8*Hp)).  M axis tiled; bf16 MXU inputs/outputs.
# ---------------------------------------------------------------------------
def _matmul_bias_kernel(x_ref, w_ref, b_ref, o_ref):
    o_ref[...] = (jnp.dot(x_ref[...], w_ref[...],
                          preferred_element_type=jnp.float32)
                  + b_ref[...]).astype(o_ref.dtype)


def _matmul2_bias_kernel(xf_ref, xb_ref, wf_ref, wb_ref, b_ref, o_ref):
    acc = jnp.dot(xf_ref[...], wf_ref[...], preferred_element_type=jnp.float32)
    acc = acc + jnp.dot(xb_ref[...], wb_ref[...],
                        preferred_element_type=jnp.float32)
    o_ref[...] = (acc + b_ref[...]).astype(o_ref.dtype)


def run_input_proj0(x_tbd, w, bias):
    """x_tbd: (T, Bp, Din).  w: (Din, 8Hp) bf16.  bias: (1, 8Hp) f32.
    Returns gates_x (T, Bp, 8Hp) bf16 (fwd gates in [:4Hp], bwd in [4Hp:])."""
    T, Bp, Din = x_tbd.shape
    G2 = w.shape[1]
    M = T * Bp
    TILE_M = _pick_m_tile(T, Bp)
    x2 = x_tbd.reshape(M, Din).astype(jnp.bfloat16)
    out = pl.pallas_call(
        _matmul_bias_kernel,
        out_shape=jax.ShapeDtypeStruct((M, G2), jnp.bfloat16),
        grid=(M // TILE_M,),
        in_specs=[
            pl.BlockSpec((TILE_M, Din), lambda m: (m, 0)),
            pl.BlockSpec((Din, G2), lambda m: (0, 0)),
            pl.BlockSpec((1, G2), lambda m: (0, 0)),
        ],
        out_specs=pl.BlockSpec((TILE_M, G2), lambda m: (m, 0)),
        compiler_params=pltpu.CompilerParams(
            dimension_semantics=("parallel",),
            vmem_limit_bytes=_PROJ_VMEM_LIMIT),
    )(x2, w, bias)
    return out.reshape(T, Bp, G2)


def run_input_projN(hf, hb, wf, wb, bias):
    """hf/hb: (T, Bp, Hp) bf16 (prev layer's fwd/bwd hidden).  wf/wb: (Hp, 8Hp)."""
    T, Bp, Hp = hf.shape
    G2 = wf.shape[1]
    M = T * Bp
    TILE_M = _pick_m_tile(T, Bp)
    out = pl.pallas_call(
        _matmul2_bias_kernel,
        out_shape=jax.ShapeDtypeStruct((M, G2), jnp.bfloat16),
        grid=(M // TILE_M,),
        in_specs=[
            pl.BlockSpec((TILE_M, Hp), lambda m: (m, 0)),
            pl.BlockSpec((TILE_M, Hp), lambda m: (m, 0)),
            pl.BlockSpec((Hp, G2), lambda m: (0, 0)),
            pl.BlockSpec((Hp, G2), lambda m: (0, 0)),
            pl.BlockSpec((1, G2), lambda m: (0, 0)),
        ],
        out_specs=pl.BlockSpec((TILE_M, G2), lambda m: (m, 0)),
        compiler_params=pltpu.CompilerParams(
            dimension_semantics=("parallel",),
            vmem_limit_bytes=_PROJ_VMEM_LIMIT),
    )(hf.reshape(M, Hp), hb.reshape(M, Hp), wf, wb, bias)
    return out.reshape(T, Bp, G2)


# ---------------------------------------------------------------------------
# LSTM cell (padded gate layout [i, f, o, g]; sigmoid via one tanh push).
# ---------------------------------------------------------------------------
def _lstm_cell(gx_row, h, c, whh, Hp):
    gates = gx_row.astype(jnp.float32) + jnp.dot(
        h.astype(jnp.bfloat16), whh, preferred_element_type=jnp.float32)
    sig = 0.5 * jnp.tanh(0.5 * gates[:, :3 * Hp]) + 0.5
    i_g = sig[:, 0 * Hp:1 * Hp]
    f_g = sig[:, 1 * Hp:2 * Hp]
    o_g = sig[:, 2 * Hp:3 * Hp]
    g_g = jnp.tanh(gates[:, 3 * Hp:])
    c = f_g * c + i_g * g_g
    h = o_g * jnp.tanh(c)
    return h, c


# ---------------------------------------------------------------------------
# Kernel 2: recurrence for a non-final layer.  grid = (time_chunk,).  Both
# directions processed inside each step (independent chains interleave);
# backward time reversal handled purely by index_maps.
# ---------------------------------------------------------------------------
def _bilstm_recurrent_kernel(gxf_ref, gxb_ref, whh_ref, hf_ref, hb_ref,
                             h_sc, c_sc, *, unroll):
    j = pl.program_id(0)
    TC, _, G = gxf_ref.shape
    Hp = G // 4

    @pl.when(j == 0)
    def _():
        h_sc[...] = jnp.zeros_like(h_sc)
        c_sc[...] = jnp.zeros_like(c_sc)

    whh_f = whh_ref[0]
    whh_b = whh_ref[1]

    def step(i, carry):
        h_f, c_f, h_b, c_b = carry
        lt_b = TC - 1 - i
        h_f, c_f = _lstm_cell(gxf_ref[i], h_f, c_f, whh_f, Hp)
        h_b, c_b = _lstm_cell(gxb_ref[lt_b], h_b, c_b, whh_b, Hp)
        hf_ref[i] = h_f.astype(hf_ref.dtype)
        hb_ref[lt_b] = h_b.astype(hb_ref.dtype)
        return h_f, c_f, h_b, c_b

    carry0 = (h_sc[0], c_sc[0], h_sc[1], c_sc[1])
    h_f, c_f, h_b, c_b = jax.lax.fori_loop(0, TC, step, carry0, unroll=unroll)
    h_sc[0] = h_f
    c_sc[0] = c_f
    h_sc[1] = h_b
    c_sc[1] = c_b


def run_bilstm_layer(gx, whh):
    """gx: (T, Bp, 8Hp) bf16.  whh: (2, Hp, 4Hp) bf16.
    Returns (hf, hb), each (T, Bp, Hp) bf16."""
    T, Bp, G2 = gx.shape
    G = G2 // 2
    Hp = G // 4
    TC = _pick_time_chunk(T, Bp, Hp)
    NT = T // TC
    kernel = functools.partial(_bilstm_recurrent_kernel, unroll=min(TC, 8))
    hf, hb = pl.pallas_call(
        kernel,
        out_shape=(jax.ShapeDtypeStruct((T, Bp, Hp), jnp.bfloat16),
                   jax.ShapeDtypeStruct((T, Bp, Hp), jnp.bfloat16)),
        grid=(NT,),
        in_specs=[
            pl.BlockSpec((TC, Bp, G), lambda j: (j, 0, 0)),            # fwd gates
            pl.BlockSpec((TC, Bp, G), lambda j: (NT - 1 - j, 0, 1)),   # bwd gates
            pl.BlockSpec((2, Hp, G), lambda j: (0, 0, 0)),
        ],
        out_specs=[
            pl.BlockSpec((TC, Bp, Hp), lambda j: (j, 0, 0)),
            pl.BlockSpec((TC, Bp, Hp), lambda j: (NT - 1 - j, 0, 0)),
        ],
        scratch_shapes=[
            pltpu.VMEM((2, Bp, Hp), jnp.float32),    # h state (fwd, bwd)
            pltpu.VMEM((2, Bp, Hp), jnp.float32),    # c state (fwd, bwd)
        ],
        compiler_params=pltpu.CompilerParams(
            dimension_semantics=("arbitrary",)),
    )(gx, gx, whh)
    return hf, hb


# ---------------------------------------------------------------------------
# Kernel 3: specialized LAST layer.  Only out[T-1] is needed: run the forward
# recurrence (no HBM hidden-sequence writes) and do ONE zero-state backward
# cell step on the last timestep's backward gates.
# ---------------------------------------------------------------------------
def _last_layer_kernel(gxf_ref, gxb_ref, whh_ref, out_ref, h_sc, c_sc, *, unroll):
    j = pl.program_id(0)
    NT = pl.num_programs(0)
    TC, _, G = gxf_ref.shape
    Hp = G // 4

    @pl.when(j == 0)
    def _():
        h_sc[...] = jnp.zeros_like(h_sc)
        c_sc[...] = jnp.zeros_like(c_sc)

    whh_f = whh_ref[0]

    def step(i, carry):
        h, c = carry
        return _lstm_cell(gxf_ref[i], h, c, whh_f, Hp)

    h_f, c_f = jax.lax.fori_loop(0, TC, step, (h_sc[...], c_sc[...]),
                                 unroll=unroll)
    h_sc[...] = h_f
    c_sc[...] = c_f

    @pl.when(j == NT - 1)
    def _():
        out_ref[:, :Hp] = h_f
        # Backward direction at t = T-1: single cell step from zero state.
        gb = gxb_ref[TC - 1].astype(jnp.float32)
        sig = 0.5 * jnp.tanh(0.5 * gb[:, :3 * Hp]) + 0.5
        i_g = sig[:, 0 * Hp:1 * Hp]
        o_g = sig[:, 2 * Hp:3 * Hp]
        g_g = jnp.tanh(gb[:, 3 * Hp:])
        c_b = i_g * g_g
        out_ref[:, Hp:] = o_g * jnp.tanh(c_b)


def run_last_layer(gx, whh):
    """gx: (T, Bp, 8Hp) bf16.  Returns (Bp, 2Hp) f32 = concat(h_fwd[T-1], h_bwd[T-1])."""
    T, Bp, G2 = gx.shape
    G = G2 // 2
    Hp = G // 4
    TC = _pick_time_chunk(T, Bp, Hp)
    NT = T // TC
    kernel = functools.partial(_last_layer_kernel, unroll=min(TC, 8))
    return pl.pallas_call(
        kernel,
        out_shape=jax.ShapeDtypeStruct((Bp, 2 * Hp), jnp.float32),
        grid=(NT,),
        in_specs=[
            pl.BlockSpec((TC, Bp, G), lambda j: (j, 0, 0)),        # fwd gates, streamed
            pl.BlockSpec((TC, Bp, G), lambda j: (NT - 1, 0, 1)),   # bwd gates, last chunk
            pl.BlockSpec((2, Hp, G), lambda j: (0, 0, 0)),
        ],
        out_specs=pl.BlockSpec((Bp, 2 * Hp), lambda j: (0, 0)),
        scratch_shapes=[
            pltpu.VMEM((Bp, Hp), jnp.float32),
            pltpu.VMEM((Bp, Hp), jnp.float32),
        ],
        compiler_params=pltpu.CompilerParams(
            dimension_semantics=("arbitrary",)),
    )(gx, gx, whh)


# ---------------------------------------------------------------------------
# Kernel 4: final fully-connected layer (tiny; whole arrays in VMEM).
# ---------------------------------------------------------------------------
def run_fc(x, w_t, b):
    """x: (Bp, 2Hp) f32, w_t: (2Hp, O) f32, b: (O,) -> (Bp, O)."""
    Bp = x.shape[0]
    O = w_t.shape[1]
    vmem = pl.BlockSpec(memory_space=pltpu.MemorySpace.VMEM)
    return pl.pallas_call(
        _matmul_bias_kernel,
        out_shape=jax.ShapeDtypeStruct((Bp, O), jnp.float32),
        in_specs=[vmem, vmem, vmem],
        out_specs=vmem,
    )(x, w_t, b.reshape(1, O))


# ---------------------------------------------------------------------------
# Parameter preparation: transpose, reorder gates to [i,f,o,g], lane-pad to Hp,
# fold fwd/bwd into one projection weight, cast MXU operands to bf16.
# Padded positions are zero and stay zero through the recurrence.
# ---------------------------------------------------------------------------
def _reorder_pad_gate_cols(w_t, H, Hp):
    R = w_t.shape[0]
    out = jnp.zeros((R, 4 * Hp), jnp.float32)
    for k, src in enumerate(_GATE_SRC):
        out = out.at[:, k * Hp:k * Hp + H].set(w_t[:, src * H:(src + 1) * H])
    return out


def prepare_params(params, *, hidden_size, num_layers):
    H = hidden_size
    Hp = _round_up(H, 128)
    prep = {"Hp": Hp, "layers": []}
    for l in range(num_layers):
        p = params["lstm"][l]
        wih, whh_l, bias_l = {}, [], []
        for d in ("f", "b"):
            wih[d] = _reorder_pad_gate_cols(p[f"w_ih_{d}"].T, H, Hp)     # (Din_l, 4Hp)
            whh_d = _reorder_pad_gate_cols(p[f"w_hh_{d}"].T, H, Hp)      # (H, 4Hp)
            whh_l.append(jnp.pad(whh_d, ((0, Hp - H), (0, 0))))          # (Hp, 4Hp)
            bias_l.append(_reorder_pad_gate_cols(
                (p[f"b_ih_{d}"] + p[f"b_hh_{d}"]).reshape(1, 4 * H), H, Hp))
        layer = {
            "whh": jnp.stack(whh_l).astype(jnp.bfloat16),                # (2, Hp, 4Hp)
            "bias": jnp.concatenate(bias_l, axis=1),                     # (1, 8Hp) f32
        }
        if l == 0:
            layer["w"] = jnp.concatenate(
                [wih["f"], wih["b"]], axis=1).astype(jnp.bfloat16)       # (Din, 8Hp)
        else:
            # rows [0:H] of the transposed weight act on the previous layer's
            # forward hidden, rows [H:2H] on its backward hidden.
            def _rows(w, lo, hi):
                return jnp.pad(w[lo:hi], ((0, Hp - H), (0, 0)))
            layer["wf"] = jnp.concatenate(
                [_rows(wih["f"], 0, H), _rows(wih["b"], 0, H)],
                axis=1).astype(jnp.bfloat16)                             # (Hp, 8Hp)
            layer["wb"] = jnp.concatenate(
                [_rows(wih["f"], H, 2 * H), _rows(wih["b"], H, 2 * H)],
                axis=1).astype(jnp.bfloat16)                             # (Hp, 8Hp)
        prep["layers"].append(layer)

    fcw = params["fc_w"].T                                               # (2H, O)
    O = fcw.shape[1]
    fc_pad = jnp.zeros((2 * Hp, O), jnp.float32)
    fc_pad = fc_pad.at[:H].set(fcw[:H]).at[Hp:Hp + H].set(fcw[H:2 * H])
    prep["fc_w"] = fc_pad
    prep["fc_b"] = params["fc_b"].astype(jnp.float32)
    return prep


# ---------------------------------------------------------------------------
# Full BiLSTM forward (matches the PyTorch module's forward()).
# ---------------------------------------------------------------------------
def bilstm_forward(x, prep, *, num_layers, output_size, ahead):
    """x: (B, T, input_size) batch-first. Returns (B, ahead, output_size)."""
    B, T, _ = x.shape
    Bp = _round_up(B, 16)          # bf16 sublane packing

    xt = jnp.transpose(x, (1, 0, 2)).astype(jnp.float32)     # (T, B, Din)
    if Bp != B:
        xt = jnp.pad(xt, ((0, 0), (0, Bp - B), (0, 0)))       # (T, Bp, Din)

    hf = hb = None
    h_last = None
    for l in range(num_layers):
        lp = prep["layers"][l]
        if l == 0:
            gx = run_input_proj0(xt, lp["w"], lp["bias"])      # (T, Bp, 8Hp) bf16
        else:
            gx = run_input_projN(hf, hb, lp["wf"], lp["wb"], lp["bias"])
        if l == num_layers - 1:
            h_last = run_last_layer(gx, lp["whh"])             # (Bp, 2Hp) f32
        else:
            hf, hb = run_bilstm_layer(gx, lp["whh"])           # 2 x (T, Bp, Hp) bf16

    y = run_fc(h_last, prep["fc_w"], prep["fc_b"])             # (Bp, O*ahead)
    return y[:B].reshape(B, ahead, output_size)


# ---------------------------------------------------------------------------
# Deterministic parameter init (same shapes as nn.LSTM / nn.Linear).
# ---------------------------------------------------------------------------
def init_params(key, input_size, hidden_size, output_size, num_layers, ahead):
    bound = 1.0 / np.sqrt(hidden_size)
    params = {"lstm": []}
    for l in range(num_layers):
        din = input_size if l == 0 else 2 * hidden_size
        layer = {}
        for d in ("f", "b"):
            key, k1, k2, k3, k4 = jax.random.split(key, 5)
            layer[f"w_ih_{d}"] = jax.random.uniform(
                k1, (4 * hidden_size, din), jnp.float32, -bound, bound)
            layer[f"w_hh_{d}"] = jax.random.uniform(
                k2, (4 * hidden_size, hidden_size), jnp.float32, -bound, bound)
            layer[f"b_ih_{d}"] = jax.random.uniform(
                k3, (4 * hidden_size,), jnp.float32, -bound, bound)
            layer[f"b_hh_{d}"] = jax.random.uniform(
                k4, (4 * hidden_size,), jnp.float32, -bound, bound)
        params["lstm"].append(layer)
    key, k1, k2 = jax.random.split(key, 3)
    fb = 1.0 / np.sqrt(2 * hidden_size)
    params["fc_w"] = jax.random.uniform(
        k1, (output_size * ahead, 2 * hidden_size), jnp.float32, -fb, fb)
    params["fc_b"] = jax.random.uniform(
        k2, (output_size * ahead,), jnp.float32, -fb, fb)
    return params


# ---------------------------------------------------------------------------
# Pure-JAX f32 reference (PyTorch gate order) for correctness checking.
# ---------------------------------------------------------------------------
def _cell_ref(x_t, h, c, w_ih, w_hh, b_ih, b_hh, H):
    gates = x_t @ w_ih.T + b_ih + h @ w_hh.T + b_hh
    i = jax.nn.sigmoid(gates[:, :H])
    f = jax.nn.sigmoid(gates[:, H:2 * H])
    g = jnp.tanh(gates[:, 2 * H:3 * H])
    o = jax.nn.sigmoid(gates[:, 3 * H:])
    c = f * c + i * g
    h = o * jnp.tanh(c)
    return h, c


def bilstm_reference(x, params, *, hidden_size, num_layers, output_size, ahead):
    B, T, _ = x.shape
    H = hidden_size
    layer_in = x.astype(jnp.float32)
    for l in range(num_layers):
        p = params["lstm"][l]
        h, c = jnp.zeros((B, H)), jnp.zeros((B, H))
        fwd = []
        for t in range(T):
            h, c = _cell_ref(layer_in[:, t], h, c, p["w_ih_f"], p["w_hh_f"],
                             p["b_ih_f"], p["b_hh_f"], H)
            fwd.append(h)
        h, c = jnp.zeros((B, H)), jnp.zeros((B, H))
        bwd = [None] * T
        for t in reversed(range(T)):
            h, c = _cell_ref(layer_in[:, t], h, c, p["w_ih_b"], p["w_hh_b"],
                             p["b_ih_b"], p["b_hh_b"], H)
            bwd[t] = h
        layer_in = jnp.stack(
            [jnp.concatenate([fwd[t], bwd[t]], axis=-1) for t in range(T)],
            axis=1)
    last = layer_in[:, -1, :]
    y = last @ params["fc_w"].T + params["fc_b"]
    return y.reshape(-1, ahead, output_size)


if __name__ == "__main__":
    batch, seq = 2, 8
    input_size, hidden_size = 4, 32
    output_size, num_layers, ahead = 3, 2, 2

    key = jax.random.PRNGKey(0)
    key, kx = jax.random.split(key)
    x = jax.random.normal(kx, (batch, seq, input_size), jnp.float32)

    params = init_params(key, input_size, hidden_size, output_size,
                         num_layers, ahead)
    prep = prepare_params(params, hidden_size=hidden_size,
                          num_layers=num_layers)

    fwd = jax.jit(functools.partial(
        bilstm_forward, num_layers=num_layers, output_size=output_size,
        ahead=ahead))
    out = jax.block_until_ready(fwd(x, prep))
    assert out.shape == (batch, ahead, output_size), out.shape

    ref = bilstm_reference(x, params, hidden_size=hidden_size,
                           num_layers=num_layers, output_size=output_size,
                           ahead=ahead)
    # bf16 MXU inputs / bf16 gates_x storage loosen tolerance vs the f32 ref.
    np.testing.assert_allclose(np.asarray(out), np.asarray(ref),
                               rtol=3e-2, atol=3e-2)
    print("KERNEL_OK")
</pallas_src>

<mosaic_0001>
module attributes {stable_mosaic.version = 11 : i64} {
  func.func @_matmul_bias_kernel(%arg0: i32, %arg1: memref<128x4xbf16, #tpu.memory_space<vmem>>, %arg2: memref<4x1024xbf16, #tpu.memory_space<vmem>>, %arg3: memref<1x1024xf32, #tpu.memory_space<vmem>>, %arg4: memref<128x1024xbf16, #tpu.memory_space<vmem>>) attributes {dimension_semantics = [#tpu.dimension_semantics<parallel>], iteration_bounds = array<i64: 1>, scalar_prefetch = 0 : i64, scratch_operands = 0 : i64, tpu.core_type = #tpu.core_type<tc>, window_params = [{transform_indices = @transform_0, window_bounds = array<i64: 128, 4>}, {pipeline_mode = #tpu.pipeline_mode<synchronous>, transform_indices = @transform_1, window_bounds = array<i64: 4, 1024>}, {pipeline_mode = #tpu.pipeline_mode<synchronous>, transform_indices = @transform_2, window_bounds = array<i64: 1, 1024>}, {transform_indices = @transform_3, window_bounds = array<i64: 128, 1024>}]} {
    %c0 = arith.constant 0 : index
    %c0_0 = arith.constant 0 : index
    %0 = vector.load %arg1[%c0, %c0_0] : memref<128x4xbf16, #tpu.memory_space<vmem>>, vector<128x4xbf16>
    %c0_1 = arith.constant 0 : index
    %c0_2 = arith.constant 0 : index
    %1 = vector.load %arg2[%c0_1, %c0_2] : memref<4x1024xbf16, #tpu.memory_space<vmem>>, vector<4x1024xbf16>
    %cst = arith.constant dense<0.000000e+00> : vector<128x1024xf32>
    %2 = tpu.matmul %0, %1, %cst {dimension_numbers = #tpu.dot_dimension_numbers<[1], [0], [0], [1], [0, 0, 1, 1], [], []>} : vector<128x4xbf16>, vector<4x1024xbf16>, vector<128x1024xf32> -> vector<128x1024xf32>
    %c0_3 = arith.constant 0 : index
    %c0_4 = arith.constant 0 : index
    %3 = vector.load %arg3[%c0_3, %c0_4] : memref<1x1024xf32, #tpu.memory_space<vmem>>, vector<1x1024xf32>
    %4 = vector.broadcast %3 : vector<1x1024xf32> to vector<128x1024xf32>
    %5 = arith.addf %2, %4 : vector<128x1024xf32>
    %6 = arith.truncf %5 : vector<128x1024xf32> to vector<128x1024xbf16>
    %c0_5 = arith.constant 0 : index
    %c0_6 = arith.constant 0 : index
    %7 = vector.load %arg4[%c0_5, %c0_6] : memref<128x1024xbf16, #tpu.memory_space<vmem>>, vector<128x1024xbf16>
    tpu.vector_store %arg4[%c0_5, %c0_6], %6 {strides = array<i32>} : memref<128x1024xbf16, #tpu.memory_space<vmem>>, vector<128x1024xbf16>,
    return
  }
  func.func @transform_0(%arg0: i32) -> (i32, i32) {
    %c0_i32 = arith.constant 0 : i32
    %c0_i32_0 = arith.constant 0 : i32
    return %arg0, %c0_i32 : i32, i32
  }
  func.func @transform_1(%arg0: i32) -> (i32, i32) {
    %c0_i32 = arith.constant 0 : i32
    %c0_i32_0 = arith.constant 0 : i32
    %c0_i32_1 = arith.constant 0 : i32
    return %c0_i32, %c0_i32_0 : i32, i32
  }
  func.func @transform_2(%arg0: i32) -> (i32, i32) {
    %c0_i32 = arith.constant 0 : i32
    %c0_i32_0 = arith.constant 0 : i32
    %c0_i32_1 = arith.constant 0 : i32
    return %c0_i32, %c0_i32_0 : i32, i32
  }
  func.func @transform_3(%arg0: i32) -> (i32, i32) {
    %c0_i32 = arith.constant 0 : i32
    %c0_i32_0 = arith.constant 0 : i32
    return %arg0, %c0_i32 : i32, i32
  }
}

module attributes {stable_mosaic.version = 11 : i64} {
  func.func @_matmul2_bias_kernel(%arg0: i32, %arg1: memref<128x128xbf16, #tpu.memory_space<vmem>>, %arg2: memref<128x128xbf16, #tpu.memory_space<vmem>>, %arg3: memref<128x1024xbf16, #tpu.memory_space<vmem>>, %arg4: memref<128x1024xbf16, #tpu.memory_space<vmem>>, %arg5: memref<1x1024xf32, #tpu.memory_space<vmem>>, %arg6: memref<128x1024xbf16, #tpu.memory_space<vmem>>) attributes {dimension_semantics = [#tpu.dimension_semantics<parallel>], iteration_bounds = array<i64: 1>, scalar_prefetch = 0 : i64, scratch_operands = 0 : i64, tpu.core_type = #tpu.core_type<tc>, window_params = [{transform_indices = @transform_0, window_bounds = array<i64: 128, 128>}, {transform_indices = @transform_1, window_bounds = array<i64: 128, 128>}, {pipeline_mode = #tpu.pipeline_mode<synchronous>, transform_indices = @transform_2, window_bounds = array<i64: 128, 1024>}, {pipeline_mode = #tpu.pipeline_mode<synchronous>, transform_indices = @transform_3, window_bounds = array<i64: 128, 1024>}, {pipeline_mode = #tpu.pipeline_mode<synchronous>, transform_indices = @transform_4, window_bounds = array<i64: 1, 1024>}, {transform_indices = @transform_5, window_bounds = array<i64: 128, 1024>}]} {
    %c0 = arith.constant 0 : index
    %c0_0 = arith.constant 0 : index
    %0 = vector.load %arg1[%c0, %c0_0] : memref<128x128xbf16, #tpu.memory_space<vmem>>, vector<128x128xbf16>
    %c0_1 = arith.constant 0 : index
    %c0_2 = arith.constant 0 : index
    %1 = vector.load %arg3[%c0_1, %c0_2] : memref<128x1024xbf16, #tpu.memory_space<vmem>>, vector<128x1024xbf16>
    %cst = arith.constant dense<0.000000e+00> : vector<128x1024xf32>
    %2 = tpu.matmul %0, %1, %cst {dimension_numbers = #tpu.dot_dimension_numbers<[1], [0], [0], [1], [0, 0, 1, 1], [], []>} : vector<128x128xbf16>, vector<128x1024xbf16>, vector<128x1024xf32> -> vector<128x1024xf32>
    %c0_3 = arith.constant 0 : index
    %c0_4 = arith.constant 0 : index
    %3 = vector.load %arg2[%c0_3, %c0_4] : memref<128x128xbf16, #tpu.memory_space<vmem>>, vector<128x128xbf16>
    %c0_5 = arith.constant 0 : index
    %c0_6 = arith.constant 0 : index
    %4 = vector.load %arg4[%c0_5, %c0_6] : memref<128x1024xbf16, #tpu.memory_space<vmem>>, vector<128x1024xbf16>
    %cst_7 = arith.constant dense<0.000000e+00> : vector<128x1024xf32>
    %5 = tpu.matmul %3, %4, %cst_7 {dimension_numbers = #tpu.dot_dimension_numbers<[1], [0], [0], [1], [0, 0, 1, 1], [], []>} : vector<128x128xbf16>, vector<128x1024xbf16>, vector<128x1024xf32> -> vector<128x1024xf32>
    %6 = arith.addf %2, %5 : vector<128x1024xf32>
    %c0_8 = arith.constant 0 : index
    %c0_9 = arith.constant 0 : index
    %7 = vector.load %arg5[%c0_8, %c0_9] : memref<1x1024xf32, #tpu.memory_space<vmem>>, vector<1x1024xf32>
    %8 = vector.broadcast %7 : vector<1x1024xf32> to vector<128x1024xf32>
    %9 = arith.addf %6, %8 : vector<128x1024xf32>
    %10 = arith.truncf %9 : vector<128x1024xf32> to vector<128x1024xbf16>
    %c0_10 = arith.constant 0 : index
    %c0_11 = arith.constant 0 : index
    %11 = vector.load %arg6[%c0_10, %c0_11] : memref<128x1024xbf16, #tpu.memory_space<vmem>>, vector<128x1024xbf16>
    tpu.vector_store %arg6[%c0_10, %c0_11], %10 {strides = array<i32>} : memref<128x1024xbf16, #tpu.memory_space<vmem>>, vector<128x1024xbf16>,
    return
  }
  func.func @transform_0(%arg0: i32) -> (i32, i32) {
    %c0_i32 = arith.constant 0 : i32
    %c0_i32_0 = arith.constant 0 : i32
    return %arg0, %c0_i32 : i32, i32
  }
  func.func @transform_1(%arg0: i32) -> (i32, i32) {
    %c0_i32 = arith.constant 0 : i32
    %c0_i32_0 = arith.constant 0 : i32
    return %arg0, %c0_i32 : i32, i32
  }
  func.func @transform_2(%arg0: i32) -> (i32, i32) {
    %c0_i32 = arith.constant 0 : i32
    %c0_i32_0 = arith.constant 0 : i32
    %c0_i32_1 = arith.constant 0 : i32
    return %c0_i32, %c0_i32_0 : i32, i32
  }
  func.func @transform_3(%arg0: i32) -> (i32, i32) {
    %c0_i32 = arith.constant 0 : i32
    %c0_i32_0 = arith.constant 0 : i32
    %c0_i32_1 = arith.constant 0 : i32
    return %c0_i32, %c0_i32_0 : i32, i32
  }
  func.func @transform_4(%arg0: i32) -> (i32, i32) {
    %c0_i32 = arith.constant 0 : i32
    %c0_i32_0 = arith.constant 0 : i32
    %c0_i32_1 = arith.constant 0 : i32
    return %c0_i32, %c0_i32_0 : i32, i32
  }
  func.func @transform_5(%arg0: i32) -> (i32, i32) {
    %c0_i32 = arith.constant 0 : i32
    %c0_i32_0 = arith.constant 0 : i32
    return %arg0, %c0_i32 : i32, i32
  }
}

module attributes {stable_mosaic.version = 11 : i64} {
  func.func @_last_layer_kernel(%arg0: i32, %arg1: memref<8x16x512xbf16, #tpu.memory_space<vmem>>, %arg2: memref<8x16x512xbf16, #tpu.memory_space<vmem>>, %arg3: memref<2x128x512xbf16, #tpu.memory_space<vmem>>, %arg4: memref<16x256xf32, #tpu.memory_space<vmem>>, %arg5: memref<16x128xf32, #tpu.memory_space<vmem>>, %arg6: memref<16x128xf32, #tpu.memory_space<vmem>>) attributes {dimension_semantics = [#tpu.dimension_semantics<arbitrary>], iteration_bounds = array<i64: 1>, scalar_prefetch = 0 : i64, scratch_operands = 2 : i64, tpu.core_type = #tpu.core_type<tc>, window_params = [{transform_indices = @transform_0, window_bounds = array<i64: 8, 16, 512>}, {transform_indices = @transform_1, window_bounds = array<i64: 8, 16, 512>}, {pipeline_mode = #tpu.pipeline_mode<synchronous>, transform_indices = @transform_2, window_bounds = array<i64: 2, 128, 512>}, {pipeline_mode = #tpu.pipeline_mode<synchronous>, transform_indices = @transform_3, window_bounds = array<i64: 16, 256>}]} {
    %c0_i32 = arith.constant 0 : i32
    %0 = arith.cmpi eq, %arg0, %c0_i32 : i32
    %1 = arith.extui %0 : i1 to i32
    %c0_i32_0 = arith.constant 0 : i32
    %2 = arith.cmpi ne, %1, %c0_i32_0 : i32
    scf.if %2 {
      %cst_61 = arith.constant 0.000000e+00 : f32
      %212 = vector.broadcast %cst_61 : f32 to vector<16x128xf32>
      %c0_62 = arith.constant 0 : index
      %c0_63 = arith.constant 0 : index
      %213 = vector.load %arg5[%c0_62, %c0_63] : memref<16x128xf32, #tpu.memory_space<vmem>>, vector<16x128xf32>
      tpu.vector_store %arg5[%c0_62, %c0_63], %212 {strides = array<i32>} : memref<16x128xf32, #tpu.memory_space<vmem>>, vector<16x128xf32>,
      %cst_64 = arith.constant 0.000000e+00 : f32
      %214 = vector.broadcast %cst_64 : f32 to vector<16x128xf32>
      %c0_65 = arith.constant 0 : index
      %c0_66 = arith.constant 0 : index
      %215 = vector.load %arg6[%c0_65, %c0_66] : memref<16x128xf32, #tpu.memory_space<vmem>>, vector<16x128xf32>
      tpu.vector_store %arg6[%c0_65, %c0_66], %214 {strides = array<i32>} : memref<16x128xf32, #tpu.memory_space<vmem>>, vector<16x128xf32>,
    } else {
    }
    %c0 = arith.constant 0 : index
    %c0_1 = arith.constant 0 : index
    %c0_2 = arith.constant 0 : index
    %3 = vector.load %arg3[%c0, %c0_1, %c0_2] : memref<2x128x512xbf16, #tpu.memory_space<vmem>>, vector<1x128x512xbf16>
    %4 = vector.shape_cast %3 : vector<1x128x512xbf16> to vector<128x512xbf16>
    %c0_3 = arith.constant 0 : index
    %c0_4 = arith.constant 0 : index
    %5 = vector.load %arg5[%c0_3, %c0_4] : memref<16x128xf32, #tpu.memory_space<vmem>>, vector<16x128xf32>
    %c0_5 = arith.constant 0 : index
    %c0_6 = arith.constant 0 : index
    %6 = vector.load %arg6[%c0_5, %c0_6] : memref<16x128xf32, #tpu.memory_space<vmem>>, vector<16x128xf32>
    %c0_i32_7 = arith.constant 0 : i32
    %7 = arith.index_cast %c0_i32_7 : i32 to index
    %c0_8 = arith.constant 0 : index
    %c0_9 = arith.constant 0 : index
    %8 = vector.load %arg1[%7, %c0_8, %c0_9] : memref<8x16x512xbf16, #tpu.memory_space<vmem>>, vector<1x16x512xbf16>
    %9 = vector.shape_cast %8 : vector<1x16x512xbf16> to vector<16x512xbf16>
    %10 = arith.extf %9 : vector<16x512xbf16> to vector<16x512xf32>
    %11 = arith.truncf %5 : vector<16x128xf32> to vector<16x128xbf16>
    %cst = arith.constant dense<0.000000e+00> : vector<16x512xf32>
    %12 = tpu.matmul %11, %4, %cst {dimension_numbers = #tpu.dot_dimension_numbers<[1], [0], [0], [1], [0, 0, 1, 1], [], []>} : vector<16x128xbf16>, vector<128x512xbf16>, vector<16x512xf32> -> vector<16x512xf32>
    %13 = arith.addf %10, %12 : vector<16x512xf32>
    %14 = vector.extract_strided_slice %13 {offsets = [0, 0], sizes = [16, 384], strides = [1, 1]} : vector<16x512xf32> to vector<16x384xf32>
    %cst_10 = arith.constant 5.000000e-01 : f32
    %15 = vector.broadcast %cst_10 : f32 to vector<16x384xf32>
    %16 = arith.mulf %15, %14 : vector<16x384xf32>
    %17 = math.tanh %16 : vector<16x384xf32>
    %cst_11 = arith.constant 5.000000e-01 : f32
    %18 = vector.broadcast %cst_11 : f32 to vector<16x384xf32>
    %19 = arith.mulf %18, %17 : vector<16x384xf32>
    %cst_12 = arith.constant 5.000000e-01 : f32
    %20 = vector.broadcast %cst_12 : f32 to vector<16x384xf32>
    %21 = arith.addf %19, %20 : vector<16x384xf32>
    %22 = vector.extract_strided_slice %21 {offsets = [0, 0], sizes = [16, 128], strides = [1, 1]} : vector<16x384xf32> to vector<16x128xf32>
    %23 = vector.extract_strided_slice %21 {offsets = [0, 128], sizes = [16, 128], strides = [1, 1]} : vector<16x384xf32> to vector<16x128xf32>
    %24 = vector.extract_strided_slice %21 {offsets = [0, 256], sizes = [16, 128], strides = [1, 1]} : vector<16x384xf32> to vector<16x128xf32>
    %25 = vector.extract_strided_slice %13 {offsets = [0, 384], sizes = [16, 128], strides = [1, 1]} : vector<16x512xf32> to vector<16x128xf32>
    %26 = math.tanh %25 : vector<16x128xf32>
    %27 = arith.mulf %23, %6 : vector<16x128xf32>
    %28 = arith.mulf %22, %26 : vector<16x128xf32>
    %29 = arith.addf %27, %28 : vector<16x128xf32>
    %30 = math.tanh %29 : vector<16x128xf32>
    %31 = arith.mulf %24, %30 : vector<16x128xf32>
    %c1_i32 = arith.constant 1 : i32
    %32 = arith.index_cast %c1_i32 : i32 to index
    %c0_13 = arith.constant 0 : index
    %c0_14 = arith.constant 0 : index
    %33 = vector.load %arg1[%32, %c0_13, %c0_14] : memref<8x16x512xbf16, #tpu.memory_space<vmem>>, vector<1x16x512xbf16>
    %34 = vector.shape_cast %33 : vector<1x16x512xbf16> to vector<16x512xbf16>
    %35 = arith.extf %34 : vector<16x512xbf16> to vector<16x512xf32>
    %36 = arith.truncf %31 : vector<16x128xf32> to vector<16x128xbf16>
    %cst_15 = arith.constant dense<0.000000e+00> : vector<16x512xf32>
    %37 = tpu.matmul %36, %4, %cst_15 {dimension_numbers = #tpu.dot_dimension_numbers<[1], [0], [0], [1], [0, 0, 1, 1], [], []>} : vector<16x128xbf16>, vector<128x512xbf16>, vector<16x512xf32> -> vector<16x512xf32>
    %38 = arith.addf %35, %37 : vector<16x512xf32>
    %39 = vector.extract_strided_slice %38 {offsets = [0, 0], sizes = [16, 384], strides = [1, 1]} : vector<16x512xf32> to vector<16x384xf32>
    %cst_16 = arith.constant 5.000000e-01 : f32
    %40 = vector.broadcast %cst_16 : f32 to vector<16x384xf32>
    %41 = arith.mulf %40, %39 : vector<16x384xf32>
    %42 = math.tanh %41 : vector<16x384xf32>
    %cst_17 = arith.constant 5.000000e-01 : f32
    %43 = vector.broadcast %cst_17 : f32 to vector<16x384xf32>
    %44 = arith.mulf %43, %42 : vector<16x384xf32>
    %cst_18 = arith.constant 5.000000e-01 : f32
    %45 = vector.broadcast %cst_18 : f32 to vector<16x384xf32>
    %46 = arith.addf %44, %45 : vector<16x384xf32>
    %47 = vector.extract_strided_slice %46 {offsets = [0, 0], sizes = [16, 128], strides = [1, 1]} : vector<16x384xf32> to vector<16x128xf32>
    %48 = vector.extract_strided_slice %46 {offsets = [0, 128], sizes = [16, 128], strides = [1, 1]} : vector<16x384xf32> to vector<16x128xf32>
    %49 = vector.extract_strided_slice %46 {offsets = [0, 256], sizes = [16, 128], strides = [1, 1]} : vector<16x384xf32> to vector<16x128xf32>
    %50 = vector.extract_strided_slice %38 {offsets = [0, 384], sizes = [16, 128], strides = [1, 1]} : vector<16x512xf32> to vector<16x128xf32>
    %51 = math.tanh %50 : vector<16x128xf32>
    %52 = arith.mulf %48, %29 : vector<16x128xf32>
    %53 = arith.mulf %47, %51 : vector<16x128xf32>
    %54 = arith.addf %52, %53 : vector<16x128xf32>
    %55 = math.tanh %54 : vector<16x128xf32>
    %56 = arith.mulf %49, %55 : vector<16x128xf32>
    %c2_i32 = arith.constant 2 : i32
    %57 = arith.index_cast %c2_i32 : i32 to index
    %c0_19 = arith.constant 0 : index
    %c0_20 = arith.constant 0 : index
    %58 = vector.load %arg1[%57, %c0_19, %c0_20] : memref<8x16x512xbf16, #tpu.memory_space<vmem>>, vector<1x16x512xbf16>
    %59 = vector.shape_cast %58 : vector<1x16x512xbf16> to vector<16x512xbf16>
    %60 = arith.extf %59 : vector<16x512xbf16> to vector<16x512xf32>
    %61 = arith.truncf %56 : vector<16x128xf32> to vector<16x128xbf16>
    %cst_21 = arith.constant dense<0.000000e+00> : vector<16x512xf32>
    %62 = tpu.matmul %61, %4, %cst_21 {dimension_numbers = #tpu.dot_dimension_numbers<[1], [0], [0], [1], [0, 0, 1, 1], [], []>} : vector<16x128xbf16>, vector<128x512xbf16>, vector<16x512xf32> -> vector<16x512xf32>
    %63 = arith.addf %60, %62 : vector<16x512xf32>
    %64 = vector.extract_strided_slice %63 {offsets = [0, 0], sizes = [16, 384], strides = [1, 1]} : vector<16x512xf32> to vector<16x384xf32>
    %cst_22 = arith.constant 5.000000e-01 : f32
    %65 = vector.broadcast %cst_22 : f32 to vector<16x384xf32>
    %66 = arith.mulf %65, %64 : vector<16x384xf32>
    %67 = math.tanh %66 : vector<16x384xf32>
    %cst_23 = arith.constant 5.000000e-01 : f32
    %68 = vector.broadcast %cst_23 : f32 to vector<16x384xf32>
    %69 = arith.mulf %68, %67 : vector<16x384xf32>
    %cst_24 = arith.constant 5.000000e-01 : f32
    %70 = vector.broadcast %cst_24 : f32 to vector<16x384xf32>
    %71 = arith.addf %69, %70 : vector<16x384xf32>
    %72 = vector.extract_strided_slice %71 {offsets = [0, 0], sizes = [16, 128], strides = [1, 1]} : vector<16x384xf32> to vector<16x128xf32>
    %73 = vector.extract_strided_slice %71 {offsets = [0, 128], sizes = [16, 128], strides = [1, 1]} : vector<16x384xf32> to vector<16x128xf32>
    %74 = vector.extract_strided_slice %71 {offsets = [0, 256], sizes = [16, 128], strides = [1, 1]} : vector<16x384xf32> to vector<16x128xf32>
    %75 = vector.extract_strided_slice %63 {offsets = [0, 384], sizes = [16, 128], strides = [1, 1]} : vector<16x512xf32> to vector<16x128xf32>
    %76 = math.tanh %75 : vector<16x128xf32>
    %77 = arith.mulf %73, %54 : vector<16x128xf32>
    %78 = arith.mulf %72, %76 : vector<16x128xf32>
    %79 = arith.addf %77, %78 : vector<16x128xf32>
    %80 = math.tanh %79 : vector<16x128xf32>
    %81 = arith.mulf %74, %80 : vector<16x128xf32>
    %c3_i32 = arith.constant 3 : i32
    %82 = arith.index_cast %c3_i32 : i32 to index
    %c0_25 = arith.constant 0 : index
    %c0_26 = arith.constant 0 : index
    %83 = vector.load %arg1[%82, %c0_25, %c0_26] : memref<8x16x512xbf16, #tpu.memory_space<vmem>>, vector<1x16x512xbf16>
    %84 = vector.shape_cast %83 : vector<1x16x512xbf16> to vector<16x512xbf16>
    %85 = arith.extf %84 : vector<16x512xbf16> to vector<16x512xf32>
    %86 = arith.truncf %81 : vector<16x128xf32> to vector<16x128xbf16>
    %cst_27 = arith.constant dense<0.000000e+00> : vector<16x512xf32>
    %87 = tpu.matmul %86, %4, %cst_27 {dimension_numbers = #tpu.dot_dimension_numbers<[1], [0], [0], [1], [0, 0, 1, 1], [], []>} : vector<16x128xbf16>, vector<128x512xbf16>, vector<16x512xf32> -> vector<16x512xf32>
    %88 = arith.addf %85, %87 : vector<16x512xf32>
    %89 = vector.extract_strided_slice %88 {offsets = [0, 0], sizes = [16, 384], strides = [1, 1]} : vector<16x512xf32> to vector<16x384xf32>
    %cst_28 = arith.constant 5.000000e-01 : f32
    %90 = vector.broadcast %cst_28 : f32 to vector<16x384xf32>
    %91 = arith.mulf %90, %89 : vector<16x384xf32>
    %92 = math.tanh %91 : vector<16x384xf32>
    %cst_29 = arith.constant 5.000000e-01 : f32
    %93 = vector.broadcast %cst_29 : f32 to vector<16x384xf32>
    %94 = arith.mulf %93, %92 : vector<16x384xf32>
    %cst_30 = arith.constant 5.000000e-01 : f32
    %95 = vector.broadcast %cst_30 : f32 to vector<16x384xf32>
    %96 = arith.addf %94, %95 : vector<16x384xf32>
    %97 = vector.extract_strided_slice %96 {offsets = [0, 0], sizes = [16, 128], strides = [1, 1]} : vector<16x384xf32> to vector<16x128xf32>
    %98 = vector.extract_strided_slice %96 {offsets = [0, 128], sizes = [16, 128], strides = [1, 1]} : vector<16x384xf32> to vector<16x128xf32>
    %99 = vector.extract_strided_slice %96 {offsets = [0, 256], sizes = [16, 128], strides = [1, 1]} : vector<16x384xf32> to vector<16x128xf32>
    %100 = vector.extract_strided_slice %88 {offsets = [0, 384], sizes = [16, 128], strides = [1, 1]} : vector<16x512xf32> to vector<16x128xf32>
    %101 = math.tanh %100 : vector<16x128xf32>
    %102 = arith.mulf %98, %79 : vector<16x128xf32>
    %103 = arith.mulf %97, %101 : vector<16x128xf32>
    %104 = arith.addf %102, %103 : vector<16x128xf32>
    %105 = math.tanh %104 : vector<16x128xf32>
    %106 = arith.mulf %99, %105 : vector<16x128xf32>
    %c4_i32 = arith.constant 4 : i32
    %107 = arith.index_cast %c4_i32 : i32 to index
    %c0_31 = arith.constant 0 : index
    %c0_32 = arith.constant 0 : index
    %108 = vector.load %arg1[%107, %c0_31, %c0_32] : memref<8x16x512xbf16, #tpu.memory_space<vmem>>, vector<1x16x512xbf16>
    %109 = vector.shape_cast %108 : vector<1x16x512xbf16> to vector<16x512xbf16>
    %110 = arith.extf %109 : vector<16x512xbf16> to vector<16x512xf32>
    %111 = arith.truncf %106 : vector<16x128xf32> to vector<16x128xbf16>
    %cst_33 = arith.constant dense<0.000000e+00> : vector<16x512xf32>
    %112 = tpu.matmul %111, %4, %cst_33 {dimension_numbers = #tpu.dot_dimension_numbers<[1], [0], [0], [1], [0, 0, 1, 1], [], []>} : vector<16x128xbf16>, vector<128x512xbf16>, vector<16x512xf32> -> vector<16x512xf32>
    %113 = arith.addf %110, %112 : vector<16x512xf32>
    %114 = vector.extract_strided_slice %113 {offsets = [0, 0], sizes = [16, 384], strides = [1, 1]} : vector<16x512xf32> to vector<16x384xf32>
    %cst_34 = arith.constant 5.000000e-01 : f32
    %115 = vector.broadcast %cst_34 : f32 to vector<16x384xf32>
    %116 = arith.mulf %115, %114 : vector<16x384xf32>
    %117 = math.tanh %116 : vector<16x384xf32>
    %cst_35 = arith.constant 5.000000e-01 : f32
    %118 = vector.broadcast %cst_35 : f32 to vector<16x384xf32>
    %119 = arith.mulf %118, %117 : vector<16x384xf32>
    %cst_36 = arith.constant 5.000000e-01 : f32
    %120 = vector.broadcast %cst_36 : f32 to vector<16x384xf32>
    %121 = arith.addf %119, %120 : vector<16x384xf32>
    %122 = vector.extract_strided_slice %121 {offsets = [0, 0], sizes = [16, 128], strides = [1, 1]} : vector<16x384xf32> to vector<16x128xf32>
    %123 = vector.extract_strided_slice %121 {offsets = [0, 128], sizes = [16, 128], strides = [1, 1]} : vector<16x384xf32> to vector<16x128xf32>
    %124 = vector.extract_strided_slice %121 {offsets = [0, 256], sizes = [16, 128], strides = [1, 1]} : vector<16x384xf32> to vector<16x128xf32>
    %125 = vector.extract_strided_slice %113 {offsets = [0, 384], sizes = [16, 128], strides = [1, 1]} : vector<16x512xf32> to vector<16x128xf32>
    %126 = math.tanh %125 : vector<16x128xf32>
    %127 = arith.mulf %123, %104 : vector<16x128xf32>
    %128 = arith.mulf %122, %126 : vector<16x128xf32>
    %129 = arith.addf %127, %128 : vector<16x128xf32>
    %130 = math.tanh %129 : vector<16x128xf32>
    %131 = arith.mulf %124, %130 : vector<16x128xf32>
    %c5_i32 = arith.constant 5 : i32
    %132 = arith.index_cast %c5_i32 : i32 to index
    %c0_37 = arith.constant 0 : index
    %c0_38 = arith.constant 0 : index
    %133 = vector.load %arg1[%132, %c0_37, %c0_38] : memref<8x16x512xbf16, #tpu.memory_space<vmem>>, vector<1x16x512xbf16>
    %134 = vector.shape_cast %133 : vector<1x16x512xbf16> to vector<16x512xbf16>
    %135 = arith.extf %134 : vector<16x512xbf16> to vector<16x512xf32>
    %136 = arith.truncf %131 : vector<16x128xf32> to vector<16x128xbf16>
    %cst_39 = arith.constant dense<0.000000e+00> : vector<16x512xf32>
    %137 = tpu.matmul %136, %4, %cst_39 {dimension_numbers = #tpu.dot_dimension_numbers<[1], [0], [0], [1], [0, 0, 1, 1], [], []>} : vector<16x128xbf16>, vector<128x512xbf16>, vector<16x512xf32> -> vector<16x512xf32>
    %138 = arith.addf %135, %137 : vector<16x512xf32>
    %139 = vector.extract_strided_slice %138 {offsets = [0, 0], sizes = [16, 384], strides = [1, 1]} : vector<16x512xf32> to vector<16x384xf32>
    %cst_40 = arith.constant 5.000000e-01 : f32
    %140 = vector.broadcast %cst_40 : f32 to vector<16x384xf32>
    %141 = arith.mulf %140, %139 : vector<16x384xf32>
    %142 = math.tanh %141 : vector<16x384xf32>
    %cst_41 = arith.constant 5.000000e-01 : f32
    %143 = vector.broadcast %cst_41 : f32 to vector<16x384xf32>
    %144 = arith.mulf %143, %142 : vector<16x384xf32>
    %cst_42 = arith.constant 5.000000e-01 : f32
    %145 = vector.broadcast %cst_42 : f32 to vector<16x384xf32>
    %146 = arith.addf %144, %145 : vector<16x384xf32>
    %147 = vector.extract_strided_slice %146 {offsets = [0, 0], sizes = [16, 128], strides = [1, 1]} : vector<16x384xf32> to vector<16x128xf32>
    %148 = vector.extract_strided_slice %146 {offsets = [0, 128], sizes = [16, 128], strides = [1, 1]} : vector<16x384xf32> to vector<16x128xf32>
    %149 = vector.extract_strided_slice %146 {offsets = [0, 256], sizes = [16, 128], strides = [1, 1]} : vector<16x384xf32> to vector<16x128xf32>
    %150 = vector.extract_strided_slice %138 {offsets = [0, 384], sizes = [16, 128], strides = [1, 1]} : vector<16x512xf32> to vector<16x128xf32>
    %151 = math.tanh %150 : vector<16x128xf32>
    %152 = arith.mulf %148, %129 : vector<16x128xf32>
    %153 = arith.mulf %147, %151 : vector<16x128xf32>
    %154 = arith.addf %152, %153 : vector<16x128xf32>
    %155 = math.tanh %154 : vector<16x128xf32>
    %156 = arith.mulf %149, %155 : vector<16x128xf32>
    %c6_i32 = arith.constant 6 : i32
    %157 = arith.index_cast %c6_i32 : i32 to index
    %c0_43 = arith.constant 0 : index
    %c0_44 = arith.constant 0 : index
    %158 = vector.load %arg1[%157, %c0_43, %c0_44] : memref<8x16x512xbf16, #tpu.memory_space<vmem>>, vector<1x16x512xbf16>
    %159 = vector.shape_cast %158 : vector<1x16x512xbf16> to vector<16x512xbf16>
    %160 = arith.extf %159 : vector<16x512xbf16> to vector<16x512xf32>
    %161 = arith.truncf %156 : vector<16x128xf32> to vector<16x128xbf16>
    %cst_45 = arith.constant dense<0.000000e+00> : vector<16x512xf32>
    %162 = tpu.matmul %161, %4, %cst_45 {dimension_numbers = #tpu.dot_dimension_numbers<[1], [0], [0], [1], [0, 0, 1, 1], [], []>} : vector<16x128xbf16>, vector<128x512xbf16>, vector<16x512xf32> -> vector<16x512xf32>
    %163 = arith.addf %160, %162 : vector<16x512xf32>
    %164 = vector.extract_strided_slice %163 {offsets = [0, 0], sizes = [16, 384], strides = [1, 1]} : vector<16x512xf32> to vector<16x384xf32>
    %cst_46 = arith.constant 5.000000e-01 : f32
    %165 = vector.broadcast %cst_46 : f32 to vector<16x384xf32>
    %166 = arith.mulf %165, %164 : vector<16x384xf32>
    %167 = math.tanh %166 : vector<16x384xf32>
    %cst_47 = arith.constant 5.000000e-01 : f32
    %168 = vector.broadcast %cst_47 : f32 to vector<16x384xf32>
    %169 = arith.mulf %168, %167 : vector<16x384xf32>
    %cst_48 = arith.constant 5.000000e-01 : f32
    %170 = vector.broadcast %cst_48 : f32 to vector<16x384xf32>
    %171 = arith.addf %169, %170 : vector<16x384xf32>
    %172 = vector.extract_strided_slice %171 {offsets = [0, 0], sizes = [16, 128], strides = [1, 1]} : vector<16x384xf32> to vector<16x128xf32>
    %173 = vector.extract_strided_slice %171 {offsets = [0, 128], sizes = [16, 128], strides = [1, 1]} : vector<16x384xf32> to vector<16x128xf32>
    %174 = vector.extract_strided_slice %171 {offsets = [0, 256], sizes = [16, 128], strides = [1, 1]} : vector<16x384xf32> to vector<16x128xf32>
    %175 = vector.extract_strided_slice %163 {offsets = [0, 384], sizes = [16, 128], strides = [1, 1]} : vector<16x512xf32> to vector<16x128xf32>
    %176 = math.tanh %175 : vector<16x128xf32>
    %177 = arith.mulf %173, %154 : vector<16x128xf32>
    %178 = arith.mulf %172, %176 : vector<16x128xf32>
    %179 = arith.addf %177, %178 : vector<16x128xf32>
    %180 = math.tanh %179 : vector<16x128xf32>
    %181 = arith.mulf %174, %180 : vector<16x128xf32>
    %c7_i32 = arith.constant 7 : i32
    %182 = arith.index_cast %c7_i32 : i32 to index
    %c0_49 = arith.constant 0 : index
    %c0_50 = arith.constant 0 : index
    %183 = vector.load %arg1[%182, %c0_49, %c0_50] : memref<8x16x512xbf16, #tpu.memory_space<vmem>>, vector<1x16x512xbf16>
    %184 = vector.shape_cast %183 : vector<1x16x512xbf16> to vector<16x512xbf16>
    %185 = arith.extf %184 : vector<16x512xbf16> to vector<16x512xf32>
    %186 = arith.truncf %181 : vector<16x128xf32> to vector<16x128xbf16>
    %cst_51 = arith.constant dense<0.000000e+00> : vector<16x512xf32>
    %187 = tpu.matmul %186, %4, %cst_51 {dimension_numbers = #tpu.dot_dimension_numbers<[1], [0], [0], [1], [0, 0, 1, 1], [], []>} : vector<16x128xbf16>, vector<128x512xbf16>, vector<16x512xf32> -> vector<16x512xf32>
    %188 = arith.addf %185, %187 : vector<16x512xf32>
    %189 = vector.extract_strided_slice %188 {offsets = [0, 0], sizes = [16, 384], strides = [1, 1]} : vector<16x512xf32> to vector<16x384xf32>
    %cst_52 = arith.constant 5.000000e-01 : f32
    %190 = vector.broadcast %cst_52 : f32 to vector<16x384xf32>
    %191 = arith.mulf %190, %189 : vector<16x384xf32>
    %192 = math.tanh %191 : vector<16x384xf32>
    %cst_53 = arith.constant 5.000000e-01 : f32
    %193 = vector.broadcast %cst_53 : f32 to vector<16x384xf32>
    %194 = arith.mulf %193, %192 : vector<16x384xf32>
    %cst_54 = arith.constant 5.000000e-01 : f32
    %195 = vector.broadcast %cst_54 : f32 to vector<16x384xf32>
    %196 = arith.addf %194, %195 : vector<16x384xf32>
    %197 = vector.extract_strided_slice %196 {offsets = [0, 0], sizes = [16, 128], strides = [1, 1]} : vector<16x384xf32> to vector<16x128xf32>
    %198 = vector.extract_strided_slice %196 {offsets = [0, 128], sizes = [16, 128], strides = [1, 1]} : vector<16x384xf32> to vector<16x128xf32>
    %199 = vector.extract_strided_slice %196 {offsets = [0, 256], sizes = [16, 128], strides = [1, 1]} : vector<16x384xf32> to vector<16x128xf32>
    %200 = vector.extract_strided_slice %188 {offsets = [0, 384], sizes = [16, 128], strides = [1, 1]} : vector<16x512xf32> to vector<16x128xf32>
    %201 = math.tanh %200 : vector<16x128xf32>
    %202 = arith.mulf %198, %179 : vector<16x128xf32>
    %203 = arith.mulf %197, %201 : vector<16x128xf32>
    %204 = arith.addf %202, %203 : vector<16x128xf32>
    %205 = math.tanh %204 : vector<16x128xf32>
    %206 = arith.mulf %199, %205 : vector<16x128xf32>
    %c8_i32 = arith.constant 8 : i32
    %c0_55 = arith.constant 0 : index
    %c0_56 = arith.constant 0 : index
    %207 = vector.load %arg5[%c0_55, %c0_56] : memref<16x128xf32, #tpu.memory_space<vmem>>, vector<16x128xf32>
    tpu.vector_store %arg5[%c0_55, %c0_56], %206 {strides = array<i32>} : memref<16x128xf32, #tpu.memory_space<vmem>>, vector<16x128xf32>,
    %c0_57 = arith.constant 0 : index
    %c0_58 = arith.constant 0 : index
    %208 = vector.load %arg6[%c0_57, %c0_58] : memref<16x128xf32, #tpu.memory_space<vmem>>, vector<16x128xf32>
    tpu.vector_store %arg6[%c0_57, %c0_58], %204 {strides = array<i32>} : memref<16x128xf32, #tpu.memory_space<vmem>>, vector<16x128xf32>,
    %c0_i32_59 = arith.constant 0 : i32
    %209 = arith.cmpi eq, %arg0, %c0_i32_59 : i32
    %210 = arith.extui %209 : i1 to i32
    %c0_i32_60 = arith.constant 0 : i32
    %211 = arith.cmpi ne, %210, %c0_i32_60 : i32
    scf.if %211 {
      %c0_61 = arith.constant 0 : index
      %c0_62 = arith.constant 0 : index
      %212 = vector.load %arg4[%c0_61, %c0_62] : memref<16x256xf32, #tpu.memory_space<vmem>>, vector<16x128xf32>
      tpu.vector_store %arg4[%c0_61, %c0_62], %206 {strides = array<i32>} : memref<16x256xf32, #tpu.memory_space<vmem>>, vector<16x128xf32>,
      %c7 = arith.constant 7 : index
      %c0_63 = arith.constant 0 : index
      %c0_64 = arith.constant 0 : index
      %213 = vector.load %arg2[%c7, %c0_63, %c0_64] : memref<8x16x512xbf16, #tpu.memory_space<vmem>>, vector<1x16x512xbf16>
      %214 = vector.shape_cast %213 : vector<1x16x512xbf16> to vector<16x512xbf16>
      %215 = arith.extf %214 : vector<16x512xbf16> to vector<16x512xf32>
      %216 = vector.extract_strided_slice %215 {offsets = [0, 0], sizes = [16, 384], strides = [1, 1]} : vector<16x512xf32> to vector<16x384xf32>
      %cst_65 = arith.constant 5.000000e-01 : f32
      %217 = vector.broadcast %cst_65 : f32 to vector<16x384xf32>
      %218 = arith.mulf %217, %216 : vector<16x384xf32>
      %219 = math.tanh %218 : vector<16x384xf32>
      %cst_66 = arith.constant 5.000000e-01 : f32
      %220 = vector.broadcast %cst_66 : f32 to vector<16x384xf32>
      %221 = arith.mulf %220, %219 : vector<16x384xf32>
      %cst_67 = arith.constant 5.000000e-01 : f32
      %222 = vector.broadcast %cst_67 : f32 to vector<16x384xf32>
      %223 = arith.addf %221, %222 : vector<16x384xf32>
      %224 = vector.extract_strided_slice %223 {offsets = [0, 0], sizes = [16, 128], strides = [1, 1]} : vector<16x384xf32> to vector<16x128xf32>
      %225 = vector.extract_strided_slice %223 {offsets = [0, 256], sizes = [16, 128], strides = [1, 1]} : vector<16x384xf32> to vector<16x128xf32>
      %226 = vector.extract_strided_slice %215 {offsets = [0, 384], sizes = [16, 128], strides = [1, 1]} : vector<16x512xf32> to vector<16x128xf32>
      %227 = math.tanh %226 : vector<16x128xf32>
      %228 = arith.mulf %224, %227 : vector<16x128xf32>
      %229 = math.tanh %228 : vector<16x128xf32>
      %230 = arith.mulf %225, %229 : vector<16x128xf32>
      %c0_68 = arith.constant 0 : index
      %c128 = arith.constant 128 : index
      %231 = vector.load %arg4[%c0_68, %c128] : memref<16x256xf32, #tpu.memory_space<vmem>>, vector<16x128xf32>
      tpu.vector_store %arg4[%c0_68, %c128], %230 {strides = array<i32>} : memref<16x256xf32, #tpu.memory_space<vmem>>, vector<16x128xf32>,
    } else {
    }
    return
  }
  func.func @transform_0(%arg0: i32) -> (i32, i32, i32) {
    %c0_i32 = arith.constant 0 : i32
    %c0_i32_0 = arith.constant 0 : i32
    %c0_i32_1 = arith.constant 0 : i32
    return %arg0, %c0_i32, %c0_i32_0 : i32, i32, i32
  }
  func.func @transform_1(%arg0: i32) -> (i32, i32, i32) {
    %c0_i32 = arith.constant 0 : i32
    %c0_i32_0 = arith.constant 0 : i32
    %c1_i32 = arith.constant 1 : i32
    %c0_i32_1 = arith.constant 0 : i32
    return %c0_i32, %c0_i32_0, %c1_i32 : i32, i32, i32
  }
  func.func @transform_2(%arg0: i32) -> (i32, i32, i32) {
    %c0_i32 = arith.constant 0 : i32
    %c0_i32_0 = arith.constant 0 : i32
    %c0_i32_1 = arith.constant 0 : i32
    %c0_i32_2 = arith.constant 0 : i32
    return %c0_i32, %c0_i32_0, %c0_i32_1 : i32, i32, i32
  }
  func.func @transform_3(%arg0: i32) -> (i32, i32) {
    %c0_i32 = arith.constant 0 : i32
    %c0_i32_0 = arith.constant 0 : i32
    %c0_i32_1 = arith.constant 0 : i32
    return %c0_i32, %c0_i32_0 : i32, i32
  }
}

module attributes {stable_mosaic.version = 11 : i64} {
  func.func @_bilstm_recurrent_kernel(%arg0: i32, %arg1: memref<8x16x512xbf16, #tpu.memory_space<vmem>>, %arg2: memref<8x16x512xbf16, #tpu.memory_space<vmem>>, %arg3: memref<2x128x512xbf16, #tpu.memory_space<vmem>>, %arg4: memref<8x16x128xbf16, #tpu.memory_space<vmem>>, %arg5: memref<8x16x128xbf16, #tpu.memory_space<vmem>>, %arg6: memref<2x16x128xf32, #tpu.memory_space<vmem>>, %arg7: memref<2x16x128xf32, #tpu.memory_space<vmem>>) attributes {dimension_semantics = [#tpu.dimension_semantics<arbitrary>], iteration_bounds = array<i64: 1>, scalar_prefetch = 0 : i64, scratch_operands = 2 : i64, tpu.core_type = #tpu.core_type<tc>, window_params = [{transform_indices = @transform_0, window_bounds = array<i64: 8, 16, 512>}, {transform_indices = @transform_1, window_bounds = array<i64: 8, 16, 512>}, {pipeline_mode = #tpu.pipeline_mode<synchronous>, transform_indices = @transform_2, window_bounds = array<i64: 2, 128, 512>}, {transform_indices = @transform_3, window_bounds = array<i64: 8, 16, 128>}, {transform_indices = @transform_4, window_bounds = array<i64: 8, 16, 128>}]} {
    %c0_i32 = arith.constant 0 : i32
    %0 = arith.cmpi eq, %arg0, %c0_i32 : i32
    %1 = arith.extui %0 : i1 to i32
    %c0_i32_0 = arith.constant 0 : i32
    %2 = arith.cmpi ne, %1, %c0_i32_0 : i32
    scf.if %2 {
      %cst_165 = arith.constant 0.000000e+00 : f32
      %515 = vector.broadcast %cst_165 : f32 to vector<2x16x128xf32>
      %c0_166 = arith.constant 0 : index
      %c0_167 = arith.constant 0 : index
      %c0_168 = arith.constant 0 : index
      %516 = vector.load %arg6[%c0_166, %c0_167, %c0_168] : memref<2x16x128xf32, #tpu.memory_space<vmem>>, vector<2x16x128xf32>
      tpu.vector_store %arg6[%c0_166, %c0_167, %c0_168], %515 {strides = array<i32>} : memref<2x16x128xf32, #tpu.memory_space<vmem>>, vector<2x16x128xf32>,
      %cst_169 = arith.constant 0.000000e+00 : f32
      %517 = vector.broadcast %cst_169 : f32 to vector<2x16x128xf32>
      %c0_170 = arith.constant 0 : index
      %c0_171 = arith.constant 0 : index
      %c0_172 = arith.constant 0 : index
      %518 = vector.load %arg7[%c0_170, %c0_171, %c0_172] : memref<2x16x128xf32, #tpu.memory_space<vmem>>, vector<2x16x128xf32>
      tpu.vector_store %arg7[%c0_170, %c0_171, %c0_172], %517 {strides = array<i32>} : memref<2x16x128xf32, #tpu.memory_space<vmem>>, vector<2x16x128xf32>,
    } else {
    }
    %c0 = arith.constant 0 : index
    %c0_1 = arith.constant 0 : index
    %c0_2 = arith.constant 0 : index
    %3 = vector.load %arg3[%c0, %c0_1, %c0_2] : memref<2x128x512xbf16, #tpu.memory_space<vmem>>, vector<1x128x512xbf16>
    %4 = vector.shape_cast %3 : vector<1x128x512xbf16> to vector<128x512xbf16>
    %c1 = arith.constant 1 : index
    %c0_3 = arith.constant 0 : index
    %c0_4 = arith.constant 0 : index
    %5 = vector.load %arg3[%c1, %c0_3, %c0_4] : memref<2x128x512xbf16, #tpu.memory_space<vmem>>, vector<1x128x512xbf16>
    %6 = vector.shape_cast %5 : vector<1x128x512xbf16> to vector<128x512xbf16>
    %c0_5 = arith.constant 0 : index
    %c0_6 = arith.constant 0 : index
    %c0_7 = arith.constant 0 : index
    %7 = vector.load %arg6[%c0_5, %c0_6, %c0_7] : memref<2x16x128xf32, #tpu.memory_space<vmem>>, vector<1x16x128xf32>
    %8 = vector.shape_cast %7 : vector<1x16x128xf32> to vector<16x128xf32>
    %c0_8 = arith.constant 0 : index
    %c0_9 = arith.constant 0 : index
    %c0_10 = arith.constant 0 : index
    %9 = vector.load %arg7[%c0_8, %c0_9, %c0_10] : memref<2x16x128xf32, #tpu.memory_space<vmem>>, vector<1x16x128xf32>
    %10 = vector.shape_cast %9 : vector<1x16x128xf32> to vector<16x128xf32>
    %c1_11 = arith.constant 1 : index
    %c0_12 = arith.constant 0 : index
    %c0_13 = arith.constant 0 : index
    %11 = vector.load %arg6[%c1_11, %c0_12, %c0_13] : memref<2x16x128xf32, #tpu.memory_space<vmem>>, vector<1x16x128xf32>
    %12 = vector.shape_cast %11 : vector<1x16x128xf32> to vector<16x128xf32>
    %c1_14 = arith.constant 1 : index
    %c0_15 = arith.constant 0 : index
    %c0_16 = arith.constant 0 : index
    %13 = vector.load %arg7[%c1_14, %c0_15, %c0_16] : memref<2x16x128xf32, #tpu.memory_space<vmem>>, vector<1x16x128xf32>
    %14 = vector.shape_cast %13 : vector<1x16x128xf32> to vector<16x128xf32>
    %c0_i32_17 = arith.constant 0 : i32
    %c7_i32 = arith.constant 7 : i32
    %15 = arith.subi %c7_i32, %c0_i32_17 : i32
    %16 = arith.index_cast %c0_i32_17 : i32 to index
    %c0_18 = arith.constant 0 : index
    %c0_19 = arith.constant 0 : index
    %17 = vector.load %arg1[%16, %c0_18, %c0_19] : memref<8x16x512xbf16, #tpu.memory_space<vmem>>, vector<1x16x512xbf16>
    %18 = vector.shape_cast %17 : vector<1x16x512xbf16> to vector<16x512xbf16>
    %19 = arith.extf %18 : vector<16x512xbf16> to vector<16x512xf32>
    %20 = arith.truncf %8 : vector<16x128xf32> to vector<16x128xbf16>
    %cst = arith.constant dense<0.000000e+00> : vector<16x512xf32>
    %21 = tpu.matmul %20, %4, %cst {dimension_numbers = #tpu.dot_dimension_numbers<[1], [0], [0], [1], [0, 0, 1, 1], [], []>} : vector<16x128xbf16>, vector<128x512xbf16>, vector<16x512xf32> -> vector<16x512xf32>
    %22 = arith.addf %19, %21 : vector<16x512xf32>
    %23 = vector.extract_strided_slice %22 {offsets = [0, 0], sizes = [16, 384], strides = [1, 1]} : vector<16x512xf32> to vector<16x384xf32>
    %cst_20 = arith.constant 5.000000e-01 : f32
    %24 = vector.broadcast %cst_20 : f32 to vector<16x384xf32>
    %25 = arith.mulf %24, %23 : vector<16x384xf32>
    %26 = math.tanh %25 : vector<16x384xf32>
    %cst_21 = arith.constant 5.000000e-01 : f32
    %27 = vector.broadcast %cst_21 : f32 to vector<16x384xf32>
    %28 = arith.mulf %27, %26 : vector<16x384xf32>
    %cst_22 = arith.constant 5.000000e-01 : f32
    %29 = vector.broadcast %cst_22 : f32 to vector<16x384xf32>
    %30 = arith.addf %28, %29 : vector<16x384xf32>
    %31 = vector.extract_strided_slice %30 {offsets = [0, 0], sizes = [16, 128], strides = [1, 1]} : vector<16x384xf32> to vector<16x128xf32>
    %32 = vector.extract_strided_slice %30 {offsets = [0, 128], sizes = [16, 128], strides = [1, 1]} : vector<16x384xf32> to vector<16x128xf32>
    %33 = vector.extract_strided_slice %30 {offsets = [0, 256], sizes = [16, 128], strides = [1, 1]} : vector<16x384xf32> to vector<16x128xf32>
    %34 = vector.extract_strided_slice %22 {offsets = [0, 384], sizes = [16, 128], strides = [1, 1]} : vector<16x512xf32> to vector<16x128xf32>
    %35 = math.tanh %34 : vector<16x128xf32>
    %36 = arith.mulf %32, %10 : vector<16x128xf32>
    %37 = arith.mulf %31, %35 : vector<16x128xf32>
    %38 = arith.addf %36, %37 : vector<16x128xf32>
    %39 = math.tanh %38 : vector<16x128xf32>
    %40 = arith.mulf %33, %39 : vector<16x128xf32>
    %41 = arith.index_cast %15 : i32 to index
    %c0_23 = arith.constant 0 : index
    %c0_24 = arith.constant 0 : index
    %42 = vector.load %arg2[%41, %c0_23, %c0_24] : memref<8x16x512xbf16, #tpu.memory_space<vmem>>, vector<1x16x512xbf16>
    %43 = vector.shape_cast %42 : vector<1x16x512xbf16> to vector<16x512xbf16>
    %44 = arith.extf %43 : vector<16x512xbf16> to vector<16x512xf32>
    %45 = arith.truncf %12 : vector<16x128xf32> to vector<16x128xbf16>
    %cst_25 = arith.constant dense<0.000000e+00> : vector<16x512xf32>
    %46 = tpu.matmul %45, %6, %cst_25 {dimension_numbers = #tpu.dot_dimension_numbers<[1], [0], [0], [1], [0, 0, 1, 1], [], []>} : vector<16x128xbf16>, vector<128x512xbf16>, vector<16x512xf32> -> vector<16x512xf32>
    %47 = arith.addf %44, %46 : vector<16x512xf32>
    %48 = vector.extract_strided_slice %47 {offsets = [0, 0], sizes = [16, 384], strides = [1, 1]} : vector<16x512xf32> to vector<16x384xf32>
    %cst_26 = arith.constant 5.000000e-01 : f32
    %49 = vector.broadcast %cst_26 : f32 to vector<16x384xf32>
    %50 = arith.mulf %49, %48 : vector<16x384xf32>
    %51 = math.tanh %50 : vector<16x384xf32>
    %cst_27 = arith.constant 5.000000e-01 : f32
    %52 = vector.broadcast %cst_27 : f32 to vector<16x384xf32>
    %53 = arith.mulf %52, %51 : vector<16x384xf32>
    %cst_28 = arith.constant 5.000000e-01 : f32
    %54 = vector.broadcast %cst_28 : f32 to vector<16x384xf32>
    %55 = arith.addf %53, %54 : vector<16x384xf32>
    %56 = vector.extract_strided_slice %55 {offsets = [0, 0], sizes = [16, 128], strides = [1, 1]} : vector<16x384xf32> to vector<16x128xf32>
    %57 = vector.extract_strided_slice %55 {offsets = [0, 128], sizes = [16, 128], strides = [1, 1]} : vector<16x384xf32> to vector<16x128xf32>
    %58 = vector.extract_strided_slice %55 {offsets = [0, 256], sizes = [16, 128], strides = [1, 1]} : vector<16x384xf32> to vector<16x128xf32>
    %59 = vector.extract_strided_slice %47 {offsets = [0, 384], sizes = [16, 128], strides = [1, 1]} : vector<16x512xf32> to vector<16x128xf32>
    %60 = math.tanh %59 : vector<16x128xf32>
    %61 = arith.mulf %57, %14 : vector<16x128xf32>
    %62 = arith.mulf %56, %60 : vector<16x128xf32>
    %63 = arith.addf %61, %62 : vector<16x128xf32>
    %64 = math.tanh %63 : vector<16x128xf32>
    %65 = arith.mulf %58, %64 : vector<16x128xf32>
    %66 = arith.truncf %40 : vector<16x128xf32> to vector<16x128xbf16>
    %67 = arith.index_cast %c0_i32_17 : i32 to index
    %c0_29 = arith.constant 0 : index
    %c0_30 = arith.constant 0 : index
    %68 = vector.load %arg4[%67, %c0_29, %c0_30] : memref<8x16x128xbf16, #tpu.memory_space<vmem>>, vector<1x16x128xbf16>
    %69 = vector.shape_cast %68 : vector<1x16x128xbf16> to vector<16x128xbf16>
    %70 = vector.shape_cast %66 : vector<16x128xbf16> to vector<1x16x128xbf16>
    tpu.vector_store %arg4[%67, %c0_29, %c0_30], %70 {strides = array<i32>} : memref<8x16x128xbf16, #tpu.memory_space<vmem>>, vector<1x16x128xbf16>,
    %71 = arith.truncf %65 : vector<16x128xf32> to vector<16x128xbf16>
    %72 = arith.index_cast %15 : i32 to index
    %c0_31 = arith.constant 0 : index
    %c0_32 = arith.constant 0 : index
    %73 = vector.load %arg5[%72, %c0_31, %c0_32] : memref<8x16x128xbf16, #tpu.memory_space<vmem>>, vector<1x16x128xbf16>
    %74 = vector.shape_cast %73 : vector<1x16x128xbf16> to vector<16x128xbf16>
    %75 = vector.shape_cast %71 : vector<16x128xbf16> to vector<1x16x128xbf16>
    tpu.vector_store %arg5[%72, %c0_31, %c0_32], %75 {strides = array<i32>} : memref<8x16x128xbf16, #tpu.memory_space<vmem>>, vector<1x16x128xbf16>,
    %c1_i32 = arith.constant 1 : i32
    %c7_i32_33 = arith.constant 7 : i32
    %76 = arith.subi %c7_i32_33, %c1_i32 : i32
    %77 = arith.index_cast %c1_i32 : i32 to index
    %c0_34 = arith.constant 0 : index
    %c0_35 = arith.constant 0 : index
    %78 = vector.load %arg1[%77, %c0_34, %c0_35] : memref<8x16x512xbf16, #tpu.memory_space<vmem>>, vector<1x16x512xbf16>
    %79 = vector.shape_cast %78 : vector<1x16x512xbf16> to vector<16x512xbf16>
    %80 = arith.extf %79 : vector<16x512xbf16> to vector<16x512xf32>
    %81 = arith.truncf %40 : vector<16x128xf32> to vector<16x128xbf16>
    %cst_36 = arith.constant dense<0.000000e+00> : vector<16x512xf32>
    %82 = tpu.matmul %81, %4, %cst_36 {dimension_numbers = #tpu.dot_dimension_numbers<[1], [0], [0], [1], [0, 0, 1, 1], [], []>} : vector<16x128xbf16>, vector<128x512xbf16>, vector<16x512xf32> -> vector<16x512xf32>
    %83 = arith.addf %80, %82 : vector<16x512xf32>
    %84 = vector.extract_strided_slice %83 {offsets = [0, 0], sizes = [16, 384], strides = [1, 1]} : vector<16x512xf32> to vector<16x384xf32>
    %cst_37 = arith.constant 5.000000e-01 : f32
    %85 = vector.broadcast %cst_37 : f32 to vector<16x384xf32>
    %86 = arith.mulf %85, %84 : vector<16x384xf32>
    %87 = math.tanh %86 : vector<16x384xf32>
    %cst_38 = arith.constant 5.000000e-01 : f32
    %88 = vector.broadcast %cst_38 : f32 to vector<16x384xf32>
    %89 = arith.mulf %88, %87 : vector<16x384xf32>
    %cst_39 = arith.constant 5.000000e-01 : f32
    %90 = vector.broadcast %cst_39 : f32 to vector<16x384xf32>
    %91 = arith.addf %89, %90 : vector<16x384xf32>
    %92 = vector.extract_strided_slice %91 {offsets = [0, 0], sizes = [16, 128], strides = [1, 1]} : vector<16x384xf32> to vector<16x128xf32>
    %93 = vector.extract_strided_slice %91 {offsets = [0, 128], sizes = [16, 128], strides = [1, 1]} : vector<16x384xf32> to vector<16x128xf32>
    %94 = vector.extract_strided_slice %91 {offsets = [0, 256], sizes = [16, 128], strides = [1, 1]} : vector<16x384xf32> to vector<16x128xf32>
    %95 = vector.extract_strided_slice %83 {offsets = [0, 384], sizes = [16, 128], strides = [1, 1]} : vector<16x512xf32> to vector<16x128xf32>
    %96 = math.tanh %95 : vector<16x128xf32>
    %97 = arith.mulf %93, %38 : vector<16x128xf32>
    %98 = arith.mulf %92, %96 : vector<16x128xf32>
    %99 = arith.addf %97, %98 : vector<16x128xf32>
    %100 = math.tanh %99 : vector<16x128xf32>
    %101 = arith.mulf %94, %100 : vector<16x128xf32>
    %102 = arith.index_cast %76 : i32 to index
    %c0_40 = arith.constant 0 : index
    %c0_41 = arith.constant 0 : index
    %103 = vector.load %arg2[%102, %c0_40, %c0_41] : memref<8x16x512xbf16, #tpu.memory_space<vmem>>, vector<1x16x512xbf16>
    %104 = vector.shape_cast %103 : vector<1x16x512xbf16> to vector<16x512xbf16>
    %105 = arith.extf %104 : vector<16x512xbf16> to vector<16x512xf32>
    %106 = arith.truncf %65 : vector<16x128xf32> to vector<16x128xbf16>
    %cst_42 = arith.constant dense<0.000000e+00> : vector<16x512xf32>
    %107 = tpu.matmul %106, %6, %cst_42 {dimension_numbers = #tpu.dot_dimension_numbers<[1], [0], [0], [1], [0, 0, 1, 1], [], []>} : vector<16x128xbf16>, vector<128x512xbf16>, vector<16x512xf32> -> vector<16x512xf32>
    %108 = arith.addf %105, %107 : vector<16x512xf32>
    %109 = vector.extract_strided_slice %108 {offsets = [0, 0], sizes = [16, 384], strides = [1, 1]} : vector<16x512xf32> to vector<16x384xf32>
    %cst_43 = arith.constant 5.000000e-01 : f32
    %110 = vector.broadcast %cst_43 : f32 to vector<16x384xf32>
    %111 = arith.mulf %110, %109 : vector<16x384xf32>
    %112 = math.tanh %111 : vector<16x384xf32>
    %cst_44 = arith.constant 5.000000e-01 : f32
    %113 = vector.broadcast %cst_44 : f32 to vector<16x384xf32>
    %114 = arith.mulf %113, %112 : vector<16x384xf32>
    %cst_45 = arith.constant 5.000000e-01 : f32
    %115 = vector.broadcast %cst_45 : f32 to vector<16x384xf32>
    %116 = arith.addf %114, %115 : vector<16x384xf32>
    %117 = vector.extract_strided_slice %116 {offsets = [0, 0], sizes = [16, 128], strides = [1, 1]} : vector<16x384xf32> to vector<16x128xf32>
    %118 = vector.extract_strided_slice %116 {offsets = [0, 128], sizes = [16, 128], strides = [1, 1]} : vector<16x384xf32> to vector<16x128xf32>
    %119 = vector.extract_strided_slice %116 {offsets = [0, 256], sizes = [16, 128], strides = [1, 1]} : vector<16x384xf32> to vector<16x128xf32>
    %120 = vector.extract_strided_slice %108 {offsets = [0, 384], sizes = [16, 128], strides = [1, 1]} : vector<16x512xf32> to vector<16x128xf32>
    %121 = math.tanh %120 : vector<16x128xf32>
    %122 = arith.mulf %118, %63 : vector<16x128xf32>
    %123 = arith.mulf %117, %121 : vector<16x128xf32>
    %124 = arith.addf %122, %123 : vector<16x128xf32>
    %125 = math.tanh %124 : vector<16x128xf32>
    %126 = arith.mulf %119, %125 : vector<16x128xf32>
    %127 = arith.truncf %101 : vector<16x128xf32> to vector<16x128xbf16>
    %128 = arith.index_cast %c1_i32 : i32 to index
    %c0_46 = arith.constant 0 : index
    %c0_47 = arith.constant 0 : index
    %129 = vector.load %arg4[%128, %c0_46, %c0_47] : memref<8x16x128xbf16, #tpu.memory_space<vmem>>, vector<1x16x128xbf16>
    %130 = vector.shape_cast %129 : vector<1x16x128xbf16> to vector<16x128xbf16>
    %131 = vector.shape_cast %127 : vector<16x128xbf16> to vector<1x16x128xbf16>
    tpu.vector_store %arg4[%128, %c0_46, %c0_47], %131 {strides = array<i32>} : memref<8x16x128xbf16, #tpu.memory_space<vmem>>, vector<1x16x128xbf16>,
    %132 = arith.truncf %126 : vector<16x128xf32> to vector<16x128xbf16>
    %133 = arith.index_cast %76 : i32 to index
    %c0_48 = arith.constant 0 : index
    %c0_49 = arith.constant 0 : index
    %134 = vector.load %arg5[%133, %c0_48, %c0_49] : memref<8x16x128xbf16, #tpu.memory_space<vmem>>, vector<1x16x128xbf16>
    %135 = vector.shape_cast %134 : vector<1x16x128xbf16> to vector<16x128xbf16>
    %136 = vector.shape_cast %132 : vector<16x128xbf16> to vector<1x16x128xbf16>
    tpu.vector_store %arg5[%133, %c0_48, %c0_49], %136 {strides = array<i32>} : memref<8x16x128xbf16, #tpu.memory_space<vmem>>, vector<1x16x128xbf16>,
    %c2_i32 = arith.constant 2 : i32
    %c7_i32_50 = arith.constant 7 : i32
    %137 = arith.subi %c7_i32_50, %c2_i32 : i32
    %138 = arith.index_cast %c2_i32 : i32 to index
    %c0_51 = arith.constant 0 : index
    %c0_52 = arith.constant 0 : index
    %139 = vector.load %arg1[%138, %c0_51, %c0_52] : memref<8x16x512xbf16, #tpu.memory_space<vmem>>, vector<1x16x512xbf16>
    %140 = vector.shape_cast %139 : vector<1x16x512xbf16> to vector<16x512xbf16>
    %141 = arith.extf %140 : vector<16x512xbf16> to vector<16x512xf32>
    %142 = arith.truncf %101 : vector<16x128xf32> to vector<16x128xbf16>
    %cst_53 = arith.constant dense<0.000000e+00> : vector<16x512xf32>
    %143 = tpu.matmul %142, %4, %cst_53 {dimension_numbers = #tpu.dot_dimension_numbers<[1], [0], [0], [1], [0, 0, 1, 1], [], []>} : vector<16x128xbf16>, vector<128x512xbf16>, vector<16x512xf32> -> vector<16x512xf32>
    %144 = arith.addf %141, %143 : vector<16x512xf32>
    %145 = vector.extract_strided_slice %144 {offsets = [0, 0], sizes = [16, 384], strides = [1, 1]} : vector<16x512xf32> to vector<16x384xf32>
    %cst_54 = arith.constant 5.000000e-01 : f32
    %146 = vector.broadcast %cst_54 : f32 to vector<16x384xf32>
    %147 = arith.mulf %146, %145 : vector<16x384xf32>
    %148 = math.tanh %147 : vector<16x384xf32>
    %cst_55 = arith.constant 5.000000e-01 : f32
    %149 = vector.broadcast %cst_55 : f32 to vector<16x384xf32>
    %150 = arith.mulf %149, %148 : vector<16x384xf32>
    %cst_56 = arith.constant 5.000000e-01 : f32
    %151 = vector.broadcast %cst_56 : f32 to vector<16x384xf32>
    %152 = arith.addf %150, %151 : vector<16x384xf32>
    %153 = vector.extract_strided_slice %152 {offsets = [0, 0], sizes = [16, 128], strides = [1, 1]} : vector<16x384xf32> to vector<16x128xf32>
    %154 = vector.extract_strided_slice %152 {offsets = [0, 128], sizes = [16, 128], strides = [1, 1]} : vector<16x384xf32> to vector<16x128xf32>
    %155 = vector.extract_strided_slice %152 {offsets = [0, 256], sizes = [16, 128], strides = [1, 1]} : vector<16x384xf32> to vector<16x128xf32>
    %156 = vector.extract_strided_slice %144 {offsets = [0, 384], sizes = [16, 128], strides = [1, 1]} : vector<16x512xf32> to vector<16x128xf32>
    %157 = math.tanh %156 : vector<16x128xf32>
    %158 = arith.mulf %154, %99 : vector<16x128xf32>
    %159 = arith.mulf %153, %157 : vector<16x128xf32>
    %160 = arith.addf %158, %159 : vector<16x128xf32>
    %161 = math.tanh %160 : vector<16x128xf32>
    %162 = arith.mulf %155, %161 : vector<16x128xf32>
    %163 = arith.index_cast %137 : i32 to index
    %c0_57 = arith.constant 0 : index
    %c0_58 = arith.constant 0 : index
    %164 = vector.load %arg2[%163, %c0_57, %c0_58] : memref<8x16x512xbf16, #tpu.memory_space<vmem>>, vector<1x16x512xbf16>
    %165 = vector.shape_cast %164 : vector<1x16x512xbf16> to vector<16x512xbf16>
    %166 = arith.extf %165 : vector<16x512xbf16> to vector<16x512xf32>
    %167 = arith.truncf %126 : vector<16x128xf32> to vector<16x128xbf16>
    %cst_59 = arith.constant dense<0.000000e+00> : vector<16x512xf32>
    %168 = tpu.matmul %167, %6, %cst_59 {dimension_numbers = #tpu.dot_dimension_numbers<[1], [0], [0], [1], [0, 0, 1, 1], [], []>} : vector<16x128xbf16>, vector<128x512xbf16>, vector<16x512xf32> -> vector<16x512xf32>
    %169 = arith.addf %166, %168 : vector<16x512xf32>
    %170 = vector.extract_strided_slice %169 {offsets = [0, 0], sizes = [16, 384], strides = [1, 1]} : vector<16x512xf32> to vector<16x384xf32>
    %cst_60 = arith.constant 5.000000e-01 : f32
    %171 = vector.broadcast %cst_60 : f32 to vector<16x384xf32>
    %172 = arith.mulf %171, %170 : vector<16x384xf32>
    %173 = math.tanh %172 : vector<16x384xf32>
    %cst_61 = arith.constant 5.000000e-01 : f32
    %174 = vector.broadcast %cst_61 : f32 to vector<16x384xf32>
    %175 = arith.mulf %174, %173 : vector<16x384xf32>
    %cst_62 = arith.constant 5.000000e-01 : f32
    %176 = vector.broadcast %cst_62 : f32 to vector<16x384xf32>
    %177 = arith.addf %175, %176 : vector<16x384xf32>
    %178 = vector.extract_strided_slice %177 {offsets = [0, 0], sizes = [16, 128], strides = [1, 1]} : vector<16x384xf32> to vector<16x128xf32>
    %179 = vector.extract_strided_slice %177 {offsets = [0, 128], sizes = [16, 128], strides = [1, 1]} : vector<16x384xf32> to vector<16x128xf32>
    %180 = vector.extract_strided_slice %177 {offsets = [0, 256], sizes = [16, 128], strides = [1, 1]} : vector<16x384xf32> to vector<16x128xf32>
    %181 = vector.extract_strided_slice %169 {offsets = [0, 384], sizes = [16, 128], strides = [1, 1]} : vector<16x512xf32> to vector<16x128xf32>
    %182 = math.tanh %181 : vector<16x128xf32>
    %183 = arith.mulf %179, %124 : vector<16x128xf32>
    %184 = arith.mulf %178, %182 : vector<16x128xf32>
    %185 = arith.addf %183, %184 : vector<16x128xf32>
    %186 = math.tanh %185 : vector<16x128xf32>
    %187 = arith.mulf %180, %186 : vector<16x128xf32>
    %188 = arith.truncf %162 : vector<16x128xf32> to vector<16x128xbf16>
    %189 = arith.index_cast %c2_i32 : i32 to index
    %c0_63 = arith.constant 0 : index
    %c0_64 = arith.constant 0 : index
    %190 = vector.load %arg4[%189, %c0_63, %c0_64] : memref<8x16x128xbf16, #tpu.memory_space<vmem>>, vector<1x16x128xbf16>
    %191 = vector.shape_cast %190 : vector<1x16x128xbf16> to vector<16x128xbf16>
    %192 = vector.shape_cast %188 : vector<16x128xbf16> to vector<1x16x128xbf16>
    tpu.vector_store %arg4[%189, %c0_63, %c0_64], %192 {strides = array<i32>} : memref<8x16x128xbf16, #tpu.memory_space<vmem>>, vector<1x16x128xbf16>,
    %193 = arith.truncf %187 : vector<16x128xf32> to vector<16x128xbf16>
    %194 = arith.index_cast %137 : i32 to index
    %c0_65 = arith.constant 0 : index
    %c0_66 = arith.constant 0 : index
    %195 = vector.load %arg5[%194, %c0_65, %c0_66] : memref<8x16x128xbf16, #tpu.memory_space<vmem>>, vector<1x16x128xbf16>
    %196 = vector.shape_cast %195 : vector<1x16x128xbf16> to vector<16x128xbf16>
    %197 = vector.shape_cast %193 : vector<16x128xbf16> to vector<1x16x128xbf16>
    tpu.vector_store %arg5[%194, %c0_65, %c0_66], %197 {strides = array<i32>} : memref<8x16x128xbf16, #tpu.memory_space<vmem>>, vector<1x16x128xbf16>,
    %c3_i32 = arith.constant 3 : i32
    %c7_i32_67 = arith.constant 7 : i32
    %198 = arith.subi %c7_i32_67, %c3_i32 : i32
    %199 = arith.index_cast %c3_i32 : i32 to index
    %c0_68 = arith.constant 0 : index
    %c0_69 = arith.constant 0 : index
    %200 = vector.load %arg1[%199, %c0_68, %c0_69] : memref<8x16x512xbf16, #tpu.memory_space<vmem>>, vector<1x16x512xbf16>
    %201 = vector.shape_cast %200 : vector<1x16x512xbf16> to vector<16x512xbf16>
    %202 = arith.extf %201 : vector<16x512xbf16> to vector<16x512xf32>
    %203 = arith.truncf %162 : vector<16x128xf32> to vector<16x128xbf16>
    %cst_70 = arith.constant dense<0.000000e+00> : vector<16x512xf32>
    %204 = tpu.matmul %203, %4, %cst_70 {dimension_numbers = #tpu.dot_dimension_numbers<[1], [0], [0], [1], [0, 0, 1, 1], [], []>} : vector<16x128xbf16>, vector<128x512xbf16>, vector<16x512xf32> -> vector<16x512xf32>
    %205 = arith.addf %202, %204 : vector<16x512xf32>
    %206 = vector.extract_strided_slice %205 {offsets = [0, 0], sizes = [16, 384], strides = [1, 1]} : vector<16x512xf32> to vector<16x384xf32>
    %cst_71 = arith.constant 5.000000e-01 : f32
    %207 = vector.broadcast %cst_71 : f32 to vector<16x384xf32>
    %208 = arith.mulf %207, %206 : vector<16x384xf32>
    %209 = math.tanh %208 : vector<16x384xf32>
    %cst_72 = arith.constant 5.000000e-01 : f32
    %210 = vector.broadcast %cst_72 : f32 to vector<16x384xf32>
    %211 = arith.mulf %210, %209 : vector<16x384xf32>
    %cst_73 = arith.constant 5.000000e-01 : f32
    %212 = vector.broadcast %cst_73 : f32 to vector<16x384xf32>
    %213 = arith.addf %211, %212 : vector<16x384xf32>
    %214 = vector.extract_strided_slice %213 {offsets = [0, 0], sizes = [16, 128], strides = [1, 1]} : vector<16x384xf32> to vector<16x128xf32>
    %215 = vector.extract_strided_slice %213 {offsets = [0, 128], sizes = [16, 128], strides = [1, 1]} : vector<16x384xf32> to vector<16x128xf32>
    %216 = vector.extract_strided_slice %213 {offsets = [0, 256], sizes = [16, 128], strides = [1, 1]} : vector<16x384xf32> to vector<16x128xf32>
    %217 = vector.extract_strided_slice %205 {offsets = [0, 384], sizes = [16, 128], strides = [1, 1]} : vector<16x512xf32> to vector<16x128xf32>
    %218 = math.tanh %217 : vector<16x128xf32>
    %219 = arith.mulf %215, %160 : vector<16x128xf32>
    %220 = arith.mulf %214, %218 : vector<16x128xf32>
    %221 = arith.addf %219, %220 : vector<16x128xf32>
    %222 = math.tanh %221 : vector<16x128xf32>
    %223 = arith.mulf %216, %222 : vector<16x128xf32>
    %224 = arith.index_cast %198 : i32 to index
    %c0_74 = arith.constant 0 : index
    %c0_75 = arith.constant 0 : index
    %225 = vector.load %arg2[%224, %c0_74, %c0_75] : memref<8x16x512xbf16, #tpu.memory_space<vmem>>, vector<1x16x512xbf16>
    %226 = vector.shape_cast %225 : vector<1x16x512xbf16> to vector<16x512xbf16>
    %227 = arith.extf %226 : vector<16x512xbf16> to vector<16x512xf32>
    %228 = arith.truncf %187 : vector<16x128xf32> to vector<16x128xbf16>
    %cst_76 = arith.constant dense<0.000000e+00> : vector<16x512xf32>
    %229 = tpu.matmul %228, %6, %cst_76 {dimension_numbers = #tpu.dot_dimension_numbers<[1], [0], [0], [1], [0, 0, 1, 1], [], []>} : vector<16x128xbf16>, vector<128x512xbf16>, vector<16x512xf32> -> vector<16x512xf32>
    %230 = arith.addf %227, %229 : vector<16x512xf32>
    %231 = vector.extract_strided_slice %230 {offsets = [0, 0], sizes = [16, 384], strides = [1, 1]} : vector<16x512xf32> to vector<16x384xf32>
    %cst_77 = arith.constant 5.000000e-01 : f32
    %232 = vector.broadcast %cst_77 : f32 to vector<16x384xf32>
    %233 = arith.mulf %232, %231 : vector<16x384xf32>
    %234 = math.tanh %233 : vector<16x384xf32>
    %cst_78 = arith.constant 5.000000e-01 : f32
    %235 = vector.broadcast %cst_78 : f32 to vector<16x384xf32>
    %236 = arith.mulf %235, %234 : vector<16x384xf32>
    %cst_79 = arith.constant 5.000000e-01 : f32
    %237 = vector.broadcast %cst_79 : f32 to vector<16x384xf32>
    %238 = arith.addf %236, %237 : vector<16x384xf32>
    %239 = vector.extract_strided_slice %238 {offsets = [0, 0], sizes = [16, 128], strides = [1, 1]} : vector<16x384xf32> to vector<16x128xf32>
    %240 = vector.extract_strided_slice %238 {offsets = [0, 128], sizes = [16, 128], strides = [1, 1]} : vector<16x384xf32> to vector<16x128xf32>
    %241 = vector.extract_strided_slice %238 {offsets = [0, 256], sizes = [16, 128], strides = [1, 1]} : vector<16x384xf32> to vector<16x128xf32>
    %242 = vector.extract_strided_slice %230 {offsets = [0, 384], sizes = [16, 128], strides = [1, 1]} : vector<16x512xf32> to vector<16x128xf32>
    %243 = math.tanh %242 : vector<16x128xf32>
    %244 = arith.mulf %240, %185 : vector<16x128xf32>
    %245 = arith.mulf %239, %243 : vector<16x128xf32>
    %246 = arith.addf %244, %245 : vector<16x128xf32>
    %247 = math.tanh %246 : vector<16x128xf32>
    %248 = arith.mulf %241, %247 : vector<16x128xf32>
    %249 = arith.truncf %223 : vector<16x128xf32> to vector<16x128xbf16>
    %250 = arith.index_cast %c3_i32 : i32 to index
    %c0_80 = arith.constant 0 : index
    %c0_81 = arith.constant 0 : index
    %251 = vector.load %arg4[%250, %c0_80, %c0_81] : memref<8x16x128xbf16, #tpu.memory_space<vmem>>, vector<1x16x128xbf16>
    %252 = vector.shape_cast %251 : vector<1x16x128xbf16> to vector<16x128xbf16>
    %253 = vector.shape_cast %249 : vector<16x128xbf16> to vector<1x16x128xbf16>
    tpu.vector_store %arg4[%250, %c0_80, %c0_81], %253 {strides = array<i32>} : memref<8x16x128xbf16, #tpu.memory_space<vmem>>, vector<1x16x128xbf16>,
    %254 = arith.truncf %248 : vector<16x128xf32> to vector<16x128xbf16>
    %255 = arith.index_cast %198 : i32 to index
    %c0_82 = arith.constant 0 : index
    %c0_83 = arith.constant 0 : index
    %256 = vector.load %arg5[%255, %c0_82, %c0_83] : memref<8x16x128xbf16, #tpu.memory_space<vmem>>, vector<1x16x128xbf16>
    %257 = vector.shape_cast %256 : vector<1x16x128xbf16> to vector<16x128xbf16>
    %258 = vector.shape_cast %254 : vector<16x128xbf16> to vector<1x16x128xbf16>
    tpu.vector_store %arg5[%255, %c0_82, %c0_83], %258 {strides = array<i32>} : memref<8x16x128xbf16, #tpu.memory_space<vmem>>, vector<1x16x128xbf16>,
    %c4_i32 = arith.constant 4 : i32
    %c7_i32_84 = arith.constant 7 : i32
    %259 = arith.subi %c7_i32_84, %c4_i32 : i32
    %260 = arith.index_cast %c4_i32 : i32 to index
    %c0_85 = arith.constant 0 : index
    %c0_86 = arith.constant 0 : index
    %261 = vector.load %arg1[%260, %c0_85, %c0_86] : memref<8x16x512xbf16, #tpu.memory_space<vmem>>, vector<1x16x512xbf16>
    %262 = vector.shape_cast %261 : vector<1x16x512xbf16> to vector<16x512xbf16>
    %263 = arith.extf %262 : vector<16x512xbf16> to vector<16x512xf32>
    %264 = arith.truncf %223 : vector<16x128xf32> to vector<16x128xbf16>
    %cst_87 = arith.constant dense<0.000000e+00> : vector<16x512xf32>
    %265 = tpu.matmul %264, %4, %cst_87 {dimension_numbers = #tpu.dot_dimension_numbers<[1], [0], [0], [1], [0, 0, 1, 1], [], []>} : vector<16x128xbf16>, vector<128x512xbf16>, vector<16x512xf32> -> vector<16x512xf32>
    %266 = arith.addf %263, %265 : vector<16x512xf32>
    %267 = vector.extract_strided_slice %266 {offsets = [0, 0], sizes = [16, 384], strides = [1, 1]} : vector<16x512xf32> to vector<16x384xf32>
    %cst_88 = arith.constant 5.000000e-01 : f32
    %268 = vector.broadcast %cst_88 : f32 to vector<16x384xf32>
    %269 = arith.mulf %268, %267 : vector<16x384xf32>
    %270 = math.tanh %269 : vector<16x384xf32>
    %cst_89 = arith.constant 5.000000e-01 : f32
    %271 = vector.broadcast %cst_89 : f32 to vector<16x384xf32>
    %272 = arith.mulf %271, %270 : vector<16x384xf32>
    %cst_90 = arith.constant 5.000000e-01 : f32
    %273 = vector.broadcast %cst_90 : f32 to vector<16x384xf32>
    %274 = arith.addf %272, %273 : vector<16x384xf32>
    %275 = vector.extract_strided_slice %274 {offsets = [0, 0], sizes = [16, 128], strides = [1, 1]} : vector<16x384xf32> to vector<16x128xf32>
    %276 = vector.extract_strided_slice %274 {offsets = [0, 128], sizes = [16, 128], strides = [1, 1]} : vector<16x384xf32> to vector<16x128xf32>
    %277 = vector.extract_strided_slice %274 {offsets = [0, 256], sizes = [16, 128], strides = [1, 1]} : vector<16x384xf32> to vector<16x128xf32>
    %278 = vector.extract_strided_slice %266 {offsets = [0, 384], sizes = [16, 128], strides = [1, 1]} : vector<16x512xf32> to vector<16x128xf32>
    %279 = math.tanh %278 : vector<16x128xf32>
    %280 = arith.mulf %276, %221 : vector<16x128xf32>
    %281 = arith.mulf %275, %279 : vector<16x128xf32>
    %282 = arith.addf %280, %281 : vector<16x128xf32>
    %283 = math.tanh %282 : vector<16x128xf32>
    %284 = arith.mulf %277, %283 : vector<16x128xf32>
    %285 = arith.index_cast %259 : i32 to index
    %c0_91 = arith.constant 0 : index
    %c0_92 = arith.constant 0 : index
    %286 = vector.load %arg2[%285, %c0_91, %c0_92] : memref<8x16x512xbf16, #tpu.memory_space<vmem>>, vector<1x16x512xbf16>
    %287 = vector.shape_cast %286 : vector<1x16x512xbf16> to vector<16x512xbf16>
    %288 = arith.extf %287 : vector<16x512xbf16> to vector<16x512xf32>
    %289 = arith.truncf %248 : vector<16x128xf32> to vector<16x128xbf16>
    %cst_93 = arith.constant dense<0.000000e+00> : vector<16x512xf32>
    %290 = tpu.matmul %289, %6, %cst_93 {dimension_numbers = #tpu.dot_dimension_numbers<[1], [0], [0], [1], [0, 0, 1, 1], [], []>} : vector<16x128xbf16>, vector<128x512xbf16>, vector<16x512xf32> -> vector<16x512xf32>
    %291 = arith.addf %288, %290 : vector<16x512xf32>
    %292 = vector.extract_strided_slice %291 {offsets = [0, 0], sizes = [16, 384], strides = [1, 1]} : vector<16x512xf32> to vector<16x384xf32>
    %cst_94 = arith.constant 5.000000e-01 : f32
    %293 = vector.broadcast %cst_94 : f32 to vector<16x384xf32>
    %294 = arith.mulf %293, %292 : vector<16x384xf32>
    %295 = math.tanh %294 : vector<16x384xf32>
    %cst_95 = arith.constant 5.000000e-01 : f32
    %296 = vector.broadcast %cst_95 : f32 to vector<16x384xf32>
    %297 = arith.mulf %296, %295 : vector<16x384xf32>
    %cst_96 = arith.constant 5.000000e-01 : f32
    %298 = vector.broadcast %cst_96 : f32 to vector<16x384xf32>
    %299 = arith.addf %297, %298 : vector<16x384xf32>
    %300 = vector.extract_strided_slice %299 {offsets = [0, 0], sizes = [16, 128], strides = [1, 1]} : vector<16x384xf32> to vector<16x128xf32>
    %301 = vector.extract_strided_slice %299 {offsets = [0, 128], sizes = [16, 128], strides = [1, 1]} : vector<16x384xf32> to vector<16x128xf32>
    %302 = vector.extract_strided_slice %299 {offsets = [0, 256], sizes = [16, 128], strides = [1, 1]} : vector<16x384xf32> to vector<16x128xf32>
    %303 = vector.extract_strided_slice %291 {offsets = [0, 384], sizes = [16, 128], strides = [1, 1]} : vector<16x512xf32> to vector<16x128xf32>
    %304 = math.tanh %303 : vector<16x128xf32>
    %305 = arith.mulf %301, %246 : vector<16x128xf32>
    %306 = arith.mulf %300, %304 : vector<16x128xf32>
    %307 = arith.addf %305, %306 : vector<16x128xf32>
    %308 = math.tanh %307 : vector<16x128xf32>
    %309 = arith.mulf %302, %308 : vector<16x128xf32>
    %310 = arith.truncf %284 : vector<16x128xf32> to vector<16x128xbf16>
    %311 = arith.index_cast %c4_i32 : i32 to index
    %c0_97 = arith.constant 0 : index
    %c0_98 = arith.constant 0 : index
    %312 = vector.load %arg4[%311, %c0_97, %c0_98] : memref<8x16x128xbf16, #tpu.memory_space<vmem>>, vector<1x16x128xbf16>
    %313 = vector.shape_cast %312 : vector<1x16x128xbf16> to vector<16x128xbf16>
    %314 = vector.shape_cast %310 : vector<16x128xbf16> to vector<1x16x128xbf16>
    tpu.vector_store %arg4[%311, %c0_97, %c0_98], %314 {strides = array<i32>} : memref<8x16x128xbf16, #tpu.memory_space<vmem>>, vector<1x16x128xbf16>,
    %315 = arith.truncf %309 : vector<16x128xf32> to vector<16x128xbf16>
    %316 = arith.index_cast %259 : i32 to index
    %c0_99 = arith.constant 0 : index
    %c0_100 = arith.constant 0 : index
    %317 = vector.load %arg5[%316, %c0_99, %c0_100] : memref<8x16x128xbf16, #tpu.memory_space<vmem>>, vector<1x16x128xbf16>
    %318 = vector.shape_cast %317 : vector<1x16x128xbf16> to vector<16x128xbf16>
    %319 = vector.shape_cast %315 : vector<16x128xbf16> to vector<1x16x128xbf16>
    tpu.vector_store %arg5[%316, %c0_99, %c0_100], %319 {strides = array<i32>} : memref<8x16x128xbf16, #tpu.memory_space<vmem>>, vector<1x16x128xbf16>,
    %c5_i32 = arith.constant 5 : i32
    %c7_i32_101 = arith.constant 7 : i32
    %320 = arith.subi %c7_i32_101, %c5_i32 : i32
    %321 = arith.index_cast %c5_i32 : i32 to index
    %c0_102 = arith.constant 0 : index
    %c0_103 = arith.constant 0 : index
    %322 = vector.load %arg1[%321, %c0_102, %c0_103] : memref<8x16x512xbf16, #tpu.memory_space<vmem>>, vector<1x16x512xbf16>
    %323 = vector.shape_cast %322 : vector<1x16x512xbf16> to vector<16x512xbf16>
    %324 = arith.extf %323 : vector<16x512xbf16> to vector<16x512xf32>
    %325 = arith.truncf %284 : vector<16x128xf32> to vector<16x128xbf16>
    %cst_104 = arith.constant dense<0.000000e+00> : vector<16x512xf32>
    %326 = tpu.matmul %325, %4, %cst_104 {dimension_numbers = #tpu.dot_dimension_numbers<[1], [0], [0], [1], [0, 0, 1, 1], [], []>} : vector<16x128xbf16>, vector<128x512xbf16>, vector<16x512xf32> -> vector<16x512xf32>
    %327 = arith.addf %324, %326 : vector<16x512xf32>
    %328 = vector.extract_strided_slice %327 {offsets = [0, 0], sizes = [16, 384], strides = [1, 1]} : vector<16x512xf32> to vector<16x384xf32>
    %cst_105 = arith.constant 5.000000e-01 : f32
    %329 = vector.broadcast %cst_105 : f32 to vector<16x384xf32>
    %330 = arith.mulf %329, %328 : vector<16x384xf32>
    %331 = math.tanh %330 : vector<16x384xf32>
    %cst_106 = arith.constant 5.000000e-01 : f32
    %332 = vector.broadcast %cst_106 : f32 to vector<16x384xf32>
    %333 = arith.mulf %332, %331 : vector<16x384xf32>
    %cst_107 = arith.constant 5.000000e-01 : f32
    %334 = vector.broadcast %cst_107 : f32 to vector<16x384xf32>
    %335 = arith.addf %333, %334 : vector<16x384xf32>
    %336 = vector.extract_strided_slice %335 {offsets = [0, 0], sizes = [16, 128], strides = [1, 1]} : vector<16x384xf32> to vector<16x128xf32>
    %337 = vector.extract_strided_slice %335 {offsets = [0, 128], sizes = [16, 128], strides = [1, 1]} : vector<16x384xf32> to vector<16x128xf32>
    %338 = vector.extract_strided_slice %335 {offsets = [0, 256], sizes = [16, 128], strides = [1, 1]} : vector<16x384xf32> to vector<16x128xf32>
    %339 = vector.extract_strided_slice %327 {offsets = [0, 384], sizes = [16, 128], strides = [1, 1]} : vector<16x512xf32> to vector<16x128xf32>
    %340 = math.tanh %339 : vector<16x128xf32>
    %341 = arith.mulf %337, %282 : vector<16x128xf32>
    %342 = arith.mulf %336, %340 : vector<16x128xf32>
    %343 = arith.addf %341, %342 : vector<16x128xf32>
    %344 = math.tanh %343 : vector<16x128xf32>
    %345 = arith.mulf %338, %344 : vector<16x128xf32>
    %346 = arith.index_cast %320 : i32 to index
    %c0_108 = arith.constant 0 : index
    %c0_109 = arith.constant 0 : index
    %347 = vector.load %arg2[%346, %c0_108, %c0_109] : memref<8x16x512xbf16, #tpu.memory_space<vmem>>, vector<1x16x512xbf16>
    %348 = vector.shape_cast %347 : vector<1x16x512xbf16> to vector<16x512xbf16>
    %349 = arith.extf %348 : vector<16x512xbf16> to vector<16x512xf32>
    %350 = arith.truncf %309 : vector<16x128xf32> to vector<16x128xbf16>
    %cst_110 = arith.constant dense<0.000000e+00> : vector<16x512xf32>
    %351 = tpu.matmul %350, %6, %cst_110 {dimension_numbers = #tpu.dot_dimension_numbers<[1], [0], [0], [1], [0, 0, 1, 1], [], []>} : vector<16x128xbf16>, vector<128x512xbf16>, vector<16x512xf32> -> vector<16x512xf32>
    %352 = arith.addf %349, %351 : vector<16x512xf32>
    %353 = vector.extract_strided_slice %352 {offsets = [0, 0], sizes = [16, 384], strides = [1, 1]} : vector<16x512xf32> to vector<16x384xf32>
    %cst_111 = arith.constant 5.000000e-01 : f32
    %354 = vector.broadcast %cst_111 : f32 to vector<16x384xf32>
    %355 = arith.mulf %354, %353 : vector<16x384xf32>
    %356 = math.tanh %355 : vector<16x384xf32>
    %cst_112 = arith.constant 5.000000e-01 : f32
    %357 = vector.broadcast %cst_112 : f32 to vector<16x384xf32>
    %358 = arith.mulf %357, %356 : vector<16x384xf32>
    %cst_113 = arith.constant 5.000000e-01 : f32
    %359 = vector.broadcast %cst_113 : f32 to vector<16x384xf32>
    %360 = arith.addf %358, %359 : vector<16x384xf32>
    %361 = vector.extract_strided_slice %360 {offsets = [0, 0], sizes = [16, 128], strides = [1, 1]} : vector<16x384xf32> to vector<16x128xf32>
    %362 = vector.extract_strided_slice %360 {offsets = [0, 128], sizes = [16, 128], strides = [1, 1]} : vector<16x384xf32> to vector<16x128xf32>
    %363 = vector.extract_strided_slice %360 {offsets = [0, 256], sizes = [16, 128], strides = [1, 1]} : vector<16x384xf32> to vector<16x128xf32>
    %364 = vector.extract_strided_slice %352 {offsets = [0, 384], sizes = [16, 128], strides = [1, 1]} : vector<16x512xf32> to vector<16x128xf32>
    %365 = math.tanh %364 : vector<16x128xf32>
    %366 = arith.mulf %362, %307 : vector<16x128xf32>
    %367 = arith.mulf %361, %365 : vector<16x128xf32>
    %368 = arith.addf %366, %367 : vector<16x128xf32>
    %369 = math.tanh %368 : vector<16x128xf32>
    %370 = arith.mulf %363, %369 : vector<16x128xf32>
    %371 = arith.truncf %345 : vector<16x128xf32> to vector<16x128xbf16>
    %372 = arith.index_cast %c5_i32 : i32 to index
    %c0_114 = arith.constant 0 : index
    %c0_115 = arith.constant 0 : index
    %373 = vector.load %arg4[%372, %c0_114, %c0_115] : memref<8x16x128xbf16, #tpu.memory_space<vmem>>, vector<1x16x128xbf16>
    %374 = vector.shape_cast %373 : vector<1x16x128xbf16> to vector<16x128xbf16>
    %375 = vector.shape_cast %371 : vector<16x128xbf16> to vector<1x16x128xbf16>
    tpu.vector_store %arg4[%372, %c0_114, %c0_115], %375 {strides = array<i32>} : memref<8x16x128xbf16, #tpu.memory_space<vmem>>, vector<1x16x128xbf16>,
    %376 = arith.truncf %370 : vector<16x128xf32> to vector<16x128xbf16>
    %377 = arith.index_cast %320 : i32 to index
    %c0_116 = arith.constant 0 : index
    %c0_117 = arith.constant 0 : index
    %378 = vector.load %arg5[%377, %c0_116, %c0_117] : memref<8x16x128xbf16, #tpu.memory_space<vmem>>, vector<1x16x128xbf16>
    %379 = vector.shape_cast %378 : vector<1x16x128xbf16> to vector<16x128xbf16>
    %380 = vector.shape_cast %376 : vector<16x128xbf16> to vector<1x16x128xbf16>
    tpu.vector_store %arg5[%377, %c0_116, %c0_117], %380 {strides = array<i32>} : memref<8x16x128xbf16, #tpu.memory_space<vmem>>, vector<1x16x128xbf16>,
    %c6_i32 = arith.constant 6 : i32
    %c7_i32_118 = arith.constant 7 : i32
    %381 = arith.subi %c7_i32_118, %c6_i32 : i32
    %382 = arith.index_cast %c6_i32 : i32 to index
    %c0_119 = arith.constant 0 : index
    %c0_120 = arith.constant 0 : index
    %383 = vector.load %arg1[%382, %c0_119, %c0_120] : memref<8x16x512xbf16, #tpu.memory_space<vmem>>, vector<1x16x512xbf16>
    %384 = vector.shape_cast %383 : vector<1x16x512xbf16> to vector<16x512xbf16>
    %385 = arith.extf %384 : vector<16x512xbf16> to vector<16x512xf32>
    %386 = arith.truncf %345 : vector<16x128xf32> to vector<16x128xbf16>
    %cst_121 = arith.constant dense<0.000000e+00> : vector<16x512xf32>
    %387 = tpu.matmul %386, %4, %cst_121 {dimension_numbers = #tpu.dot_dimension_numbers<[1], [0], [0], [1], [0, 0, 1, 1], [], []>} : vector<16x128xbf16>, vector<128x512xbf16>, vector<16x512xf32> -> vector<16x512xf32>
    %388 = arith.addf %385, %387 : vector<16x512xf32>
    %389 = vector.extract_strided_slice %388 {offsets = [0, 0], sizes = [16, 384], strides = [1, 1]} : vector<16x512xf32> to vector<16x384xf32>
    %cst_122 = arith.constant 5.000000e-01 : f32
    %390 = vector.broadcast %cst_122 : f32 to vector<16x384xf32>
    %391 = arith.mulf %390, %389 : vector<16x384xf32>
    %392 = math.tanh %391 : vector<16x384xf32>
    %cst_123 = arith.constant 5.000000e-01 : f32
    %393 = vector.broadcast %cst_123 : f32 to vector<16x384xf32>
    %394 = arith.mulf %393, %392 : vector<16x384xf32>
    %cst_124 = arith.constant 5.000000e-01 : f32
    %395 = vector.broadcast %cst_124 : f32 to vector<16x384xf32>
    %396 = arith.addf %394, %395 : vector<16x384xf32>
    %397 = vector.extract_strided_slice %396 {offsets = [0, 0], sizes = [16, 128], strides = [1, 1]} : vector<16x384xf32> to vector<16x128xf32>
    %398 = vector.extract_strided_slice %396 {offsets = [0, 128], sizes = [16, 128], strides = [1, 1]} : vector<16x384xf32> to vector<16x128xf32>
    %399 = vector.extract_strided_slice %396 {offsets = [0, 256], sizes = [16, 128], strides = [1, 1]} : vector<16x384xf32> to vector<16x128xf32>
    %400 = vector.extract_strided_slice %388 {offsets = [0, 384], sizes = [16, 128], strides = [1, 1]} : vector<16x512xf32> to vector<16x128xf32>
    %401 = math.tanh %400 : vector<16x128xf32>
    %402 = arith.mulf %398, %343 : vector<16x128xf32>
    %403 = arith.mulf %397, %401 : vector<16x128xf32>
    %404 = arith.addf %402, %403 : vector<16x128xf32>
    %405 = math.tanh %404 : vector<16x128xf32>
    %406 = arith.mulf %399, %405 : vector<16x128xf32>
    %407 = arith.index_cast %381 : i32 to index
    %c0_125 = arith.constant 0 : index
    %c0_126 = arith.constant 0 : index
    %408 = vector.load %arg2[%407, %c0_125, %c0_126] : memref<8x16x512xbf16, #tpu.memory_space<vmem>>, vector<1x16x512xbf16>
    %409 = vector.shape_cast %408 : vector<1x16x512xbf16> to vector<16x512xbf16>
    %410 = arith.extf %409 : vector<16x512xbf16> to vector<16x512xf32>
    %411 = arith.truncf %370 : vector<16x128xf32> to vector<16x128xbf16>
    %cst_127 = arith.constant dense<0.000000e+00> : vector<16x512xf32>
    %412 = tpu.matmul %411, %6, %cst_127 {dimension_numbers = #tpu.dot_dimension_numbers<[1], [0], [0], [1], [0, 0, 1, 1], [], []>} : vector<16x128xbf16>, vector<128x512xbf16>, vector<16x512xf32> -> vector<16x512xf32>
    %413 = arith.addf %410, %412 : vector<16x512xf32>
    %414 = vector.extract_strided_slice %413 {offsets = [0, 0], sizes = [16, 384], strides = [1, 1]} : vector<16x512xf32> to vector<16x384xf32>
    %cst_128 = arith.constant 5.000000e-01 : f32
    %415 = vector.broadcast %cst_128 : f32 to vector<16x384xf32>
    %416 = arith.mulf %415, %414 : vector<16x384xf32>
    %417 = math.tanh %416 : vector<16x384xf32>
    %cst_129 = arith.constant 5.000000e-01 : f32
    %418 = vector.broadcast %cst_129 : f32 to vector<16x384xf32>
    %419 = arith.mulf %418, %417 : vector<16x384xf32>
    %cst_130 = arith.constant 5.000000e-01 : f32
    %420 = vector.broadcast %cst_130 : f32 to vector<16x384xf32>
    %421 = arith.addf %419, %420 : vector<16x384xf32>
    %422 = vector.extract_strided_slice %421 {offsets = [0, 0], sizes = [16, 128], strides = [1, 1]} : vector<16x384xf32> to vector<16x128xf32>
    %423 = vector.extract_strided_slice %421 {offsets = [0, 128], sizes = [16, 128], strides = [1, 1]} : vector<16x384xf32> to vector<16x128xf32>
    %424 = vector.extract_strided_slice %421 {offsets = [0, 256], sizes = [16, 128], strides = [1, 1]} : vector<16x384xf32> to vector<16x128xf32>
    %425 = vector.extract_strided_slice %413 {offsets = [0, 384], sizes = [16, 128], strides = [1, 1]} : vector<16x512xf32> to vector<16x128xf32>
    %426 = math.tanh %425 : vector<16x128xf32>
    %427 = arith.mulf %423, %368 : vector<16x128xf32>
    %428 = arith.mulf %422, %426 : vector<16x128xf32>
    %429 = arith.addf %427, %428 : vector<16x128xf32>
    %430 = math.tanh %429 : vector<16x128xf32>
    %431 = arith.mulf %424, %430 : vector<16x128xf32>
    %432 = arith.truncf %406 : vector<16x128xf32> to vector<16x128xbf16>
    %433 = arith.index_cast %c6_i32 : i32 to index
    %c0_131 = arith.constant 0 : index
    %c0_132 = arith.constant 0 : index
    %434 = vector.load %arg4[%433, %c0_131, %c0_132] : memref<8x16x128xbf16, #tpu.memory_space<vmem>>, vector<1x16x128xbf16>
    %435 = vector.shape_cast %434 : vector<1x16x128xbf16> to vector<16x128xbf16>
    %436 = vector.shape_cast %432 : vector<16x128xbf16> to vector<1x16x128xbf16>
    tpu.vector_store %arg4[%433, %c0_131, %c0_132], %436 {strides = array<i32>} : memref<8x16x128xbf16, #tpu.memory_space<vmem>>, vector<1x16x128xbf16>,
    %437 = arith.truncf %431 : vector<16x128xf32> to vector<16x128xbf16>
    %438 = arith.index_cast %381 : i32 to index
    %c0_133 = arith.constant 0 : index
    %c0_134 = arith.constant 0 : index
    %439 = vector.load %arg5[%438, %c0_133, %c0_134] : memref<8x16x128xbf16, #tpu.memory_space<vmem>>, vector<1x16x128xbf16>
    %440 = vector.shape_cast %439 : vector<1x16x128xbf16> to vector<16x128xbf16>
    %441 = vector.shape_cast %437 : vector<16x128xbf16> to vector<1x16x128xbf16>
    tpu.vector_store %arg5[%438, %c0_133, %c0_134], %441 {strides = array<i32>} : memref<8x16x128xbf16, #tpu.memory_space<vmem>>, vector<1x16x128xbf16>,
    %c7_i32_135 = arith.constant 7 : i32
    %c7_i32_136 = arith.constant 7 : i32
    %442 = arith.subi %c7_i32_136, %c7_i32_135 : i32
    %443 = arith.index_cast %c7_i32_135 : i32 to index
    %c0_137 = arith.constant 0 : index
    %c0_138 = arith.constant 0 : index
    %444 = vector.load %arg1[%443, %c0_137, %c0_138] : memref<8x16x512xbf16, #tpu.memory_space<vmem>>, vector<1x16x512xbf16>
    %445 = vector.shape_cast %444 : vector<1x16x512xbf16> to vector<16x512xbf16>
    %446 = arith.extf %445 : vector<16x512xbf16> to vector<16x512xf32>
    %447 = arith.truncf %406 : vector<16x128xf32> to vector<16x128xbf16>
    %cst_139 = arith.constant dense<0.000000e+00> : vector<16x512xf32>
    %448 = tpu.matmul %447, %4, %cst_139 {dimension_numbers = #tpu.dot_dimension_numbers<[1], [0], [0], [1], [0, 0, 1, 1], [], []>} : vector<16x128xbf16>, vector<128x512xbf16>, vector<16x512xf32> -> vector<16x512xf32>
    %449 = arith.addf %446, %448 : vector<16x512xf32>
    %450 = vector.extract_strided_slice %449 {offsets = [0, 0], sizes = [16, 384], strides = [1, 1]} : vector<16x512xf32> to vector<16x384xf32>
    %cst_140 = arith.constant 5.000000e-01 : f32
    %451 = vector.broadcast %cst_140 : f32 to vector<16x384xf32>
    %452 = arith.mulf %451, %450 : vector<16x384xf32>
    %453 = math.tanh %452 : vector<16x384xf32>
    %cst_141 = arith.constant 5.000000e-01 : f32
    %454 = vector.broadcast %cst_141 : f32 to vector<16x384xf32>
    %455 = arith.mulf %454, %453 : vector<16x384xf32>
    %cst_142 = arith.constant 5.000000e-01 : f32
    %456 = vector.broadcast %cst_142 : f32 to vector<16x384xf32>
    %457 = arith.addf %455, %456 : vector<16x384xf32>
    %458 = vector.extract_strided_slice %457 {offsets = [0, 0], sizes = [16, 128], strides = [1, 1]} : vector<16x384xf32> to vector<16x128xf32>
    %459 = vector.extract_strided_slice %457 {offsets = [0, 128], sizes = [16, 128], strides = [1, 1]} : vector<16x384xf32> to vector<16x128xf32>
    %460 = vector.extract_strided_slice %457 {offsets = [0, 256], sizes = [16, 128], strides = [1, 1]} : vector<16x384xf32> to vector<16x128xf32>
    %461 = vector.extract_strided_slice %449 {offsets = [0, 384], sizes = [16, 128], strides = [1, 1]} : vector<16x512xf32> to vector<16x128xf32>
    %462 = math.tanh %461 : vector<16x128xf32>
    %463 = arith.mulf %459, %404 : vector<16x128xf32>
    %464 = arith.mulf %458, %462 : vector<16x128xf32>
    %465 = arith.addf %463, %464 : vector<16x128xf32>
    %466 = math.tanh %465 : vector<16x128xf32>
    %467 = arith.mulf %460, %466 : vector<16x128xf32>
    %468 = arith.index_cast %442 : i32 to index
    %c0_143 = arith.constant 0 : index
    %c0_144 = arith.constant 0 : index
    %469 = vector.load %arg2[%468, %c0_143, %c0_144] : memref<8x16x512xbf16, #tpu.memory_space<vmem>>, vector<1x16x512xbf16>
    %470 = vector.shape_cast %469 : vector<1x16x512xbf16> to vector<16x512xbf16>
    %471 = arith.extf %470 : vector<16x512xbf16> to vector<16x512xf32>
    %472 = arith.truncf %431 : vector<16x128xf32> to vector<16x128xbf16>
    %cst_145 = arith.constant dense<0.000000e+00> : vector<16x512xf32>
    %473 = tpu.matmul %472, %6, %cst_145 {dimension_numbers = #tpu.dot_dimension_numbers<[1], [0], [0], [1], [0, 0, 1, 1], [], []>} : vector<16x128xbf16>, vector<128x512xbf16>, vector<16x512xf32> -> vector<16x512xf32>
    %474 = arith.addf %471, %473 : vector<16x512xf32>
    %475 = vector.extract_strided_slice %474 {offsets = [0, 0], sizes = [16, 384], strides = [1, 1]} : vector<16x512xf32> to vector<16x384xf32>
    %cst_146 = arith.constant 5.000000e-01 : f32
    %476 = vector.broadcast %cst_146 : f32 to vector<16x384xf32>
    %477 = arith.mulf %476, %475 : vector<16x384xf32>
    %478 = math.tanh %477 : vector<16x384xf32>
    %cst_147 = arith.constant 5.000000e-01 : f32
    %479 = vector.broadcast %cst_147 : f32 to vector<16x384xf32>
    %480 = arith.mulf %479, %478 : vector<16x384xf32>
    %cst_148 = arith.constant 5.000000e-01 : f32
    %481 = vector.broadcast %cst_148 : f32 to vector<16x384xf32>
    %482 = arith.addf %480, %481 : vector<16x384xf32>
    %483 = vector.extract_strided_slice %482 {offsets = [0, 0], sizes = [16, 128], strides = [1, 1]} : vector<16x384xf32> to vector<16x128xf32>
    %484 = vector.extract_strided_slice %482 {offsets = [0, 128], sizes = [16, 128], strides = [1, 1]} : vector<16x384xf32> to vector<16x128xf32>
    %485 = vector.extract_strided_slice %482 {offsets = [0, 256], sizes = [16, 128], strides = [1, 1]} : vector<16x384xf32> to vector<16x128xf32>
    %486 = vector.extract_strided_slice %474 {offsets = [0, 384], sizes = [16, 128], strides = [1, 1]} : vector<16x512xf32> to vector<16x128xf32>
    %487 = math.tanh %486 : vector<16x128xf32>
    %488 = arith.mulf %484, %429 : vector<16x128xf32>
    %489 = arith.mulf %483, %487 : vector<16x128xf32>
    %490 = arith.addf %488, %489 : vector<16x128xf32>
    %491 = math.tanh %490 : vector<16x128xf32>
    %492 = arith.mulf %485, %491 : vector<16x128xf32>
    %493 = arith.truncf %467 : vector<16x128xf32> to vector<16x128xbf16>
    %494 = arith.index_cast %c7_i32_135 : i32 to index
    %c0_149 = arith.constant 0 : index
    %c0_150 = arith.constant 0 : index
    %495 = vector.load %arg4[%494, %c0_149, %c0_150] : memref<8x16x128xbf16, #tpu.memory_space<vmem>>, vector<1x16x128xbf16>
    %496 = vector.shape_cast %495 : vector<1x16x128xbf16> to vector<16x128xbf16>
    %497 = vector.shape_cast %493 : vector<16x128xbf16> to vector<1x16x128xbf16>
    tpu.vector_store %arg4[%494, %c0_149, %c0_150], %497 {strides = array<i32>} : memref<8x16x128xbf16, #tpu.memory_space<vmem>>, vector<1x16x128xbf16>,
    %498 = arith.truncf %492 : vector<16x128xf32> to vector<16x128xbf16>
    %499 = arith.index_cast %442 : i32 to index
    %c0_151 = arith.constant 0 : index
    %c0_152 = arith.constant 0 : index
    %500 = vector.load %arg5[%499, %c0_151, %c0_152] : memref<8x16x128xbf16, #tpu.memory_space<vmem>>, vector<1x16x128xbf16>
    %501 = vector.shape_cast %500 : vector<1x16x128xbf16> to vector<16x128xbf16>
    %502 = vector.shape_cast %498 : vector<16x128xbf16> to vector<1x16x128xbf16>
    tpu.vector_store %arg5[%499, %c0_151, %c0_152], %502 {strides = array<i32>} : memref<8x16x128xbf16, #tpu.memory_space<vmem>>, vector<1x16x128xbf16>,
    %c8_i32 = arith.constant 8 : i32
    %c0_153 = arith.constant 0 : index
    %c0_154 = arith.constant 0 : index
    %c0_155 = arith.constant 0 : index
    %503 = vector.load %arg6[%c0_153, %c0_154, %c0_155] : memref<2x16x128xf32, #tpu.memory_space<vmem>>, vector<1x16x128xf32>
    %504 = vector.shape_cast %503 : vector<1x16x128xf32> to vector<16x128xf32>
    %505 = vector.shape_cast %467 : vector<16x128xf32> to vector<1x16x128xf32>
    tpu.vector_store %arg6[%c0_153, %c0_154, %c0_155], %505 {strides = array<i32>} : memref<2x16x128xf32, #tpu.memory_space<vmem>>, vector<1x16x128xf32>,
    %c0_156 = arith.constant 0 : index
    %c0_157 = arith.constant 0 : index
    %c0_158 = arith.constant 0 : index
    %506 = vector.load %arg7[%c0_156, %c0_157, %c0_158] : memref<2x16x128xf32, #tpu.memory_space<vmem>>, vector<1x16x128xf32>
    %507 = vector.shape_cast %506 : vector<1x16x128xf32> to vector<16x128xf32>
    %508 = vector.shape_cast %465 : vector<16x128xf32> to vector<1x16x128xf32>
    tpu.vector_store %arg7[%c0_156, %c0_157, %c0_158], %508 {strides = array<i32>} : memref<2x16x128xf32, #tpu.memory_space<vmem>>, vector<1x16x128xf32>,
    %c1_159 = arith.constant 1 : index
    %c0_160 = arith.constant 0 : index
    %c0_161 = arith.constant 0 : index
    %509 = vector.load %arg6[%c1_159, %c0_160, %c0_161] : memref<2x16x128xf32, #tpu.memory_space<vmem>>, vector<1x16x128xf32>
    %510 = vector.shape_cast %509 : vector<1x16x128xf32> to vector<16x128xf32>
    %511 = vector.shape_cast %492 : vector<16x128xf32> to vector<1x16x128xf32>
    tpu.vector_store %arg6[%c1_159, %c0_160, %c0_161], %511 {strides = array<i32>} : memref<2x16x128xf32, #tpu.memory_space<vmem>>, vector<1x16x128xf32>,
    %c1_162 = arith.constant 1 : index
    %c0_163 = arith.constant 0 : index
    %c0_164 = arith.constant 0 : index
    %512 = vector.load %arg7[%c1_162, %c0_163, %c0_164] : memref<2x16x128xf32, #tpu.memory_space<vmem>>, vector<1x16x128xf32>
    %513 = vector.shape_cast %512 : vector<1x16x128xf32> to vector<16x128xf32>
    %514 = vector.shape_cast %490 : vector<16x128xf32> to vector<1x16x128xf32>
    tpu.vector_store %arg7[%c1_162, %c0_163, %c0_164], %514 {strides = array<i32>} : memref<2x16x128xf32, #tpu.memory_space<vmem>>, vector<1x16x128xf32>,
    return
  }
  func.func @transform_0(%arg0: i32) -> (i32, i32, i32) {
    %c0_i32 = arith.constant 0 : i32
    %c0_i32_0 = arith.constant 0 : i32
    %c0_i32_1 = arith.constant 0 : i32
    return %arg0, %c0_i32, %c0_i32_0 : i32, i32, i32
  }
  func.func @transform_1(%arg0: i32) -> (i32, i32, i32) {
    %c0_i32 = arith.constant 0 : i32
    %0 = arith.subi %c0_i32, %arg0 : i32
    %c0_i32_0 = arith.constant 0 : i32
    %c1_i32 = arith.constant 1 : i32
    %c0_i32_1 = arith.constant 0 : i32
    return %0, %c0_i32_0, %c1_i32 : i32, i32, i32
  }
  func.func @transform_2(%arg0: i32) -> (i32, i32, i32) {
    %c0_i32 = arith.constant 0 : i32
    %c0_i32_0 = arith.constant 0 : i32
    %c0_i32_1 = arith.constant 0 : i32
    %c0_i32_2 = arith.constant 0 : i32
    return %c0_i32, %c0_i32_0, %c0_i32_1 : i32, i32, i32
  }
  func.func @transform_3(%arg0: i32) -> (i32, i32, i32) {
    %c0_i32 = arith.constant 0 : i32
    %c0_i32_0 = arith.constant 0 : i32
    %c0_i32_1 = arith.constant 0 : i32
    return %arg0, %c0_i32, %c0_i32_0 : i32, i32, i32
  }
  func.func @transform_4(%arg0: i32) -> (i32, i32, i32) {
    %c0_i32 = arith.constant 0 : i32
    %0 = arith.subi %c0_i32, %arg0 : i32
    %c0_i32_0 = arith.constant 0 : i32
    %c0_i32_1 = arith.constant 0 : i32
    %c0_i32_2 = arith.constant 0 : i32
    return %0, %c0_i32_0, %c0_i32_1 : i32, i32, i32
  }
}

module attributes {stable_mosaic.version = 11 : i64} {
  func.func @_matmul_bias_kernel(%arg0: memref<16x256xf32, #tpu.memory_space<vmem>>, %arg1: memref<256x6xf32, #tpu.memory_space<vmem>>, %arg2: memref<1x6xf32, #tpu.memory_space<vmem>>, %arg3: memref<16x6xf32, #tpu.memory_space<vmem>>) attributes {dimension_semantics = [], scalar_prefetch = 0 : i64, scratch_operands = 0 : i64, tpu.core_type = #tpu.core_type<tc>} {
    %c0 = arith.constant 0 : index
    %c0_0 = arith.constant 0 : index
    %0 = vector.load %arg0[%c0, %c0_0] : memref<16x256xf32, #tpu.memory_space<vmem>>, vector<16x256xf32>
    %c0_1 = arith.constant 0 : index
    %c0_2 = arith.constant 0 : index
    %1 = vector.load %arg1[%c0_1, %c0_2] : memref<256x6xf32, #tpu.memory_space<vmem>>, vector<256x6xf32>
    %cst = arith.constant dense<0.000000e+00> : vector<16x6xf32>
    %2 = tpu.matmul %0, %1, %cst {dimension_numbers = #tpu.dot_dimension_numbers<[1], [0], [0], [1], [0, 0, 1, 1], [], []>} : vector<16x256xf32>, vector<256x6xf32>, vector<16x6xf32> -> vector<16x6xf32>
    %c0_3 = arith.constant 0 : index
    %c0_4 = arith.constant 0 : index
    %3 = vector.load %arg2[%c0_3, %c0_4] : memref<1x6xf32, #tpu.memory_space<vmem>>, vector<1x6xf32>
    %4 = vector.broadcast %3 : vector<1x6xf32> to vector<16x6xf32>
    %5 = arith.addf %2, %4 : vector<16x6xf32>
    %c0_5 = arith.constant 0 : index
    %c0_6 = arith.constant 0 : index
    %6 = vector.load %arg3[%c0_5, %c0_6] : memref<16x6xf32, #tpu.memory_space<vmem>>, vector<16x6xf32>
    tpu.vector_store %arg3[%c0_5, %c0_6], %5 {strides = array<i32>} : memref<16x6xf32, #tpu.memory_space<vmem>>, vector<16x6xf32>,
    return
  }
}

</mosaic_0001>

<bundles_post_ra>
// kernel: bilstm_forward.5
= control target key start
LH: loop header
LB: loop body
LE: loop exit
PB: predicated region body
PF: predicated region fallthrough
CT: control target
= control target key end

     0   :  { %v35_v0 = vlaneseq  ;;  %v1289_v3 = vmov 1983009808   ;;  %v1290_v5 = vmov 0   ;;  %vm176_vm0 = vcmask 1041408   ;;  %s1773_s1 = inlined_call_operand.vmem [shape: bf16[4,1024], index: 1, kind: input, shape index: {}]   ;;  %s1774_s0 = inlined_call_operand.vmem [shape: bf16[128,4], index: 0, kind: input, shape index: {}]   ;;  %s1775_s2 = inlined_call_operand.vmem [shape: f32[1,1024], index: 2, kind: input, shape index: {}]   ;;  %s1776_s3 = inlined_call_operand.vmem [shape: bf16[128,1024], index: 3, kind: output, shape index: {}]  }
   0x1   :  { %v31_v1 = vld [vmem:[%s1773_s1] sm:$0xff]  ;;  %v32_v2 = vld [vmem:[%s1773_s1 + $0x8] sm:$0xff]  ;;  %v119_v4 = vunpack.c.l.s4 %v1289_v3  ;;  %233 = vmatprep.mubr.bf16.mxu0 %v1290_v5  ;;  %346 = vmatprep.mubr.bf16.mxu1 %v1290_v5  ;;  %vm151_vm1 = vcmask 31744   ;;  %v1283_v25 = vld [vmem:[%s1774_s0 + $0x10] sm:$0xff]  }
   0x2   :  { %v1319_v6 = vshrl.u32 %v35_v0, 7  ;;  %v134_v8 = vcombine.high %v32_v2, %v32_v2  ;;  %v117_v9 = vcombine.high %v31_v1, %v31_v1  ;;  %v1281_v21 = vld [vmem:[%s1774_s0] sm:$0xff]   ;;  %v1282_v24 = vld [vmem:[%s1774_s0 + $0x8] sm:$0xff]   ;;  %v1284_v26 = vld [vmem:[%s1774_s0 + $0x18] sm:$0xff]  }
   0x3   :  { %v120_v7 = vunpack.c.0.s8 %v119_v4  ;;  %v1285_v27 = vld [vmem:[%s1774_s0 + $0x20] sm:$0xff]   ;;  %v1286_v28 = vld [vmem:[%s1774_s0 + $0x28] sm:$0xff]   ;;  %v1287_v29 = vld [vmem:[%s1774_s0 + $0x30] sm:$0xff]  }
   0x4   :  { %v1288_v30 = vld [vmem:[%s1774_s0 + $0x38] sm:$0xff]   ;;  %v37_v31 = vsub.s32 0, %v1319_v6  ;;  %v45_v32 = vsub.s32 2, %v1319_v6  ;;  %v1421_v33 = vld [vmem:[%s1775_s2] sm:$0xff]  ;;  %v41_v34 = vsub.s32 1, %v1319_v6  ;;  %v49_v35 = vsub.s32 3, %v1319_v6 }
   0x5   :  { %v123_v10 = vsub.s32 %v120_v7, %v1319_v6 }
   0x6   :  { %v1426_v36 = vrot.slane %v1421_v33, %v37_v31  ;;  %v1429_v37 = vrot.slane %v1421_v33, %v45_v32  ;;  %v1432_v38 = vrot.slane %v1421_v33, %v41_v34  ;;  %v1435_v39 = vrot.slane %v1421_v33, %v49_v35 }
   0x7   :  { %v124_v11 = vrot.slane %v31_v1, %v123_v10  ;;  %v141_v12 = vrot.slane %v32_v2, %v123_v10  ;;  %v131_v13 = vrot.slane %v117_v9, %v123_v10  ;;  %v148_v14 = vrot.slane %v134_v8, %v123_v10 }
   0x9   :  { %v132_v15 = vcombine.high %v124_v11, %v124_v11  ;;  %v133_v16 = vcombine.high %v131_v13, %v131_v13  ;;  %v178_v17 = vsel %vm176_vm0, %v124_v11, 0  ;;  %v184_v18 = vsel %vm176_vm0, %v131_v13, 0 }
   0xa   :  { %v149_v19 = vcombine.high %v141_v12, %v141_v12  ;;  %v150_v20 = vcombine.high %v148_v14, %v148_v14  ;;  %v190_v22 = vsel %vm176_vm0, %v141_v12, 0  ;;  %v196_v23 = vsel %vm176_vm0, %v148_v14, 0 }
   0xb   :  { %1113 = vmatprep.subr.msk.bf16.mxu0 %vm176_vm0, %v132_v15  ;;  %1122 = vmatprep.subr.msk.bf16.mxu1 %vm176_vm0, %v133_v16 }
   0xc   :  { %202 = vmatpush1.bf16.msra.mxu0 %v178_v17  ;;  %315 = vmatpush1.bf16.msra.mxu1 %v184_v18 }
   0xd   :  { %1131 = vmatprep.subr.msk.bf16.mxu0 %vm176_vm0, %v149_v19  ;;  %1140 = vmatprep.subr.msk.bf16.mxu1 %vm176_vm0, %v150_v20 }
   0xf   :  { %1114 = vmatmul.mubr.msk.bf16.vlgmr.msra.gmra.mrb[0].mxu0 %vm151_vm1, %v1281_v21  ;;  %1123 = vmatmul.mubr.msk.bf16.vlgmr.msra.gmra.mrb[0].mxu1 %vm151_vm1, %v1281_v21 }
  0x10   :  { %428 = vmatpush1.bf16.msra.mxu0 %v190_v22  ;;  %541 = vmatpush1.bf16.msra.mxu1 %v196_v23 }
  0x11   :  { %243 = vmatprep.mubr.bf16.mxu0 %v1290_v5  ;;  %356 = vmatprep.mubr.bf16.mxu1 %v1290_v5 }
  0x17   :  { %1115 = vmatmul.mubr.msk.bf16.gmra.mrb[4].mxu0 %vm151_vm1, %v1282_v24  ;;  %1124 = vmatmul.mubr.msk.bf16.gmra.mrb[4].mxu1 %vm151_vm1, %v1282_v24 }
  0x18   :  { %253 = vmatprep.mubr.bf16.mxu0 %v1290_v5  ;;  %366 = vmatprep.mubr.bf16.mxu1 %v1290_v5 }
  0x1f   :  { %1116 = vmatmul.mubr.msk.bf16.gmra.mrb[8].mxu0 %vm151_vm1, %v1283_v25  ;;  %1125 = vmatmul.mubr.msk.bf16.gmra.mrb[8].mxu1 %vm151_vm1, %v1283_v25 }
  0x20   :  { %263 = vmatprep.mubr.bf16.mxu0 %v1290_v5  ;;  %376 = vmatprep.mubr.bf16.mxu1 %v1290_v5 }
  0x27   :  { %1117 = vmatmul.mubr.msk.bf16.gmra.mrb[12].mxu0 %vm151_vm1, %v1284_v26  ;;  %1126 = vmatmul.mubr.msk.bf16.gmra.mrb[12].mxu1 %vm151_vm1, %v1284_v26 }
  0x28   :  { %273 = vmatprep.mubr.bf16.mxu0 %v1290_v5  ;;  %386 = vmatprep.mubr.bf16.mxu1 %v1290_v5 }
  0x2f   :  { %1118 = vmatmul.mubr.msk.bf16.gmra.mrb[16].mxu0 %vm151_vm1, %v1285_v27  ;;  %1127 = vmatmul.mubr.msk.bf16.gmra.mrb[16].mxu1 %vm151_vm1, %v1285_v27 }
  0x30   :  { %283 = vmatprep.mubr.bf16.mxu0 %v1290_v5  ;;  %396 = vmatprep.mubr.bf16.mxu1 %v1290_v5 }
  0x37   :  { %1119 = vmatmul.mubr.msk.bf16.gmra.mrb[20].mxu0 %vm151_vm1, %v1286_v28  ;;  %1128 = vmatmul.mubr.msk.bf16.gmra.mrb[20].mxu1 %vm151_vm1, %v1286_v28 }
  0x38   :  { %293 = vmatprep.mubr.bf16.mxu0 %v1290_v5  ;;  %406 = vmatprep.mubr.bf16.mxu1 %v1290_v5 }
  0x3f   :  { %1120 = vmatmul.mubr.msk.bf16.gmra.mrb[24].mxu0 %vm151_vm1, %v1287_v29  ;;  %1129 = vmatmul.mubr.msk.bf16.gmra.mrb[24].mxu1 %vm151_vm1, %v1287_v29 }
  0x40   :  { %303 = vmatprep.mubr.bf16.mxu0 %v1290_v5  ;;  %416 = vmatprep.mubr.bf16.mxu1 %v1290_v5 }
  0x47   :  { %1121 = vmatmul.mubr.msk.bf16.gmra.mrb[28].mxu0 %vm151_vm1, %v1288_v30  ;;  %1130 = vmatmul.mubr.msk.bf16.gmra.mrb[28].mxu1 %vm151_vm1, %v1288_v30 }
  0x48   :  { %459 = vmatprep.mubr.bf16.mxu0 %v1290_v5  ;;  %572 = vmatprep.mubr.bf16.mxu1 %v1290_v5 }
  0x4f   :  { %1132 = vmatmul.mubr.msk.bf16.vlgmr.msra.gmra.mrb[32].mxu0 %vm151_vm1, %v1281_v21  ;;  %1141 = vmatmul.mubr.msk.bf16.vlgmr.msra.gmra.mrb[32].mxu1 %vm151_vm1, %v1281_v21 }
  0x50   :  { %469 = vmatprep.mubr.bf16.mxu0 %v1290_v5  ;;  %582 = vmatprep.mubr.bf16.mxu1 %v1290_v5 }
  0x57   :  { %1133 = vmatmul.mubr.msk.bf16.gmra.mrb[36].mxu0 %vm151_vm1, %v1282_v24  ;;  %1142 = vmatmul.mubr.msk.bf16.gmra.mrb[36].mxu1 %vm151_vm1, %v1282_v24 }
  0x58   :  { %479 = vmatprep.mubr.bf16.mxu0 %v1290_v5  ;;  %592 = vmatprep.mubr.bf16.mxu1 %v1290_v5 }
  0x5f   :  { %1134 = vmatmul.mubr.msk.bf16.gmra.mrb[40].mxu0 %vm151_vm1, %v1283_v25  ;;  %1143 = vmatmul.mubr.msk.bf16.gmra.mrb[40].mxu1 %vm151_vm1, %v1283_v25 }
  0x60   :  { %489 = vmatprep.mubr.bf16.mxu0 %v1290_v5  ;;  %602 = vmatprep.mubr.bf16.mxu1 %v1290_v5 }
  0x67   :  { %1135 = vmatmul.mubr.msk.bf16.gmra.mrb[44].mxu0 %vm151_vm1, %v1284_v26  ;;  %1144 = vmatmul.mubr.msk.bf16.gmra.mrb[44].mxu1 %vm151_vm1, %v1284_v26 }
  0x68   :  { %499 = vmatprep.mubr.bf16.mxu0 %v1290_v5  ;;  %612 = vmatprep.mubr.bf16.mxu1 %v1290_v5 }
  0x6f   :  { %1136 = vmatmul.mubr.msk.bf16.gmra.mrb[48].mxu0 %vm151_vm1, %v1285_v27  ;;  %1145 = vmatmul.mubr.msk.bf16.gmra.mrb[48].mxu1 %vm151_vm1, %v1285_v27 }
  0x70   :  { %509 = vmatprep.mubr.bf16.mxu0 %v1290_v5  ;;  %622 = vmatprep.mubr.bf16.mxu1 %v1290_v5 }
  0x77   :  { %1137 = vmatmul.mubr.msk.bf16.gmra.mrb[52].mxu0 %vm151_vm1, %v1286_v28  ;;  %1146 = vmatmul.mubr.msk.bf16.gmra.mrb[52].mxu1 %vm151_vm1, %v1286_v28 }
  0x78   :  { %519 = vmatprep.mubr.bf16.mxu0 %v1290_v5  ;;  %632 = vmatprep.mubr.bf16.mxu1 %v1290_v5 }
  0x7f   :  { %1138 = vmatmul.mubr.msk.bf16.gmra.mrb[56].mxu0 %vm151_vm1, %v1287_v29  ;;  %1147 = vmatmul.mubr.msk.bf16.gmra.mrb[56].mxu1 %vm151_vm1, %v1287_v29 }
  0x80   :  { %529 = vmatprep.mubr.bf16.mxu0 %v1290_v5  ;;  %642 = vmatprep.mubr.bf16.mxu1 %v1290_v5 }
  0x87   :  { %1139 = vmatmul.mubr.msk.bf16.gmra.mrb[60].mxu0 %vm151_vm1, %v1288_v30  ;;  %1148 = vmatmul.mubr.msk.bf16.gmra.mrb[60].mxu1 %vm151_vm1, %v1288_v30 }
  0xe2   :  { %v235_v40 = vpop.f32.mrb[0].mxu0  ;;  %v348_v41 = vpop.f32.mrb[0].mxu1 }
  0xe3   :  { %v236_v42 = vadd.f32 %v235_v40, %v1426_v36  ;;  %v349_v43 = vadd.f32 %v348_v41, %v1429_v37  ;;  %v237_v44 = vpop.f32.mrb[1].mxu0  ;;  %v350_v45 = vpop.f32.mrb[1].mxu1 }
  0xe4   :  { %v238_v46 = vadd.f32 %v237_v44, %v1432_v38  ;;  %v351_v47 = vadd.f32 %v350_v45, %v1435_v39  ;;  %v239_v48 = vpop.f32.mrb[2].mxu0  ;;  %v352_v49 = vpop.f32.mrb[2].mxu1 }
  0xe5   :  { %v240_v50 = vadd.f32 %v239_v48, %v1426_v36  ;;  %v353_v51 = vadd.f32 %v352_v49, %v1429_v37  ;;  %v241_v52 = vpop.f32.mrb[3].mxu0  ;;  %v354_v53 = vpop.f32.mrb[3].mxu1 }
  0xe6   :  { %v1213_v54 = vpack.c.bf16 %v238_v46, %v236_v42  ;;  %v1214_v55 = vpack.c.bf16 %v351_v47, %v349_v43  ;;  %v242_v56 = vadd.f32 %v241_v52, %v1432_v38  ;;  %v355_v57 = vadd.f32 %v354_v53, %v1435_v39 }
  0xe8   :  { %1037 = vst [vmem:[%s1776_s3] sm:$0xff] %v1213_v54  ;;  %1038 = vst [vmem:[%s1776_s3 + $0x8] sm:$0xff] %v1214_v55  ;;  %v1217_v58 = vpack.c.bf16 %v242_v56, %v240_v50  ;;  %v1218_v59 = vpack.c.bf16 %v355_v57, %v353_v51 }
  0xea   :  { %1041 = vst [vmem:[%s1776_s3 + $0x20] sm:$0xff] %v1217_v58  ;;  %1042 = vst [vmem:[%s1776_s3 + $0x28] sm:$0xff] %v1218_v59  ;;  %v245_v60 = vpop.f32.mrb[4].mxu0  ;;  %v358_v61 = vpop.f32.mrb[4].mxu1 }
  0xeb   :  { %v246_v62 = vadd.f32 %v245_v60, %v1426_v36  ;;  %v359_v63 = vadd.f32 %v358_v61, %v1429_v37  ;;  %v247_v0 = vpop.f32.mrb[5].mxu0  ;;  %v360_v1 = vpop.f32.mrb[5].mxu1 }
  0xec   :  { %v248_v2 = vadd.f32 %v247_v0, %v1432_v38  ;;  %v361_v3 = vadd.f32 %v360_v1, %v1435_v39  ;;  %v249_v4 = vpop.f32.mrb[6].mxu0  ;;  %v362_v5 = vpop.f32.mrb[6].mxu1 }
  0xed   :  { %v250_v7 = vadd.f32 %v249_v4, %v1426_v36  ;;  %v363_v8 = vadd.f32 %v362_v5, %v1429_v37  ;;  %v251_v9 = vpop.f32.mrb[7].mxu0  ;;  %v364_v10 = vpop.f32.mrb[7].mxu1 }
  0xee   :  { %v1221_v11 = vpack.c.bf16 %v248_v2, %v246_v62  ;;  %v1222_v12 = vpack.c.bf16 %v361_v3, %v359_v63  ;;  %v252_v13 = vadd.f32 %v251_v9, %v1432_v38  ;;  %v365_v14 = vadd.f32 %v364_v10, %v1435_v39 }
  0xf0   :  { %1045 = vst [vmem:[%s1776_s3 + $0x40] sm:$0xff] %v1221_v11  ;;  %1046 = vst [vmem:[%s1776_s3 + $0x48] sm:$0xff] %v1222_v12  ;;  %v1225_v15 = vpack.c.bf16 %v252_v13, %v250_v7  ;;  %v1226_v16 = vpack.c.bf16 %v365_v14, %v363_v8 }
  0xf2   :  { %1049 = vst [vmem:[%s1776_s3 + $0x60] sm:$0xff] %v1225_v15  ;;  %1050 = vst [vmem:[%s1776_s3 + $0x68] sm:$0xff] %v1226_v16  ;;  %v255_v17 = vpop.f32.mrb[8].mxu0  ;;  %v368_v18 = vpop.f32.mrb[8].mxu1 }
  0xf3   :  { %v256_v19 = vadd.f32 %v255_v17, %v1426_v36  ;;  %v369_v20 = vadd.f32 %v368_v18, %v1429_v37  ;;  %v257_v21 = vpop.f32.mrb[9].mxu0  ;;  %v370_v22 = vpop.f32.mrb[9].mxu1 }
  0xf4   :  { %v258_v23 = vadd.f32 %v257_v21, %v1432_v38  ;;  %v371_v24 = vadd.f32 %v370_v22, %v1435_v39  ;;  %v259_v25 = vpop.f32.mrb[10].mxu0  ;;  %v372_v26 = vpop.f32.mrb[10].mxu1 }
  0xf5   :  { %v260_v27 = vadd.f32 %v259_v25, %v1426_v36  ;;  %v373_v28 = vadd.f32 %v372_v26, %v1429_v37  ;;  %v261_v29 = vpop.f32.mrb[11].mxu0  ;;  %v374_v30 = vpop.f32.mrb[11].mxu1 }
  0xf6   :  { %v1229_v31 = vpack.c.bf16 %v258_v23, %v256_v19  ;;  %v1230_v32 = vpack.c.bf16 %v371_v24, %v369_v20  ;;  %v262_v34 = vadd.f32 %v261_v29, %v1432_v38  ;;  %v375_v35 = vadd.f32 %v374_v30, %v1435_v39 }
  0xf8   :  { %1053 = vst [vmem:[%s1776_s3 + $0x80] sm:$0xff] %v1229_v31  ;;  %1054 = vst [vmem:[%s1776_s3 + $0x88] sm:$0xff] %v1230_v32  ;;  %v1233_v40 = vpack.c.bf16 %v262_v34, %v260_v27  ;;  %v1234_v41 = vpack.c.bf16 %v375_v35, %v373_v28 }
  0xfa   :  { %1057 = vst [vmem:[%s1776_s3 + $0xa0] sm:$0xff] %v1233_v40  ;;  %1058 = vst [vmem:[%s1776_s3 + $0xa8] sm:$0xff] %v1234_v41  ;;  %v265_v42 = vpop.f32.mrb[12].mxu0  ;;  %v378_v43 = vpop.f32.mrb[12].mxu1 }
  0xfb   :  { %v266_v44 = vadd.f32 %v265_v42, %v1426_v36  ;;  %v379_v45 = vadd.f32 %v378_v43, %v1429_v37  ;;  %v267_v46 = vpop.f32.mrb[13].mxu0  ;;  %v380_v47 = vpop.f32.mrb[13].mxu1 }
  0xfc   :  { %v268_v48 = vadd.f32 %v267_v46, %v1432_v38  ;;  %v381_v49 = vadd.f32 %v380_v47, %v1435_v39  ;;  %v269_v50 = vpop.f32.mrb[14].mxu0  ;;  %v382_v51 = vpop.f32.mrb[14].mxu1 }
  0xfd   :  { %v270_v52 = vadd.f32 %v269_v50, %v1426_v36  ;;  %v383_v53 = vadd.f32 %v382_v51, %v1429_v37  ;;  %v271_v54 = vpop.f32.mrb[15].mxu0  ;;  %v384_v55 = vpop.f32.mrb[15].mxu1 }
  0xfe   :  { %v1237_v56 = vpack.c.bf16 %v268_v48, %v266_v44  ;;  %v1238_v57 = vpack.c.bf16 %v381_v49, %v379_v45  ;;  %v272_v58 = vadd.f32 %v271_v54, %v1432_v38  ;;  %v385_v59 = vadd.f32 %v384_v55, %v1435_v39 }
 0x100   :  { %1061 = vst [vmem:[%s1776_s3 + $0xc0] sm:$0xff] %v1237_v56  ;;  %1062 = vst [vmem:[%s1776_s3 + $0xc8] sm:$0xff] %v1238_v57  ;;  %v1241_v60 = vpack.c.bf16 %v272_v58, %v270_v52  ;;  %v1242_v61 = vpack.c.bf16 %v385_v59, %v383_v53 }
 0x102   :  { %1065 = vst [vmem:[%s1776_s3 + $0xe0] sm:$0xff] %v1241_v60  ;;  %1066 = vst [vmem:[%s1776_s3 + $0xe8] sm:$0xff] %v1242_v61  ;;  %v275_v62 = vpop.f32.mrb[16].mxu0  ;;  %v388_v63 = vpop.f32.mrb[16].mxu1 }
 0x103   :  { %v276_v0 = vadd.f32 %v275_v62, %v1426_v36  ;;  %v389_v1 = vadd.f32 %v388_v63, %v1429_v37  ;;  %v277_v2 = vpop.f32.mrb[17].mxu0  ;;  %v390_v3 = vpop.f32.mrb[17].mxu1 }
 0x104   :  { %v278_v4 = vadd.f32 %v277_v2, %v1432_v38  ;;  %v391_v5 = vadd.f32 %v390_v3, %v1435_v39  ;;  %v279_v7 = vpop.f32.mrb[18].mxu0  ;;  %v392_v8 = vpop.f32.mrb[18].mxu1 }
 0x105   :  { %v280_v9 = vadd.f32 %v279_v7, %v1426_v36  ;;  %v393_v10 = vadd.f32 %v392_v8, %v1429_v37  ;;  %v281_v11 = vpop.f32.mrb[19].mxu0  ;;  %v394_v12 = vpop.f32.mrb[19].mxu1  ;;  %v53_v7 = vsub.s32 4, %v1319_v6  ;;  %v61_v8 = vsub.s32 6, %v1319_v6 }
 0x106   :  { %v1245_v13 = vpack.c.bf16 %v278_v4, %v276_v0  ;;  %v1246_v14 = vpack.c.bf16 %v391_v5, %v389_v1  ;;  %v282_v15 = vadd.f32 %v281_v11, %v1432_v38  ;;  %v395_v16 = vadd.f32 %v394_v12, %v1435_v39 }
 0x108   :  { %1069 = vst [vmem:[%s1776_s3 + $0x100] sm:$0xff] %v1245_v13  ;;  %1070 = vst [vmem:[%s1776_s3 + $0x108] sm:$0xff] %v1246_v14  ;;  %v1249_v17 = vpack.c.bf16 %v282_v15, %v280_v9  ;;  %v1250_v18 = vpack.c.bf16 %v395_v16, %v393_v10  ;;  %v57_v13 = vsub.s32 5, %v1319_v6  ;;  %v65_v14 = vsub.s32 7, %v1319_v6 }
 0x10a   :  { %1073 = vst [vmem:[%s1776_s3 + $0x120] sm:$0xff] %v1249_v17  ;;  %1074 = vst [vmem:[%s1776_s3 + $0x128] sm:$0xff] %v1250_v18  ;;  %v285_v19 = vpop.f32.mrb[20].mxu0  ;;  %v398_v20 = vpop.f32.mrb[20].mxu1 }
 0x10b   :  { %v286_v21 = vadd.f32 %v285_v19, %v1426_v36  ;;  %v399_v22 = vadd.f32 %v398_v20, %v1429_v37  ;;  %v287_v23 = vpop.f32.mrb[21].mxu0  ;;  %v400_v24 = vpop.f32.mrb[21].mxu1 }
 0x10c   :  { %v288_v25 = vadd.f32 %v287_v23, %v1432_v38  ;;  %v401_v26 = vadd.f32 %v400_v24, %v1435_v39  ;;  %v289_v27 = vpop.f32.mrb[22].mxu0  ;;  %v402_v28 = vpop.f32.mrb[22].mxu1  ;;  %v1590_v23 = vrot.slane %v1421_v33, %v53_v7  ;;  %v1593_v24 = vrot.slane %v1421_v33, %v61_v8 }
 0x10d   :  { %v290_v29 = vadd.f32 %v289_v27, %v1426_v36  ;;  %v403_v30 = vadd.f32 %v402_v28, %v1429_v37  ;;  %v291_v31 = vpop.f32.mrb[23].mxu0  ;;  %v404_v32 = vpop.f32.mrb[23].mxu1 }
 0x10e   :  { %v1253_v34 = vpack.c.bf16 %v288_v25, %v286_v21  ;;  %v1254_v35 = vpack.c.bf16 %v401_v26, %v399_v22  ;;  %v292_v40 = vadd.f32 %v291_v31, %v1432_v38  ;;  %v405_v41 = vadd.f32 %v404_v32, %v1435_v39 }
 0x110   :  { %1077 = vst [vmem:[%s1776_s3 + $0x140] sm:$0xff] %v1253_v34  ;;  %1078 = vst [vmem:[%s1776_s3 + $0x148] sm:$0xff] %v1254_v35  ;;  %v1257_v42 = vpack.c.bf16 %v292_v40, %v290_v29  ;;  %v1258_v43 = vpack.c.bf16 %v405_v41, %v403_v30 }
 0x112   :  { %1081 = vst [vmem:[%s1776_s3 + $0x160] sm:$0xff] %v1257_v42  ;;  %1082 = vst [vmem:[%s1776_s3 + $0x168] sm:$0xff] %v1258_v43  ;;  %v295_v44 = vpop.f32.mrb[24].mxu0  ;;  %v408_v45 = vpop.f32.mrb[24].mxu1 }
 0x113   :  { %v296_v46 = vadd.f32 %v295_v44, %v1426_v36  ;;  %v409_v47 = vadd.f32 %v408_v45, %v1429_v37  ;;  %v297_v48 = vpop.f32.mrb[25].mxu0  ;;  %v410_v49 = vpop.f32.mrb[25].mxu1 }
 0x114   :  { %v298_v50 = vadd.f32 %v297_v48, %v1432_v38  ;;  %v411_v51 = vadd.f32 %v410_v49, %v1435_v39  ;;  %v299_v52 = vpop.f32.mrb[26].mxu0  ;;  %v412_v53 = vpop.f32.mrb[26].mxu1 }
 0x115   :  { %v300_v54 = vadd.f32 %v299_v52, %v1426_v36  ;;  %v413_v55 = vadd.f32 %v412_v53, %v1429_v37  ;;  %v301_v56 = vpop.f32.mrb[27].mxu0  ;;  %v414_v57 = vpop.f32.mrb[27].mxu1 }
 0x116   :  { %v1261_v58 = vpack.c.bf16 %v298_v50, %v296_v46  ;;  %v1262_v59 = vpack.c.bf16 %v411_v51, %v409_v47  ;;  %v302_v60 = vadd.f32 %v301_v56, %v1432_v38  ;;  %v415_v61 = vadd.f32 %v414_v57, %v1435_v39 }
 0x118   :  { %1085 = vst [vmem:[%s1776_s3 + $0x180] sm:$0xff] %v1261_v58  ;;  %1086 = vst [vmem:[%s1776_s3 + $0x188] sm:$0xff] %v1262_v59  ;;  %v1265_v62 = vpack.c.bf16 %v302_v60, %v300_v54  ;;  %v1266_v63 = vpack.c.bf16 %v415_v61, %v413_v55 }
 0x11a   :  { %1089 = vst [vmem:[%s1776_s3 + $0x1a0] sm:$0xff] %v1265_v62  ;;  %1090 = vst [vmem:[%s1776_s3 + $0x1a8] sm:$0xff] %v1266_v63  ;;  %v305_v0 = vpop.f32.mrb[28].mxu0  ;;  %v418_v1 = vpop.f32.mrb[28].mxu1 }
 0x11b   :  { %v306_v2 = vadd.f32 %v305_v0, %v1426_v36  ;;  %v419_v3 = vadd.f32 %v418_v1, %v1429_v37  ;;  %v307_v4 = vpop.f32.mrb[29].mxu0  ;;  %v420_v5 = vpop.f32.mrb[29].mxu1 }
 0x11c   :  { %v308_v9 = vadd.f32 %v307_v4, %v1432_v38  ;;  %v421_v10 = vadd.f32 %v420_v5, %v1435_v39  ;;  %v309_v11 = vpop.f32.mrb[30].mxu0  ;;  %v422_v12 = vpop.f32.mrb[30].mxu1 }
 0x11d   :  { %v310_v15 = vadd.f32 %v309_v11, %v1426_v36  ;;  %v423_v16 = vadd.f32 %v422_v12, %v1429_v37  ;;  %v311_v17 = vpop.f32.mrb[31].mxu0  ;;  %v424_v18 = vpop.f32.mrb[31].mxu1  ;;  %v1602_v37 = vrot.slane %v1421_v33, %v57_v13 }
 0x11e   :  { %v1269_v19 = vpack.c.bf16 %v308_v9, %v306_v2  ;;  %v1270_v20 = vpack.c.bf16 %v421_v10, %v419_v3  ;;  %v312_v21 = vadd.f32 %v311_v17, %v1432_v38  ;;  %v425_v22 = vadd.f32 %v424_v18, %v1435_v39 }
 0x11f   :  { %v1605_v38 = vrot.slane %v1421_v33, %v65_v14 }
 0x120   :  { %1093 = vst [vmem:[%s1776_s3 + $0x1c0] sm:$0xff] %v1269_v19  ;;  %1094 = vst [vmem:[%s1776_s3 + $0x1c8] sm:$0xff] %v1270_v20  ;;  %v1273_v6 = vpack.c.bf16 %v312_v21, %v310_v15  ;;  %v1274_v36 = vpack.c.bf16 %v425_v22, %v423_v16 }
 0x122   :  { %1097 = vst [vmem:[%s1776_s3 + $0x1e0] sm:$0xff] %v1273_v6  ;;  %1098 = vst [vmem:[%s1776_s3 + $0x1e8] sm:$0xff] %v1274_v36  ;;  %v461_v39 = vpop.f32.mrb[32].mxu0  ;;  %v574_v25 = vpop.f32.mrb[32].mxu1 }
 0x123   :  { %v462_v26 = vadd.f32 %v461_v39, %v1590_v23  ;;  %v575_v27 = vadd.f32 %v574_v25, %v1593_v24  ;;  %v463_v28 = vpop.f32.mrb[33].mxu0  ;;  %v576_v29 = vpop.f32.mrb[33].mxu1 }
 0x124   :  { %v464_v30 = vadd.f32 %v463_v28, %v1602_v37  ;;  %v577_v33 = vadd.f32 %v576_v29, %v1605_v38  ;;  %v465_v31 = vpop.f32.mrb[34].mxu0  ;;  %v578_v32 = vpop.f32.mrb[34].mxu1 }
 0x125   :  { %v466_v34 = vadd.f32 %v465_v31, %v1590_v23  ;;  %v579_v35 = vadd.f32 %v578_v32, %v1593_v24  ;;  %v467_v40 = vpop.f32.mrb[35].mxu0  ;;  %v580_v41 = vpop.f32.mrb[35].mxu1 }
 0x126   :  { %v1215_v42 = vpack.c.bf16 %v464_v30, %v462_v26  ;;  %v1216_v43 = vpack.c.bf16 %v577_v33, %v575_v27  ;;  %v468_v44 = vadd.f32 %v467_v40, %v1602_v37  ;;  %v581_v45 = vadd.f32 %v580_v41, %v1605_v38 }
 0x128   :  { %1039 = vst [vmem:[%s1776_s3 + $0x10] sm:$0xff] %v1215_v42  ;;  %1040 = vst [vmem:[%s1776_s3 + $0x18] sm:$0xff] %v1216_v43  ;;  %v1219_v46 = vpack.c.bf16 %v468_v44, %v466_v34  ;;  %v1220_v47 = vpack.c.bf16 %v581_v45, %v579_v35 }
 0x12a   :  { %1043 = vst [vmem:[%s1776_s3 + $0x30] sm:$0xff] %v1219_v46  ;;  %1044 = vst [vmem:[%s1776_s3 + $0x38] sm:$0xff] %v1220_v47  ;;  %v471_v48 = vpop.f32.mrb[36].mxu0  ;;  %v584_v49 = vpop.f32.mrb[36].mxu1 }
 0x12b   :  { %v472_v50 = vadd.f32 %v471_v48, %v1590_v23  ;;  %v585_v51 = vadd.f32 %v584_v49, %v1593_v24  ;;  %v473_v52 = vpop.f32.mrb[37].mxu0  ;;  %v586_v53 = vpop.f32.mrb[37].mxu1 }
 0x12c   :  { %v474_v54 = vadd.f32 %v473_v52, %v1602_v37  ;;  %v587_v55 = vadd.f32 %v586_v53, %v1605_v38  ;;  %v475_v56 = vpop.f32.mrb[38].mxu0  ;;  %v588_v57 = vpop.f32.mrb[38].mxu1 }
 0x12d   :  { %v476_v58 = vadd.f32 %v475_v56, %v1590_v23  ;;  %v589_v59 = vadd.f32 %v588_v57, %v1593_v24  ;;  %v477_v60 = vpop.f32.mrb[39].mxu0  ;;  %v590_v61 = vpop.f32.mrb[39].mxu1 }
 0x12e   :  { %v1223_v62 = vpack.c.bf16 %v474_v54, %v472_v50  ;;  %v1224_v63 = vpack.c.bf16 %v587_v55, %v585_v51  ;;  %v478_v0 = vadd.f32 %v477_v60, %v1602_v37  ;;  %v591_v1 = vadd.f32 %v590_v61, %v1605_v38 }
 0x130   :  { %1047 = vst [vmem:[%s1776_s3 + $0x50] sm:$0xff] %v1223_v62  ;;  %1048 = vst [vmem:[%s1776_s3 + $0x58] sm:$0xff] %v1224_v63  ;;  %v1227_v2 = vpack.c.bf16 %v478_v0, %v476_v58  ;;  %v1228_v3 = vpack.c.bf16 %v591_v1, %v589_v59 }
 0x132   :  { %1051 = vst [vmem:[%s1776_s3 + $0x70] sm:$0xff] %v1227_v2  ;;  %1052 = vst [vmem:[%s1776_s3 + $0x78] sm:$0xff] %v1228_v3  ;;  %v481_v4 = vpop.f32.mrb[40].mxu0  ;;  %v594_v5 = vpop.f32.mrb[40].mxu1 }
 0x133   :  { %v482_v7 = vadd.f32 %v481_v4, %v1590_v23  ;;  %v595_v8 = vadd.f32 %v594_v5, %v1593_v24  ;;  %v483_v9 = vpop.f32.mrb[41].mxu0  ;;  %v596_v10 = vpop.f32.mrb[41].mxu1 }
 0x134   :  { %v484_v11 = vadd.f32 %v483_v9, %v1602_v37  ;;  %v597_v12 = vadd.f32 %v596_v10, %v1605_v38  ;;  %v485_v13 = vpop.f32.mrb[42].mxu0  ;;  %v598_v14 = vpop.f32.mrb[42].mxu1 }
 0x135   :  { %v486_v15 = vadd.f32 %v485_v13, %v1590_v23  ;;  %v599_v16 = vadd.f32 %v598_v14, %v1593_v24  ;;  %v487_v17 = vpop.f32.mrb[43].mxu0  ;;  %v600_v18 = vpop.f32.mrb[43].mxu1 }
 0x136   :  { %v1231_v19 = vpack.c.bf16 %v484_v11, %v482_v7  ;;  %v1232_v20 = vpack.c.bf16 %v597_v12, %v595_v8  ;;  %v488_v21 = vadd.f32 %v487_v17, %v1602_v37  ;;  %v601_v22 = vadd.f32 %v600_v18, %v1605_v38 }
 0x138   :  { %1055 = vst [vmem:[%s1776_s3 + $0x90] sm:$0xff] %v1231_v19  ;;  %1056 = vst [vmem:[%s1776_s3 + $0x98] sm:$0xff] %v1232_v20  ;;  %v1235_v6 = vpack.c.bf16 %v488_v21, %v486_v15  ;;  %v1236_v36 = vpack.c.bf16 %v601_v22, %v599_v16 }
 0x13a   :  { %1059 = vst [vmem:[%s1776_s3 + $0xb0] sm:$0xff] %v1235_v6  ;;  %1060 = vst [vmem:[%s1776_s3 + $0xb8] sm:$0xff] %v1236_v36  ;;  %v491_v39 = vpop.f32.mrb[44].mxu0  ;;  %v604_v25 = vpop.f32.mrb[44].mxu1 }
 0x13b   :  { %v492_v26 = vadd.f32 %v491_v39, %v1590_v23  ;;  %v605_v27 = vadd.f32 %v604_v25, %v1593_v24  ;;  %v493_v28 = vpop.f32.mrb[45].mxu0  ;;  %v606_v29 = vpop.f32.mrb[45].mxu1 }
 0x13c   :  { %v494_v30 = vadd.f32 %v493_v28, %v1602_v37  ;;  %v607_v33 = vadd.f32 %v606_v29, %v1605_v38  ;;  %v495_v31 = vpop.f32.mrb[46].mxu0  ;;  %v608_v32 = vpop.f32.mrb[46].mxu1 }
 0x13d   :  { %v496_v34 = vadd.f32 %v495_v31, %v1590_v23  ;;  %v609_v35 = vadd.f32 %v608_v32, %v1593_v24  ;;  %v497_v40 = vpop.f32.mrb[47].mxu0  ;;  %v610_v41 = vpop.f32.mrb[47].mxu1 }
 0x13e   :  { %v1239_v42 = vpack.c.bf16 %v494_v30, %v492_v26  ;;  %v1240_v43 = vpack.c.bf16 %v607_v33, %v605_v27  ;;  %v498_v44 = vadd.f32 %v497_v40, %v1602_v37  ;;  %v611_v45 = vadd.f32 %v610_v41, %v1605_v38 }
 0x140   :  { %1063 = vst [vmem:[%s1776_s3 + $0xd0] sm:$0xff] %v1239_v42  ;;  %1064 = vst [vmem:[%s1776_s3 + $0xd8] sm:$0xff] %v1240_v43  ;;  %v1243_v46 = vpack.c.bf16 %v498_v44, %v496_v34  ;;  %v1244_v47 = vpack.c.bf16 %v611_v45, %v609_v35 }
 0x142   :  { %1067 = vst [vmem:[%s1776_s3 + $0xf0] sm:$0xff] %v1243_v46  ;;  %1068 = vst [vmem:[%s1776_s3 + $0xf8] sm:$0xff] %v1244_v47  ;;  %v501_v48 = vpop.f32.mrb[48].mxu0  ;;  %v614_v49 = vpop.f32.mrb[48].mxu1 }
 0x143   :  { %v502_v50 = vadd.f32 %v501_v48, %v1590_v23  ;;  %v615_v51 = vadd.f32 %v614_v49, %v1593_v24  ;;  %v503_v52 = vpop.f32.mrb[49].mxu0  ;;  %v616_v53 = vpop.f32.mrb[49].mxu1 }
 0x144   :  { %v504_v54 = vadd.f32 %v503_v52, %v1602_v37  ;;  %v617_v55 = vadd.f32 %v616_v53, %v1605_v38  ;;  %v505_v56 = vpop.f32.mrb[50].mxu0  ;;  %v618_v57 = vpop.f32.mrb[50].mxu1 }
 0x145   :  { %v506_v58 = vadd.f32 %v505_v56, %v1590_v23  ;;  %v619_v59 = vadd.f32 %v618_v57, %v1593_v24  ;;  %v507_v60 = vpop.f32.mrb[51].mxu0  ;;  %v620_v61 = vpop.f32.mrb[51].mxu1 }
 0x146   :  { %v1247_v62 = vpack.c.bf16 %v504_v54, %v502_v50  ;;  %v1248_v63 = vpack.c.bf16 %v617_v55, %v615_v51  ;;  %v508_v0 = vadd.f32 %v507_v60, %v1602_v37  ;;  %v621_v1 = vadd.f32 %v620_v61, %v1605_v38 }
 0x148   :  { %1071 = vst [vmem:[%s1776_s3 + $0x110] sm:$0xff] %v1247_v62  ;;  %1072 = vst [vmem:[%s1776_s3 + $0x118] sm:$0xff] %v1248_v63  ;;  %v1251_v2 = vpack.c.bf16 %v508_v0, %v506_v58  ;;  %v1252_v3 = vpack.c.bf16 %v621_v1, %v619_v59 }
 0x14a   :  { %1075 = vst [vmem:[%s1776_s3 + $0x130] sm:$0xff] %v1251_v2  ;;  %1076 = vst [vmem:[%s1776_s3 + $0x138] sm:$0xff] %v1252_v3  ;;  %v511_v4 = vpop.f32.mrb[52].mxu0  ;;  %v624_v5 = vpop.f32.mrb[52].mxu1 }
 0x14b   :  { %v512_v7 = vadd.f32 %v511_v4, %v1590_v23  ;;  %v625_v8 = vadd.f32 %v624_v5, %v1593_v24  ;;  %v513_v9 = vpop.f32.mrb[53].mxu0  ;;  %v626_v10 = vpop.f32.mrb[53].mxu1 }
 0x14c   :  { %v514_v11 = vadd.f32 %v513_v9, %v1602_v37  ;;  %v627_v12 = vadd.f32 %v626_v10, %v1605_v38  ;;  %v515_v13 = vpop.f32.mrb[54].mxu0  ;;  %v628_v14 = vpop.f32.mrb[54].mxu1 }
 0x14d   :  { %v516_v15 = vadd.f32 %v515_v13, %v1590_v23  ;;  %v629_v16 = vadd.f32 %v628_v14, %v1593_v24  ;;  %v517_v17 = vpop.f32.mrb[55].mxu0  ;;  %v630_v18 = vpop.f32.mrb[55].mxu1 }
 0x14e   :  { %v1255_v19 = vpack.c.bf16 %v514_v11, %v512_v7  ;;  %v1256_v20 = vpack.c.bf16 %v627_v12, %v625_v8  ;;  %v518_v21 = vadd.f32 %v517_v17, %v1602_v37  ;;  %v631_v22 = vadd.f32 %v630_v18, %v1605_v38 }
 0x150   :  { %1079 = vst [vmem:[%s1776_s3 + $0x150] sm:$0xff] %v1255_v19  ;;  %1080 = vst [vmem:[%s1776_s3 + $0x158] sm:$0xff] %v1256_v20  ;;  %v1259_v6 = vpack.c.bf16 %v518_v21, %v516_v15  ;;  %v1260_v36 = vpack.c.bf16 %v631_v22, %v629_v16 }
 0x152   :  { %1083 = vst [vmem:[%s1776_s3 + $0x170] sm:$0xff] %v1259_v6  ;;  %1084 = vst [vmem:[%s1776_s3 + $0x178] sm:$0xff] %v1260_v36  ;;  %v521_v39 = vpop.f32.mrb[56].mxu0  ;;  %v634_v25 = vpop.f32.mrb[56].mxu1 }
 0x153   :  { %v522_v26 = vadd.f32 %v521_v39, %v1590_v23  ;;  %v635_v27 = vadd.f32 %v634_v25, %v1593_v24  ;;  %v523_v28 = vpop.f32.mrb[57].mxu0  ;;  %v636_v29 = vpop.f32.mrb[57].mxu1 }
 0x154   :  { %v524_v30 = vadd.f32 %v523_v28, %v1602_v37  ;;  %v637_v33 = vadd.f32 %v636_v29, %v1605_v38  ;;  %v525_v31 = vpop.f32.mrb[58].mxu0  ;;  %v638_v32 = vpop.f32.mrb[58].mxu1 }
 0x155   :  { %v526_v34 = vadd.f32 %v525_v31, %v1590_v23  ;;  %v639_v35 = vadd.f32 %v638_v32, %v1593_v24  ;;  %v527_v40 = vpop.f32.mrb[59].mxu0  ;;  %v640_v41 = vpop.f32.mrb[59].mxu1 }
 0x156   :  { %v1263_v42 = vpack.c.bf16 %v524_v30, %v522_v26  ;;  %v1264_v43 = vpack.c.bf16 %v637_v33, %v635_v27  ;;  %v528_v44 = vadd.f32 %v527_v40, %v1602_v37  ;;  %v641_v45 = vadd.f32 %v640_v41, %v1605_v38 }
 0x158   :  { %1087 = vst [vmem:[%s1776_s3 + $0x190] sm:$0xff] %v1263_v42  ;;  %1088 = vst [vmem:[%s1776_s3 + $0x198] sm:$0xff] %v1264_v43  ;;  %v1267_v46 = vpack.c.bf16 %v528_v44, %v526_v34  ;;  %v1268_v47 = vpack.c.bf16 %v641_v45, %v639_v35 }
 0x15a   :  { %1091 = vst [vmem:[%s1776_s3 + $0x1b0] sm:$0xff] %v1267_v46  ;;  %1092 = vst [vmem:[%s1776_s3 + $0x1b8] sm:$0xff] %v1268_v47  ;;  %v531_v48 = vpop.f32.mrb[60].mxu0  ;;  %v644_v49 = vpop.f32.mrb[60].mxu1 }
 0x15b   :  { %v532_v50 = vadd.f32 %v531_v48, %v1590_v23  ;;  %v645_v51 = vadd.f32 %v644_v49, %v1593_v24  ;;  %v533_v52 = vpop.f32.mrb[61].mxu0  ;;  %v646_v53 = vpop.f32.mrb[61].mxu1 }
 0x15c   :  { %v534_v54 = vadd.f32 %v533_v52, %v1602_v37  ;;  %v647_v55 = vadd.f32 %v646_v53, %v1605_v38  ;;  %v535_v56 = vpop.f32.mrb[62].mxu0  ;;  %v648_v57 = vpop.f32.mrb[62].mxu1 }
 0x15d   :  { %v536_v58 = vadd.f32 %v535_v56, %v1590_v23  ;;  %v649_v59 = vadd.f32 %v648_v57, %v1593_v24  ;;  %v537_v60 = vpop.f32.mrb[63].mxu0  ;;  %v650_v61 = vpop.f32.mrb[63].mxu1 }
 0x15e   :  { %v1271_v62 = vpack.c.bf16 %v534_v54, %v532_v50  ;;  %v1272_v63 = vpack.c.bf16 %v647_v55, %v645_v51  ;;  %v538_v0 = vadd.f32 %v537_v60, %v1602_v37  ;;  %v651_v1 = vadd.f32 %v650_v61, %v1605_v38 }
 0x160   :  { %1095 = vst [vmem:[%s1776_s3 + $0x1d0] sm:$0xff] %v1271_v62  ;;  %1096 = vst [vmem:[%s1776_s3 + $0x1d8] sm:$0xff] %v1272_v63  ;;  %v1275_v2 = vpack.c.bf16 %v538_v0, %v536_v58  ;;  %v1276_v23 = vpack.c.bf16 %v651_v1, %v649_v59 }
 0x162   :  { %1099 = vst [vmem:[%s1776_s3 + $0x1f0] sm:$0xff] %v1275_v2  ;;  %1100 = vst [vmem:[%s1776_s3 + $0x1f8] sm:$0xff] %v1276_v23 }

// kernel: bilstm_forward.8
= control target key start
LH: loop header
LB: loop body
LE: loop exit
PB: predicated region body
PF: predicated region fallthrough
CT: control target
= control target key end

     0   :  { %v1913_v0 = vmov 0   ;;  %v1914_v33 = vmov 0.0|0.0   ;;  %s2703_s0 = inlined_call_operand.vmem [shape: bf16[8,16,1024], index: 0, kind: input, shape index: {}, may-alias: {0,1}]   ;;  %s2704_s1 = inlined_call_operand.vmem [shape: bf16[8,16,1024], index: 1, kind: input, shape index: {}, may-alias: {0,1}]   ;;  %s2705_s2 = inlined_call_operand.vmem [shape: bf16[2,128,512], index: 2, kind: input, shape index: {}]   ;;  %s2706_s3 = inlined_call_operand.vmem [shape: f32[16,256], index: 3, kind: output, shape index: {}]  }
   0x1   :  { %427 = vmatprep.mubr.bf16.mxu0 %v1913_v0  ;;  %470 = vmatprep.mubr.bf16.mxu1 %v1913_v0  ;;  %v1940_v1 = vld [vmem:[%s2705_s2 + $0x4] ss:$16 sps:$4 sm:$0xff]   ;;  %v1945_v2 = vld [vmem:[%s2705_s2] ss:$16 sps:$4 sm:$0xff]   ;;  %v1950_v3 = vld [vmem:[%s2705_s2 + $0xc] ss:$16 sps:$4 sm:$0xff]  }
   0x2   :  { %395 = vmatprep.subr.bf16.mxu0 %v1940_v1  ;;  %v1956_v4 = vld [vmem:[%s2705_s2 + $0x24] ss:$16 sps:$4 sm:$0xff]   ;;  %v1961_v5 = vld [vmem:[%s2705_s2 + $0x8] ss:$16 sps:$4 sm:$0xff]   ;;  %438 = vmatprep.subr.bf16.mxu1 %v1950_v3  ;;  %v1968_v6 = vld [vmem:[%s2705_s2 + $0x20] ss:$16 sps:$4 sm:$0xff]  }
   0x3   :  { %396 = vmatpush1.bf16.msra.mxu0 %v1945_v2  ;;  %439 = vmatpush1.bf16.msra.mxu1 %v1961_v5  ;;  %v1975_v7 = vld [vmem:[%s2705_s2 + $0x2c] ss:$16 sps:$4 sm:$0xff]   ;;  %v1980_v8 = vld [vmem:[%s2705_s2 + $0x44] ss:$16 sps:$4 sm:$0xff]   ;;  %v1985_v9 = vld [vmem:[%s2705_s2 + $0x28] ss:$16 sps:$4 sm:$0xff]  }
   0x4   :  { %397 = vmatprep.subr.bf16.mxu0 %v1956_v4  ;;  %440 = vmatprep.subr.bf16.mxu1 %v1975_v7  ;;  %v1991_v10 = vld [vmem:[%s2705_s2 + $0x4c] ss:$16 sps:$4 sm:$0xff]   ;;  %v1997_v11 = vld [vmem:[%s2705_s2 + $0x40] ss:$16 sps:$4 sm:$0xff]   ;;  %v2004_v12 = vld [vmem:[%s2705_s2 + $0x64] ss:$16 sps:$4 sm:$0xff]  }
   0x5   :  { %v2009_v13 = vld [vmem:[%s2705_s2 + $0x48] ss:$16 sps:$4 sm:$0xff]   ;;  %v2015_v14 = vld [vmem:[%s2705_s2 + $0x6c] ss:$16 sps:$4 sm:$0xff]   ;;  %v2020_v15 = vld [vmem:[%s2705_s2 + $0x60] ss:$16 sps:$4 sm:$0xff]  }
   0x6   :  { %v2026_v16 = vld [vmem:[%s2705_s2 + $0x84] ss:$16 sps:$4 sm:$0xff]   ;;  %v2033_v17 = vld [vmem:[%s2705_s2 + $0x68] ss:$16 sps:$4 sm:$0xff]   ;;  %v2039_v18 = vld [vmem:[%s2705_s2 + $0x8c] ss:$16 sps:$4 sm:$0xff]  }
   0x7   :  { %398 = vmatpush1.bf16.msra.mxu0 %v1968_v6  ;;  %441 = vmatpush1.bf16.msra.mxu1 %v1985_v9  ;;  %v2045_v19 = vld [vmem:[%s2705_s2 + $0x80] ss:$16 sps:$4 sm:$0xff]   ;;  %v2052_v20 = vld [vmem:[%s2705_s2 + $0xa4] ss:$16 sps:$4 sm:$0xff]   ;;  %v2057_v21 = vld [vmem:[%s2705_s2 + $0x88] ss:$16 sps:$4 sm:$0xff]  }
   0x8   :  { %399 = vmatprep.subr.bf16.mxu0 %v1980_v8  ;;  %442 = vmatprep.subr.bf16.mxu1 %v1991_v10  ;;  %v2063_v22 = vld [vmem:[%s2705_s2 + $0xac] ss:$16 sps:$4 sm:$0xff]   ;;  %v2069_v23 = vld [vmem:[%s2705_s2 + $0xa0] ss:$16 sps:$4 sm:$0xff]   ;;  %v2076_v24 = vld [vmem:[%s2705_s2 + $0xc4] ss:$16 sps:$4 sm:$0xff]  }
   0x9   :  { %v2081_v25 = vld [vmem:[%s2705_s2 + $0xa8] ss:$16 sps:$4 sm:$0xff]   ;;  %v2087_v26 = vld [vmem:[%s2705_s2 + $0xcc] ss:$16 sps:$4 sm:$0xff]   ;;  %v2093_v27 = vld [vmem:[%s2705_s2 + $0xc0] ss:$16 sps:$4 sm:$0xff]  }
   0xa   :  { %v2100_v28 = vld [vmem:[%s2705_s2 + $0xe4] ss:$16 sps:$4 sm:$0xff]   ;;  %v2105_v29 = vld [vmem:[%s2705_s2 + $0xc8] ss:$16 sps:$4 sm:$0xff]   ;;  %v2111_v30 = vld [vmem:[%s2705_s2 + $0xec] ss:$16 sps:$4 sm:$0xff]  }
   0xb   :  { %400 = vmatpush1.bf16.msra.mxu0 %v1997_v11  ;;  %443 = vmatpush1.bf16.msra.mxu1 %v2009_v13  ;;  %v2117_v31 = vld [vmem:[%s2705_s2 + $0xe0] ss:$16 sps:$4 sm:$0xff]   ;;  %v2124_v32 = vld [vmem:[%s2705_s2 + $0xe8] ss:$16 sps:$4 sm:$0xff]  }
   0xc   :  { %401 = vmatprep.subr.bf16.mxu0 %v2004_v12  ;;  %444 = vmatprep.subr.bf16.mxu1 %v2015_v14  ;;  %v22_v34 = vld [vmem:[%s2703_s0] sm:$0xff]  ;;  %v24_v39 = vld [vmem:[%s2703_s0 + $0x8] sm:$0xff] }
   0xd   :  { %v26_v35 = vld [vmem:[%s2703_s0 + $0x20] sm:$0xff]  ;;  %v226_v36 = vunpack.c.l.bf16 %v22_v34  ;;  %v227_v37 = vunpack.c.h.bf16 %v22_v34  ;;  %v28_v45 = vld [vmem:[%s2703_s0 + $0x28] sm:$0xff]  ;;  %v229_v48 = vunpack.c.h.bf16 %v24_v39  ;;  %v228_v60 = vunpack.c.l.bf16 %v24_v39 }
   0xe   :  { %v230_v38 = vunpack.c.l.bf16 %v26_v35  ;;  %v231_v41 = vunpack.c.h.bf16 %v26_v35  ;;  %v233_v56 = vunpack.c.h.bf16 %v28_v45  ;;  %v232_v62 = vunpack.c.l.bf16 %v28_v45 }
   0xf   :  { %402 = vmatpush1.bf16.msra.mxu0 %v2020_v15  ;;  %445 = vmatpush1.bf16.msra.mxu1 %v2033_v17 }
  0x10   :  { %403 = vmatprep.subr.bf16.mxu0 %v2026_v16  ;;  %446 = vmatprep.subr.bf16.mxu1 %v2039_v18 }
  0x13   :  { %404 = vmatpush1.bf16.msra.mxu0 %v2045_v19  ;;  %447 = vmatpush1.bf16.msra.mxu1 %v2057_v21 }
  0x14   :  { %405 = vmatprep.subr.bf16.mxu0 %v2052_v20  ;;  %448 = vmatprep.subr.bf16.mxu1 %v2063_v22 }
  0x17   :  { %406 = vmatpush1.bf16.msra.mxu0 %v2069_v23  ;;  %449 = vmatpush1.bf16.msra.mxu1 %v2081_v25 }
  0x18   :  { %407 = vmatprep.subr.bf16.mxu0 %v2076_v24  ;;  %450 = vmatprep.subr.bf16.mxu1 %v2087_v26 }
  0x1b   :  { %408 = vmatpush1.bf16.msra.mxu0 %v2093_v27  ;;  %451 = vmatpush1.bf16.msra.mxu1 %v2105_v29 }
  0x1c   :  { %409 = vmatprep.subr.bf16.mxu0 %v2100_v28  ;;  %452 = vmatprep.subr.bf16.mxu1 %v2111_v30 }
  0x1f   :  { %410 = vmatpush1.bf16.msra.mxu0 %v2117_v31  ;;  %453 = vmatpush1.bf16.msra.mxu1 %v2124_v32 }
  0x20   :  { %539 = vmatprep.subr.bf16.mxu0 %v1940_v1  ;;  %582 = vmatprep.subr.bf16.mxu1 %v1950_v3 }
  0x22   :  { %428 = vmatmul.mubr.bf16.vlgmr.msra.gmra.mrb[0].mxu0 %v1914_v33  ;;  %471 = vmatmul.mubr.bf16.vlgmr.msra.gmra.mrb[0].mxu1 %v1914_v33 }
  0x23   :  { %540 = vmatpush1.bf16.msra.mxu0 %v1945_v2  ;;  %583 = vmatpush1.bf16.msra.mxu1 %v1961_v5 }
  0x24   :  { %541 = vmatprep.subr.bf16.mxu0 %v1956_v4  ;;  %584 = vmatprep.subr.bf16.mxu1 %v1975_v7 }
  0x25   :  { %571 = vmatprep.mubr.bf16.mxu0 %v1913_v0  ;;  %614 = vmatprep.mubr.bf16.mxu1 %v1913_v0 }
  0x27   :  { %542 = vmatpush1.bf16.msra.mxu0 %v1968_v6  ;;  %585 = vmatpush1.bf16.msra.mxu1 %v1985_v9 }
  0x28   :  { %543 = vmatprep.subr.bf16.mxu0 %v1980_v8  ;;  %586 = vmatprep.subr.bf16.mxu1 %v1991_v10 }
  0x2b   :  { %544 = vmatpush1.bf16.msra.mxu0 %v1997_v11  ;;  %587 = vmatpush1.bf16.msra.mxu1 %v2009_v13 }
  0x2c   :  { %545 = vmatprep.subr.bf16.mxu0 %v2004_v12  ;;  %588 = vmatprep.subr.bf16.mxu1 %v2015_v14 }
  0x2f   :  { %546 = vmatpush1.bf16.msra.mxu0 %v2020_v15  ;;  %589 = vmatpush1.bf16.msra.mxu1 %v2033_v17 }
  0x30   :  { %547 = vmatprep.subr.bf16.mxu0 %v2026_v16  ;;  %590 = vmatprep.subr.bf16.mxu1 %v2039_v18 }
  0x33   :  { %548 = vmatpush1.bf16.msra.mxu0 %v2045_v19  ;;  %591 = vmatpush1.bf16.msra.mxu1 %v2057_v21 }
  0x34   :  { %549 = vmatprep.subr.bf16.mxu0 %v2052_v20  ;;  %592 = vmatprep.subr.bf16.mxu1 %v2063_v22 }
  0x37   :  { %550 = vmatpush1.bf16.msra.mxu0 %v2069_v23  ;;  %593 = vmatpush1.bf16.msra.mxu1 %v2081_v25 }
  0x38   :  { %551 = vmatprep.subr.bf16.mxu0 %v2076_v24  ;;  %594 = vmatprep.subr.bf16.mxu1 %v2087_v26 }
  0x3b   :  { %552 = vmatpush1.bf16.msra.mxu0 %v2093_v27  ;;  %595 = vmatpush1.bf16.msra.mxu1 %v2105_v29 }
  0x3c   :  { %553 = vmatprep.subr.bf16.mxu0 %v2100_v28  ;;  %596 = vmatprep.subr.bf16.mxu1 %v2111_v30 }
  0x3f   :  { %554 = vmatpush1.bf16.msra.mxu0 %v2117_v31  ;;  %597 = vmatpush1.bf16.msra.mxu1 %v2124_v32 }
  0x40   :  { %683 = vmatprep.subr.bf16.mxu0 %v1940_v1  ;;  %726 = vmatprep.subr.bf16.mxu1 %v1950_v3 }
  0xf5   :  { %v429_v40 = vpop.f32.mrb[0].mxu0  ;;  %v472_v44 = vpop.f32.mrb[0].mxu1 }
  0xf6   :  { %v481_v42 = vadd.f32 %v429_v40, %v226_v36  ;;  %v431_v43 = vpop.f32.mrb[1].mxu0  ;;  %v474_v49 = vpop.f32.mrb[1].mxu1  ;;  %v483_v33 = vadd.f32 %v472_v44, %v228_v60 }
  0xf7   :  { %v482_v46 = vadd.f32 %v431_v43, %v227_v37  ;;  %v433_v47 = vpop.f32.mrb[2].mxu0  ;;  %v476_v53 = vpop.f32.mrb[2].mxu1  ;;  %v484_v61 = vadd.f32 %v474_v49, %v229_v48 }
  0xf8   :  { %v489_v50 = vmul.f32 0.5, %v481_v42  ;;  %v485_v51 = vadd.f32 %v433_v47, %v230_v38  ;;  %v435_v52 = vpop.f32.mrb[3].mxu0  ;;  %v478_v57 = vpop.f32.mrb[3].mxu1  ;;  %v487_v34 = vadd.f32 %v476_v53, %v232_v62  ;;  %v491_v35 = vmul.f32 0.5, %v483_v33 }
  0xf9   :  { %v490_v54 = vmul.f32 0.5, %v482_v46  ;;  %v486_v55 = vadd.f32 %v435_v52, %v231_v41  ;;  %v488_v63 = vadd.f32 %v478_v57, %v233_v56 }
  0xfa   :  { %1705 = vtanh.f32 %v489_v50  ;;  %v492_v58 = vmul.f32 0.5, %v485_v51  ;;  %v494_v37 = vmul.f32 0.5, %v487_v34 }
  0xfb   :  { %1707 = vtanh.f32 %v490_v54  ;;  %v493_v59 = vmul.f32 0.5, %v486_v55 }
  0xfc   :  { %1709 = vtanh.f32 %v492_v58 }
  0xfd   :  { %1711 = vtanh.f32 %v493_v59 }
  0xfe   :  { %1713 = vtanh.f32 %v484_v61 }
  0xff   :  { %1715 = vtanh.f32 %v488_v63 }
 0x100   :  { %1717 = vtanh.f32 %v491_v35 }
 0x101   :  { %1719 = vtanh.f32 %v494_v37  ;;  %v30_v37 = vld [vmem:[%s2703_s0 + $0x40] sm:$0xff] }
 0x104   :  { %v1706_v36 = vpop.eup %1705 }
 0x105   :  { %v1708_v38 = vpop.eup %1707  ;;  %v501_v40 = vmul.f32 0.5, %v1706_v36 }
 0x106   :  { %v1710_v41 = vpop.eup %1709  ;;  %v502_v42 = vmul.f32 0.5, %v1708_v38  ;;  %v34_v38 = vld [vmem:[%s2703_s0 + $0x60] sm:$0xff] }
 0x107   :  { %v1712_v43 = vpop.eup %1711  ;;  %v507_v46 = vadd.f32 0.5, %v501_v40  ;;  %v504_v47 = vmul.f32 0.5, %v1710_v41  ;;  %v530_v40 = vunpack.c.l.bf16 %v30_v37  ;;  %v32_v41 = vld [vmem:[%s2703_s0 + $0x48] sm:$0xff] }
 0x108   :  { %v508_v39 = vadd.f32 0.5, %v502_v42  ;;  %v505_v48 = vmul.f32 0.5, %v1712_v43  ;;  %v1714_v45 = vpop.eup %1713  ;;  %v531_v42 = vunpack.c.h.bf16 %v30_v37  ;;  %v534_v43 = vunpack.c.l.bf16 %v34_v38 }
 0x109   :  { %v510_v49 = vadd.f32 0.5, %v504_v47  ;;  %v517_v51 = vmul.f32 %v1714_v45, %v507_v46  ;;  %v1716_v52 = vpop.eup %1715 }
 0x10a   :  { %v515_v44 = vmul.f32 0.0, %v508_v39  ;;  %v511_v50 = vadd.f32 0.5, %v505_v48  ;;  %v1718_v57 = vpop.eup %1717  ;;  %v535_v39 = vunpack.c.h.bf16 %v34_v38 }
 0x10b   :  { %v518_v55 = vmul.f32 %v1716_v52, %v510_v49  ;;  %v1720_v58 = vpop.eup %1719  ;;  %v503_v59 = vmul.f32 0.5, %v1718_v57  ;;  %v533_v49 = vunpack.c.h.bf16 %v32_v41 }
 0x10c   :  { %v516_v53 = vmul.f32 0.0, %v511_v50  ;;  %v2177_v54 = vadd.f32 %v517_v51, %v515_v44  ;;  %v506_v60 = vmul.f32 0.5, %v1720_v58  ;;  %v36_v50 = vld [vmem:[%s2703_s0 + $0x68] sm:$0xff] }
 0x10d   :  { %v509_v62 = vadd.f32 0.5, %v503_v59  ;;  %v536_v37 = vunpack.c.l.bf16 %v36_v50 }
 0x10e   :  { %1721 = vtanh.f32 %v2177_v54  ;;  %v2180_v56 = vadd.f32 %v518_v55, %v516_v53  ;;  %v512_v63 = vadd.f32 0.5, %v506_v60 }
 0x110   :  { %1723 = vtanh.f32 %v2180_v56 }
 0x118   :  { %v1722_v61 = vpop.eup %1721 }
 0x119   :  { %v523_v34 = vmul.f32 %v1722_v61, %v509_v62  ;;  %v537_v62 = vunpack.c.h.bf16 %v36_v50 }
 0x11a   :  { %v1724_v33 = vpop.eup %1723 }
 0x11b   :  { %v524_v35 = vmul.f32 %v1724_v33, %v512_v63 }
 0x11d   :  { %v538_v36 = vpack.c.bf16 %v524_v35, %v523_v34  ;;  %v532_v35 = vunpack.c.l.bf16 %v32_v41 }
 0x11f   :  { %572 = vmatmul.mubr.bf16.vlgmr.msra.gmra.mrb[4].mxu0 %v538_v36  ;;  %615 = vmatmul.mubr.bf16.vlgmr.msra.gmra.mrb[4].mxu1 %v538_v36 }
 0x120   :  { %684 = vmatpush1.bf16.msra.mxu0 %v1945_v2  ;;  %727 = vmatpush1.bf16.msra.mxu1 %v1961_v5 }
 0x121   :  { %685 = vmatprep.subr.bf16.mxu0 %v1956_v4  ;;  %728 = vmatprep.subr.bf16.mxu1 %v1975_v7 }
 0x122   :  { %715 = vmatprep.mubr.bf16.mxu0 %v1913_v0  ;;  %758 = vmatprep.mubr.bf16.mxu1 %v1913_v0 }
 0x124   :  { %686 = vmatpush1.bf16.msra.mxu0 %v1968_v6  ;;  %729 = vmatpush1.bf16.msra.mxu1 %v1985_v9 }
 0x125   :  { %687 = vmatprep.subr.bf16.mxu0 %v1980_v8  ;;  %730 = vmatprep.subr.bf16.mxu1 %v1991_v10 }
 0x128   :  { %688 = vmatpush1.bf16.msra.mxu0 %v1997_v11  ;;  %731 = vmatpush1.bf16.msra.mxu1 %v2009_v13 }
 0x129   :  { %689 = vmatprep.subr.bf16.mxu0 %v2004_v12  ;;  %732 = vmatprep.subr.bf16.mxu1 %v2015_v14 }
 0x12c   :  { %690 = vmatpush1.bf16.msra.mxu0 %v2020_v15  ;;  %733 = vmatpush1.bf16.msra.mxu1 %v2033_v17 }
 0x12d   :  { %691 = vmatprep.subr.bf16.mxu0 %v2026_v16  ;;  %734 = vmatprep.subr.bf16.mxu1 %v2039_v18 }
 0x130   :  { %692 = vmatpush1.bf16.msra.mxu0 %v2045_v19  ;;  %735 = vmatpush1.bf16.msra.mxu1 %v2057_v21 }
 0x131   :  { %693 = vmatprep.subr.bf16.mxu0 %v2052_v20  ;;  %736 = vmatprep.subr.bf16.mxu1 %v2063_v22 }
 0x134   :  { %694 = vmatpush1.bf16.msra.mxu0 %v2069_v23  ;;  %737 = vmatpush1.bf16.msra.mxu1 %v2081_v25 }
 0x135   :  { %695 = vmatprep.subr.bf16.mxu0 %v2076_v24  ;;  %738 = vmatprep.subr.bf16.mxu1 %v2087_v26 }
 0x138   :  { %696 = vmatpush1.bf16.msra.mxu0 %v2093_v27  ;;  %739 = vmatpush1.bf16.msra.mxu1 %v2105_v29 }
 0x139   :  { %697 = vmatprep.subr.bf16.mxu0 %v2100_v28  ;;  %740 = vmatprep.subr.bf16.mxu1 %v2111_v30 }
 0x13c   :  { %698 = vmatpush1.bf16.msra.mxu0 %v2117_v31  ;;  %741 = vmatpush1.bf16.msra.mxu1 %v2124_v32 }
 0x13d   :  { %827 = vmatprep.subr.bf16.mxu0 %v1940_v1  ;;  %870 = vmatprep.subr.bf16.mxu1 %v1950_v3 }
 0x1f2   :  { %v573_v46 = vpop.f32.mrb[4].mxu0  ;;  %v616_v47 = vpop.f32.mrb[4].mxu1 }
 0x1f3   :  { %v625_v48 = vadd.f32 %v573_v46, %v530_v40  ;;  %v575_v45 = vpop.f32.mrb[5].mxu0  ;;  %v618_v44 = vpop.f32.mrb[5].mxu1  ;;  %v627_v38 = vadd.f32 %v616_v47, %v532_v35 }
 0x1f4   :  { %v626_v51 = vadd.f32 %v575_v45, %v531_v42  ;;  %v577_v52 = vpop.f32.mrb[6].mxu0  ;;  %v620_v53 = vpop.f32.mrb[6].mxu1  ;;  %v628_v63 = vadd.f32 %v618_v44, %v533_v49 }
 0x1f5   :  { %v633_v55 = vmul.f32 0.5, %v625_v48  ;;  %v629_v57 = vadd.f32 %v577_v52, %v534_v43  ;;  %v579_v58 = vpop.f32.mrb[7].mxu0  ;;  %v622_v59 = vpop.f32.mrb[7].mxu1  ;;  %v631_v40 = vadd.f32 %v620_v53, %v536_v37  ;;  %v635_v46 = vmul.f32 0.5, %v627_v38 }
 0x1f6   :  { %v634_v60 = vmul.f32 0.5, %v626_v51  ;;  %v630_v61 = vadd.f32 %v579_v58, %v535_v39  ;;  %v632_v36 = vadd.f32 %v622_v59, %v537_v62 }
 0x1f7   :  { %1725 = vtanh.f32 %v633_v55  ;;  %v636_v33 = vmul.f32 0.5, %v629_v57  ;;  %v638_v39 = vmul.f32 0.5, %v631_v40 }
 0x1f8   :  { %v637_v34 = vmul.f32 0.5, %v630_v61  ;;  %1727 = vtanh.f32 %v634_v60 }
 0x1f9   :  { %1729 = vtanh.f32 %v636_v33 }
 0x1fa   :  { %1731 = vtanh.f32 %v628_v63 }
 0x1fb   :  { %1733 = vtanh.f32 %v637_v34 }
 0x1fc   :  { %1735 = vtanh.f32 %v632_v36 }
 0x1fd   :  { %1737 = vtanh.f32 %v635_v46 }
 0x1fe   :  { %1739 = vtanh.f32 %v638_v39 }
 0x201   :  { %v1726_v42 = vpop.eup %1725 }
 0x202   :  { %v645_v43 = vmul.f32 0.5, %v1726_v42  ;;  %v1728_v48 = vpop.eup %1727 }
 0x203   :  { %v1730_v45 = vpop.eup %1729  ;;  %v646_v49 = vmul.f32 0.5, %v1728_v48  ;;  %v42_v48 = vld [vmem:[%s2703_s0 + $0xa0] sm:$0xff] }
 0x204   :  { %v651_v51 = vadd.f32 0.5, %v645_v43  ;;  %v1732_v44 = vpop.eup %1731  ;;  %v648_v52 = vmul.f32 0.5, %v1730_v45  ;;  %v40_v45 = vld [vmem:[%s2703_s0 + $0x88] sm:$0xff] }
 0x205   :  { %v1734_v55 = vpop.eup %1733  ;;  %v652_v41 = vadd.f32 0.5, %v646_v49  ;;  %v678_v49 = vunpack.c.l.bf16 %v42_v48 }
 0x206   :  { %v661_v57 = vmul.f32 %v1732_v44, %v651_v51  ;;  %v654_v58 = vadd.f32 0.5, %v648_v52  ;;  %v649_v50 = vmul.f32 0.5, %v1734_v55  ;;  %v1736_v47 = vpop.eup %1735  ;;  %v679_v55 = vunpack.c.h.bf16 %v42_v48 }
 0x207   :  { %v659_v53 = vmul.f32 %v652_v41, %v2177_v54  ;;  %v1738_v33 = vpop.eup %1737 }
 0x208   :  { %v655_v59 = vadd.f32 0.5, %v649_v50  ;;  %v662_v60 = vmul.f32 %v1736_v47, %v654_v58  ;;  %v1740_v34 = vpop.eup %1739  ;;  %v647_v35 = vmul.f32 0.5, %v1738_v33  ;;  %v677_v58 = vunpack.c.h.bf16 %v40_v45  ;;  %v44_v47 = vld [vmem:[%s2703_s0 + $0xa8] sm:$0xff] }
 0x209   :  { %v2230_v61 = vadd.f32 %v661_v57, %v659_v53  ;;  %v650_v36 = vmul.f32 0.5, %v1740_v34 }
 0x20a   :  { %v660_v62 = vmul.f32 %v655_v59, %v2180_v56  ;;  %v653_v38 = vadd.f32 0.5, %v647_v35  ;;  %v38_v56 = vld [vmem:[%s2703_s0 + $0x80] sm:$0xff] }
 0x20b   :  { %1741 = vtanh.f32 %v2230_v61  ;;  %v656_v40 = vadd.f32 0.5, %v650_v36  ;;  %v674_v39 = vunpack.c.l.bf16 %v38_v56  ;;  %v675_v51 = vunpack.c.h.bf16 %v38_v56 }
 0x20c   :  { %v2234_v63 = vadd.f32 %v662_v60, %v660_v62  ;;  %v680_v56 = vunpack.c.l.bf16 %v44_v47 }
 0x20e   :  { %1743 = vtanh.f32 %v2234_v63 }
 0x215   :  { %v1742_v37 = vpop.eup %1741 }
 0x216   :  { %v667_v42 = vmul.f32 %v1742_v37, %v653_v38  ;;  %v681_v38 = vunpack.c.h.bf16 %v44_v47 }
 0x218   :  { %v1744_v54 = vpop.eup %1743 }
 0x219   :  { %v668_v43 = vmul.f32 %v1744_v54, %v656_v40 }
 0x21b   :  { %v682_v46 = vpack.c.bf16 %v668_v43, %v667_v42  ;;  %v676_v43 = vunpack.c.l.bf16 %v40_v45 }
 0x21d   :  { %716 = vmatmul.mubr.bf16.vlgmr.msra.gmra.mrb[8].mxu0 %v682_v46  ;;  %759 = vmatmul.mubr.bf16.vlgmr.msra.gmra.mrb[8].mxu1 %v682_v46 }
 0x21e   :  { %828 = vmatpush1.bf16.msra.mxu0 %v1945_v2  ;;  %871 = vmatpush1.bf16.msra.mxu1 %v1961_v5 }
 0x21f   :  { %829 = vmatprep.subr.bf16.mxu0 %v1956_v4  ;;  %872 = vmatprep.subr.bf16.mxu1 %v1975_v7 }
 0x220   :  { %859 = vmatprep.mubr.bf16.mxu0 %v1913_v0  ;;  %902 = vmatprep.mubr.bf16.mxu1 %v1913_v0 }
 0x222   :  { %830 = vmatpush1.bf16.msra.mxu0 %v1968_v6  ;;  %873 = vmatpush1.bf16.msra.mxu1 %v1985_v9 }
 0x223   :  { %831 = vmatprep.subr.bf16.mxu0 %v1980_v8  ;;  %874 = vmatprep.subr.bf16.mxu1 %v1991_v10 }
 0x226   :  { %832 = vmatpush1.bf16.msra.mxu0 %v1997_v11  ;;  %875 = vmatpush1.bf16.msra.mxu1 %v2009_v13 }
 0x227   :  { %833 = vmatprep.subr.bf16.mxu0 %v2004_v12  ;;  %876 = vmatprep.subr.bf16.mxu1 %v2015_v14 }
 0x22a   :  { %834 = vmatpush1.bf16.msra.mxu0 %v2020_v15  ;;  %877 = vmatpush1.bf16.msra.mxu1 %v2033_v17 }
 0x22b   :  { %835 = vmatprep.subr.bf16.mxu0 %v2026_v16  ;;  %878 = vmatprep.subr.bf16.mxu1 %v2039_v18 }
 0x22e   :  { %836 = vmatpush1.bf16.msra.mxu0 %v2045_v19  ;;  %879 = vmatpush1.bf16.msra.mxu1 %v2057_v21 }
 0x22f   :  { %837 = vmatprep.subr.bf16.mxu0 %v2052_v20  ;;  %880 = vmatprep.subr.bf16.mxu1 %v2063_v22 }
 0x232   :  { %838 = vmatpush1.bf16.msra.mxu0 %v2069_v23  ;;  %881 = vmatpush1.bf16.msra.mxu1 %v2081_v25 }
 0x233   :  { %839 = vmatprep.subr.bf16.mxu0 %v2076_v24  ;;  %882 = vmatprep.subr.bf16.mxu1 %v2087_v26 }
 0x236   :  { %840 = vmatpush1.bf16.msra.mxu0 %v2093_v27  ;;  %883 = vmatpush1.bf16.msra.mxu1 %v2105_v29 }
 0x237   :  { %841 = vmatprep.subr.bf16.mxu0 %v2100_v28  ;;  %884 = vmatprep.subr.bf16.mxu1 %v2111_v30 }
 0x23a   :  { %842 = vmatpush1.bf16.msra.mxu0 %v2117_v31  ;;  %885 = vmatpush1.bf16.msra.mxu1 %v2124_v32 }
 0x23b   :  { %971 = vmatprep.subr.bf16.mxu0 %v1940_v1  ;;  %1014 = vmatprep.subr.bf16.mxu1 %v1950_v3 }
 0x2f0   :  { %v717_v44 = vpop.f32.mrb[8].mxu0  ;;  %v760_v52 = vpop.f32.mrb[8].mxu1 }
 0x2f1   :  { %v769_v41 = vadd.f32 %v717_v44, %v674_v39  ;;  %v719_v57 = vpop.f32.mrb[9].mxu0  ;;  %v762_v50 = vpop.f32.mrb[9].mxu1  ;;  %v771_v48 = vadd.f32 %v760_v52, %v676_v43 }
 0x2f2   :  { %v770_v53 = vadd.f32 %v719_v57, %v675_v51  ;;  %v721_v59 = vpop.f32.mrb[10].mxu0  ;;  %v764_v60 = vpop.f32.mrb[10].mxu1  ;;  %v772_v40 = vadd.f32 %v762_v50, %v677_v58 }
 0x2f3   :  { %v777_v62 = vmul.f32 0.5, %v769_v41  ;;  %v773_v33 = vadd.f32 %v721_v59, %v678_v49  ;;  %v723_v34 = vpop.f32.mrb[11].mxu0  ;;  %v766_v35 = vpop.f32.mrb[11].mxu1  ;;  %v775_v39 = vadd.f32 %v764_v60, %v680_v56  ;;  %v779_v44 = vmul.f32 0.5, %v771_v48 }
 0x2f4   :  { %v778_v36 = vmul.f32 0.5, %v770_v53  ;;  %v774_v37 = vadd.f32 %v723_v34, %v679_v55  ;;  %v776_v46 = vadd.f32 %v766_v35, %v681_v38 }
 0x2f5   :  { %1745 = vtanh.f32 %v777_v62  ;;  %v780_v54 = vmul.f32 0.5, %v773_v33  ;;  %v782_v55 = vmul.f32 0.5, %v775_v39 }
 0x2f6   :  { %v781_v42 = vmul.f32 0.5, %v774_v37  ;;  %1747 = vtanh.f32 %v778_v36 }
 0x2f7   :  { %1749 = vtanh.f32 %v780_v54 }
 0x2f8   :  { %1751 = vtanh.f32 %v772_v40 }
 0x2f9   :  { %1753 = vtanh.f32 %v781_v42 }
 0x2fa   :  { %1755 = vtanh.f32 %v776_v46 }
 0x2fb   :  { %1757 = vtanh.f32 %v779_v44 }
 0x2fc   :  { %1759 = vtanh.f32 %v782_v55 }
 0x2ff   :  { %v1746_v51 = vpop.eup %1745 }
 0x300   :  { %v789_v49 = vmul.f32 0.5, %v1746_v51  ;;  %v1748_v41 = vpop.eup %1747 }
 0x301   :  { %v1750_v57 = vpop.eup %1749  ;;  %v790_v58 = vmul.f32 0.5, %v1748_v41 }
 0x302   :  { %v795_v53 = vadd.f32 0.5, %v789_v49  ;;  %v1752_v50 = vpop.eup %1751  ;;  %v792_v59 = vmul.f32 0.5, %v1750_v57 }
 0x303   :  { %v1754_v62 = vpop.eup %1753  ;;  %v796_v45 = vadd.f32 0.5, %v790_v58 }
 0x304   :  { %v805_v33 = vmul.f32 %v1752_v50, %v795_v53  ;;  %v798_v34 = vadd.f32 0.5, %v792_v59  ;;  %v793_v47 = vmul.f32 0.5, %v1754_v62  ;;  %v1756_v52 = vpop.eup %1755 }
 0x305   :  { %v803_v60 = vmul.f32 %v796_v45, %v2230_v61  ;;  %v1758_v54 = vpop.eup %1757 }
 0x306   :  { %v799_v35 = vadd.f32 0.5, %v793_v47  ;;  %v806_v36 = vmul.f32 %v1756_v52, %v798_v34  ;;  %v1760_v42 = vpop.eup %1759  ;;  %v791_v43 = vmul.f32 0.5, %v1758_v54 }
 0x307   :  { %v2284_v37 = vadd.f32 %v805_v33, %v803_v60  ;;  %v794_v46 = vmul.f32 0.5, %v1760_v42 }
 0x308   :  { %v804_v38 = vmul.f32 %v799_v35, %v2234_v63  ;;  %v797_v48 = vadd.f32 0.5, %v791_v43 }
 0x309   :  { %1761 = vtanh.f32 %v2284_v37  ;;  %v800_v39 = vadd.f32 0.5, %v794_v46 }
 0x30a   :  { %v2288_v40 = vadd.f32 %v806_v36, %v804_v38 }
 0x30c   :  { %1763 = vtanh.f32 %v2288_v40 }
 0x313   :  { %v1762_v56 = vpop.eup %1761 }
 0x314   :  { %v811_v51 = vmul.f32 %v1762_v56, %v797_v48 }
 0x316   :  { %v1764_v61 = vpop.eup %1763 }
 0x317   :  { %v812_v49 = vmul.f32 %v1764_v61, %v800_v39 }
 0x319   :  { %v826_v44 = vpack.c.bf16 %v812_v49, %v811_v51 }
 0x31b   :  { %860 = vmatmul.mubr.bf16.vlgmr.msra.gmra.mrb[12].mxu0 %v826_v44  ;;  %903 = vmatmul.mubr.bf16.vlgmr.msra.gmra.mrb[12].mxu1 %v826_v44 }
 0x31c   :  { %972 = vmatpush1.bf16.msra.mxu0 %v1945_v2  ;;  %1015 = vmatpush1.bf16.msra.mxu1 %v1961_v5  ;;  %v46_v2 = vld [vmem:[%s2703_s0 + $0xc0] sm:$0xff] }
 0x31d   :  { %973 = vmatprep.subr.bf16.mxu0 %v1956_v4  ;;  %1016 = vmatprep.subr.bf16.mxu1 %v1975_v7  ;;  %v50_v4 = vld [vmem:[%s2703_s0 + $0xe0] sm:$0xff]  ;;  %v818_v5 = vunpack.c.l.bf16 %v46_v2  ;;  %v819_v7 = vunpack.c.h.bf16 %v46_v2 }
 0x31e   :  { %1003 = vmatprep.mubr.bf16.mxu0 %v1913_v0  ;;  %1046 = vmatprep.mubr.bf16.mxu1 %v1913_v0 }
 0x320   :  { %974 = vmatpush1.bf16.msra.mxu0 %v1968_v6  ;;  %1017 = vmatpush1.bf16.msra.mxu1 %v1985_v9  ;;  %v48_v6 = vld [vmem:[%s2703_s0 + $0xc8] sm:$0xff] }
 0x321   :  { %975 = vmatprep.subr.bf16.mxu0 %v1980_v8  ;;  %1018 = vmatprep.subr.bf16.mxu1 %v1991_v10  ;;  %v822_v8 = vunpack.c.l.bf16 %v50_v4  ;;  %v820_v34 = vunpack.c.l.bf16 %v48_v6 }
 0x324   :  { %976 = vmatpush1.bf16.msra.mxu0 %v1997_v11  ;;  %1019 = vmatpush1.bf16.msra.mxu1 %v2009_v13 }
 0x325   :  { %977 = vmatprep.subr.bf16.mxu0 %v2004_v12  ;;  %1020 = vmatprep.subr.bf16.mxu1 %v2015_v14  ;;  %v821_v12 = vunpack.c.h.bf16 %v48_v6  ;;  %v52_v14 = vld [vmem:[%s2703_s0 + $0xe8] sm:$0xff] }
 0x326   :  { %v825_v59 = vunpack.c.h.bf16 %v52_v14  ;;  %v824_v52 = vunpack.c.l.bf16 %v52_v14 }
 0x328   :  { %978 = vmatpush1.bf16.msra.mxu0 %v2020_v15  ;;  %1021 = vmatpush1.bf16.msra.mxu1 %v2033_v17 }
 0x329   :  { %979 = vmatprep.subr.bf16.mxu0 %v2026_v16  ;;  %1022 = vmatprep.subr.bf16.mxu1 %v2039_v18 }
 0x32c   :  { %980 = vmatpush1.bf16.msra.mxu0 %v2045_v19  ;;  %1023 = vmatpush1.bf16.msra.mxu1 %v2057_v21 }
 0x32d   :  { %981 = vmatprep.subr.bf16.mxu0 %v2052_v20  ;;  %1024 = vmatprep.subr.bf16.mxu1 %v2063_v22 }
 0x330   :  { %982 = vmatpush1.bf16.msra.mxu0 %v2069_v23  ;;  %1025 = vmatpush1.bf16.msra.mxu1 %v2081_v25 }
 0x331   :  { %983 = vmatprep.subr.bf16.mxu0 %v2076_v24  ;;  %1026 = vmatprep.subr.bf16.mxu1 %v2087_v26 }
 0x334   :  { %984 = vmatpush1.bf16.msra.mxu0 %v2093_v27  ;;  %1027 = vmatpush1.bf16.msra.mxu1 %v2105_v29 }
 0x335   :  { %985 = vmatprep.subr.bf16.mxu0 %v2100_v28  ;;  %1028 = vmatprep.subr.bf16.mxu1 %v2111_v30 }
 0x338   :  { %986 = vmatpush1.bf16.msra.mxu0 %v2117_v31  ;;  %1029 = vmatpush1.bf16.msra.mxu1 %v2124_v32 }
 0x339   :  { %1115 = vmatprep.subr.bf16.mxu0 %v1940_v1  ;;  %1158 = vmatprep.subr.bf16.mxu1 %v1950_v3  ;;  %v823_v1 = vunpack.c.h.bf16 %v50_v4 }
 0x3ee   :  { %v861_v9 = vpop.f32.mrb[12].mxu0  ;;  %v904_v10 = vpop.f32.mrb[12].mxu1 }
 0x3ef   :  { %v913_v11 = vadd.f32 %v861_v9, %v818_v5  ;;  %v863_v3 = vpop.f32.mrb[13].mxu0  ;;  %v906_v13 = vpop.f32.mrb[13].mxu1  ;;  %v915_v60 = vadd.f32 %v904_v10, %v820_v34  ;;  %v2404_v34 = vld [vmem:[%s2705_s2 + $0x48] ss:$16 sps:$4 sm:$0xff]  }
 0x3f0   :  { %v914_v15 = vadd.f32 %v863_v3, %v819_v7  ;;  %v865_v16 = vpop.f32.mrb[14].mxu0  ;;  %v908_v63 = vpop.f32.mrb[14].mxu1  ;;  %v916_v62 = vadd.f32 %v906_v13, %v821_v12 }
 0x3f1   :  { %v921_v41 = vmul.f32 0.5, %v913_v11  ;;  %v917_v55 = vadd.f32 %v865_v16, %v822_v8  ;;  %v867_v57 = vpop.f32.mrb[15].mxu0  ;;  %v910_v53 = vpop.f32.mrb[15].mxu1  ;;  %v919_v35 = vadd.f32 %v908_v63, %v824_v52  ;;  %v923_v54 = vmul.f32 0.5, %v915_v60  ;;  %v2416_v52 = vld [vmem:[%s2705_s2 + $0x6c] ss:$16 sps:$4 sm:$0xff]  }
 0x3f2   :  { %v922_v58 = vmul.f32 0.5, %v914_v15  ;;  %v918_v50 = vadd.f32 %v867_v57, %v823_v1  ;;  %v920_v47 = vadd.f32 %v910_v53, %v825_v59  ;;  %v2354_v57 = vld [vmem:[%s2705_s2 + $0x8] ss:$16 sps:$4 sm:$0xff]   ;;  %v2360_v53 = vld [vmem:[%s2705_s2 + $0x24] ss:$16 sps:$4 sm:$0xff]  }
 0x3f3   :  { %1765 = vtanh.f32 %v921_v41  ;;  %v924_v45 = vmul.f32 0.5, %v917_v55  ;;  %v926_v43 = vmul.f32 0.5, %v919_v35  ;;  %v2380_v59 = vld [vmem:[%s2705_s2 + $0x28] ss:$16 sps:$4 sm:$0xff]   ;;  %v2422_v60 = vld [vmem:[%s2705_s2 + $0x60] ss:$16 sps:$4 sm:$0xff]  }
 0x3f4   :  { %v925_v33 = vmul.f32 0.5, %v918_v50  ;;  %1767 = vtanh.f32 %v922_v58  ;;  %v2366_v58 = vld [vmem:[%s2705_s2 + $0x2c] ss:$16 sps:$4 sm:$0xff]   ;;  %v2374_v50 = vld [vmem:[%s2705_s2 + $0x20] ss:$16 sps:$4 sm:$0xff]  }
 0x3f5   :  { %1769 = vtanh.f32 %v924_v45  ;;  %v2392_v45 = vld [vmem:[%s2705_s2 + $0x4c] ss:$16 sps:$4 sm:$0xff]   ;;  %v2429_v35 = vld [vmem:[%s2705_s2 + $0x84] ss:$16 sps:$4 sm:$0xff]  }
 0x3f6   :  { %1771 = vtanh.f32 %v916_v62  ;;  %v2386_v62 = vld [vmem:[%s2705_s2 + $0x44] ss:$16 sps:$4 sm:$0xff]  }
 0x3f7   :  { %1773 = vtanh.f32 %v925_v33  ;;  %v2398_v33 = vld [vmem:[%s2705_s2 + $0x40] ss:$16 sps:$4 sm:$0xff]  }
 0x3f8   :  { %1775 = vtanh.f32 %v920_v47  ;;  %v2410_v47 = vld [vmem:[%s2705_s2 + $0x64] ss:$16 sps:$4 sm:$0xff]  }
 0x3f9   :  { %1777 = vtanh.f32 %v923_v54 }
 0x3fa   :  { %1779 = vtanh.f32 %v926_v43 }
 0x3fd   :  { %v1766_v36 = vpop.eup %1765 }
 0x3fe   :  { %v933_v38 = vmul.f32 0.5, %v1766_v36  ;;  %v1768_v42 = vpop.eup %1767 }
 0x3ff   :  { %v1770_v46 = vpop.eup %1769  ;;  %v934_v48 = vmul.f32 0.5, %v1768_v42 }
 0x400   :  { %v939_v56 = vadd.f32 0.5, %v933_v38  ;;  %v1772_v39 = vpop.eup %1771  ;;  %v936_v61 = vmul.f32 0.5, %v1770_v46 }
 0x401   :  { %v1774_v51 = vpop.eup %1773  ;;  %v940_v49 = vadd.f32 0.5, %v934_v48 }
 0x402   :  { %v949_v44 = vmul.f32 %v1772_v39, %v939_v56  ;;  %v942_v2 = vadd.f32 0.5, %v936_v61  ;;  %v937_v4 = vmul.f32 0.5, %v1774_v51  ;;  %v1776_v5 = vpop.eup %1775 }
 0x403   :  { %v947_v6 = vmul.f32 %v940_v49, %v2284_v37  ;;  %v1778_v11 = vpop.eup %1777 }
 0x404   :  { %v943_v7 = vadd.f32 0.5, %v937_v4  ;;  %v950_v8 = vmul.f32 %v1776_v5, %v942_v2  ;;  %v1780_v3 = vpop.eup %1779  ;;  %v935_v12 = vmul.f32 0.5, %v1778_v11 }
 0x405   :  { %v2338_v9 = vadd.f32 %v949_v44, %v947_v6  ;;  %v938_v13 = vmul.f32 0.5, %v1780_v3 }
 0x406   :  { %v948_v10 = vmul.f32 %v943_v7, %v2288_v40  ;;  %v941_v15 = vadd.f32 0.5, %v935_v12  ;;  %v2348_v40 = vld [vmem:[%s2705_s2] ss:$16 sps:$4 sm:$0xff]  }
 0x407   :  { %1781 = vtanh.f32 %v2338_v9  ;;  %v944_v16 = vadd.f32 0.5, %v938_v13 }
 0x408   :  { %v2342_v1 = vadd.f32 %v950_v8, %v948_v10 }
 0x40a   :  { %1783 = vtanh.f32 %v2342_v1 }
 0x411   :  { %v1782_v14 = vpop.eup %1781 }
 0x412   :  { %v955_v63 = vmul.f32 %v1782_v14, %v941_v15 }
 0x414   :  { %v1784_v37 = vpop.eup %1783 }
 0x415   :  { %v956_v41 = vmul.f32 %v1784_v37, %v944_v16 }
 0x417   :  { %v970_v55 = vpack.c.bf16 %v956_v41, %v955_v63 }
 0x419   :  { %1004 = vmatmul.mubr.bf16.vlgmr.msra.gmra.mrb[16].mxu0 %v970_v55  ;;  %1047 = vmatmul.mubr.bf16.vlgmr.msra.gmra.mrb[16].mxu1 %v970_v55 }
 0x41a   :  { %1116 = vmatpush1.bf16.msra.mxu0 %v2348_v40  ;;  %1159 = vmatpush1.bf16.msra.mxu1 %v2354_v57 }
 0x41b   :  { %1117 = vmatprep.subr.bf16.mxu0 %v2360_v53  ;;  %1160 = vmatprep.subr.bf16.mxu1 %v2366_v58 }
 0x41c   :  { %1147 = vmatprep.mubr.bf16.mxu0 %v1913_v0  ;;  %1190 = vmatprep.mubr.bf16.mxu1 %v1913_v0 }
 0x41e   :  { %1118 = vmatpush1.bf16.msra.mxu0 %v2374_v50  ;;  %1161 = vmatpush1.bf16.msra.mxu1 %v2380_v59 }
 0x41f   :  { %1119 = vmatprep.subr.bf16.mxu0 %v2386_v62  ;;  %1162 = vmatprep.subr.bf16.mxu1 %v2392_v45 }
 0x422   :  { %1120 = vmatpush1.bf16.msra.mxu0 %v2398_v33  ;;  %1163 = vmatpush1.bf16.msra.mxu1 %v2404_v34 }
 0x423   :  { %1121 = vmatprep.subr.bf16.mxu0 %v2410_v47  ;;  %1164 = vmatprep.subr.bf16.mxu1 %v2416_v52 }
 0x426   :  { %1122 = vmatpush1.bf16.msra.mxu0 %v2422_v60  ;;  %1165 = vmatpush1.bf16.msra.mxu1 %v2033_v17  ;;  %v2450_v17 = vld [vmem:[%s2705_s2 + $0x4] ss:$16 sps:$4 sm:$0xff]  }
 0x427   :  { %1123 = vmatprep.subr.bf16.mxu0 %v2429_v35  ;;  %1166 = vmatprep.subr.bf16.mxu1 %v2039_v18  ;;  %v2456_v18 = vld [vmem:[%s2705_s2 + $0xc] ss:$16 sps:$4 sm:$0xff]  }
 0x42a   :  { %1124 = vmatpush1.bf16.msra.mxu0 %v2045_v19  ;;  %1167 = vmatpush1.bf16.msra.mxu1 %v2057_v21  ;;  %v54_v19 = vld [vmem:[%s2703_s0 + $0x100] sm:$0xff] }
 0x42b   :  { %1125 = vmatprep.subr.bf16.mxu0 %v2052_v20  ;;  %1168 = vmatprep.subr.bf16.mxu1 %v2063_v22  ;;  %v58_v20 = vld [vmem:[%s2703_s0 + $0x120] sm:$0xff]  ;;  %v962_v21 = vunpack.c.l.bf16 %v54_v19  ;;  %v56_v22 = vld [vmem:[%s2703_s0 + $0x108] sm:$0xff] }
 0x42c   :  { %v964_v2 = vunpack.c.l.bf16 %v56_v22 }
 0x42e   :  { %1126 = vmatpush1.bf16.msra.mxu0 %v2069_v23  ;;  %1169 = vmatpush1.bf16.msra.mxu1 %v2081_v25  ;;  %v963_v23 = vunpack.c.h.bf16 %v54_v19 }
 0x42f   :  { %1127 = vmatprep.subr.bf16.mxu0 %v2076_v24  ;;  %1170 = vmatprep.subr.bf16.mxu1 %v2087_v26  ;;  %v966_v24 = vunpack.c.l.bf16 %v58_v20 }
 0x432   :  { %1128 = vmatpush1.bf16.msra.mxu0 %v2093_v27  ;;  %1171 = vmatpush1.bf16.msra.mxu1 %v2105_v29  ;;  %v967_v27 = vunpack.c.h.bf16 %v58_v20 }
 0x433   :  { %1129 = vmatprep.subr.bf16.mxu0 %v2100_v28  ;;  %1172 = vmatprep.subr.bf16.mxu1 %v2111_v30  ;;  %v965_v30 = vunpack.c.h.bf16 %v56_v22 }
 0x436   :  { %1130 = vmatpush1.bf16.msra.mxu0 %v2117_v31  ;;  %1173 = vmatpush1.bf16.msra.mxu1 %v2124_v32  ;;  %v60_v32 = vld [vmem:[%s2703_s0 + $0x128] sm:$0xff] }
 0x437   :  { %1259 = vmatprep.subr.bf16.mxu0 %v2450_v17  ;;  %1302 = vmatprep.subr.bf16.mxu1 %v2456_v18  ;;  %v969_v61 = vunpack.c.h.bf16 %v60_v32  ;;  %v968_v5 = vunpack.c.l.bf16 %v60_v32 }
 0x4ec   :  { %v1005_v25 = vpop.f32.mrb[16].mxu0  ;;  %v1048_v26 = vpop.f32.mrb[16].mxu1 }
 0x4ed   :  { %v1057_v28 = vadd.f32 %v1005_v25, %v962_v21  ;;  %v1007_v29 = vpop.f32.mrb[17].mxu0  ;;  %v1050_v31 = vpop.f32.mrb[17].mxu1  ;;  %v1059_v6 = vadd.f32 %v1048_v26, %v964_v2  ;;  %v2552_v2 = vld [vmem:[%s2705_s2 + $0xcc] ss:$16 sps:$4 sm:$0xff]  }
 0x4ee   :  { %v1058_v36 = vadd.f32 %v1007_v29, %v963_v23  ;;  %v1009_v38 = vpop.f32.mrb[18].mxu0  ;;  %v1052_v54 = vpop.f32.mrb[18].mxu1  ;;  %v1060_v51 = vadd.f32 %v1050_v31, %v965_v30 }
 0x4ef   :  { %v1065_v42 = vmul.f32 0.5, %v1057_v28  ;;  %v1061_v43 = vadd.f32 %v1009_v38, %v966_v24  ;;  %v1011_v46 = vpop.f32.mrb[19].mxu0  ;;  %v1054_v56 = vpop.f32.mrb[19].mxu1  ;;  %v1063_v7 = vadd.f32 %v1052_v54, %v968_v5  ;;  %v1067_v11 = vmul.f32 0.5, %v1059_v6  ;;  %v2564_v5 = vld [vmem:[%s2705_s2 + $0xc8] ss:$16 sps:$4 sm:$0xff]  }
 0x4f0   :  { %v1066_v48 = vmul.f32 0.5, %v1058_v36  ;;  %v1062_v39 = vadd.f32 %v1011_v46, %v967_v27  ;;  %v1064_v4 = vadd.f32 %v1054_v56, %v969_v61  ;;  %v2504_v46 = vld [vmem:[%s2705_s2 + $0x8c] ss:$16 sps:$4 sm:$0xff]   ;;  %v2510_v56 = vld [vmem:[%s2705_s2 + $0x80] ss:$16 sps:$4 sm:$0xff]  }
 0x4f1   :  { %1785 = vtanh.f32 %v1065_v42  ;;  %v1068_v49 = vmul.f32 0.5, %v1061_v43  ;;  %v1070_v12 = vmul.f32 0.5, %v1063_v7  ;;  %v2528_v61 = vld [vmem:[%s2705_s2 + $0xac] ss:$16 sps:$4 sm:$0xff]   ;;  %v2570_v6 = vld [vmem:[%s2705_s2 + $0xe4] ss:$16 sps:$4 sm:$0xff]  }
 0x4f2   :  { %v1069_v44 = vmul.f32 0.5, %v1062_v39  ;;  %1787 = vtanh.f32 %v1066_v48  ;;  %v2516_v48 = vld [vmem:[%s2705_s2 + $0x88] ss:$16 sps:$4 sm:$0xff]   ;;  %v2522_v39 = vld [vmem:[%s2705_s2 + $0xa4] ss:$16 sps:$4 sm:$0xff]  }
 0x4f3   :  { %1789 = vtanh.f32 %v1068_v49  ;;  %v2540_v49 = vld [vmem:[%s2705_s2 + $0xa8] ss:$16 sps:$4 sm:$0xff]   ;;  %v2576_v7 = vld [vmem:[%s2705_s2 + $0xec] ss:$16 sps:$4 sm:$0xff]  }
 0x4f4   :  { %1791 = vtanh.f32 %v1060_v51  ;;  %v2534_v51 = vld [vmem:[%s2705_s2 + $0xa0] ss:$16 sps:$4 sm:$0xff]  }
 0x4f5   :  { %1793 = vtanh.f32 %v1069_v44  ;;  %v2546_v44 = vld [vmem:[%s2705_s2 + $0xc4] ss:$16 sps:$4 sm:$0xff]  }
 0x4f6   :  { %1795 = vtanh.f32 %v1064_v4  ;;  %v2558_v4 = vld [vmem:[%s2705_s2 + $0xc0] ss:$16 sps:$4 sm:$0xff]  }
 0x4f7   :  { %1797 = vtanh.f32 %v1067_v11  ;;  %v62_v11 = vld [vmem:[%s2703_s0 + $0x140] sm:$0xff] }
 0x4f8   :  { %1799 = vtanh.f32 %v1070_v12  ;;  %v1106_v12 = vunpack.c.l.bf16 %v62_v11 }
 0x4fb   :  { %v1786_v8 = vpop.eup %1785 }
 0x4fc   :  { %v1077_v10 = vmul.f32 0.5, %v1786_v8  ;;  %v1788_v3 = vpop.eup %1787  ;;  %v2582_v8 = vld [vmem:[%s2705_s2 + $0xe0] ss:$16 sps:$4 sm:$0xff]  }
 0x4fd   :  { %v1790_v13 = vpop.eup %1789  ;;  %v1078_v15 = vmul.f32 0.5, %v1788_v3  ;;  %v66_v3 = vld [vmem:[%s2703_s0 + $0x160] sm:$0xff] }
 0x4fe   :  { %v1083_v14 = vadd.f32 0.5, %v1077_v10  ;;  %v1792_v16 = vpop.eup %1791  ;;  %v1080_v37 = vmul.f32 0.5, %v1790_v13  ;;  %v2588_v10 = vld [vmem:[%s2705_s2 + $0xe8] ss:$16 sps:$4 sm:$0xff]  }
 0x4ff   :  { %v1794_v63 = vpop.eup %1793  ;;  %v1084_v41 = vadd.f32 0.5, %v1078_v15  ;;  %v64_v13 = vld [vmem:[%s2703_s0 + $0x148] sm:$0xff]  ;;  %v1110_v15 = vunpack.c.l.bf16 %v66_v3 }
 0x500   :  { %v1093_v55 = vmul.f32 %v1792_v16, %v1083_v14  ;;  %v1086_v19 = vadd.f32 0.5, %v1080_v37  ;;  %v1081_v20 = vmul.f32 0.5, %v1794_v63  ;;  %v1796_v21 = vpop.eup %1795  ;;  %v1107_v14 = vunpack.c.h.bf16 %v62_v11 }
 0x501   :  { %v1091_v22 = vmul.f32 %v1084_v41, %v2338_v9  ;;  %v1798_v28 = vpop.eup %1797  ;;  %v1109_v41 = vunpack.c.h.bf16 %v64_v13 }
 0x502   :  { %v1087_v23 = vadd.f32 0.5, %v1081_v20  ;;  %v1094_v24 = vmul.f32 %v1796_v21, %v1086_v19  ;;  %v1800_v29 = vpop.eup %1799  ;;  %v1079_v30 = vmul.f32 0.5, %v1798_v28  ;;  %v68_v19 = vld [vmem:[%s2703_s0 + $0x168] sm:$0xff] }
 0x503   :  { %v2472_v25 = vadd.f32 %v1093_v55, %v1091_v22  ;;  %v1082_v31 = vmul.f32 0.5, %v1800_v29 }
 0x504   :  { %v1092_v26 = vmul.f32 %v1087_v23, %v2342_v1  ;;  %v1085_v36 = vadd.f32 0.5, %v1079_v30  ;;  %v2497_v1 = vld [vmem:[%s2705_s2 + $0x68] ss:$16 sps:$4 sm:$0xff]  }
 0x505   :  { %1801 = vtanh.f32 %v2472_v25  ;;  %v1088_v38 = vadd.f32 0.5, %v1082_v31  ;;  %v1113_v31 = vunpack.c.h.bf16 %v68_v19 }
 0x506   :  { %v2476_v27 = vadd.f32 %v1094_v24, %v1092_v26 }
 0x508   :  { %1803 = vtanh.f32 %v2476_v27 }
 0x50f   :  { %v1802_v32 = vpop.eup %1801 }
 0x510   :  { %v1099_v54 = vmul.f32 %v1802_v32, %v1085_v36 }
 0x512   :  { %v1804_v9 = vpop.eup %1803 }
 0x513   :  { %v1100_v42 = vmul.f32 %v1804_v9, %v1088_v38  ;;  %v1108_v9 = vunpack.c.l.bf16 %v64_v13 }
 0x515   :  { %v1114_v43 = vpack.c.bf16 %v1100_v42, %v1099_v54  ;;  %v1112_v42 = vunpack.c.l.bf16 %v68_v19 }
 0x517   :  { %1148 = vmatmul.mubr.bf16.vlgmr.msra.gmra.mrb[20].mxu0 %v1114_v43  ;;  %1191 = vmatmul.mubr.bf16.vlgmr.msra.gmra.mrb[20].mxu1 %v1114_v43 }
 0x518   :  { %1260 = vmatpush1.bf16.msra.mxu0 %v2348_v40  ;;  %1303 = vmatpush1.bf16.msra.mxu1 %v2354_v57 }
 0x519   :  { %1261 = vmatprep.subr.bf16.mxu0 %v2360_v53  ;;  %1304 = vmatprep.subr.bf16.mxu1 %v2366_v58 }
 0x51a   :  { %1291 = vmatprep.mubr.bf16.mxu0 %v1913_v0  ;;  %1334 = vmatprep.mubr.bf16.mxu1 %v1913_v0 }
 0x51c   :  { %1262 = vmatpush1.bf16.msra.mxu0 %v2374_v50  ;;  %1305 = vmatpush1.bf16.msra.mxu1 %v2380_v59 }
 0x51d   :  { %1263 = vmatprep.subr.bf16.mxu0 %v2386_v62  ;;  %1306 = vmatprep.subr.bf16.mxu1 %v2392_v45 }
 0x520   :  { %1264 = vmatpush1.bf16.msra.mxu0 %v2398_v33  ;;  %1307 = vmatpush1.bf16.msra.mxu1 %v2404_v34 }
 0x521   :  { %1265 = vmatprep.subr.bf16.mxu0 %v2410_v47  ;;  %1308 = vmatprep.subr.bf16.mxu1 %v2416_v52 }
 0x524   :  { %1266 = vmatpush1.bf16.msra.mxu0 %v2422_v60  ;;  %1309 = vmatpush1.bf16.msra.mxu1 %v2497_v1 }
 0x525   :  { %1267 = vmatprep.subr.bf16.mxu0 %v2429_v35  ;;  %1310 = vmatprep.subr.bf16.mxu1 %v2504_v46 }
 0x528   :  { %1268 = vmatpush1.bf16.msra.mxu0 %v2510_v56  ;;  %1311 = vmatpush1.bf16.msra.mxu1 %v2516_v48 }
 0x529   :  { %1269 = vmatprep.subr.bf16.mxu0 %v2522_v39  ;;  %1312 = vmatprep.subr.bf16.mxu1 %v2528_v61 }
 0x52c   :  { %1270 = vmatpush1.bf16.msra.mxu0 %v2534_v51  ;;  %1313 = vmatpush1.bf16.msra.mxu1 %v2540_v49 }
 0x52d   :  { %1271 = vmatprep.subr.bf16.mxu0 %v2546_v44  ;;  %1314 = vmatprep.subr.bf16.mxu1 %v2552_v2 }
 0x530   :  { %1272 = vmatpush1.bf16.msra.mxu0 %v2558_v4  ;;  %1315 = vmatpush1.bf16.msra.mxu1 %v2564_v5 }
 0x531   :  { %1273 = vmatprep.subr.bf16.mxu0 %v2570_v6  ;;  %1316 = vmatprep.subr.bf16.mxu1 %v2576_v7 }
 0x534   :  { %1274 = vmatpush1.bf16.msra.mxu0 %v2582_v8  ;;  %1317 = vmatpush1.bf16.msra.mxu1 %v2588_v10 }
 0x535   :  { %1403 = vmatprep.subr.bf16.mxu0 %v2450_v17  ;;  %1446 = vmatprep.subr.bf16.mxu1 %v2456_v18  ;;  %v1111_v17 = vunpack.c.h.bf16 %v66_v3 }
 0x5ea   :  { %v1149_v16 = vpop.f32.mrb[20].mxu0  ;;  %v1192_v37 = vpop.f32.mrb[20].mxu1 }
 0x5eb   :  { %v1201_v63 = vadd.f32 %v1149_v16, %v1106_v12  ;;  %v1151_v18 = vpop.f32.mrb[21].mxu0  ;;  %v1194_v55 = vpop.f32.mrb[21].mxu1  ;;  %v1203_v43 = vadd.f32 %v1192_v37, %v1108_v9 }
 0x5ec   :  { %v1202_v20 = vadd.f32 %v1151_v18, %v1107_v14  ;;  %v1153_v21 = vpop.f32.mrb[22].mxu0  ;;  %v1196_v22 = vpop.f32.mrb[22].mxu1  ;;  %v1204_v32 = vadd.f32 %v1194_v55, %v1109_v41 }
 0x5ed   :  { %v1209_v23 = vmul.f32 0.5, %v1201_v63  ;;  %v1205_v24 = vadd.f32 %v1153_v21, %v1110_v15  ;;  %v1155_v26 = vpop.f32.mrb[23].mxu0  ;;  %v1198_v28 = vpop.f32.mrb[23].mxu1  ;;  %v1207_v11 = vadd.f32 %v1196_v22, %v1112_v42  ;;  %v1211_v14 = vmul.f32 0.5, %v1203_v43 }
 0x5ee   :  { %v1210_v29 = vmul.f32 0.5, %v1202_v20  ;;  %v1206_v30 = vadd.f32 %v1155_v26, %v1111_v17  ;;  %v1208_v54 = vadd.f32 %v1198_v28, %v1113_v31 }
 0x5ef   :  { %1805 = vtanh.f32 %v1209_v23  ;;  %v1212_v36 = vmul.f32 0.5, %v1205_v24  ;;  %v1214_v16 = vmul.f32 0.5, %v1207_v11 }
 0x5f0   :  { %v1213_v38 = vmul.f32 0.5, %v1206_v30  ;;  %1807 = vtanh.f32 %v1210_v29 }
 0x5f1   :  { %1809 = vtanh.f32 %v1212_v36 }
 0x5f2   :  { %1811 = vtanh.f32 %v1204_v32 }
 0x5f3   :  { %1813 = vtanh.f32 %v1213_v38 }
 0x5f4   :  { %1815 = vtanh.f32 %v1208_v54 }
 0x5f5   :  { %1817 = vtanh.f32 %v1211_v14 }
 0x5f6   :  { %1819 = vtanh.f32 %v1214_v16 }
 0x5f9   :  { %v1806_v3 = vpop.eup %1805 }
 0x5fa   :  { %v1221_v12 = vmul.f32 0.5, %v1806_v3  ;;  %v1808_v15 = vpop.eup %1807 }
 0x5fb   :  { %v1810_v17 = vpop.eup %1809  ;;  %v1222_v18 = vmul.f32 0.5, %v1808_v15 }
 0x5fc   :  { %v1227_v63 = vadd.f32 0.5, %v1221_v12  ;;  %v1812_v41 = vpop.eup %1811  ;;  %v1224_v55 = vmul.f32 0.5, %v1810_v17 }
 0x5fd   :  { %v1814_v20 = vpop.eup %1813  ;;  %v1228_v13 = vadd.f32 0.5, %v1222_v18 }
 0x5fe   :  { %v1237_v21 = vmul.f32 %v1812_v41, %v1227_v63  ;;  %v1230_v23 = vadd.f32 0.5, %v1224_v55  ;;  %v1225_v19 = vmul.f32 0.5, %v1814_v20  ;;  %v1816_v37 = vpop.eup %1815 }
 0x5ff   :  { %v1235_v22 = vmul.f32 %v1228_v13, %v2472_v25  ;;  %v1818_v31 = vpop.eup %1817 }
 0x600   :  { %v1231_v24 = vadd.f32 0.5, %v1225_v19  ;;  %v1238_v26 = vmul.f32 %v1816_v37, %v1230_v23  ;;  %v1820_v32 = vpop.eup %1819  ;;  %v1223_v36 = vmul.f32 0.5, %v1818_v31 }
 0x601   :  { %v2606_v28 = vadd.f32 %v1237_v21, %v1235_v22  ;;  %v1226_v38 = vmul.f32 0.5, %v1820_v32 }
 0x602   :  { %v1236_v29 = vmul.f32 %v1231_v24, %v2476_v27  ;;  %v1229_v54 = vadd.f32 0.5, %v1223_v36 }
 0x603   :  { %1821 = vtanh.f32 %v2606_v28  ;;  %v1232_v42 = vadd.f32 0.5, %v1226_v38 }
 0x604   :  { %v2610_v30 = vadd.f32 %v1238_v26, %v1236_v29 }
 0x606   :  { %1823 = vtanh.f32 %v2610_v30 }
 0x60d   :  { %v1822_v9 = vpop.eup %1821 }
 0x60e   :  { %v1243_v43 = vmul.f32 %v1822_v9, %v1229_v54 }
 0x610   :  { %v1824_v25 = vpop.eup %1823 }
 0x611   :  { %v1244_v11 = vmul.f32 %v1824_v25, %v1232_v42 }
 0x613   :  { %v1258_v3 = vpack.c.bf16 %v1244_v11, %v1243_v43 }
 0x615   :  { %1292 = vmatmul.mubr.bf16.vlgmr.msra.gmra.mrb[24].mxu0 %v1258_v3  ;;  %1335 = vmatmul.mubr.bf16.vlgmr.msra.gmra.mrb[24].mxu1 %v1258_v3 }
 0x616   :  { %1404 = vmatpush1.bf16.msra.mxu0 %v2348_v40  ;;  %1447 = vmatpush1.bf16.msra.mxu1 %v2354_v57  ;;  %v74_v40 = vld [vmem:[%s2703_s0 + $0x1a0] sm:$0xff] }
 0x617   :  { %1405 = vmatprep.subr.bf16.mxu0 %v2360_v53  ;;  %1448 = vmatprep.subr.bf16.mxu1 %v2366_v58  ;;  %v72_v53 = vld [vmem:[%s2703_s0 + $0x188] sm:$0xff] }
 0x618   :  { %1435 = vmatprep.mubr.bf16.mxu0 %v1913_v0  ;;  %1478 = vmatprep.mubr.bf16.mxu1 %v1913_v0  ;;  %v70_v0 = vld [vmem:[%s2703_s0 + $0x180] sm:$0xff] }
 0x619   :  { %v1250_v57 = vunpack.c.l.bf16 %v70_v0  ;;  %v1251_v58 = vunpack.c.h.bf16 %v70_v0 }
 0x61a   :  { %1406 = vmatpush1.bf16.msra.mxu0 %v2374_v50  ;;  %1449 = vmatpush1.bf16.msra.mxu1 %v2380_v59  ;;  %v1254_v50 = vunpack.c.l.bf16 %v74_v40 }
 0x61b   :  { %1407 = vmatprep.subr.bf16.mxu0 %v2386_v62  ;;  %1450 = vmatprep.subr.bf16.mxu1 %v2392_v45  ;;  %v1255_v45 = vunpack.c.h.bf16 %v74_v40 }
 0x61e   :  { %1408 = vmatpush1.bf16.msra.mxu0 %v2398_v33  ;;  %1451 = vmatpush1.bf16.msra.mxu1 %v2404_v34 }
 0x61f   :  { %1409 = vmatprep.subr.bf16.mxu0 %v2410_v47  ;;  %1452 = vmatprep.subr.bf16.mxu1 %v2416_v52  ;;  %v1253_v47 = vunpack.c.h.bf16 %v72_v53 }
 0x622   :  { %1410 = vmatpush1.bf16.msra.mxu0 %v2422_v60  ;;  %1453 = vmatpush1.bf16.msra.mxu1 %v2497_v1  ;;  %v76_v60 = vld [vmem:[%s2703_s0 + $0x1a8] sm:$0xff] }
 0x623   :  { %1411 = vmatprep.subr.bf16.mxu0 %v2429_v35  ;;  %1454 = vmatprep.subr.bf16.mxu1 %v2504_v46 }
 0x626   :  { %1412 = vmatpush1.bf16.msra.mxu0 %v2510_v56  ;;  %1455 = vmatpush1.bf16.msra.mxu1 %v2516_v48 }
 0x627   :  { %1413 = vmatprep.subr.bf16.mxu0 %v2522_v39  ;;  %1456 = vmatprep.subr.bf16.mxu1 %v2528_v61 }
 0x62a   :  { %1414 = vmatpush1.bf16.msra.mxu0 %v2534_v51  ;;  %1457 = vmatpush1.bf16.msra.mxu1 %v2540_v49  ;;  %v1257_v49 = vunpack.c.h.bf16 %v76_v60 }
 0x62b   :  { %1415 = vmatprep.subr.bf16.mxu0 %v2546_v44  ;;  %1458 = vmatprep.subr.bf16.mxu1 %v2552_v2 }
 0x62e   :  { %1416 = vmatpush1.bf16.msra.mxu0 %v2558_v4  ;;  %1459 = vmatpush1.bf16.msra.mxu1 %v2564_v5  ;;  %v1252_v5 = vunpack.c.l.bf16 %v72_v53 }
 0x62f   :  { %1417 = vmatprep.subr.bf16.mxu0 %v2570_v6  ;;  %1460 = vmatprep.subr.bf16.mxu1 %v2576_v7  ;;  %v1256_v7 = vunpack.c.l.bf16 %v76_v60 }
 0x632   :  { %1418 = vmatpush1.bf16.msra.mxu0 %v2582_v8  ;;  %1461 = vmatpush1.bf16.msra.mxu1 %v2588_v10 }
 0x6e8   :  { %v1293_v59 = vpop.f32.mrb[24].mxu0  ;;  %v1336_v62 = vpop.f32.mrb[24].mxu1 }
 0x6e9   :  { %v1345_v33 = vadd.f32 %v1293_v59, %v1250_v57  ;;  %v1295_v34 = vpop.f32.mrb[25].mxu0  ;;  %v1338_v52 = vpop.f32.mrb[25].mxu1  ;;  %v1347_v8 = vadd.f32 %v1336_v62, %v1252_v5  ;;  %v1621_v57 = vld [vmem:[%s2704_s1 + $0x1f0] sm:$0xf]  ;;  %v1620_v62 = vld [vmem:[%s2704_s1 + $0x1d8] sm:$0xff] }
 0x6ea   :  { %v1346_v35 = vadd.f32 %v1295_v34, %v1251_v58  ;;  %v1297_v27 = vpop.f32.mrb[26].mxu0  ;;  %v1340_v1 = vpop.f32.mrb[26].mxu1  ;;  %v1348_v44 = vadd.f32 %v1338_v52, %v1253_v47  ;;  %v1550_v58 = vunpack.c.l.bf16 %v1621_v57  ;;  %v1548_v47 = vunpack.c.l.bf16 %v1620_v62 }
 0x6eb   :  { %v1353_v46 = vmul.f32 0.5, %v1345_v33  ;;  %v1349_v56 = vadd.f32 %v1297_v27, %v1254_v50  ;;  %v1299_v48 = vpop.f32.mrb[27].mxu0  ;;  %v1342_v39 = vpop.f32.mrb[27].mxu1  ;;  %v1351_v10 = vadd.f32 %v1340_v1, %v1256_v7  ;;  %v1355_v15 = vmul.f32 0.5, %v1347_v8 }
 0x6ec   :  { %v1354_v61 = vmul.f32 0.5, %v1346_v35  ;;  %v1350_v51 = vadd.f32 %v1299_v48, %v1255_v45  ;;  %v1352_v6 = vadd.f32 %v1342_v39, %v1257_v49  ;;  %v1555_v59 = vmul.f32 0.5, %v1550_v58  ;;  %v1622_v45 = vld [vmem:[%s2704_s1 + $0x1f8] sm:$0xff] }
 0x6ed   :  { %1825 = vtanh.f32 %v1353_v46  ;;  %v1356_v2 = vmul.f32 0.5, %v1349_v56  ;;  %v1358_v17 = vmul.f32 0.5, %v1351_v10  ;;  %v1549_v33 = vunpack.c.h.bf16 %v1620_v62 }
 0x6ee   :  { %v1357_v4 = vmul.f32 0.5, %v1350_v51  ;;  %1827 = vtanh.f32 %v1354_v61  ;;  %v1552_v34 = vunpack.c.h.bf16 %v1622_v45  ;;  %v1551_v52 = vunpack.c.l.bf16 %v1622_v45 }
 0x6ef   :  { %1829 = vtanh.f32 %v1356_v2  ;;  %v1554_v27 = vmul.f32 0.5, %v1548_v47 }
 0x6f0   :  { %1831 = vtanh.f32 %v1348_v44  ;;  %v1556_v1 = vmul.f32 0.5, %v1551_v52 }
 0x6f1   :  { %1833 = vtanh.f32 %v1357_v4 }
 0x6f2   :  { %1835 = vtanh.f32 %v1352_v6 }
 0x6f3   :  { %1837 = vtanh.f32 %v1355_v15 }
 0x6f4   :  { %1839 = vtanh.f32 %v1358_v17  ;;  %v82_v17 = vld [vmem:[%s2703_s0 + $0x1e0] sm:$0xff] }
 0x6f7   :  { %v1826_v12 = vpop.eup %1825 }
 0x6f8   :  { %v1365_v14 = vmul.f32 0.5, %v1826_v12  ;;  %v1828_v16 = vpop.eup %1827 }
 0x6f9   :  { %v1830_v63 = vpop.eup %1829  ;;  %v1366_v41 = vmul.f32 0.5, %v1828_v16  ;;  %v78_v16 = vld [vmem:[%s2703_s0 + $0x1c0] sm:$0xff] }
 0x6fa   :  { %v1371_v18 = vadd.f32 0.5, %v1365_v14  ;;  %v1832_v55 = vpop.eup %1831  ;;  %v1368_v20 = vmul.f32 0.5, %v1830_v63  ;;  %v1394_v63 = vunpack.c.l.bf16 %v78_v16 }
 0x6fb   :  { %v1834_v13 = vpop.eup %1833  ;;  %v1372_v21 = vadd.f32 0.5, %v1366_v41  ;;  %v1395_v41 = vunpack.c.h.bf16 %v78_v16 }
 0x6fc   :  { %v1381_v23 = vmul.f32 %v1832_v55, %v1371_v18  ;;  %v1374_v19 = vadd.f32 0.5, %v1368_v20  ;;  %v1369_v37 = vmul.f32 0.5, %v1834_v13  ;;  %v1836_v22 = vpop.eup %1835  ;;  %v80_v18 = vld [vmem:[%s2703_s0 + $0x1c8] sm:$0xff]  ;;  %v1398_v55 = vunpack.c.l.bf16 %v82_v17 }
 0x6fd   :  { %v1379_v24 = vmul.f32 %v1372_v21, %v2606_v28  ;;  %v1838_v38 = vpop.eup %1837  ;;  %v1399_v21 = vunpack.c.h.bf16 %v82_v17 }
 0x6fe   :  { %v1375_v26 = vadd.f32 0.5, %v1369_v37  ;;  %v1382_v29 = vmul.f32 %v1836_v22, %v1374_v19  ;;  %v1840_v9 = vpop.eup %1839  ;;  %v1367_v54 = vmul.f32 0.5, %v1838_v38  ;;  %v1397_v37 = vunpack.c.h.bf16 %v80_v18 }
 0x6ff   :  { %v2658_v31 = vadd.f32 %v1381_v23, %v1379_v24  ;;  %v1370_v42 = vmul.f32 0.5, %v1840_v9  ;;  %v84_v24 = vld [vmem:[%s2703_s0 + $0x1e8] sm:$0xff] }
 0x700   :  { %v1380_v32 = vmul.f32 %v1375_v26, %v2610_v30  ;;  %v1373_v43 = vadd.f32 0.5, %v1367_v54  ;;  %v1619_v30 = vld [vmem:[%s2704_s1 + $0x1d0] sm:$0xf]  ;;  %v1400_v57 = vunpack.c.l.bf16 %v84_v24 }
 0x701   :  { %1841 = vtanh.f32 %v2658_v31  ;;  %v1376_v11 = vadd.f32 0.5, %v1370_v42  ;;  %v1547_v53 = vunpack.c.l.bf16 %v1619_v30 }
 0x702   :  { %v2662_v36 = vadd.f32 %v1382_v29, %v1380_v32 }
 0x703   :  { %v1553_v50 = vmul.f32 0.5, %v1547_v53 }
 0x704   :  { %1843 = vtanh.f32 %v2662_v36 }
 0x705   :  { %1845 = vtanh.f32 %v1553_v50 }
 0x706   :  { %1847 = vtanh.f32 %v1555_v59 }
 0x707   :  { %1849 = vtanh.f32 %v1549_v33 }
 0x708   :  { %1851 = vtanh.f32 %v1552_v34 }
 0x709   :  { %1853 = vtanh.f32 %v1554_v27 }
 0x70a   :  { %1855 = vtanh.f32 %v1556_v1 }
 0x70b   :  { %v1842_v25 = vpop.eup %1841 }
 0x70c   :  { %v1387_v3 = vmul.f32 %v1842_v25, %v1373_v43 }
 0x70e   :  { %v1844_v28 = vpop.eup %1843 }
 0x70f   :  { %v1388_v0 = vmul.f32 %v1844_v28, %v1376_v11  ;;  %v1846_v60 = vpop.eup %1845  ;;  %v1401_v11 = vunpack.c.h.bf16 %v84_v24 }
 0x710   :  { %v1848_v35 = vpop.eup %1847  ;;  %v1561_v46 = vmul.f32 0.5, %v1846_v60 }
 0x711   :  { %v1402_v40 = vpack.c.bf16 %v1388_v0, %v1387_v3  ;;  %v1563_v56 = vmul.f32 0.5, %v1848_v35  ;;  %v1850_v39 = vpop.eup %1849  ;;  %v1396_v0 = vunpack.c.l.bf16 %v80_v18 }
 0x712   :  { %v1565_v48 = vadd.f32 0.5, %v1561_v46  ;;  %v1852_v51 = vpop.eup %1851 }
 0x713   :  { %1436 = vmatmul.mubr.bf16.vlgmr.msra.gmra.mrb[28].mxu0 %v1402_v40  ;;  %1479 = vmatmul.mubr.bf16.vlgmr.msra.gmra.mrb[28].mxu1 %v1402_v40  ;;  %v1567_v61 = vadd.f32 0.5, %v1563_v56  ;;  %v1854_v2 = vpop.eup %1853 }
 0x714   :  { %v1571_v49 = vmul.f32 %v1850_v39, %v1565_v48  ;;  %v1856_v4 = vpop.eup %1855  ;;  %v1562_v5 = vmul.f32 0.5, %v1854_v2 }
 0x715   :  { %v1572_v44 = vmul.f32 %v1852_v51, %v1567_v61  ;;  %v1564_v6 = vmul.f32 0.5, %v1856_v4 }
 0x716   :  { %1857 = vtanh.f32 %v1571_v49  ;;  %v1566_v7 = vadd.f32 0.5, %v1562_v5 }
 0x717   :  { %1859 = vtanh.f32 %v1572_v44  ;;  %v1568_v10 = vadd.f32 0.5, %v1564_v6 }
 0x720   :  { %v1858_v8 = vpop.eup %1857 }
 0x721   :  { %v1860_v12 = vpop.eup %1859  ;;  %v1575_v14 = vmul.f32 %v1858_v8, %v1566_v7 }
 0x722   :  { %v1576_v15 = vmul.f32 %v1860_v12, %v1568_v10 }
 0x723   :  { %1577 = vst [vmem:[%s2706_s3 + $0x8] sm:$0xff] %v1575_v14 }
 0x724   :  { %1578 = vst [vmem:[%s2706_s3 + $0x18] sm:$0xff] %v1576_v15 }
 0x7e6   :  { %v1437_v20 = vpop.f32.mrb[28].mxu0  ;;  %v1480_v13 = vpop.f32.mrb[28].mxu1 }
 0x7e7   :  { %v1489_v23 = vadd.f32 %v1437_v20, %v1394_v63  ;;  %v1439_v19 = vpop.f32.mrb[29].mxu0  ;;  %v1482_v22 = vpop.f32.mrb[29].mxu1  ;;  %v1491_v53 = vadd.f32 %v1480_v13, %v1396_v0 }
 0x7e8   :  { %v1490_v26 = vadd.f32 %v1439_v19, %v1395_v41  ;;  %v1441_v29 = vpop.f32.mrb[30].mxu0  ;;  %v1484_v32 = vpop.f32.mrb[30].mxu1  ;;  %v1492_v28 = vadd.f32 %v1482_v22, %v1397_v37 }
 0x7e9   :  { %v1497_v38 = vmul.f32 0.5, %v1489_v23  ;;  %v1493_v9 = vadd.f32 %v1441_v29, %v1398_v55  ;;  %v1443_v54 = vpop.f32.mrb[31].mxu0  ;;  %v1486_v42 = vpop.f32.mrb[31].mxu1  ;;  %v1495_v58 = vadd.f32 %v1484_v32, %v1400_v57  ;;  %v1499_v50 = vmul.f32 0.5, %v1491_v53 }
 0x7ea   :  { %v1498_v25 = vmul.f32 0.5, %v1490_v26  ;;  %v1494_v43 = vadd.f32 %v1443_v54, %v1399_v21  ;;  %v1496_v30 = vadd.f32 %v1486_v42, %v1401_v11 }
 0x7eb   :  { %1861 = vtanh.f32 %v1497_v38  ;;  %v1500_v3 = vmul.f32 0.5, %v1493_v9  ;;  %v1502_v33 = vmul.f32 0.5, %v1495_v58 }
 0x7ec   :  { %v1501_v40 = vmul.f32 0.5, %v1494_v43  ;;  %1863 = vtanh.f32 %v1498_v25 }
 0x7ed   :  { %1865 = vtanh.f32 %v1500_v3 }
 0x7ee   :  { %1867 = vtanh.f32 %v1492_v28 }
 0x7ef   :  { %1869 = vtanh.f32 %v1501_v40 }
 0x7f0   :  { %1871 = vtanh.f32 %v1496_v30 }
 0x7f1   :  { %1873 = vtanh.f32 %v1499_v50 }
 0x7f2   :  { %1875 = vtanh.f32 %v1502_v33 }
 0x7f5   :  { %v1862_v59 = vpop.eup %1861 }
 0x7f6   :  { %v1509_v62 = vmul.f32 0.5, %v1862_v59  ;;  %v1864_v45 = vpop.eup %1863 }
 0x7f7   :  { %v1866_v34 = vpop.eup %1865  ;;  %v1510_v52 = vmul.f32 0.5, %v1864_v45 }
 0x7f8   :  { %v1515_v47 = vadd.f32 0.5, %v1509_v62  ;;  %v1868_v60 = vpop.eup %1867  ;;  %v1512_v35 = vmul.f32 0.5, %v1866_v34 }
 0x7f9   :  { %v1870_v27 = vpop.eup %1869  ;;  %v1516_v1 = vadd.f32 0.5, %v1510_v52 }
 0x7fa   :  { %v1525_v46 = vmul.f32 %v1868_v60, %v1515_v47  ;;  %v1518_v56 = vadd.f32 0.5, %v1512_v35  ;;  %v1513_v48 = vmul.f32 0.5, %v1870_v27  ;;  %v1872_v39 = vpop.eup %1871 }
 0x7fb   :  { %v1523_v61 = vmul.f32 %v1516_v1, %v2658_v31  ;;  %v1874_v5 = vpop.eup %1873 }
 0x7fc   :  { %v1519_v51 = vadd.f32 0.5, %v1513_v48  ;;  %v1526_v49 = vmul.f32 %v1872_v39, %v1518_v56  ;;  %v1876_v6 = vpop.eup %1875  ;;  %v1511_v7 = vmul.f32 0.5, %v1874_v5 }
 0x7fd   :  { %v1527_v44 = vadd.f32 %v1525_v46, %v1523_v61  ;;  %v1514_v8 = vmul.f32 0.5, %v1876_v6 }
 0x7fe   :  { %v1524_v2 = vmul.f32 %v1519_v51, %v2662_v36  ;;  %v1517_v10 = vadd.f32 0.5, %v1511_v7 }
 0x7ff   :  { %1877 = vtanh.f32 %v1527_v44  ;;  %v1520_v15 = vadd.f32 0.5, %v1514_v8 }
 0x800   :  { %v1528_v4 = vadd.f32 %v1526_v49, %v1524_v2 }
 0x802   :  { %1879 = vtanh.f32 %v1528_v4 }
 0x809   :  { %v1878_v12 = vpop.eup %1877 }
 0x80a   :  { %v1531_v14 = vmul.f32 %v1878_v12, %v1517_v10 }
 0x80c   :  { %v1880_v16 = vpop.eup %1879  ;;  %1540 = vst [vmem:[%s2706_s3] sm:$0xff] %v1531_v14 }
 0x80d   :  { %v1532_v31 = vmul.f32 %v1880_v16, %v1520_v15 }
 0x80f   :  { %1541 = vst [vmem:[%s2706_s3 + $0x10] sm:$0xff] %v1532_v31 }

// kernel: bilstm_forward.7
= control target key start
LH: loop header
LB: loop body
LE: loop exit
PB: predicated region body
PF: predicated region fallthrough
CT: control target
= control target key end

     0   :  { %v2860_v3 = vmov 0   ;;  %s3812_s3 = inlined_call_operand.vmem [shape: bf16[128,1024], index: 3, kind: input, shape index: {}]   ;;  %s3813_s1 = inlined_call_operand.vmem [shape: bf16[128,128], index: 1, kind: input, shape index: {}]   ;;  %s3814_s0 = inlined_call_operand.vmem [shape: bf16[128,128], index: 0, kind: input, shape index: {}]   ;;  %s3815_s2 = inlined_call_operand.vmem [shape: bf16[128,1024], index: 2, kind: input, shape index: {}]   ;;  %s3816_s4 = inlined_call_operand.vmem [shape: f32[1,1024], index: 4, kind: input, shape index: {}]   ;;  %s3817_s5 = inlined_call_operand.vmem [shape: bf16[128,1024], index: 5, kind: output, shape index: {}]  }
   0x1   :  { %v117_v0 = vld [vmem:[%s3812_s3] sm:$0xff]  ;;  %v118_v2 = vld [vmem:[%s3812_s3 + $0x8] sm:$0xff]  ;;  %581 = vmatprep.mubr.bf16.mxu0 %v2860_v3  ;;  %694 = vmatprep.mubr.bf16.mxu1 %v2860_v3  ;;  %v119_v63 = vld [vmem:[%s3812_s3 + $0x10] sm:$0xff] }
   0x2   :  { %v121_v1 = vld [vmem:[%s3812_s3 + $0x20] sm:$0xff]  ;;  %v122_v5 = vld [vmem:[%s3812_s3 + $0x28] sm:$0xff] }
   0x3   :  { %v2452_v4 = vcombine.high %v117_v0, %v121_v1  ;;  %v2451_v6 = vcombine.low %v117_v0, %v121_v1  ;;  %v125_v7 = vld [vmem:[%s3812_s3 + $0x40] sm:$0xff]  ;;  %v2454_v9 = vcombine.high %v118_v2, %v122_v5  ;;  %v2453_v10 = vcombine.low %v118_v2, %v122_v5  ;;  %v126_v12 = vld [vmem:[%s3812_s3 + $0x48] sm:$0xff]  ;;  %v123_v0 = vld [vmem:[%s3812_s3 + $0x30] sm:$0xff] }
   0x4   :  { %v129_v8 = vld [vmem:[%s3812_s3 + $0x60] sm:$0xff]  ;;  %v130_v13 = vld [vmem:[%s3812_s3 + $0x68] sm:$0xff]  ;;  %v120_v1 = vld [vmem:[%s3812_s3 + $0x18] sm:$0xff] }
   0x5   :  { %v2460_v11 = vcombine.high %v125_v7, %v129_v8  ;;  %v133_v14 = vld [vmem:[%s3812_s3 + $0x80] sm:$0xff]  ;;  %549 = vmatprep.subr.bf16.mxu0 %v2452_v4  ;;  %v2462_v15 = vcombine.high %v126_v12, %v130_v13  ;;  %v134_v17 = vld [vmem:[%s3812_s3 + $0x88] sm:$0xff]  ;;  %662 = vmatprep.subr.bf16.mxu1 %v2454_v9  ;;  %v2459_v19 = vcombine.low %v125_v7, %v129_v8  ;;  %v124_v2 = vld [vmem:[%s3812_s3 + $0x38] sm:$0xff] }
   0x6   :  { %v137_v16 = vld [vmem:[%s3812_s3 + $0xa0] sm:$0xff]  ;;  %v138_v18 = vld [vmem:[%s3812_s3 + $0xa8] sm:$0xff]  ;;  %550 = vmatpush1.bf16.msra.mxu0 %v2451_v6  ;;  %663 = vmatpush1.bf16.msra.mxu1 %v2453_v10  ;;  %v2461_v20 = vcombine.low %v126_v12, %v130_v13  ;;  %v2456_v6 = vcombine.high %v119_v63, %v123_v0  ;;  %v2458_v7 = vcombine.high %v120_v1, %v124_v2  ;;  %v127_v9 = vld [vmem:[%s3812_s3 + $0x50] sm:$0xff] }
   0x7   :  { %551 = vmatprep.subr.bf16.mxu0 %v2460_v11  ;;  %v2468_v21 = vcombine.high %v133_v14, %v137_v16  ;;  %664 = vmatprep.subr.bf16.mxu1 %v2462_v15  ;;  %v2470_v22 = vcombine.high %v134_v17, %v138_v18  ;;  %v141_v23 = vld [vmem:[%s3812_s3 + $0xc0] sm:$0xff]  ;;  %v142_v25 = vld [vmem:[%s3812_s3 + $0xc8] sm:$0xff]  ;;  %v2467_v27 = vcombine.low %v133_v14, %v137_v16  ;;  %v131_v10 = vld [vmem:[%s3812_s3 + $0x70] sm:$0xff] }
   0x8   :  { %v145_v24 = vld [vmem:[%s3812_s3 + $0xe0] sm:$0xff]  ;;  %v146_v26 = vld [vmem:[%s3812_s3 + $0xe8] sm:$0xff]  ;;  %v2469_v28 = vcombine.low %v134_v17, %v138_v18  ;;  %v2455_v11 = vcombine.low %v119_v63, %v123_v0  ;;  %v128_v12 = vld [vmem:[%s3812_s3 + $0x58] sm:$0xff]  ;;  %v2457_v14 = vcombine.low %v120_v1, %v124_v2  ;;  %v2464_v15 = vcombine.high %v127_v9, %v131_v10 }
   0x9   :  { %v2476_v29 = vcombine.high %v141_v23, %v145_v24  ;;  %v2478_v30 = vcombine.high %v142_v25, %v146_v26  ;;  %v149_v31 = vld [vmem:[%s3812_s3 + $0x100] sm:$0xff]  ;;  %v150_v33 = vld [vmem:[%s3812_s3 + $0x108] sm:$0xff]  ;;  %v2475_v35 = vcombine.low %v141_v23, %v145_v24  ;;  %v2477_v36 = vcombine.low %v142_v25, %v146_v26  ;;  %v132_v13 = vld [vmem:[%s3812_s3 + $0x78] sm:$0xff] }
   0xa   :  { %552 = vmatpush1.bf16.msra.mxu0 %v2459_v19  ;;  %665 = vmatpush1.bf16.msra.mxu1 %v2461_v20  ;;  %v153_v32 = vld [vmem:[%s3812_s3 + $0x120] sm:$0xff]  ;;  %v154_v34 = vld [vmem:[%s3812_s3 + $0x128] sm:$0xff]  ;;  %v135_v16 = vld [vmem:[%s3812_s3 + $0x90] sm:$0xff]  ;;  %v2466_v18 = vcombine.high %v128_v12, %v132_v13 }
   0xb   :  { %553 = vmatprep.subr.bf16.mxu0 %v2468_v21  ;;  %666 = vmatprep.subr.bf16.mxu1 %v2470_v22  ;;  %v2484_v37 = vcombine.high %v149_v31, %v153_v32  ;;  %v2486_v38 = vcombine.high %v150_v33, %v154_v34  ;;  %v157_v39 = vld [vmem:[%s3812_s3 + $0x140] sm:$0xff]  ;;  %v158_v41 = vld [vmem:[%s3812_s3 + $0x148] sm:$0xff]  ;;  %v2483_v43 = vcombine.low %v149_v31, %v153_v32  ;;  %v139_v17 = vld [vmem:[%s3812_s3 + $0xb0] sm:$0xff] }
   0xc   :  { %v161_v40 = vld [vmem:[%s3812_s3 + $0x160] sm:$0xff]  ;;  %v162_v42 = vld [vmem:[%s3812_s3 + $0x168] sm:$0xff]  ;;  %v2485_v44 = vcombine.low %v150_v33, %v154_v34  ;;  %v136_v19 = vld [vmem:[%s3812_s3 + $0x98] sm:$0xff]  ;;  %v2463_v21 = vcombine.low %v127_v9, %v131_v10  ;;  %v2465_v22 = vcombine.low %v128_v12, %v132_v13  ;;  %v2472_v23 = vcombine.high %v135_v16, %v139_v17 }
   0xd   :  { %v2492_v45 = vcombine.high %v157_v39, %v161_v40  ;;  %v2494_v46 = vcombine.high %v158_v41, %v162_v42  ;;  %v165_v47 = vld [vmem:[%s3812_s3 + $0x180] sm:$0xff]  ;;  %v166_v49 = vld [vmem:[%s3812_s3 + $0x188] sm:$0xff]  ;;  %v2491_v51 = vcombine.low %v157_v39, %v161_v40  ;;  %v2493_v52 = vcombine.low %v158_v41, %v162_v42  ;;  %v140_v20 = vld [vmem:[%s3812_s3 + $0xb8] sm:$0xff] }
   0xe   :  { %554 = vmatpush1.bf16.msra.mxu0 %v2467_v27  ;;  %667 = vmatpush1.bf16.msra.mxu1 %v2469_v28  ;;  %v169_v48 = vld [vmem:[%s3812_s3 + $0x1a0] sm:$0xff]  ;;  %v170_v50 = vld [vmem:[%s3812_s3 + $0x1a8] sm:$0xff]  ;;  %v2474_v25 = vcombine.high %v136_v19, %v140_v20  ;;  %v143_v26 = vld [vmem:[%s3812_s3 + $0xd0] sm:$0xff]  ;;  %v2473_v31 = vcombine.low %v136_v19, %v140_v20 }
   0xf   :  { %555 = vmatprep.subr.bf16.mxu0 %v2476_v29  ;;  %668 = vmatprep.subr.bf16.mxu1 %v2478_v30  ;;  %v2500_v53 = vcombine.high %v165_v47, %v169_v48  ;;  %v173_v54 = vld [vmem:[%s3812_s3 + $0x1c0] sm:$0xff]  ;;  %v2502_v55 = vcombine.high %v166_v49, %v170_v50  ;;  %v174_v57 = vld [vmem:[%s3812_s3 + $0x1c8] sm:$0xff]  ;;  %v2499_v59 = vcombine.low %v165_v47, %v169_v48  ;;  %v147_v27 = vld [vmem:[%s3812_s3 + $0xf0] sm:$0xff] }
  0x10   :  { %v177_v56 = vld [vmem:[%s3812_s3 + $0x1e0] sm:$0xff]  ;;  %v178_v58 = vld [vmem:[%s3812_s3 + $0x1e8] sm:$0xff]  ;;  %v2501_v60 = vcombine.low %v166_v49, %v170_v50  ;;  %v144_v28 = vld [vmem:[%s3812_s3 + $0xd8] sm:$0xff]  ;;  %v2471_v30 = vcombine.low %v135_v16, %v139_v17  ;;  %v2480_v32 = vcombine.high %v143_v26, %v147_v27  ;;  %v2479_v39 = vcombine.low %v143_v26, %v147_v27 }
  0x11   :  { %v2508_v61 = vcombine.high %v173_v54, %v177_v56  ;;  %v2510_v62 = vcombine.high %v174_v57, %v178_v58  ;;  %v2507_v4 = vcombine.low %v173_v54, %v177_v56  ;;  %v2509_v5 = vcombine.low %v174_v57, %v178_v58  ;;  %v3004_v8 = vld [vmem:[%s3813_s1] sm:$0xff]   ;;  %v3037_v24 = vld [vmem:[%s3813_s1 + $0x8] sm:$0xff]   ;;  %v148_v29 = vld [vmem:[%s3812_s3 + $0xf8] sm:$0xff] }
  0x12   :  { %556 = vmatpush1.bf16.msra.mxu0 %v2475_v35  ;;  %669 = vmatpush1.bf16.msra.mxu1 %v2477_v36  ;;  %v151_v33 = vld [vmem:[%s3812_s3 + $0x110] sm:$0xff]  ;;  %v2482_v34 = vcombine.high %v144_v28, %v148_v29  ;;  %v152_v36 = vld [vmem:[%s3812_s3 + $0x118] sm:$0xff]  ;;  %v2481_v42 = vcombine.low %v144_v28, %v148_v29  ;;  %v42_v9 = vld [vmem:[%s3815_s2 + $0x28] sm:$0xff] }
  0x13   :  { %557 = vmatprep.subr.bf16.mxu0 %v2484_v37  ;;  %670 = vmatprep.subr.bf16.mxu1 %v2486_v38  ;;  %v155_v35 = vld [vmem:[%s3812_s3 + $0x130] sm:$0xff]  ;;  %v156_v37 = vld [vmem:[%s3812_s3 + $0x138] sm:$0xff]  ;;  %v3136_v13 = vld [vmem:[%s3813_s1 + $0x20] sm:$0xff]  }
  0x14   :  { %v3070_v38 = vld [vmem:[%s3813_s1 + $0x10] sm:$0xff]   ;;  %v2487_v47 = vcombine.low %v151_v33, %v155_v35  ;;  %v2489_v48 = vcombine.low %v152_v36, %v156_v37  ;;  %v172_v54 = vld [vmem:[%s3812_s3 + $0x1b8] sm:$0xff]  ;;  %v49_v19 = vld [vmem:[%s3815_s2 + $0x60] sm:$0xff] }
  0x15   :  { %v159_v40 = vld [vmem:[%s3812_s3 + $0x150] sm:$0xff]  ;;  %v3103_v58 = vld [vmem:[%s3813_s1 + $0x18] sm:$0xff]   ;;  %v53_v26 = vld [vmem:[%s3815_s2 + $0x80] sm:$0xff] }
  0x16   :  { %558 = vmatpush1.bf16.msra.mxu0 %v2483_v43  ;;  %671 = vmatpush1.bf16.msra.mxu1 %v2485_v44  ;;  %v163_v41 = vld [vmem:[%s3812_s3 + $0x170] sm:$0xff]  ;;  %v2488_v43 = vcombine.high %v151_v33, %v155_v35  ;;  %v160_v44 = vld [vmem:[%s3812_s3 + $0x158] sm:$0xff]  ;;  %v57_v27 = vld [vmem:[%s3815_s2 + $0xa0] sm:$0xff] }
  0x17   :  { %559 = vmatprep.subr.bf16.mxu0 %v2492_v45  ;;  %672 = vmatprep.subr.bf16.mxu1 %v2494_v46  ;;  %v164_v45 = vld [vmem:[%s3812_s3 + $0x178] sm:$0xff]  ;;  %v2490_v46 = vcombine.high %v152_v36, %v156_v37  ;;  %v2496_v49 = vcombine.high %v159_v40, %v163_v41  ;;  %v3154_v16 = vld [vmem:[%s3813_s1 + $0x30] sm:$0xff]   ;;  %v54_v29 = vld [vmem:[%s3815_s2 + $0x88] sm:$0xff]  ;;  %v2540_v33 = vcombine.high %v53_v26, %v57_v27 }
  0x18   :  { %v2498_v50 = vcombine.high %v160_v44, %v164_v45  ;;  %v2497_v56 = vcombine.low %v160_v44, %v164_v45  ;;  %v180_v63 = vld [vmem:[%s3812_s3 + $0x1f8] sm:$0xff]  ;;  %v61_v35 = vld [vmem:[%s3815_s2 + $0xc0] sm:$0xff]  ;;  %v62_v36 = vld [vmem:[%s3815_s2 + $0xc8] sm:$0xff] }
  0x19   :  { %v3163_v17 = vld [vmem:[%s3813_s1 + $0x38] sm:$0xff]   ;;  %v66_v37 = vld [vmem:[%s3815_s2 + $0xe8] sm:$0xff]  ;;  %v73_v44 = vld [vmem:[%s3815_s2 + $0x120] sm:$0xff] }
  0x1a   :  { %560 = vmatpush1.bf16.msra.mxu0 %v2491_v51  ;;  %673 = vmatpush1.bf16.msra.mxu1 %v2493_v52  ;;  %v167_v51 = vld [vmem:[%s3812_s3 + $0x190] sm:$0xff]  ;;  %v70_v45 = vld [vmem:[%s3815_s2 + $0x108] sm:$0xff] }
  0x1b   :  { %561 = vmatprep.subr.bf16.mxu0 %v2500_v53  ;;  %674 = vmatprep.subr.bf16.mxu1 %v2502_v55  ;;  %v171_v52 = vld [vmem:[%s3812_s3 + $0x1b0] sm:$0xff]  ;;  %v168_v53 = vld [vmem:[%s3812_s3 + $0x198] sm:$0xff]  ;;  %v2495_v55 = vcombine.low %v159_v40, %v163_v41 }
  0x1c   :  { %v2504_v57 = vcombine.high %v167_v51, %v171_v52  ;;  %v2503_v0 = vcombine.low %v167_v51, %v171_v52  ;;  %v2505_v1 = vcombine.low %v168_v53, %v172_v54  ;;  %v81_v51 = vld [vmem:[%s3815_s2 + $0x160] sm:$0xff]  ;;  %v78_v52 = vld [vmem:[%s3815_s2 + $0x148] sm:$0xff] }
  0x1e   :  { %562 = vmatpush1.bf16.msra.mxu0 %v2499_v59  ;;  %675 = vmatpush1.bf16.msra.mxu1 %v2501_v60  ;;  %v2506_v59 = vcombine.high %v168_v53, %v172_v54  ;;  %v175_v60 = vld [vmem:[%s3812_s3 + $0x1d0] sm:$0xff]  ;;  %v82_v53 = vld [vmem:[%s3815_s2 + $0x168] sm:$0xff] }
  0x1f   :  { %563 = vmatprep.subr.bf16.mxu0 %v2508_v61  ;;  %676 = vmatprep.subr.bf16.mxu1 %v2510_v62  ;;  %v179_v61 = vld [vmem:[%s3812_s3 + $0x1f0] sm:$0xff]  ;;  %v176_v62 = vld [vmem:[%s3812_s3 + $0x1d8] sm:$0xff] }
  0x20   :  { %v2512_v2 = vcombine.high %v175_v60, %v179_v61  ;;  %v2511_v10 = vcombine.low %v175_v60, %v179_v61  ;;  %v89_v60 = vld [vmem:[%s3815_s2 + $0x1a0] sm:$0xff]  ;;  %v86_v61 = vld [vmem:[%s3815_s2 + $0x188] sm:$0xff] }
  0x22   :  { %564 = vmatpush1.bf16.msra.mxu0 %v2507_v4  ;;  %677 = vmatpush1.bf16.msra.mxu1 %v2509_v5  ;;  %v2514_v4 = vcombine.high %v176_v62, %v180_v63  ;;  %v37_v5 = vld [vmem:[%s3815_s2] sm:$0xff] }
  0x23   :  { %775 = vmatprep.subr.bf16.mxu0 %v2456_v6  ;;  %888 = vmatprep.subr.bf16.mxu1 %v2458_v7  ;;  %v41_v6 = vld [vmem:[%s3815_s2 + $0x20] sm:$0xff]  ;;  %v38_v7 = vld [vmem:[%s3815_s2 + $0x8] sm:$0xff] }
  0x24   :  { %v2524_v12 = vcombine.high %v37_v5, %v41_v6  ;;  %v2523_v20 = vcombine.low %v37_v5, %v41_v6  ;;  %v94_v5 = vld [vmem:[%s3815_s2 + $0x1c8] sm:$0xff] }
  0x25   :  { %582 = vmatmul.mubr.bf16.vlgmr.msra.gmra.mrb[0].mxu0 %v3004_v8  ;;  %695 = vmatmul.mubr.bf16.vlgmr.msra.gmra.mrb[0].mxu1 %v3004_v8  ;;  %v98_v6 = vld [vmem:[%s3815_s2 + $0x1e8] sm:$0xff] }
  0x26   :  { %776 = vmatpush1.bf16.msra.mxu0 %v2455_v11  ;;  %889 = vmatpush1.bf16.msra.mxu1 %v2457_v14  ;;  %v2513_v11 = vcombine.low %v176_v62, %v180_v63  ;;  %v2526_v14 = vcombine.high %v38_v7, %v42_v9  ;;  %v90_v62 = vld [vmem:[%s3815_s2 + $0x1a8] sm:$0xff] }
  0x27   :  { %591 = vmatprep.mubr.bf16.mxu0 %v2860_v3  ;;  %704 = vmatprep.mubr.bf16.mxu1 %v2860_v3 }
  0x28   :  { %777 = vmatprep.subr.bf16.mxu0 %v2464_v15  ;;  %890 = vmatprep.subr.bf16.mxu1 %v2466_v18  ;;  %v3145_v15 = vld [vmem:[%s3813_s1 + $0x28] sm:$0xff]   ;;  %v45_v18 = vld [vmem:[%s3815_s2 + $0x40] sm:$0xff] }
  0x2a   :  { %778 = vmatpush1.bf16.msra.mxu0 %v2463_v21  ;;  %891 = vmatpush1.bf16.msra.mxu1 %v2465_v22  ;;  %v46_v21 = vld [vmem:[%s3815_s2 + $0x48] sm:$0xff] }
  0x2b   :  { %779 = vmatprep.subr.bf16.mxu0 %v2472_v23  ;;  %892 = vmatprep.subr.bf16.mxu1 %v2474_v25  ;;  %v50_v22 = vld [vmem:[%s3815_s2 + $0x68] sm:$0xff]  ;;  %v2525_v23 = vcombine.low %v38_v7, %v42_v9  ;;  %v2532_v25 = vcombine.high %v45_v18, %v49_v19  ;;  %v2573_v9 = vcombine.low %v86_v61, %v90_v62 }
  0x2c   :  { %v2534_v28 = vcombine.high %v46_v21, %v50_v22 }
  0x2d   :  { %592 = vmatmul.mubr.bf16.gmra.mrb[4].mxu0 %v3037_v24  ;;  %705 = vmatmul.mubr.bf16.gmra.mrb[4].mxu1 %v3037_v24 }
  0x2e   :  { %601 = vmatprep.mubr.bf16.mxu0 %v2860_v3  ;;  %714 = vmatprep.mubr.bf16.mxu1 %v2860_v3 }
  0x2f   :  { %780 = vmatpush1.bf16.msra.mxu0 %v2471_v30  ;;  %893 = vmatpush1.bf16.msra.mxu1 %v2473_v31  ;;  %v58_v30 = vld [vmem:[%s3815_s2 + $0xa8] sm:$0xff]  ;;  %v2531_v31 = vcombine.low %v45_v18, %v49_v19  ;;  %v40_v18 = vld [vmem:[%s3815_s2 + $0x18] sm:$0xff] }
  0x30   :  { %781 = vmatprep.subr.bf16.mxu0 %v2480_v32  ;;  %894 = vmatprep.subr.bf16.mxu1 %v2482_v34  ;;  %v2533_v32 = vcombine.low %v46_v21, %v50_v22  ;;  %v2542_v34 = vcombine.high %v54_v29, %v58_v30  ;;  %v2541_v40 = vcombine.low %v54_v29, %v58_v30  ;;  %v44_v19 = vld [vmem:[%s3815_s2 + $0x38] sm:$0xff]  ;;  %v59_v29 = vld [vmem:[%s3815_s2 + $0xb0] sm:$0xff] }
  0x31   :  { %v2581_v21 = vcombine.low %v94_v5, %v98_v6 }
  0x33   :  { %782 = vmatpush1.bf16.msra.mxu0 %v2479_v39  ;;  %895 = vmatpush1.bf16.msra.mxu1 %v2481_v42  ;;  %v2539_v39 = vcombine.low %v53_v26, %v57_v27  ;;  %v2550_v42 = vcombine.high %v62_v36, %v66_v37  ;;  %v2529_v26 = vcombine.low %v40_v18, %v44_v19 }
  0x34   :  { %783 = vmatprep.subr.bf16.mxu0 %v2488_v43  ;;  %896 = vmatprep.subr.bf16.mxu1 %v2490_v46  ;;  %v69_v43 = vld [vmem:[%s3815_s2 + $0x100] sm:$0xff]  ;;  %v74_v46 = vld [vmem:[%s3815_s2 + $0x128] sm:$0xff] }
  0x35   :  { %602 = vmatmul.mubr.bf16.gmra.mrb[8].mxu0 %v3070_v38  ;;  %715 = vmatmul.mubr.bf16.gmra.mrb[8].mxu1 %v3070_v38  ;;  %v2555_v54 = vcombine.low %v69_v43, %v73_v44 }
  0x36   :  { %611 = vmatprep.mubr.bf16.mxu0 %v2860_v3  ;;  %724 = vmatprep.mubr.bf16.mxu1 %v2860_v3 }
  0x37   :  { %784 = vmatpush1.bf16.msra.mxu0 %v2487_v47  ;;  %897 = vmatpush1.bf16.msra.mxu1 %v2489_v48  ;;  %v2549_v48 = vcombine.low %v62_v36, %v66_v37  ;;  %v3333_v36 = vld [vmem:[%s3814_s0 + $0x8] sm:$0xff]   ;;  %v63_v37 = vld [vmem:[%s3815_s2 + $0xd0] sm:$0xff] }
  0x38   :  { %785 = vmatprep.subr.bf16.mxu0 %v2496_v49  ;;  %898 = vmatprep.subr.bf16.mxu1 %v2498_v50  ;;  %v2556_v49 = vcombine.high %v69_v43, %v73_v44  ;;  %v77_v50 = vld [vmem:[%s3815_s2 + $0x140] sm:$0xff] }
  0x39   :  { %v2563_v63 = vcombine.low %v77_v50, %v81_v51 }
  0x3b   :  { %786 = vmatpush1.bf16.msra.mxu0 %v2495_v55  ;;  %899 = vmatpush1.bf16.msra.mxu1 %v2497_v56  ;;  %v2557_v55 = vcombine.low %v70_v45, %v74_v46  ;;  %v2564_v56 = vcombine.high %v77_v50, %v81_v51 }
  0x3c   :  { %787 = vmatprep.subr.bf16.mxu0 %v2504_v57  ;;  %900 = vmatprep.subr.bf16.mxu1 %v2506_v59  ;;  %v2566_v57 = vcombine.high %v78_v52, %v82_v53  ;;  %v85_v59 = vld [vmem:[%s3815_s2 + $0x180] sm:$0xff] }
  0x3d   :  { %612 = vmatmul.mubr.bf16.gmra.mrb[12].mxu0 %v3103_v58  ;;  %725 = vmatmul.mubr.bf16.gmra.mrb[12].mxu1 %v3103_v58  ;;  %v2571_v7 = vcombine.low %v85_v59, %v89_v60 }
  0x3e   :  { %621 = vmatprep.mubr.bf16.mxu0 %v2860_v3  ;;  %734 = vmatprep.mubr.bf16.mxu1 %v2860_v3 }
  0x3f   :  { %788 = vmatpush1.bf16.msra.mxu0 %v2503_v0  ;;  %901 = vmatpush1.bf16.msra.mxu1 %v2505_v1  ;;  %v2565_v0 = vcombine.low %v78_v52, %v82_v53  ;;  %v2572_v1 = vcombine.high %v85_v59, %v89_v60  ;;  %v3366_v52 = vld [vmem:[%s3814_s0 + $0x10] sm:$0xff]  }
  0x40   :  { %789 = vmatprep.subr.bf16.mxu0 %v2512_v2  ;;  %902 = vmatprep.subr.bf16.mxu1 %v2514_v4  ;;  %v93_v2 = vld [vmem:[%s3815_s2 + $0x1c0] sm:$0xff] }
  0x41   :  { %v97_v4 = vld [vmem:[%s3815_s2 + $0x1e0] sm:$0xff] }
  0x43   :  { %790 = vmatpush1.bf16.msra.mxu0 %v2511_v10  ;;  %903 = vmatpush1.bf16.msra.mxu1 %v2513_v11  ;;  %v2580_v10 = vcombine.high %v93_v2, %v97_v4  ;;  %v2582_v11 = vcombine.high %v94_v5, %v98_v6  ;;  %v2855_v6 = vld [vmem:[%s3814_s0 + $0x18] sm:$0xff]  }
  0x44   :  { %1369 = vmatprep.subr.bf16.mxu0 %v2524_v12  ;;  %1482 = vmatprep.subr.bf16.mxu1 %v2526_v14  ;;  %v39_v12 = vld [vmem:[%s3815_s2 + $0x10] sm:$0xff] }
  0x45   :  { %622 = vmatmul.mubr.bf16.gmra.mrb[16].mxu0 %v3136_v13  ;;  %735 = vmatmul.mubr.bf16.gmra.mrb[16].mxu1 %v3136_v13  ;;  %v43_v14 = vld [vmem:[%s3815_s2 + $0x30] sm:$0xff] }
  0x46   :  { %631 = vmatprep.mubr.bf16.mxu0 %v2860_v3  ;;  %744 = vmatprep.mubr.bf16.mxu1 %v2860_v3  ;;  %v2528_v22 = vcombine.high %v39_v12, %v43_v14 }
  0x4d   :  { %632 = vmatmul.mubr.bf16.gmra.mrb[20].mxu0 %v3145_v15  ;;  %745 = vmatmul.mubr.bf16.gmra.mrb[20].mxu1 %v3145_v15 }
  0x4e   :  { %641 = vmatprep.mubr.bf16.mxu0 %v2860_v3  ;;  %754 = vmatprep.mubr.bf16.mxu1 %v2860_v3 }
  0x55   :  { %642 = vmatmul.mubr.bf16.gmra.mrb[24].mxu0 %v3154_v16  ;;  %755 = vmatmul.mubr.bf16.gmra.mrb[24].mxu1 %v3154_v16 }
  0x56   :  { %651 = vmatprep.mubr.bf16.mxu0 %v2860_v3  ;;  %764 = vmatprep.mubr.bf16.mxu1 %v2860_v3 }
  0x5d   :  { %652 = vmatmul.mubr.bf16.gmra.mrb[28].mxu0 %v3163_v17  ;;  %765 = vmatmul.mubr.bf16.gmra.mrb[28].mxu1 %v3163_v17 }
  0x5e   :  { %807 = vmatprep.mubr.bf16.mxu0 %v2860_v3  ;;  %920 = vmatprep.mubr.bf16.mxu1 %v2860_v3 }
  0x65   :  { %808 = vmatmul.mubr.bf16.vlgmr.msra.gmra.mrb[32].mxu0 %v3004_v8  ;;  %921 = vmatmul.mubr.bf16.vlgmr.msra.gmra.mrb[32].mxu1 %v3004_v8  ;;  %v65_v8 = vld [vmem:[%s3815_s2 + $0xe0] sm:$0xff] }
  0x66   :  { %1370 = vmatpush1.bf16.msra.mxu0 %v2523_v20  ;;  %1483 = vmatpush1.bf16.msra.mxu1 %v2525_v23  ;;  %v2548_v41 = vcombine.high %v61_v35, %v65_v8  ;;  %v2547_v47 = vcombine.low %v61_v35, %v65_v8  ;;  %v2579_v20 = vcombine.low %v93_v2, %v97_v4 }
  0x67   :  { %817 = vmatprep.mubr.bf16.mxu0 %v2860_v3  ;;  %930 = vmatprep.mubr.bf16.mxu1 %v2860_v3  ;;  %v2527_v23 = vcombine.low %v39_v12, %v43_v14  ;;  %v100_v12 = vld [vmem:[%s3815_s2 + $0x1f8] sm:$0xff] }
  0x68   :  { %1371 = vmatprep.subr.bf16.mxu0 %v2532_v25  ;;  %1484 = vmatprep.subr.bf16.mxu1 %v2534_v28  ;;  %v52_v25 = vld [vmem:[%s3815_s2 + $0x78] sm:$0xff]  ;;  %v55_v28 = vld [vmem:[%s3815_s2 + $0x90] sm:$0xff] }
  0x69   :  { %v2544_v35 = vcombine.high %v55_v28, %v59_v29 }
  0x6a   :  { %1372 = vmatpush1.bf16.msra.mxu0 %v2531_v31  ;;  %1485 = vmatpush1.bf16.msra.mxu1 %v2533_v32  ;;  %v56_v31 = vld [vmem:[%s3815_s2 + $0x98] sm:$0xff] }
  0x6b   :  { %1373 = vmatprep.subr.bf16.mxu0 %v2540_v33  ;;  %1486 = vmatprep.subr.bf16.mxu1 %v2542_v34  ;;  %v60_v32 = vld [vmem:[%s3815_s2 + $0xb8] sm:$0xff] }
  0x6c   :  { %v2546_v8 = vcombine.high %v56_v31, %v60_v32  ;;  %v2545_v43 = vcombine.low %v56_v31, %v60_v32 }
  0x6d   :  { %818 = vmatmul.mubr.bf16.gmra.mrb[36].mxu0 %v3037_v24  ;;  %931 = vmatmul.mubr.bf16.gmra.mrb[36].mxu1 %v3037_v24  ;;  %v2558_v24 = vcombine.high %v70_v45, %v74_v46  ;;  %v71_v46 = vld [vmem:[%s3815_s2 + $0x110] sm:$0xff] }
  0x6e   :  { %827 = vmatprep.mubr.bf16.mxu0 %v2860_v3  ;;  %940 = vmatprep.mubr.bf16.mxu1 %v2860_v3 }
  0x6f   :  { %1374 = vmatpush1.bf16.msra.mxu0 %v2539_v39  ;;  %1487 = vmatpush1.bf16.msra.mxu1 %v2541_v40  ;;  %v67_v39 = vld [vmem:[%s3815_s2 + $0xf0] sm:$0xff]  ;;  %v64_v40 = vld [vmem:[%s3815_s2 + $0xd8] sm:$0xff] }
  0x70   :  { %1375 = vmatprep.subr.bf16.mxu0 %v2548_v41  ;;  %1488 = vmatprep.subr.bf16.mxu1 %v2550_v42  ;;  %v68_v41 = vld [vmem:[%s3815_s2 + $0xf8] sm:$0xff]  ;;  %v2543_v42 = vcombine.low %v55_v28, %v59_v29  ;;  %v2552_v44 = vcombine.high %v63_v37, %v67_v39 }
  0x71   :  { %v2554_v45 = vcombine.high %v64_v40, %v68_v41  ;;  %v2553_v50 = vcombine.low %v64_v40, %v68_v41 }
  0x73   :  { %1376 = vmatpush1.bf16.msra.mxu0 %v2547_v47  ;;  %1489 = vmatpush1.bf16.msra.mxu1 %v2549_v48  ;;  %v75_v47 = vld [vmem:[%s3815_s2 + $0x130] sm:$0xff]  ;;  %v72_v48 = vld [vmem:[%s3815_s2 + $0x118] sm:$0xff] }
  0x74   :  { %1377 = vmatprep.subr.bf16.mxu0 %v2556_v49  ;;  %1490 = vmatprep.subr.bf16.mxu1 %v2558_v24  ;;  %v76_v49 = vld [vmem:[%s3815_s2 + $0x138] sm:$0xff]  ;;  %v2551_v24 = vcombine.low %v63_v37, %v67_v39  ;;  %v2560_v51 = vcombine.high %v71_v46, %v75_v47  ;;  %v2559_v59 = vcombine.low %v71_v46, %v75_v47 }
  0x75   :  { %828 = vmatmul.mubr.bf16.gmra.mrb[40].mxu0 %v3070_v38  ;;  %941 = vmatmul.mubr.bf16.gmra.mrb[40].mxu1 %v3070_v38  ;;  %v2574_v38 = vcombine.high %v86_v61, %v90_v62  ;;  %v2562_v53 = vcombine.high %v72_v48, %v76_v49  ;;  %v2561_v60 = vcombine.low %v72_v48, %v76_v49 }
  0x76   :  { %837 = vmatprep.mubr.bf16.mxu0 %v2860_v3  ;;  %950 = vmatprep.mubr.bf16.mxu1 %v2860_v3 }
  0x77   :  { %1378 = vmatpush1.bf16.msra.mxu0 %v2555_v54  ;;  %1491 = vmatpush1.bf16.msra.mxu1 %v2557_v55  ;;  %v79_v54 = vld [vmem:[%s3815_s2 + $0x150] sm:$0xff] }
  0x78   :  { %1379 = vmatprep.subr.bf16.mxu0 %v2564_v56  ;;  %1492 = vmatprep.subr.bf16.mxu1 %v2566_v57  ;;  %v83_v55 = vld [vmem:[%s3815_s2 + $0x170] sm:$0xff]  ;;  %v80_v56 = vld [vmem:[%s3815_s2 + $0x158] sm:$0xff] }
  0x79   :  { %v84_v57 = vld [vmem:[%s3815_s2 + $0x178] sm:$0xff]  ;;  %v2568_v61 = vcombine.high %v79_v54, %v83_v55  ;;  %v2567_v2 = vcombine.low %v79_v54, %v83_v55 }
  0x7a   :  { %v2570_v62 = vcombine.high %v80_v56, %v84_v57  ;;  %v2569_v4 = vcombine.low %v80_v56, %v84_v57 }
  0x7b   :  { %1380 = vmatpush1.bf16.msra.mxu0 %v2563_v63  ;;  %1493 = vmatpush1.bf16.msra.mxu1 %v2565_v0  ;;  %v87_v63 = vld [vmem:[%s3815_s2 + $0x190] sm:$0xff] }
  0x7c   :  { %1381 = vmatprep.subr.bf16.mxu0 %v2572_v1  ;;  %1494 = vmatprep.subr.bf16.mxu1 %v2574_v38  ;;  %v91_v0 = vld [vmem:[%s3815_s2 + $0x1b0] sm:$0xff]  ;;  %v88_v1 = vld [vmem:[%s3815_s2 + $0x198] sm:$0xff] }
  0x7d   :  { %838 = vmatmul.mubr.bf16.gmra.mrb[44].mxu0 %v3103_v58  ;;  %951 = vmatmul.mubr.bf16.gmra.mrb[44].mxu1 %v3103_v58  ;;  %v2530_v58 = vcombine.high %v40_v18, %v44_v19  ;;  %v92_v38 = vld [vmem:[%s3815_s2 + $0x1b8] sm:$0xff]  ;;  %v2576_v5 = vcombine.high %v87_v63, %v91_v0  ;;  %v2575_v14 = vcombine.low %v87_v63, %v91_v0 }
  0x7e   :  { %847 = vmatprep.mubr.bf16.mxu0 %v2860_v3  ;;  %960 = vmatprep.mubr.bf16.mxu1 %v2860_v3  ;;  %v2577_v18 = vcombine.low %v88_v1, %v92_v38 }
  0x7f   :  { %1382 = vmatpush1.bf16.msra.mxu0 %v2571_v7  ;;  %1495 = vmatpush1.bf16.msra.mxu1 %v2573_v9  ;;  %v2578_v7 = vcombine.high %v88_v1, %v92_v38  ;;  %v95_v9 = vld [vmem:[%s3815_s2 + $0x1d0] sm:$0xff] }
  0x80   :  { %1383 = vmatprep.subr.bf16.mxu0 %v2580_v10  ;;  %1496 = vmatprep.subr.bf16.mxu1 %v2582_v11  ;;  %v99_v10 = vld [vmem:[%s3815_s2 + $0x1f0] sm:$0xff]  ;;  %v96_v11 = vld [vmem:[%s3815_s2 + $0x1d8] sm:$0xff] }
  0x81   :  { %v2584_v19 = vcombine.high %v95_v9, %v99_v10 }
  0x83   :  { %1384 = vmatpush1.bf16.msra.mxu0 %v2579_v20  ;;  %1497 = vmatpush1.bf16.msra.mxu1 %v2581_v21  ;;  %v2586_v20 = vcombine.high %v96_v11, %v100_v12  ;;  %v2583_v21 = vcombine.low %v95_v9, %v99_v10 }
  0x84   :  { %1595 = vmatprep.subr.bf16.mxu0 %v2528_v22  ;;  %1708 = vmatprep.subr.bf16.mxu1 %v2530_v58  ;;  %v2585_v22 = vcombine.low %v96_v11, %v100_v12  ;;  %v2856_v58 = vld [vmem:[%s3814_s0 + $0x20] sm:$0xff]  }
  0x85   :  { %848 = vmatmul.mubr.bf16.gmra.mrb[48].mxu0 %v3136_v13  ;;  %961 = vmatmul.mubr.bf16.gmra.mrb[48].mxu1 %v3136_v13  ;;  %v3300_v13 = vld [vmem:[%s3814_s0] sm:$0xff]  }
  0x86   :  { %857 = vmatprep.mubr.bf16.mxu0 %v2860_v3  ;;  %970 = vmatprep.mubr.bf16.mxu1 %v2860_v3 }
  0x8d   :  { %858 = vmatmul.mubr.bf16.gmra.mrb[52].mxu0 %v3145_v15  ;;  %971 = vmatmul.mubr.bf16.gmra.mrb[52].mxu1 %v3145_v15  ;;  %v47_v15 = vld [vmem:[%s3815_s2 + $0x50] sm:$0xff] }
  0x8e   :  { %867 = vmatprep.mubr.bf16.mxu0 %v2860_v3  ;;  %980 = vmatprep.mubr.bf16.mxu1 %v2860_v3 }
  0x95   :  { %868 = vmatmul.mubr.bf16.gmra.mrb[56].mxu0 %v3154_v16  ;;  %981 = vmatmul.mubr.bf16.gmra.mrb[56].mxu1 %v3154_v16  ;;  %v51_v16 = vld [vmem:[%s3815_s2 + $0x70] sm:$0xff] }
  0x96   :  { %877 = vmatprep.mubr.bf16.mxu0 %v2860_v3  ;;  %990 = vmatprep.mubr.bf16.mxu1 %v2860_v3  ;;  %v2536_v27 = vcombine.high %v47_v15, %v51_v16  ;;  %v2535_v33 = vcombine.low %v47_v15, %v51_v16  ;;  %v2857_v15 = vld [vmem:[%s3814_s0 + $0x28] sm:$0xff]   ;;  %v2858_v16 = vld [vmem:[%s3814_s0 + $0x30] sm:$0xff]  }
  0x9d   :  { %878 = vmatmul.mubr.bf16.gmra.mrb[60].mxu0 %v3163_v17  ;;  %991 = vmatmul.mubr.bf16.gmra.mrb[60].mxu1 %v3163_v17  ;;  %v48_v17 = vld [vmem:[%s3815_s2 + $0x58] sm:$0xff] }
  0x9e   :  { %1401 = vmatprep.mubr.bf16.mxu0 %v2860_v3  ;;  %1514 = vmatprep.mubr.bf16.mxu1 %v2860_v3  ;;  %v2538_v30 = vcombine.high %v48_v17, %v52_v25  ;;  %v2537_v34 = vcombine.low %v48_v17, %v52_v25 }
  0xa5   :  { %1402 = vmatmul.mubr.bf16.vlgmr.msra.gmra.mrb[0].mxu0 %v3300_v13  ;;  %1515 = vmatmul.mubr.bf16.vlgmr.msra.gmra.mrb[0].mxu1 %v3300_v13 }
  0xa6   :  { %1596 = vmatpush1.bf16.msra.mxu0 %v2527_v23  ;;  %1709 = vmatpush1.bf16.msra.mxu1 %v2529_v26  ;;  %v2859_v23 = vld [vmem:[%s3814_s0 + $0x38] sm:$0xff]   ;;  %v3459_v26 = vld [vmem:[%s3816_s4] sm:$0xff] }
  0xa7   :  { %1411 = vmatprep.mubr.bf16.mxu0 %v2860_v3  ;;  %1524 = vmatprep.mubr.bf16.mxu1 %v2860_v3 }
  0xa8   :  { %1597 = vmatprep.subr.bf16.mxu0 %v2536_v27  ;;  %1710 = vmatprep.subr.bf16.mxu1 %v2538_v30 }
  0xaa   :  { %1598 = vmatpush1.bf16.msra.mxu0 %v2535_v33  ;;  %1711 = vmatpush1.bf16.msra.mxu1 %v2537_v34 }
  0xab   :  { %1599 = vmatprep.subr.bf16.mxu0 %v2544_v35  ;;  %1712 = vmatprep.subr.bf16.mxu1 %v2546_v8 }
  0xad   :  { %1412 = vmatmul.mubr.bf16.gmra.mrb[4].mxu0 %v3333_v36  ;;  %1525 = vmatmul.mubr.bf16.gmra.mrb[4].mxu1 %v3333_v36 }
  0xae   :  { %1421 = vmatprep.mubr.bf16.mxu0 %v2860_v3  ;;  %1534 = vmatprep.mubr.bf16.mxu1 %v2860_v3 }
  0xaf   :  { %1600 = vmatpush1.bf16.msra.mxu0 %v2543_v42  ;;  %1713 = vmatpush1.bf16.msra.mxu1 %v2545_v43 }
  0xb0   :  { %1601 = vmatprep.subr.bf16.mxu0 %v2552_v44  ;;  %1714 = vmatprep.subr.bf16.mxu1 %v2554_v45 }
  0xb3   :  { %1602 = vmatpush1.bf16.msra.mxu0 %v2551_v24  ;;  %1715 = vmatpush1.bf16.msra.mxu1 %v2553_v50 }
  0xb4   :  { %1603 = vmatprep.subr.bf16.mxu0 %v2560_v51  ;;  %1716 = vmatprep.subr.bf16.mxu1 %v2562_v53 }
  0xb5   :  { %1422 = vmatmul.mubr.bf16.gmra.mrb[8].mxu0 %v3366_v52  ;;  %1535 = vmatmul.mubr.bf16.gmra.mrb[8].mxu1 %v3366_v52 }
  0xb6   :  { %1431 = vmatprep.mubr.bf16.mxu0 %v2860_v3  ;;  %1544 = vmatprep.mubr.bf16.mxu1 %v2860_v3 }
  0xb7   :  { %1604 = vmatpush1.bf16.msra.mxu0 %v2559_v59  ;;  %1717 = vmatpush1.bf16.msra.mxu1 %v2561_v60 }
  0xb8   :  { %1605 = vmatprep.subr.bf16.mxu0 %v2568_v61  ;;  %1718 = vmatprep.subr.bf16.mxu1 %v2570_v62 }
  0xbb   :  { %1606 = vmatpush1.bf16.msra.mxu0 %v2567_v2  ;;  %1719 = vmatpush1.bf16.msra.mxu1 %v2569_v4 }
  0xbc   :  { %1607 = vmatprep.subr.bf16.mxu0 %v2576_v5  ;;  %1720 = vmatprep.subr.bf16.mxu1 %v2578_v7 }
  0xbd   :  { %1432 = vmatmul.mubr.bf16.gmra.mrb[12].mxu0 %v2855_v6  ;;  %1545 = vmatmul.mubr.bf16.gmra.mrb[12].mxu1 %v2855_v6 }
  0xbe   :  { %1441 = vmatprep.mubr.bf16.mxu0 %v2860_v3  ;;  %1554 = vmatprep.mubr.bf16.mxu1 %v2860_v3 }
  0xbf   :  { %1608 = vmatpush1.bf16.msra.mxu0 %v2575_v14  ;;  %1721 = vmatpush1.bf16.msra.mxu1 %v2577_v18 }
  0xc0   :  { %1609 = vmatprep.subr.bf16.mxu0 %v2584_v19  ;;  %1722 = vmatprep.subr.bf16.mxu1 %v2586_v20 }
  0xc3   :  { %1610 = vmatpush1.bf16.msra.mxu0 %v2583_v21  ;;  %1723 = vmatpush1.bf16.msra.mxu1 %v2585_v22 }
  0xc5   :  { %1442 = vmatmul.mubr.bf16.gmra.mrb[16].mxu0 %v2856_v58  ;;  %1555 = vmatmul.mubr.bf16.gmra.mrb[16].mxu1 %v2856_v58 }
  0xc6   :  { %1451 = vmatprep.mubr.bf16.mxu0 %v2860_v3  ;;  %1564 = vmatprep.mubr.bf16.mxu1 %v2860_v3 }
  0xcd   :  { %1452 = vmatmul.mubr.bf16.gmra.mrb[20].mxu0 %v2857_v15  ;;  %1565 = vmatmul.mubr.bf16.gmra.mrb[20].mxu1 %v2857_v15 }
  0xce   :  { %1461 = vmatprep.mubr.bf16.mxu0 %v2860_v3  ;;  %1574 = vmatprep.mubr.bf16.mxu1 %v2860_v3 }
  0xd5   :  { %1462 = vmatmul.mubr.bf16.gmra.mrb[24].mxu0 %v2858_v16  ;;  %1575 = vmatmul.mubr.bf16.gmra.mrb[24].mxu1 %v2858_v16 }
  0xd6   :  { %1471 = vmatprep.mubr.bf16.mxu0 %v2860_v3  ;;  %1584 = vmatprep.mubr.bf16.mxu1 %v2860_v3 }
  0xdd   :  { %1472 = vmatmul.mubr.bf16.gmra.mrb[28].mxu0 %v2859_v23  ;;  %1585 = vmatmul.mubr.bf16.gmra.mrb[28].mxu1 %v2859_v23 }
  0xde   :  { %1627 = vmatprep.mubr.bf16.mxu0 %v2860_v3  ;;  %1740 = vmatprep.mubr.bf16.mxu1 %v2860_v3 }
  0xe5   :  { %1628 = vmatmul.mubr.bf16.vlgmr.msra.gmra.mrb[32].mxu0 %v3300_v13  ;;  %1741 = vmatmul.mubr.bf16.vlgmr.msra.gmra.mrb[32].mxu1 %v3300_v13  ;;  %v1823_v13 = vlaneseq }
  0xe6   :  { %1637 = vmatprep.mubr.bf16.mxu0 %v2860_v3  ;;  %1750 = vmatprep.mubr.bf16.mxu1 %v2860_v3 }
  0xe7   :  { %v3453_v17 = vshrl.u32 %v1823_v13, 7 }
  0xe9   :  { %v1825_v25 = vsub.s32 0, %v3453_v17  ;;  %v1833_v27 = vsub.s32 2, %v3453_v17  ;;  %v1829_v28 = vsub.s32 1, %v3453_v17  ;;  %v1837_v29 = vsub.s32 3, %v3453_v17 }
  0xeb   :  { %v3468_v30 = vrot.slane %v3459_v26, %v1833_v27  ;;  %v3471_v31 = vrot.slane %v3459_v26, %v1829_v28  ;;  %v3474_v32 = vrot.slane %v3459_v26, %v1837_v29 }
  0xed   :  { %1638 = vmatmul.mubr.bf16.gmra.mrb[36].mxu0 %v3333_v36  ;;  %1751 = vmatmul.mubr.bf16.gmra.mrb[36].mxu1 %v3333_v36 }
  0xee   :  { %1647 = vmatprep.mubr.bf16.mxu0 %v2860_v3  ;;  %1760 = vmatprep.mubr.bf16.mxu1 %v2860_v3 }
  0xf5   :  { %1648 = vmatmul.mubr.bf16.gmra.mrb[40].mxu0 %v3366_v52  ;;  %1761 = vmatmul.mubr.bf16.gmra.mrb[40].mxu1 %v3366_v52 }
  0xf6   :  { %1657 = vmatprep.mubr.bf16.mxu0 %v2860_v3  ;;  %1770 = vmatprep.mubr.bf16.mxu1 %v2860_v3 }
  0xfd   :  { %1658 = vmatmul.mubr.bf16.gmra.mrb[44].mxu0 %v2855_v6  ;;  %1771 = vmatmul.mubr.bf16.gmra.mrb[44].mxu1 %v2855_v6 }
  0xfe   :  { %1667 = vmatprep.mubr.bf16.mxu0 %v2860_v3  ;;  %1780 = vmatprep.mubr.bf16.mxu1 %v2860_v3 }
 0x105   :  { %1668 = vmatmul.mubr.bf16.gmra.mrb[48].mxu0 %v2856_v58  ;;  %1781 = vmatmul.mubr.bf16.gmra.mrb[48].mxu1 %v2856_v58 }
 0x106   :  { %1677 = vmatprep.mubr.bf16.mxu0 %v2860_v3  ;;  %1790 = vmatprep.mubr.bf16.mxu1 %v2860_v3 }
 0x10d   :  { %1678 = vmatmul.mubr.bf16.gmra.mrb[52].mxu0 %v2857_v15  ;;  %1791 = vmatmul.mubr.bf16.gmra.mrb[52].mxu1 %v2857_v15 }
 0x10e   :  { %1687 = vmatprep.mubr.bf16.mxu0 %v2860_v3  ;;  %1800 = vmatprep.mubr.bf16.mxu1 %v2860_v3 }
 0x115   :  { %1688 = vmatmul.mubr.bf16.gmra.mrb[56].mxu0 %v2858_v16  ;;  %1801 = vmatmul.mubr.bf16.gmra.mrb[56].mxu1 %v2858_v16 }
 0x116   :  { %1697 = vmatprep.mubr.bf16.mxu0 %v2860_v3  ;;  %1810 = vmatprep.mubr.bf16.mxu1 %v2860_v3  ;;  %v3465_v3 = vrot.slane %v3459_v26, %v1825_v25 }
 0x11d   :  { %1698 = vmatmul.mubr.bf16.gmra.mrb[60].mxu0 %v2859_v23  ;;  %1811 = vmatmul.mubr.bf16.gmra.mrb[60].mxu1 %v2859_v23 }
 0x178   :  { %v1403_v33 = vpop.f32.mrb[0].mxu0  ;;  %v1516_v35 = vpop.f32.mrb[0].mxu1 }
 0x179   :  { %v1863_v34 = vadd.f32 %v3465_v3, %v1403_v33  ;;  %v1405_v8 = vpop.f32.mrb[1].mxu0  ;;  %v1865_v36 = vadd.f32 %v3468_v30, %v1516_v35  ;;  %v1518_v39 = vpop.f32.mrb[1].mxu1 }
 0x17a   :  { %v1864_v37 = vadd.f32 %v3471_v31, %v1405_v8  ;;  %v1407_v40 = vpop.f32.mrb[2].mxu0  ;;  %v1866_v41 = vadd.f32 %v3474_v32, %v1518_v39  ;;  %v1520_v43 = vpop.f32.mrb[2].mxu1 }
 0x17b   :  { %v1871_v42 = vadd.f32 %v3465_v3, %v1407_v40  ;;  %v1409_v44 = vpop.f32.mrb[3].mxu0  ;;  %v1873_v46 = vadd.f32 %v3468_v30, %v1520_v43  ;;  %v1522_v48 = vpop.f32.mrb[3].mxu1 }
 0x17c   :  { %v2651_v45 = vpack.c.bf16 %v1864_v37, %v1863_v34  ;;  %v1872_v47 = vadd.f32 %v3471_v31, %v1409_v44  ;;  %v2652_v49 = vpack.c.bf16 %v1866_v41, %v1865_v36  ;;  %v1874_v24 = vadd.f32 %v3474_v32, %v1522_v48 }
 0x17e   :  { %2375 = vst [vmem:[%s3817_s5] sm:$0xff] %v2651_v45  ;;  %v2655_v50 = vpack.c.bf16 %v1872_v47, %v1871_v42  ;;  %2376 = vst [vmem:[%s3817_s5 + $0x8] sm:$0xff] %v2652_v49  ;;  %v2656_v51 = vpack.c.bf16 %v1874_v24, %v1873_v46 }
 0x180   :  { %2379 = vst [vmem:[%s3817_s5 + $0x20] sm:$0xff] %v2655_v50  ;;  %v1413_v52 = vpop.f32.mrb[4].mxu0  ;;  %2380 = vst [vmem:[%s3817_s5 + $0x28] sm:$0xff] %v2656_v51  ;;  %v1526_v54 = vpop.f32.mrb[4].mxu1 }
 0x181   :  { %v1879_v53 = vadd.f32 %v3465_v3, %v1413_v52  ;;  %v1415_v55 = vpop.f32.mrb[5].mxu0  ;;  %v1881_v56 = vadd.f32 %v3468_v30, %v1526_v54  ;;  %v1528_v59 = vpop.f32.mrb[5].mxu1 }
 0x182   :  { %v1880_v57 = vadd.f32 %v3471_v31, %v1415_v55  ;;  %v1417_v60 = vpop.f32.mrb[6].mxu0  ;;  %v1882_v61 = vadd.f32 %v3474_v32, %v1528_v59  ;;  %v1530_v63 = vpop.f32.mrb[6].mxu1 }
 0x183   :  { %v1887_v62 = vadd.f32 %v3465_v3, %v1417_v60  ;;  %v1419_v0 = vpop.f32.mrb[7].mxu0  ;;  %v1889_v38 = vadd.f32 %v3468_v30, %v1530_v63  ;;  %v1532_v4 = vpop.f32.mrb[7].mxu1 }
 0x184   :  { %v2659_v1 = vpack.c.bf16 %v1880_v57, %v1879_v53  ;;  %v1888_v2 = vadd.f32 %v3471_v31, %v1419_v0  ;;  %v2660_v5 = vpack.c.bf16 %v1882_v61, %v1881_v56  ;;  %v1890_v6 = vadd.f32 %v3474_v32, %v1532_v4 }
 0x186   :  { %2383 = vst [vmem:[%s3817_s5 + $0x40] sm:$0xff] %v2659_v1  ;;  %v2663_v7 = vpack.c.bf16 %v1888_v2, %v1887_v62  ;;  %2384 = vst [vmem:[%s3817_s5 + $0x48] sm:$0xff] %v2660_v5  ;;  %v2664_v9 = vpack.c.bf16 %v1890_v6, %v1889_v38 }
 0x188   :  { %2387 = vst [vmem:[%s3817_s5 + $0x60] sm:$0xff] %v2663_v7  ;;  %v1423_v10 = vpop.f32.mrb[8].mxu0  ;;  %2388 = vst [vmem:[%s3817_s5 + $0x68] sm:$0xff] %v2664_v9  ;;  %v1536_v12 = vpop.f32.mrb[8].mxu1 }
 0x189   :  { %v1895_v11 = vadd.f32 %v3465_v3, %v1423_v10  ;;  %v1425_v14 = vpop.f32.mrb[9].mxu0  ;;  %v1897_v18 = vadd.f32 %v3468_v30, %v1536_v12  ;;  %v1538_v20 = vpop.f32.mrb[9].mxu1 }
 0x18a   :  { %v1896_v19 = vadd.f32 %v3471_v31, %v1425_v14  ;;  %v1427_v21 = vpop.f32.mrb[10].mxu0  ;;  %v1898_v22 = vadd.f32 %v3474_v32, %v1538_v20  ;;  %v1540_v15 = vpop.f32.mrb[10].mxu1 }
 0x18b   :  { %v1903_v58 = vadd.f32 %v3465_v3, %v1427_v21  ;;  %v1429_v16 = vpop.f32.mrb[11].mxu0  ;;  %v1905_v13 = vadd.f32 %v3468_v30, %v1540_v15  ;;  %v1542_v27 = vpop.f32.mrb[11].mxu1 }
 0x18c   :  { %v2667_v23 = vpack.c.bf16 %v1896_v19, %v1895_v11  ;;  %v1904_v25 = vadd.f32 %v3471_v31, %v1429_v16  ;;  %v2668_v28 = vpack.c.bf16 %v1898_v22, %v1897_v18  ;;  %v1906_v29 = vadd.f32 %v3474_v32, %v1542_v27 }
 0x18e   :  { %2391 = vst [vmem:[%s3817_s5 + $0x80] sm:$0xff] %v2667_v23  ;;  %v2671_v33 = vpack.c.bf16 %v1904_v25, %v1903_v58  ;;  %2392 = vst [vmem:[%s3817_s5 + $0x88] sm:$0xff] %v2668_v28  ;;  %v2672_v34 = vpack.c.bf16 %v1906_v29, %v1905_v13 }
 0x190   :  { %2395 = vst [vmem:[%s3817_s5 + $0xa0] sm:$0xff] %v2671_v33  ;;  %v1433_v35 = vpop.f32.mrb[12].mxu0  ;;  %2396 = vst [vmem:[%s3817_s5 + $0xa8] sm:$0xff] %v2672_v34  ;;  %v1546_v36 = vpop.f32.mrb[12].mxu1 }
 0x191   :  { %v1911_v8 = vadd.f32 %v3465_v3, %v1433_v35  ;;  %v1435_v37 = vpop.f32.mrb[13].mxu0  ;;  %v1913_v39 = vadd.f32 %v3468_v30, %v1546_v36  ;;  %v1548_v41 = vpop.f32.mrb[13].mxu1 }
 0x192   :  { %v1912_v40 = vadd.f32 %v3471_v31, %v1435_v37  ;;  %v1437_v42 = vpop.f32.mrb[14].mxu0  ;;  %v1914_v43 = vadd.f32 %v3474_v32, %v1548_v41  ;;  %v1550_v45 = vpop.f32.mrb[14].mxu1 }
 0x193   :  { %v1919_v44 = vadd.f32 %v3465_v3, %v1437_v42  ;;  %v1439_v46 = vpop.f32.mrb[15].mxu0  ;;  %v1921_v48 = vadd.f32 %v3468_v30, %v1550_v45  ;;  %v1552_v24 = vpop.f32.mrb[15].mxu1 }
 0x194   :  { %v2675_v47 = vpack.c.bf16 %v1912_v40, %v1911_v8  ;;  %v1920_v49 = vadd.f32 %v3471_v31, %v1439_v46  ;;  %v2676_v50 = vpack.c.bf16 %v1914_v43, %v1913_v39  ;;  %v1922_v51 = vadd.f32 %v3474_v32, %v1552_v24 }
 0x196   :  { %2399 = vst [vmem:[%s3817_s5 + $0xc0] sm:$0xff] %v2675_v47  ;;  %v2679_v52 = vpack.c.bf16 %v1920_v49, %v1919_v44  ;;  %2400 = vst [vmem:[%s3817_s5 + $0xc8] sm:$0xff] %v2676_v50  ;;  %v2680_v53 = vpack.c.bf16 %v1922_v51, %v1921_v48 }
 0x198   :  { %2403 = vst [vmem:[%s3817_s5 + $0xe0] sm:$0xff] %v2679_v52  ;;  %v1443_v54 = vpop.f32.mrb[16].mxu0  ;;  %2404 = vst [vmem:[%s3817_s5 + $0xe8] sm:$0xff] %v2680_v53  ;;  %v1556_v56 = vpop.f32.mrb[16].mxu1 }
 0x199   :  { %v1927_v55 = vadd.f32 %v3465_v3, %v1443_v54  ;;  %v1445_v57 = vpop.f32.mrb[17].mxu0  ;;  %v1929_v59 = vadd.f32 %v3468_v30, %v1556_v56  ;;  %v1558_v61 = vpop.f32.mrb[17].mxu1 }
 0x19a   :  { %v1928_v60 = vadd.f32 %v3471_v31, %v1445_v57  ;;  %v1447_v62 = vpop.f32.mrb[18].mxu0  ;;  %v1930_v63 = vadd.f32 %v3474_v32, %v1558_v61  ;;  %v1560_v1 = vpop.f32.mrb[18].mxu1  ;;  %v1841_v61 = vsub.s32 4, %v3453_v17 }
 0x19b   :  { %v1935_v0 = vadd.f32 %v3465_v3, %v1447_v62  ;;  %v1449_v38 = vpop.f32.mrb[19].mxu0  ;;  %v1937_v4 = vadd.f32 %v3468_v30, %v1560_v1  ;;  %v1562_v6 = vpop.f32.mrb[19].mxu1 }
 0x19c   :  { %v2683_v2 = vpack.c.bf16 %v1928_v60, %v1927_v55  ;;  %v1936_v5 = vadd.f32 %v3471_v31, %v1449_v38  ;;  %v2684_v7 = vpack.c.bf16 %v1930_v63, %v1929_v59  ;;  %v1938_v9 = vadd.f32 %v3474_v32, %v1562_v6 }
 0x19d   :  { %v1849_v38 = vsub.s32 6, %v3453_v17 }
 0x19e   :  { %2407 = vst [vmem:[%s3817_s5 + $0x100] sm:$0xff] %v2683_v2  ;;  %v2687_v10 = vpack.c.bf16 %v1936_v5, %v1935_v0  ;;  %2408 = vst [vmem:[%s3817_s5 + $0x108] sm:$0xff] %v2684_v7  ;;  %v2688_v11 = vpack.c.bf16 %v1938_v9, %v1937_v4  ;;  %v1845_v2 = vsub.s32 5, %v3453_v17  ;;  %v1853_v9 = vsub.s32 7, %v3453_v17 }
 0x1a0   :  { %2411 = vst [vmem:[%s3817_s5 + $0x120] sm:$0xff] %v2687_v10  ;;  %v1453_v12 = vpop.f32.mrb[20].mxu0  ;;  %2412 = vst [vmem:[%s3817_s5 + $0x128] sm:$0xff] %v2688_v11  ;;  %v1566_v18 = vpop.f32.mrb[20].mxu1  ;;  %v3638_v17 = vrot.slane %v3459_v26, %v1845_v2 }
 0x1a1   :  { %v1943_v14 = vadd.f32 %v3465_v3, %v1453_v12  ;;  %v1455_v19 = vpop.f32.mrb[21].mxu0  ;;  %v1945_v20 = vadd.f32 %v3468_v30, %v1566_v18  ;;  %v1568_v22 = vpop.f32.mrb[21].mxu1 }
 0x1a2   :  { %v1944_v21 = vadd.f32 %v3471_v31, %v1455_v19  ;;  %v1457_v58 = vpop.f32.mrb[22].mxu0  ;;  %v1946_v15 = vadd.f32 %v3474_v32, %v1568_v22  ;;  %v1570_v23 = vpop.f32.mrb[22].mxu1 }
 0x1a3   :  { %v1951_v16 = vadd.f32 %v3465_v3, %v1457_v58  ;;  %v1459_v13 = vpop.f32.mrb[23].mxu0  ;;  %v1953_v27 = vadd.f32 %v3468_v30, %v1570_v23  ;;  %v1572_v29 = vpop.f32.mrb[23].mxu1 }
 0x1a4   :  { %v2691_v25 = vpack.c.bf16 %v1944_v21, %v1943_v14  ;;  %v1952_v28 = vadd.f32 %v3471_v31, %v1459_v13  ;;  %v2692_v33 = vpack.c.bf16 %v1946_v15, %v1945_v20  ;;  %v1954_v34 = vadd.f32 %v3474_v32, %v1572_v29 }
 0x1a5   :  { %v3629_v20 = vrot.slane %v3459_v26, %v1841_v61  ;;  %v3635_v21 = vrot.slane %v3459_v26, %v1849_v38 }
 0x1a6   :  { %2415 = vst [vmem:[%s3817_s5 + $0x140] sm:$0xff] %v2691_v25  ;;  %v2695_v35 = vpack.c.bf16 %v1952_v28, %v1951_v16  ;;  %2416 = vst [vmem:[%s3817_s5 + $0x148] sm:$0xff] %v2692_v33  ;;  %v2696_v8 = vpack.c.bf16 %v1954_v34, %v1953_v27 }
 0x1a8   :  { %2419 = vst [vmem:[%s3817_s5 + $0x160] sm:$0xff] %v2695_v35  ;;  %v1463_v36 = vpop.f32.mrb[24].mxu0  ;;  %2420 = vst [vmem:[%s3817_s5 + $0x168] sm:$0xff] %v2696_v8  ;;  %v1576_v39 = vpop.f32.mrb[24].mxu1 }
 0x1a9   :  { %v1959_v37 = vadd.f32 %v3465_v3, %v1463_v36  ;;  %v1465_v40 = vpop.f32.mrb[25].mxu0  ;;  %v1961_v41 = vadd.f32 %v3468_v30, %v1576_v39  ;;  %v1578_v43 = vpop.f32.mrb[25].mxu1 }
 0x1aa   :  { %v1960_v42 = vadd.f32 %v3471_v31, %v1465_v40  ;;  %v1467_v44 = vpop.f32.mrb[26].mxu0  ;;  %v1962_v45 = vadd.f32 %v3474_v32, %v1578_v43  ;;  %v1580_v47 = vpop.f32.mrb[26].mxu1 }
 0x1ab   :  { %v1967_v46 = vadd.f32 %v3465_v3, %v1467_v44  ;;  %v1469_v48 = vpop.f32.mrb[27].mxu0  ;;  %v1969_v24 = vadd.f32 %v3468_v30, %v1580_v47  ;;  %v1582_v51 = vpop.f32.mrb[27].mxu1 }
 0x1ac   :  { %v2699_v49 = vpack.c.bf16 %v1960_v42, %v1959_v37  ;;  %v1968_v50 = vadd.f32 %v3471_v31, %v1469_v48  ;;  %v2700_v52 = vpack.c.bf16 %v1962_v45, %v1961_v41  ;;  %v1970_v53 = vadd.f32 %v3474_v32, %v1582_v51 }
 0x1ae   :  { %2423 = vst [vmem:[%s3817_s5 + $0x180] sm:$0xff] %v2699_v49  ;;  %v2703_v54 = vpack.c.bf16 %v1968_v50, %v1967_v46  ;;  %2424 = vst [vmem:[%s3817_s5 + $0x188] sm:$0xff] %v2700_v52  ;;  %v2704_v55 = vpack.c.bf16 %v1970_v53, %v1969_v24 }
 0x1b0   :  { %2427 = vst [vmem:[%s3817_s5 + $0x1a0] sm:$0xff] %v2703_v54  ;;  %v1473_v56 = vpop.f32.mrb[28].mxu0  ;;  %2428 = vst [vmem:[%s3817_s5 + $0x1a8] sm:$0xff] %v2704_v55  ;;  %v1586_v59 = vpop.f32.mrb[28].mxu1 }
 0x1b1   :  { %v1975_v57 = vadd.f32 %v3465_v3, %v1473_v56  ;;  %v1475_v60 = vpop.f32.mrb[29].mxu0  ;;  %v1977_v62 = vadd.f32 %v3468_v30, %v1586_v59  ;;  %v1588_v0 = vpop.f32.mrb[29].mxu1 }
 0x1b2   :  { %v1976_v63 = vadd.f32 %v3471_v31, %v1475_v60  ;;  %v1477_v1 = vpop.f32.mrb[30].mxu0  ;;  %v1978_v4 = vadd.f32 %v3474_v32, %v1588_v0  ;;  %v1590_v6 = vpop.f32.mrb[30].mxu1 }
 0x1b3   :  { %v1983_v5 = vadd.f32 %v3465_v3, %v1477_v1  ;;  %v1479_v7 = vpop.f32.mrb[31].mxu0  ;;  %v1985_v11 = vadd.f32 %v3468_v30, %v1590_v6  ;;  %v1592_v14 = vpop.f32.mrb[31].mxu1 }
 0x1b4   :  { %v2707_v10 = vpack.c.bf16 %v1976_v63, %v1975_v57  ;;  %v1984_v12 = vadd.f32 %v3471_v31, %v1479_v7  ;;  %v2708_v18 = vpack.c.bf16 %v1978_v4, %v1977_v62  ;;  %v1986_v19 = vadd.f32 %v3474_v32, %v1592_v14 }
 0x1b5   :  { %v3644_v31 = vrot.slane %v3459_v26, %v1853_v9 }
 0x1b6   :  { %2431 = vst [vmem:[%s3817_s5 + $0x1c0] sm:$0xff] %v2707_v10  ;;  %v2711_v3 = vpack.c.bf16 %v1984_v12, %v1983_v5  ;;  %2432 = vst [vmem:[%s3817_s5 + $0x1c8] sm:$0xff] %v2708_v18  ;;  %v2712_v30 = vpack.c.bf16 %v1986_v19, %v1985_v11 }
 0x1b8   :  { %2435 = vst [vmem:[%s3817_s5 + $0x1e0] sm:$0xff] %v2711_v3  ;;  %v1629_v32 = vpop.f32.mrb[32].mxu0  ;;  %2436 = vst [vmem:[%s3817_s5 + $0x1e8] sm:$0xff] %v2712_v30  ;;  %v1742_v58 = vpop.f32.mrb[32].mxu1 }
 0x1b9   :  { %v1867_v22 = vadd.f32 %v3629_v20, %v1629_v32  ;;  %v1631_v15 = vpop.f32.mrb[33].mxu0  ;;  %v1869_v16 = vadd.f32 %v3635_v21, %v1742_v58  ;;  %v1744_v13 = vpop.f32.mrb[33].mxu1 }
 0x1ba   :  { %v1868_v23 = vadd.f32 %v3638_v17, %v1631_v15  ;;  %v1633_v26 = vpop.f32.mrb[34].mxu0  ;;  %v1870_v25 = vadd.f32 %v3644_v31, %v1744_v13  ;;  %v1746_v28 = vpop.f32.mrb[34].mxu1 }
 0x1bb   :  { %v1875_v27 = vadd.f32 %v3629_v20, %v1633_v26  ;;  %v1635_v29 = vpop.f32.mrb[35].mxu0  ;;  %v1877_v34 = vadd.f32 %v3635_v21, %v1746_v28  ;;  %v1748_v8 = vpop.f32.mrb[35].mxu1 }
 0x1bc   :  { %v2653_v33 = vpack.c.bf16 %v1868_v23, %v1867_v22  ;;  %v1876_v35 = vadd.f32 %v3638_v17, %v1635_v29  ;;  %v2654_v36 = vpack.c.bf16 %v1870_v25, %v1869_v16  ;;  %v1878_v37 = vadd.f32 %v3644_v31, %v1748_v8 }
 0x1be   :  { %2377 = vst [vmem:[%s3817_s5 + $0x10] sm:$0xff] %v2653_v33  ;;  %v2657_v39 = vpack.c.bf16 %v1876_v35, %v1875_v27  ;;  %2378 = vst [vmem:[%s3817_s5 + $0x18] sm:$0xff] %v2654_v36  ;;  %v2658_v40 = vpack.c.bf16 %v1878_v37, %v1877_v34 }
 0x1c0   :  { %2381 = vst [vmem:[%s3817_s5 + $0x30] sm:$0xff] %v2657_v39  ;;  %v1639_v41 = vpop.f32.mrb[36].mxu0  ;;  %2382 = vst [vmem:[%s3817_s5 + $0x38] sm:$0xff] %v2658_v40  ;;  %v1752_v43 = vpop.f32.mrb[36].mxu1 }
 0x1c1   :  { %v1883_v42 = vadd.f32 %v3629_v20, %v1639_v41  ;;  %v1641_v44 = vpop.f32.mrb[37].mxu0  ;;  %v1885_v45 = vadd.f32 %v3635_v21, %v1752_v43  ;;  %v1754_v47 = vpop.f32.mrb[37].mxu1 }
 0x1c2   :  { %v1884_v46 = vadd.f32 %v3638_v17, %v1641_v44  ;;  %v1643_v48 = vpop.f32.mrb[38].mxu0  ;;  %v1886_v49 = vadd.f32 %v3644_v31, %v1754_v47  ;;  %v1756_v50 = vpop.f32.mrb[38].mxu1 }
 0x1c3   :  { %v1891_v24 = vadd.f32 %v3629_v20, %v1643_v48  ;;  %v1645_v51 = vpop.f32.mrb[39].mxu0  ;;  %v1893_v53 = vadd.f32 %v3635_v21, %v1756_v50  ;;  %v1758_v55 = vpop.f32.mrb[39].mxu1 }
 0x1c4   :  { %v2661_v52 = vpack.c.bf16 %v1884_v46, %v1883_v42  ;;  %v1892_v54 = vadd.f32 %v3638_v17, %v1645_v51  ;;  %v2662_v56 = vpack.c.bf16 %v1886_v49, %v1885_v45  ;;  %v1894_v57 = vadd.f32 %v3644_v31, %v1758_v55 }
 0x1c6   :  { %2385 = vst [vmem:[%s3817_s5 + $0x50] sm:$0xff] %v2661_v52  ;;  %v2665_v59 = vpack.c.bf16 %v1892_v54, %v1891_v24  ;;  %2386 = vst [vmem:[%s3817_s5 + $0x58] sm:$0xff] %v2662_v56  ;;  %v2666_v60 = vpack.c.bf16 %v1894_v57, %v1893_v53 }
 0x1c8   :  { %2389 = vst [vmem:[%s3817_s5 + $0x70] sm:$0xff] %v2665_v59  ;;  %v1649_v61 = vpop.f32.mrb[40].mxu0  ;;  %2390 = vst [vmem:[%s3817_s5 + $0x78] sm:$0xff] %v2666_v60  ;;  %v1762_v63 = vpop.f32.mrb[40].mxu1 }
 0x1c9   :  { %v1899_v62 = vadd.f32 %v3629_v20, %v1649_v61  ;;  %v1651_v0 = vpop.f32.mrb[41].mxu0  ;;  %v1901_v1 = vadd.f32 %v3635_v21, %v1762_v63  ;;  %v1764_v2 = vpop.f32.mrb[41].mxu1 }
 0x1ca   :  { %v1900_v38 = vadd.f32 %v3638_v17, %v1651_v0  ;;  %v1653_v4 = vpop.f32.mrb[42].mxu0  ;;  %v1902_v5 = vadd.f32 %v3644_v31, %v1764_v2  ;;  %v1766_v7 = vpop.f32.mrb[42].mxu1 }
 0x1cb   :  { %v1907_v6 = vadd.f32 %v3629_v20, %v1653_v4  ;;  %v1655_v9 = vpop.f32.mrb[43].mxu0  ;;  %v1909_v11 = vadd.f32 %v3635_v21, %v1766_v7  ;;  %v1768_v14 = vpop.f32.mrb[43].mxu1 }
 0x1cc   :  { %v2669_v10 = vpack.c.bf16 %v1900_v38, %v1899_v62  ;;  %v1908_v12 = vadd.f32 %v3638_v17, %v1655_v9  ;;  %v2670_v18 = vpack.c.bf16 %v1902_v5, %v1901_v1  ;;  %v1910_v19 = vadd.f32 %v3644_v31, %v1768_v14 }
 0x1ce   :  { %2393 = vst [vmem:[%s3817_s5 + $0x90] sm:$0xff] %v2669_v10  ;;  %v2673_v3 = vpack.c.bf16 %v1908_v12, %v1907_v6  ;;  %2394 = vst [vmem:[%s3817_s5 + $0x98] sm:$0xff] %v2670_v18  ;;  %v2674_v30 = vpack.c.bf16 %v1910_v19, %v1909_v11 }
 0x1d0   :  { %2397 = vst [vmem:[%s3817_s5 + $0xb0] sm:$0xff] %v2673_v3  ;;  %v1659_v32 = vpop.f32.mrb[44].mxu0  ;;  %2398 = vst [vmem:[%s3817_s5 + $0xb8] sm:$0xff] %v2674_v30  ;;  %v1772_v58 = vpop.f32.mrb[44].mxu1 }
 0x1d1   :  { %v1915_v22 = vadd.f32 %v3629_v20, %v1659_v32  ;;  %v1661_v15 = vpop.f32.mrb[45].mxu0  ;;  %v1917_v16 = vadd.f32 %v3635_v21, %v1772_v58  ;;  %v1774_v13 = vpop.f32.mrb[45].mxu1 }
 0x1d2   :  { %v1916_v23 = vadd.f32 %v3638_v17, %v1661_v15  ;;  %v1663_v26 = vpop.f32.mrb[46].mxu0  ;;  %v1918_v25 = vadd.f32 %v3644_v31, %v1774_v13  ;;  %v1776_v28 = vpop.f32.mrb[46].mxu1 }
 0x1d3   :  { %v1923_v27 = vadd.f32 %v3629_v20, %v1663_v26  ;;  %v1665_v29 = vpop.f32.mrb[47].mxu0  ;;  %v1925_v34 = vadd.f32 %v3635_v21, %v1776_v28  ;;  %v1778_v8 = vpop.f32.mrb[47].mxu1 }
 0x1d4   :  { %v2677_v33 = vpack.c.bf16 %v1916_v23, %v1915_v22  ;;  %v1924_v35 = vadd.f32 %v3638_v17, %v1665_v29  ;;  %v2678_v36 = vpack.c.bf16 %v1918_v25, %v1917_v16  ;;  %v1926_v37 = vadd.f32 %v3644_v31, %v1778_v8 }
 0x1d6   :  { %2401 = vst [vmem:[%s3817_s5 + $0xd0] sm:$0xff] %v2677_v33  ;;  %v2681_v39 = vpack.c.bf16 %v1924_v35, %v1923_v27  ;;  %2402 = vst [vmem:[%s3817_s5 + $0xd8] sm:$0xff] %v2678_v36  ;;  %v2682_v40 = vpack.c.bf16 %v1926_v37, %v1925_v34 }
 0x1d8   :  { %2405 = vst [vmem:[%s3817_s5 + $0xf0] sm:$0xff] %v2681_v39  ;;  %v1669_v41 = vpop.f32.mrb[48].mxu0  ;;  %2406 = vst [vmem:[%s3817_s5 + $0xf8] sm:$0xff] %v2682_v40  ;;  %v1782_v43 = vpop.f32.mrb[48].mxu1 }
 0x1d9   :  { %v1931_v42 = vadd.f32 %v3629_v20, %v1669_v41  ;;  %v1671_v44 = vpop.f32.mrb[49].mxu0  ;;  %v1933_v45 = vadd.f32 %v3635_v21, %v1782_v43  ;;  %v1784_v47 = vpop.f32.mrb[49].mxu1 }
 0x1da   :  { %v1932_v46 = vadd.f32 %v3638_v17, %v1671_v44  ;;  %v1673_v48 = vpop.f32.mrb[50].mxu0  ;;  %v1934_v49 = vadd.f32 %v3644_v31, %v1784_v47  ;;  %v1786_v50 = vpop.f32.mrb[50].mxu1 }
 0x1db   :  { %v1939_v24 = vadd.f32 %v3629_v20, %v1673_v48  ;;  %v1675_v51 = vpop.f32.mrb[51].mxu0  ;;  %v1941_v53 = vadd.f32 %v3635_v21, %v1786_v50  ;;  %v1788_v55 = vpop.f32.mrb[51].mxu1 }
 0x1dc   :  { %v2685_v52 = vpack.c.bf16 %v1932_v46, %v1931_v42  ;;  %v1940_v54 = vadd.f32 %v3638_v17, %v1675_v51  ;;  %v2686_v56 = vpack.c.bf16 %v1934_v49, %v1933_v45  ;;  %v1942_v57 = vadd.f32 %v3644_v31, %v1788_v55 }
 0x1de   :  { %2409 = vst [vmem:[%s3817_s5 + $0x110] sm:$0xff] %v2685_v52  ;;  %v2689_v59 = vpack.c.bf16 %v1940_v54, %v1939_v24  ;;  %2410 = vst [vmem:[%s3817_s5 + $0x118] sm:$0xff] %v2686_v56  ;;  %v2690_v60 = vpack.c.bf16 %v1942_v57, %v1941_v53 }
 0x1e0   :  { %2413 = vst [vmem:[%s3817_s5 + $0x130] sm:$0xff] %v2689_v59  ;;  %v1679_v61 = vpop.f32.mrb[52].mxu0  ;;  %2414 = vst [vmem:[%s3817_s5 + $0x138] sm:$0xff] %v2690_v60  ;;  %v1792_v63 = vpop.f32.mrb[52].mxu1 }
 0x1e1   :  { %v1947_v62 = vadd.f32 %v3629_v20, %v1679_v61  ;;  %v1681_v0 = vpop.f32.mrb[53].mxu0  ;;  %v1949_v1 = vadd.f32 %v3635_v21, %v1792_v63  ;;  %v1794_v2 = vpop.f32.mrb[53].mxu1 }
 0x1e2   :  { %v1948_v38 = vadd.f32 %v3638_v17, %v1681_v0  ;;  %v1683_v4 = vpop.f32.mrb[54].mxu0  ;;  %v1950_v5 = vadd.f32 %v3644_v31, %v1794_v2  ;;  %v1796_v7 = vpop.f32.mrb[54].mxu1 }
 0x1e3   :  { %v1955_v6 = vadd.f32 %v3629_v20, %v1683_v4  ;;  %v1685_v9 = vpop.f32.mrb[55].mxu0  ;;  %v1957_v11 = vadd.f32 %v3635_v21, %v1796_v7  ;;  %v1798_v14 = vpop.f32.mrb[55].mxu1 }
 0x1e4   :  { %v2693_v10 = vpack.c.bf16 %v1948_v38, %v1947_v62  ;;  %v1956_v12 = vadd.f32 %v3638_v17, %v1685_v9  ;;  %v2694_v18 = vpack.c.bf16 %v1950_v5, %v1949_v1  ;;  %v1958_v19 = vadd.f32 %v3644_v31, %v1798_v14 }
 0x1e6   :  { %2417 = vst [vmem:[%s3817_s5 + $0x150] sm:$0xff] %v2693_v10  ;;  %v2697_v3 = vpack.c.bf16 %v1956_v12, %v1955_v6  ;;  %2418 = vst [vmem:[%s3817_s5 + $0x158] sm:$0xff] %v2694_v18  ;;  %v2698_v30 = vpack.c.bf16 %v1958_v19, %v1957_v11 }
 0x1e8   :  { %2421 = vst [vmem:[%s3817_s5 + $0x170] sm:$0xff] %v2697_v3  ;;  %v1689_v32 = vpop.f32.mrb[56].mxu0  ;;  %2422 = vst [vmem:[%s3817_s5 + $0x178] sm:$0xff] %v2698_v30  ;;  %v1802_v58 = vpop.f32.mrb[56].mxu1 }
 0x1e9   :  { %v1963_v22 = vadd.f32 %v3629_v20, %v1689_v32  ;;  %v1691_v15 = vpop.f32.mrb[57].mxu0  ;;  %v1965_v16 = vadd.f32 %v3635_v21, %v1802_v58  ;;  %v1804_v13 = vpop.f32.mrb[57].mxu1 }
 0x1ea   :  { %v1964_v23 = vadd.f32 %v3638_v17, %v1691_v15  ;;  %v1693_v26 = vpop.f32.mrb[58].mxu0  ;;  %v1966_v25 = vadd.f32 %v3644_v31, %v1804_v13  ;;  %v1806_v28 = vpop.f32.mrb[58].mxu1 }
 0x1eb   :  { %v1971_v27 = vadd.f32 %v3629_v20, %v1693_v26  ;;  %v1695_v29 = vpop.f32.mrb[59].mxu0  ;;  %v1973_v34 = vadd.f32 %v3635_v21, %v1806_v28  ;;  %v1808_v8 = vpop.f32.mrb[59].mxu1 }
 0x1ec   :  { %v2701_v33 = vpack.c.bf16 %v1964_v23, %v1963_v22  ;;  %v1972_v35 = vadd.f32 %v3638_v17, %v1695_v29  ;;  %v2702_v36 = vpack.c.bf16 %v1966_v25, %v1965_v16  ;;  %v1974_v37 = vadd.f32 %v3644_v31, %v1808_v8 }
 0x1ee   :  { %2425 = vst [vmem:[%s3817_s5 + $0x190] sm:$0xff] %v2701_v33  ;;  %v2705_v39 = vpack.c.bf16 %v1972_v35, %v1971_v27  ;;  %2426 = vst [vmem:[%s3817_s5 + $0x198] sm:$0xff] %v2702_v36  ;;  %v2706_v40 = vpack.c.bf16 %v1974_v37, %v1973_v34 }
 0x1f0   :  { %2429 = vst [vmem:[%s3817_s5 + $0x1b0] sm:$0xff] %v2705_v39  ;;  %v1699_v41 = vpop.f32.mrb[60].mxu0  ;;  %2430 = vst [vmem:[%s3817_s5 + $0x1b8] sm:$0xff] %v2706_v40  ;;  %v1812_v43 = vpop.f32.mrb[60].mxu1 }
 0x1f1   :  { %v1979_v42 = vadd.f32 %v3629_v20, %v1699_v41  ;;  %v1701_v44 = vpop.f32.mrb[61].mxu0  ;;  %v1981_v45 = vadd.f32 %v3635_v21, %v1812_v43  ;;  %v1814_v47 = vpop.f32.mrb[61].mxu1 }
 0x1f2   :  { %v1980_v46 = vadd.f32 %v3638_v17, %v1701_v44  ;;  %v1703_v48 = vpop.f32.mrb[62].mxu0  ;;  %v1982_v49 = vadd.f32 %v3644_v31, %v1814_v47  ;;  %v1816_v50 = vpop.f32.mrb[62].mxu1 }
 0x1f3   :  { %v1987_v24 = vadd.f32 %v3629_v20, %v1703_v48  ;;  %v1705_v51 = vpop.f32.mrb[63].mxu0  ;;  %v1989_v53 = vadd.f32 %v3635_v21, %v1816_v50  ;;  %v1818_v55 = vpop.f32.mrb[63].mxu1 }
 0x1f4   :  { %v2709_v52 = vpack.c.bf16 %v1980_v46, %v1979_v42  ;;  %v1988_v54 = vadd.f32 %v3638_v17, %v1705_v51  ;;  %v2710_v56 = vpack.c.bf16 %v1982_v49, %v1981_v45  ;;  %v1990_v57 = vadd.f32 %v3644_v31, %v1818_v55 }
 0x1f6   :  { %2433 = vst [vmem:[%s3817_s5 + $0x1d0] sm:$0xff] %v2709_v52  ;;  %v2713_v59 = vpack.c.bf16 %v1988_v54, %v1987_v24  ;;  %2434 = vst [vmem:[%s3817_s5 + $0x1d8] sm:$0xff] %v2710_v56  ;;  %v2714_v20 = vpack.c.bf16 %v1990_v57, %v1989_v53 }
 0x1f8   :  { %2437 = vst [vmem:[%s3817_s5 + $0x1f0] sm:$0xff] %v2713_v59  ;;  %2438 = vst [vmem:[%s3817_s5 + $0x1f8] sm:$0xff] %v2714_v20 }

// kernel: bilstm_forward.9
= control target key start
LH: loop header
LB: loop body
LE: loop exit
PB: predicated region body
PF: predicated region fallthrough
CT: control target
= control target key end

     0   :  { %vm132_vm0 = vcmask 48128   ;;  %s363_s1 = inlined_call_operand.vmem [shape: f32[256,6], index: 1, kind: input, shape index: {}]   ;;  %s364_s0 = inlined_call_operand.vmem [shape: f32[16,256], index: 0, kind: input, shape index: {}]   ;;  %s365_s2 = inlined_call_operand.vmem [shape: f32[1,6], index: 2, kind: input, shape index: {}]   ;;  %s366_s3 = inlined_call_operand.vmem [shape: f32[16,6], index: 3, kind: output, shape index: {}]  }
   0x1   :  { %v34_v0 = vld [vmem:[%s363_s1 + $0x80] sm:$0xff]  ;;  %v35_v1 = vld [vmem:[%s363_s1 + $0x88] sm:$0xff]  ;;  %v36_v5 = vld [vmem:[%s363_s1 + $0x90] sm:$0xff] }
   0x2   :  { %v18_v2 = vld [vmem:[%s363_s1] sm:$0xff]  ;;  %v178_v3 = vpack.c.bf16 %v35_v1, %v34_v0  ;;  %v19_v4 = vld [vmem:[%s363_s1 + $0x8] sm:$0xff]  ;;  %v37_v6 = vld [vmem:[%s363_s1 + $0x98] sm:$0xff] }
   0x3   :  { %v180_v7 = vpack.c.bf16 %v19_v4, %v18_v2  ;;  %v182_v8 = vpack.c.bf16 %v37_v6, %v36_v5  ;;  %v20_v9 = vld [vmem:[%s363_s1 + $0x10] sm:$0xff]  ;;  %v21_v10 = vld [vmem:[%s363_s1 + $0x18] sm:$0xff]  ;;  %v38_v11 = vld [vmem:[%s363_s1 + $0xa0] sm:$0xff] }
   0x4   :  { %179 = vmatprep.subr.bf16.mxu0 %v178_v3  ;;  %210 = vmatprep.subr.bf16.mxu1 %v178_v3  ;;  %v39_v12 = vld [vmem:[%s363_s1 + $0xa8] sm:$0xff]  ;;  %v184_v13 = vpack.c.bf16 %v21_v10, %v20_v9  ;;  %v22_v15 = vld [vmem:[%s363_s1 + $0x20] sm:$0xff]  ;;  %v40_v17 = vld [vmem:[%s363_s1 + $0xb0] sm:$0xff] }
   0x5   :  { %181 = vmatpush3.bf16.msra.mxu0 %v180_v7  ;;  %218 = vmatpush3.bf16.msra.mxu1 %v180_v7  ;;  %v186_v14 = vpack.c.bf16 %v39_v12, %v38_v11  ;;  %v23_v16 = vld [vmem:[%s363_s1 + $0x28] sm:$0xff]  ;;  %v41_v18 = vld [vmem:[%s363_s1 + $0xb8] sm:$0xff]  ;;  %v24_v21 = vld [vmem:[%s363_s1 + $0x30] sm:$0xff] }
   0x6   :  { %183 = vmatprep.subr.bf16.mxu0 %v182_v8  ;;  %211 = vmatprep.subr.bf16.mxu1 %v182_v8  ;;  %v188_v19 = vpack.c.bf16 %v23_v16, %v22_v15  ;;  %v190_v20 = vpack.c.bf16 %v41_v18, %v40_v17  ;;  %v25_v22 = vld [vmem:[%s363_s1 + $0x38] sm:$0xff]  ;;  %v42_v23 = vld [vmem:[%s363_s1 + $0xc0] sm:$0xff]  ;;  %v43_v24 = vld [vmem:[%s363_s1 + $0xc8] sm:$0xff] }
   0x7   :  { %v15_v25 = vld [vmem:[%s364_s0 + $0x8] sm:$0xff]  ;;  %v17_v26 = vld [vmem:[%s364_s0 + $0x18] sm:$0xff]  ;;  %v192_v27 = vpack.c.bf16 %v25_v22, %v24_v21  ;;  %v194_v28 = vpack.c.bf16 %v43_v24, %v42_v23  ;;  %v26_v29 = vld [vmem:[%s363_s1 + $0x40] sm:$0xff] }
   0x8   :  { %121 = vmatprep.mubr.f32.mxu0 %v15_v25  ;;  %v27_v30 = vld [vmem:[%s363_s1 + $0x48] sm:$0xff]  ;;  %v44_v31 = vld [vmem:[%s363_s1 + $0xd0] sm:$0xff]  ;;  %v45_v32 = vld [vmem:[%s363_s1 + $0xd8] sm:$0xff]  ;;  %126 = vmatprep.mubr.f32.mxu1 %v17_v26 }
   0x9   :  { %185 = vmatpush3.bf16.msra.mxu0 %v184_v13  ;;  %219 = vmatpush3.bf16.msra.mxu1 %v184_v13  ;;  %v196_v33 = vpack.c.bf16 %v27_v30, %v26_v29  ;;  %v198_v34 = vpack.c.bf16 %v45_v32, %v44_v31  ;;  %v28_v35 = vld [vmem:[%s363_s1 + $0x50] sm:$0xff]  ;;  %v29_v36 = vld [vmem:[%s363_s1 + $0x58] sm:$0xff]  ;;  %v46_v37 = vld [vmem:[%s363_s1 + $0xe0] sm:$0xff] }
   0xa   :  { %187 = vmatprep.subr.bf16.mxu0 %v186_v14  ;;  %212 = vmatprep.subr.bf16.mxu1 %v186_v14  ;;  %v47_v38 = vld [vmem:[%s363_s1 + $0xe8] sm:$0xff]  ;;  %v200_v39 = vpack.c.bf16 %v29_v36, %v28_v35  ;;  %v30_v41 = vld [vmem:[%s363_s1 + $0x60] sm:$0xff]  ;;  %v48_v43 = vld [vmem:[%s363_s1 + $0xf0] sm:$0xff] }
   0xb   :  { %v202_v40 = vpack.c.bf16 %v47_v38, %v46_v37  ;;  %v31_v42 = vld [vmem:[%s363_s1 + $0x68] sm:$0xff]  ;;  %v49_v44 = vld [vmem:[%s363_s1 + $0xf8] sm:$0xff]  ;;  %v32_v47 = vld [vmem:[%s363_s1 + $0x70] sm:$0xff] }
   0xc   :  { %v204_v45 = vpack.c.bf16 %v31_v42, %v30_v41  ;;  %v206_v46 = vpack.c.bf16 %v49_v44, %v48_v43  ;;  %v33_v48 = vld [vmem:[%s363_s1 + $0x78] sm:$0xff]  ;;  %v14_v50 = vld [vmem:[%s364_s0] sm:$0xff]  ;;  %v16_v51 = vld [vmem:[%s364_s0 + $0x10] sm:$0xff] }
   0xd   :  { %189 = vmatpush3.bf16.msra.mxu0 %v188_v19  ;;  %220 = vmatpush3.bf16.msra.mxu1 %v188_v19  ;;  %v208_v49 = vpack.c.bf16 %v33_v48, %v32_v47  ;;  %v139_v54 = vld [vmem:[%s365_s2] ss:$0 sm:$0xff] }
   0xe   :  { %191 = vmatprep.subr.bf16.mxu0 %v190_v20  ;;  %213 = vmatprep.subr.bf16.mxu1 %v190_v20 }
  0x11   :  { %193 = vmatpush3.bf16.msra.mxu0 %v192_v27  ;;  %221 = vmatpush3.bf16.msra.mxu1 %v192_v27 }
  0x12   :  { %195 = vmatprep.subr.bf16.mxu0 %v194_v28  ;;  %214 = vmatprep.subr.bf16.mxu1 %v194_v28 }
  0x15   :  { %197 = vmatpush3.bf16.msra.mxu0 %v196_v33  ;;  %222 = vmatpush3.bf16.msra.mxu1 %v196_v33 }
  0x16   :  { %199 = vmatprep.subr.bf16.mxu0 %v198_v34  ;;  %215 = vmatprep.subr.bf16.mxu1 %v198_v34 }
  0x19   :  { %201 = vmatpush3.bf16.msra.mxu0 %v200_v39  ;;  %223 = vmatpush3.bf16.msra.mxu1 %v200_v39 }
  0x1a   :  { %203 = vmatprep.subr.bf16.mxu0 %v202_v40  ;;  %216 = vmatprep.subr.bf16.mxu1 %v202_v40 }
  0x1d   :  { %205 = vmatpush3.bf16.msra.mxu0 %v204_v45  ;;  %224 = vmatpush3.bf16.msra.mxu1 %v204_v45 }
  0x1e   :  { %207 = vmatprep.subr.bf16.mxu0 %v206_v46  ;;  %217 = vmatprep.subr.bf16.mxu1 %v206_v46 }
  0x21   :  { %209 = vmatpush3.bf16.msra.mxu0 %v208_v49  ;;  %225 = vmatpush3.bf16.msra.mxu1 %v208_v49 }
  0x24   :  { %122 = vmatmul.mubr.f32.vlgmr.msra.gmra.mrb[0].mxu0 %v14_v50  ;;  %127 = vmatmul.mubr.f32.vlgmr.msra.gmra.mrb[0].mxu1 %v16_v51 }
  0xf7   :  { %v172_v52 = vpop.f32.mrb[0].mxu0  ;;  %v175_v53 = vpop.f32.mrb[0].mxu1 }
  0xf8   :  { %v173_v55 = vpop.f32.mrb[1].mxu0  ;;  %v176_v56 = vpop.f32.mrb[1].mxu1 }
  0xf9   :  { %v174_v57 = vadd.f32 %v173_v55, %v172_v52  ;;  %v177_v58 = vadd.f32 %v176_v56, %v175_v53 }
  0xfb   :  { %v124_v59 = vadd.f32 %v174_v57, %v139_v54  ;;  %v129_v60 = vadd.f32 %v177_v58, %v139_v54 }
  0xfd   :  { %133 = vst.msk [vmem:[%s366_s3] sm:$0xff] %vm132_vm0, %v124_v59  ;;  %134 = vst.msk [vmem:[%s366_s3 + $0x8] sm:$0xff] %vm132_vm0, %v129_v60 }

// kernel: bilstm_forward.6
= control target key start
LH: loop header
LB: loop body
LE: loop exit
PB: predicated region body
PF: predicated region fallthrough
CT: control target
= control target key end

     0   :  { %v5876_v2 = vmov 0   ;;  %v5878_v38 = vmov 0.0|0.0   ;;  %s5871_s0 = inlined_call_operand.vmem [shape: bf16[8,16,1024], index: 0, kind: input, shape index: {}, may-alias: {0,1}]   ;;  %s5872_s1 = inlined_call_operand.vmem [shape: bf16[8,16,1024], index: 1, kind: input, shape index: {}, may-alias: {0,1}]   ;;  %s5873_s2 = inlined_call_operand.vmem [shape: bf16[2,128,512], index: 2, kind: input, shape index: {}]   ;;  %s5874_s3 = inlined_call_operand.vmem [shape: bf16[8,16,128], index: 3, kind: output, shape index: {0}]   ;;  %s5875_s4 = inlined_call_operand.vmem [shape: bf16[8,16,128], index: 4, kind: output, shape index: {1}]  }
   0x1   :  { %v4014_v0 = vld [vmem:[%s5873_s2 + $0x4] ss:$16 sps:$4 sm:$0xff]   ;;  %v4019_v1 = vld [vmem:[%s5873_s2] ss:$16 sps:$4 sm:$0xff]   ;;  %495 = vmatprep.mubr.bf16.mxu0 %v5876_v2  ;;  %538 = vmatprep.mubr.bf16.mxu1 %v5876_v2  ;;  %v4027_v3 = vld [vmem:[%s5873_s2 + $0xc] ss:$16 sps:$4 sm:$0xff]  }
   0x2   :  { %463 = vmatprep.subr.bf16.mxu0 %v4014_v0  ;;  %v4033_v4 = vld [vmem:[%s5873_s2 + $0x24] ss:$16 sps:$4 sm:$0xff]   ;;  %v4038_v5 = vld [vmem:[%s5873_s2 + $0x8] ss:$16 sps:$4 sm:$0xff]   ;;  %v4043_v6 = vld [vmem:[%s5873_s2 + $0x20] ss:$16 sps:$4 sm:$0xff]   ;;  %506 = vmatprep.subr.bf16.mxu1 %v4027_v3 }
   0x3   :  { %464 = vmatpush1.bf16.msra.mxu0 %v4019_v1  ;;  %5979 = vst [vmem:[#allocation6_spill] sm:$0xff] %v4043_v6  ;;  %v4049_v7 = vld [vmem:[%s5873_s2 + $0x2c] ss:$16 sps:$4 sm:$0xff]   ;;  %507 = vmatpush1.bf16.msra.mxu1 %v4038_v5  ;;  %v4056_v8 = vld [vmem:[%s5873_s2 + $0x44] ss:$16 sps:$4 sm:$0xff]  }
   0x4   :  { %5980 = vst [vmem:[#allocation7_spill] sm:$0xff] %v4049_v7  ;;  %465 = vmatprep.subr.bf16.mxu0 %v4033_v4  ;;  %5981 = vst [vmem:[#allocation8_spill] sm:$0xff] %v4056_v8  ;;  %508 = vmatprep.subr.bf16.mxu1 %v4049_v7  ;;  %v4062_v9 = vld [vmem:[%s5873_s2 + $0x28] ss:$16 sps:$4 sm:$0xff]   ;;  %v4067_v10 = vld [vmem:[%s5873_s2 + $0x40] ss:$16 sps:$4 sm:$0xff]  }
   0x5   :  { %5982 = vst [vmem:[#allocation9_spill] sm:$0xff] %v4062_v9  ;;  %5983 = vst [vmem:[#allocation10_spill] sm:$0xff] %v4067_v10  ;;  %v4073_v11 = vld [vmem:[%s5873_s2 + $0x4c] ss:$16 sps:$4 sm:$0xff]   ;;  %v4079_v12 = vld [vmem:[%s5873_s2 + $0x64] ss:$16 sps:$4 sm:$0xff]  }
   0x6   :  { %5984 = vst [vmem:[#allocation11_spill] sm:$0xff] %v4073_v11  ;;  %5985 = vst [vmem:[#allocation12_spill] sm:$0xff] %v4079_v12  ;;  %v4085_v13 = vld [vmem:[%s5873_s2 + $0x48] ss:$16 sps:$4 sm:$0xff]   ;;  %v4091_v14 = vld [vmem:[%s5873_s2 + $0x6c] ss:$16 sps:$4 sm:$0xff]  }
   0x7   :  { %466 = vmatpush1.bf16.msra.mxu0 %v4043_v6  ;;  %509 = vmatpush1.bf16.msra.mxu1 %v4062_v9  ;;  %5986 = vst [vmem:[#allocation13_spill] sm:$0xff] %v4085_v13  ;;  %5987 = vst [vmem:[#allocation14_spill] sm:$0xff] %v4091_v14  ;;  %v4097_v15 = vld [vmem:[%s5873_s2 + $0x60] ss:$16 sps:$4 sm:$0xff]   ;;  %v4103_v16 = vld [vmem:[%s5873_s2 + $0x84] ss:$16 sps:$4 sm:$0xff]  }
   0x8   :  { %467 = vmatprep.subr.bf16.mxu0 %v4056_v8  ;;  %510 = vmatprep.subr.bf16.mxu1 %v4073_v11  ;;  %5988 = vst [vmem:[#allocation15_spill] sm:$0xff] %v4097_v15  ;;  %5989 = vst [vmem:[#allocation16_spill] sm:$0xff] %v4103_v16  ;;  %v4109_v17 = vld [vmem:[%s5873_s2 + $0x68] ss:$16 sps:$4 sm:$0xff]   ;;  %v4115_v18 = vld [vmem:[%s5873_s2 + $0x8c] ss:$16 sps:$4 sm:$0xff]  }
   0x9   :  { %5990 = vst [vmem:[#allocation17_spill] sm:$0xff] %v4109_v17  ;;  %5991 = vst [vmem:[#allocation18_spill] sm:$0xff] %v4115_v18  ;;  %v4121_v19 = vld [vmem:[%s5873_s2 + $0x80] ss:$16 sps:$4 sm:$0xff]   ;;  %v4127_v20 = vld [vmem:[%s5873_s2 + $0xa4] ss:$16 sps:$4 sm:$0xff]  }
   0xa   :  { %5992 = vst [vmem:[#allocation19_spill] sm:$0xff] %v4121_v19  ;;  %5993 = vst [vmem:[#allocation20_spill] sm:$0xff] %v4127_v20  ;;  %v4133_v21 = vld [vmem:[%s5873_s2 + $0x88] ss:$16 sps:$4 sm:$0xff]   ;;  %v4139_v22 = vld [vmem:[%s5873_s2 + $0xac] ss:$16 sps:$4 sm:$0xff]  }
   0xb   :  { %468 = vmatpush1.bf16.msra.mxu0 %v4067_v10  ;;  %511 = vmatpush1.bf16.msra.mxu1 %v4085_v13  ;;  %5994 = vst [vmem:[#allocation21_spill] sm:$0xff] %v4133_v21  ;;  %5995 = vst [vmem:[#allocation22_spill] sm:$0xff] %v4139_v22  ;;  %v4145_v23 = vld [vmem:[%s5873_s2 + $0xa0] ss:$16 sps:$4 sm:$0xff]   ;;  %v4151_v24 = vld [vmem:[%s5873_s2 + $0xc4] ss:$16 sps:$4 sm:$0xff]  }
   0xc   :  { %469 = vmatprep.subr.bf16.mxu0 %v4079_v12  ;;  %512 = vmatprep.subr.bf16.mxu1 %v4091_v14  ;;  %5996 = vst [vmem:[#allocation23_spill] sm:$0xff] %v4145_v23  ;;  %5997 = vst [vmem:[#allocation24_spill] sm:$0xff] %v4151_v24  ;;  %v4157_v25 = vld [vmem:[%s5873_s2 + $0xa8] ss:$16 sps:$4 sm:$0xff]   ;;  %v4163_v26 = vld [vmem:[%s5873_s2 + $0xcc] ss:$16 sps:$4 sm:$0xff]  }
   0xd   :  { %5998 = vst [vmem:[#allocation25_spill] sm:$0xff] %v4157_v25  ;;  %5999 = vst [vmem:[#allocation26_spill] sm:$0xff] %v4163_v26  ;;  %v4169_v27 = vld [vmem:[%s5873_s2 + $0xc0] ss:$16 sps:$4 sm:$0xff]   ;;  %v4175_v28 = vld [vmem:[%s5873_s2 + $0xe4] ss:$16 sps:$4 sm:$0xff]  }
   0xe   :  { %6000 = vst [vmem:[#allocation27_spill] sm:$0xff] %v4169_v27  ;;  %6001 = vst [vmem:[#allocation28_spill] sm:$0xff] %v4175_v28  ;;  %v4181_v29 = vld [vmem:[%s5873_s2 + $0xc8] ss:$16 sps:$4 sm:$0xff]   ;;  %v4187_v30 = vld [vmem:[%s5873_s2 + $0xec] ss:$16 sps:$4 sm:$0xff]  }
   0xf   :  { %470 = vmatpush1.bf16.msra.mxu0 %v4097_v15  ;;  %513 = vmatpush1.bf16.msra.mxu1 %v4109_v17  ;;  %6002 = vst [vmem:[#allocation29_spill] sm:$0xff] %v4181_v29  ;;  %6003 = vst [vmem:[#allocation30_spill] sm:$0xff] %v4187_v30  ;;  %v4193_v31 = vld [vmem:[%s5873_s2 + $0xe0] ss:$16 sps:$4 sm:$0xff]   ;;  %v4199_v32 = vld [vmem:[%s5873_s2 + $0x104] ss:$16 sps:$4 sm:$0xff]  }
  0x10   :  { %471 = vmatprep.subr.bf16.mxu0 %v4103_v16  ;;  %514 = vmatprep.subr.bf16.mxu1 %v4115_v18  ;;  %6004 = vst [vmem:[#allocation31_spill] sm:$0xff] %v4193_v31  ;;  %6005 = vst [vmem:[#allocation32_spill] sm:$0xff] %v4199_v32  ;;  %v4205_v33 = vld [vmem:[%s5873_s2 + $0xe8] ss:$16 sps:$4 sm:$0xff]   ;;  %v4211_v34 = vld [vmem:[%s5873_s2 + $0x10c] ss:$16 sps:$4 sm:$0xff]  }
  0x11   :  { %6006 = vst [vmem:[#allocation33_spill] sm:$0xff] %v4205_v33  ;;  %6007 = vst [vmem:[#allocation34_spill] sm:$0xff] %v4211_v34  ;;  %v4217_v35 = vld [vmem:[%s5873_s2 + $0x100] ss:$16 sps:$4 sm:$0xff]   ;;  %v4223_v36 = vld [vmem:[%s5873_s2 + $0x124] ss:$16 sps:$4 sm:$0xff]  }
  0x12   :  { %v4229_v37 = vld [vmem:[%s5873_s2 + $0x108] ss:$16 sps:$4 sm:$0xff]   ;;  %v4236_v39 = vld [vmem:[%s5873_s2 + $0x12c] ss:$16 sps:$4 sm:$0xff]   ;;  %v4242_v40 = vld [vmem:[%s5873_s2 + $0x120] ss:$16 sps:$4 sm:$0xff]  }
  0x13   :  { %472 = vmatpush1.bf16.msra.mxu0 %v4121_v19  ;;  %515 = vmatpush1.bf16.msra.mxu1 %v4133_v21  ;;  %v4250_v41 = vld [vmem:[%s5873_s2 + $0x144] ss:$16 sps:$4 sm:$0xff]   ;;  %v4256_v42 = vld [vmem:[%s5873_s2 + $0x128] ss:$16 sps:$4 sm:$0xff]   ;;  %v4263_v43 = vld [vmem:[%s5873_s2 + $0x14c] ss:$16 sps:$4 sm:$0xff]  }
  0x14   :  { %473 = vmatprep.subr.bf16.mxu0 %v4127_v20  ;;  %516 = vmatprep.subr.bf16.mxu1 %v4139_v22  ;;  %v4269_v44 = vld [vmem:[%s5873_s2 + $0x140] ss:$16 sps:$4 sm:$0xff]   ;;  %v4275_v45 = vld [vmem:[%s5873_s2 + $0x164] ss:$16 sps:$4 sm:$0xff]   ;;  %v4281_v46 = vld [vmem:[%s5873_s2 + $0x148] ss:$16 sps:$4 sm:$0xff]  }
  0x15   :  { %v4287_v47 = vld [vmem:[%s5873_s2 + $0x16c] ss:$16 sps:$4 sm:$0xff]   ;;  %v4293_v48 = vld [vmem:[%s5873_s2 + $0x160] ss:$16 sps:$4 sm:$0xff]   ;;  %v4299_v49 = vld [vmem:[%s5873_s2 + $0x184] ss:$16 sps:$4 sm:$0xff]  }
  0x16   :  { %v4305_v50 = vld [vmem:[%s5873_s2 + $0x168] ss:$16 sps:$4 sm:$0xff]   ;;  %v4311_v51 = vld [vmem:[%s5873_s2 + $0x18c] ss:$16 sps:$4 sm:$0xff]   ;;  %v4317_v52 = vld [vmem:[%s5873_s2 + $0x180] ss:$16 sps:$4 sm:$0xff]  }
  0x17   :  { %474 = vmatpush1.bf16.msra.mxu0 %v4145_v23  ;;  %517 = vmatpush1.bf16.msra.mxu1 %v4157_v25  ;;  %v4323_v53 = vld [vmem:[%s5873_s2 + $0x1a4] ss:$16 sps:$4 sm:$0xff]   ;;  %v4329_v54 = vld [vmem:[%s5873_s2 + $0x188] ss:$16 sps:$4 sm:$0xff]   ;;  %v4335_v55 = vld [vmem:[%s5873_s2 + $0x1ac] ss:$16 sps:$4 sm:$0xff]  }
  0x18   :  { %475 = vmatprep.subr.bf16.mxu0 %v4151_v24  ;;  %518 = vmatprep.subr.bf16.mxu1 %v4163_v26  ;;  %v4341_v56 = vld [vmem:[%s5873_s2 + $0x1a0] ss:$16 sps:$4 sm:$0xff]   ;;  %v4347_v57 = vld [vmem:[%s5873_s2 + $0x1c4] ss:$16 sps:$4 sm:$0xff]   ;;  %v4353_v58 = vld [vmem:[%s5873_s2 + $0x1a8] ss:$16 sps:$4 sm:$0xff]  }
  0x19   :  { %v4359_v59 = vld [vmem:[%s5873_s2 + $0x1cc] ss:$16 sps:$4 sm:$0xff]   ;;  %v4365_v60 = vld [vmem:[%s5873_s2 + $0x1c0] ss:$16 sps:$4 sm:$0xff]   ;;  %v4371_v61 = vld [vmem:[%s5873_s2 + $0x1e4] ss:$16 sps:$4 sm:$0xff]  }
  0x1a   :  { %6008 = vst [vmem:[#allocation35_spill] sm:$0xff] %v4365_v60  ;;  %6009 = vst [vmem:[#allocation36_spill] sm:$0xff] %v4371_v61  ;;  %v4377_v62 = vld [vmem:[%s5873_s2 + $0x1c8] ss:$16 sps:$4 sm:$0xff]   ;;  %v4383_v63 = vld [vmem:[%s5873_s2 + $0x1ec] ss:$16 sps:$4 sm:$0xff]  }
  0x1b   :  { %476 = vmatpush1.bf16.msra.mxu0 %v4169_v27  ;;  %519 = vmatpush1.bf16.msra.mxu1 %v4181_v29 }
  0x1c   :  { %477 = vmatprep.subr.bf16.mxu0 %v4175_v28  ;;  %520 = vmatprep.subr.bf16.mxu1 %v4187_v30 }
  0x1f   :  { %478 = vmatpush1.bf16.msra.mxu0 %v4193_v31  ;;  %521 = vmatpush1.bf16.msra.mxu1 %v4205_v33 }
  0x20   :  { %767 = vmatprep.subr.bf16.mxu0 %v4199_v32  ;;  %810 = vmatprep.subr.bf16.mxu1 %v4211_v34 }
  0x22   :  { %496 = vmatmul.mubr.bf16.vlgmr.msra.gmra.mrb[0].mxu0 %v5878_v38  ;;  %539 = vmatmul.mubr.bf16.vlgmr.msra.gmra.mrb[0].mxu1 %v5878_v38  ;;  %v4396_v38 = vld [vmem:[%s5873_s2 + $0x1e8] ss:$16 sps:$4 sm:$0xff]  }
  0x23   :  { %768 = vmatpush1.bf16.msra.mxu0 %v4217_v35  ;;  %799 = vmatprep.mubr.bf16.mxu0 %v5876_v2 }
  0x24   :  { %769 = vmatprep.subr.bf16.mxu0 %v4223_v36  ;;  %811 = vmatpush1.bf16.msra.mxu1 %v4229_v37 }
  0x25   :  { %842 = vmatprep.mubr.bf16.mxu1 %v5876_v2  ;;  %812 = vmatprep.subr.bf16.mxu1 %v4236_v39  ;;  %v4389_v2 = vld [vmem:[%s5873_s2 + $0x1e0] ss:$16 sps:$4 sm:$0xff]  }
  0x27   :  { %770 = vmatpush1.bf16.msra.mxu0 %v4242_v40 }
  0x28   :  { %771 = vmatprep.subr.bf16.mxu0 %v4250_v41  ;;  %813 = vmatpush1.bf16.msra.mxu1 %v4256_v42 }
  0x29   :  { %814 = vmatprep.subr.bf16.mxu1 %v4263_v43 }
  0x2b   :  { %772 = vmatpush1.bf16.msra.mxu0 %v4269_v44 }
  0x2c   :  { %773 = vmatprep.subr.bf16.mxu0 %v4275_v45  ;;  %815 = vmatpush1.bf16.msra.mxu1 %v4281_v46 }
  0x2d   :  { %816 = vmatprep.subr.bf16.mxu1 %v4287_v47 }
  0x2f   :  { %774 = vmatpush1.bf16.msra.mxu0 %v4293_v48 }
  0x30   :  { %775 = vmatprep.subr.bf16.mxu0 %v4299_v49  ;;  %817 = vmatpush1.bf16.msra.mxu1 %v4305_v50 }
  0x31   :  { %818 = vmatprep.subr.bf16.mxu1 %v4311_v51 }
  0x33   :  { %776 = vmatpush1.bf16.msra.mxu0 %v4317_v52 }
  0x34   :  { %777 = vmatprep.subr.bf16.mxu0 %v4323_v53  ;;  %819 = vmatpush1.bf16.msra.mxu1 %v4329_v54 }
  0x35   :  { %820 = vmatprep.subr.bf16.mxu1 %v4335_v55 }
  0x37   :  { %778 = vmatpush1.bf16.msra.mxu0 %v4341_v56 }
  0x38   :  { %779 = vmatprep.subr.bf16.mxu0 %v4347_v57  ;;  %821 = vmatpush1.bf16.msra.mxu1 %v4353_v58 }
  0x39   :  { %822 = vmatprep.subr.bf16.mxu1 %v4359_v59 }
  0x3b   :  { %780 = vmatpush1.bf16.msra.mxu0 %v4365_v60  ;;  %v6010_v60 = vmov 0.0|0.0  }
  0x3c   :  { %781 = vmatprep.subr.bf16.mxu0 %v4371_v61  ;;  %823 = vmatpush1.bf16.msra.mxu1 %v4377_v62  ;;  %v6011_v61 = vmov 0  }
  0x3d   :  { %824 = vmatprep.subr.bf16.mxu1 %v4383_v63 }
  0x3f   :  { %782 = vmatpush1.bf16.msra.mxu0 %v4389_v2 }
  0x40   :  { %931 = vmatprep.subr.bf16.mxu0 %v4014_v0  ;;  %825 = vmatpush1.bf16.msra.mxu1 %v4396_v38 }
  0x41   :  { %974 = vmatprep.subr.bf16.mxu1 %v4027_v3 }
  0x42   :  { %800 = vmatmul.mubr.bf16.vlgmr.msra.gmra.mrb[4].mxu0 %v6010_v60 }
  0x43   :  { %932 = vmatpush1.bf16.msra.mxu0 %v4019_v1  ;;  %963 = vmatprep.mubr.bf16.mxu0 %v6011_v61 }
  0x44   :  { %843 = vmatmul.mubr.bf16.vlgmr.msra.gmra.mrb[4].mxu1 %v6010_v60  ;;  %933 = vmatprep.subr.bf16.mxu0 %v4033_v4  ;;  %v24_v60 = vld [vmem:[%s5871_s0] sm:$0xff] }
  0x45   :  { %975 = vmatpush1.bf16.msra.mxu1 %v4038_v5  ;;  %1006 = vmatprep.mubr.bf16.mxu1 %v6011_v61 }
  0x46   :  { %976 = vmatprep.subr.bf16.mxu1 %v4049_v7 }
  0x47   :  { %934 = vmatpush1.bf16.msra.mxu0 %v4043_v6 }
  0x48   :  { %935 = vmatprep.subr.bf16.mxu0 %v4056_v8 }
  0x49   :  { %977 = vmatpush1.bf16.msra.mxu1 %v4062_v9 }
  0x4a   :  { %978 = vmatprep.subr.bf16.mxu1 %v4073_v11 }
  0x4b   :  { %936 = vmatpush1.bf16.msra.mxu0 %v4067_v10 }
  0x4c   :  { %937 = vmatprep.subr.bf16.mxu0 %v4079_v12 }
  0x4d   :  { %979 = vmatpush1.bf16.msra.mxu1 %v4085_v13 }
  0x4e   :  { %980 = vmatprep.subr.bf16.mxu1 %v4091_v14 }
  0x4f   :  { %938 = vmatpush1.bf16.msra.mxu0 %v4097_v15 }
  0x50   :  { %939 = vmatprep.subr.bf16.mxu0 %v4103_v16 }
  0x51   :  { %981 = vmatpush1.bf16.msra.mxu1 %v4109_v17 }
  0x52   :  { %982 = vmatprep.subr.bf16.mxu1 %v4115_v18 }
  0x53   :  { %940 = vmatpush1.bf16.msra.mxu0 %v4121_v19 }
  0x54   :  { %941 = vmatprep.subr.bf16.mxu0 %v4127_v20 }
  0x55   :  { %983 = vmatpush1.bf16.msra.mxu1 %v4133_v21 }
  0x56   :  { %984 = vmatprep.subr.bf16.mxu1 %v4139_v22 }
  0x57   :  { %942 = vmatpush1.bf16.msra.mxu0 %v4145_v23 }
  0x58   :  { %943 = vmatprep.subr.bf16.mxu0 %v4151_v24 }
  0x59   :  { %985 = vmatpush1.bf16.msra.mxu1 %v4157_v25 }
  0x5a   :  { %986 = vmatprep.subr.bf16.mxu1 %v4163_v26 }
  0x5b   :  { %944 = vmatpush1.bf16.msra.mxu0 %v4169_v27  ;;  %v294_v27 = vunpack.c.l.bf16 %v24_v60 }
  0x5c   :  { %945 = vmatprep.subr.bf16.mxu0 %v4175_v28  ;;  %v28_v28 = vld [vmem:[%s5871_s0 + $0x20] sm:$0xff] }
  0x5d   :  { %987 = vmatpush1.bf16.msra.mxu1 %v4181_v29  ;;  %v295_v29 = vunpack.c.h.bf16 %v24_v60  ;;  %v298_v26 = vunpack.c.l.bf16 %v28_v28 }
  0x5e   :  { %988 = vmatprep.subr.bf16.mxu1 %v4187_v30  ;;  %v299_v30 = vunpack.c.h.bf16 %v28_v28 }
  0x5f   :  { %946 = vmatpush1.bf16.msra.mxu0 %v4193_v31  ;;  %v26_v31 = vld [vmem:[%s5871_s0 + $0x8] sm:$0xff] }
  0x60   :  { %1074 = vmatprep.subr.bf16.mxu0 %v4199_v32  ;;  %v297_v20 = vunpack.c.h.bf16 %v26_v31  ;;  %v296_v12 = vunpack.c.l.bf16 %v26_v31 }
  0x61   :  { %989 = vmatpush1.bf16.msra.mxu1 %v4205_v33 }
  0x62   :  { %1117 = vmatprep.subr.bf16.mxu1 %v4211_v34  ;;  %v30_v34 = vld [vmem:[%s5871_s0 + $0x28] sm:$0xff] }
  0x63   :  { %v301_v14 = vunpack.c.h.bf16 %v30_v34 }
  0xf5   :  { %v497_v32 = vpop.f32.mrb[0].mxu0  ;;  %v540_v22 = vpop.f32.mrb[0].mxu1 }
  0xf6   :  { %v549_v33 = vadd.f32 %v497_v32, %v294_v27  ;;  %v499_v24 = vpop.f32.mrb[1].mxu0  ;;  %v542_v18 = vpop.f32.mrb[1].mxu1  ;;  %v551_v10 = vadd.f32 %v540_v22, %v296_v12 }
  0xf7   :  { %v550_v25 = vadd.f32 %v499_v24, %v295_v29  ;;  %v501_v23 = vpop.f32.mrb[2].mxu0  ;;  %v544_v15 = vpop.f32.mrb[2].mxu1  ;;  %v552_v13 = vadd.f32 %v542_v18, %v297_v20  ;;  %v300_v24 = vunpack.c.l.bf16 %v30_v34 }
  0xf8   :  { %v557_v21 = vmul.f32 0.5, %v549_v33  ;;  %v553_v19 = vadd.f32 %v501_v23, %v298_v26  ;;  %v503_v60 = vpop.f32.mrb[3].mxu0  ;;  %v546_v27 = vpop.f32.mrb[3].mxu1  ;;  %v559_v26 = vmul.f32 0.5, %v551_v10 }
  0xf9   :  { %v558_v16 = vmul.f32 0.5, %v550_v25  ;;  %v554_v17 = vadd.f32 %v503_v60, %v299_v30  ;;  %v556_v29 = vadd.f32 %v546_v27, %v301_v14  ;;  %v555_v23 = vadd.f32 %v544_v15, %v300_v24  ;;  %v3154_v24 = vld [vmem:[%s5872_s1 + $0x1f0] sm:$0xff] }
  0xfa   :  { %3536 = vtanh.f32 %v557_v21  ;;  %v560_v28 = vmul.f32 0.5, %v553_v19 }
  0xfb   :  { %3538 = vtanh.f32 %v558_v16  ;;  %v561_v32 = vmul.f32 0.5, %v554_v17  ;;  %v562_v30 = vmul.f32 0.5, %v555_v23 }
  0xfc   :  { %3540 = vtanh.f32 %v560_v28 }
  0xfd   :  { %3542 = vtanh.f32 %v561_v32  ;;  %v3152_v32 = vld [vmem:[%s5872_s1 + $0x1d0] sm:$0xff] }
  0xfe   :  { %3544 = vtanh.f32 %v552_v13  ;;  %v598_v23 = vunpack.c.l.bf16 %v3152_v32 }
  0xff   :  { %3546 = vtanh.f32 %v556_v29 }
 0x100   :  { %3548 = vtanh.f32 %v559_v26  ;;  %v599_v26 = vunpack.c.h.bf16 %v3152_v32 }
 0x101   :  { %3550 = vtanh.f32 %v562_v30  ;;  %v602_v30 = vunpack.c.l.bf16 %v3154_v24 }
 0x104   :  { %v3537_v25 = vpop.eup %3536 }
 0x105   :  { %v3539_v33 = vpop.eup %3538  ;;  %v569_v60 = vmul.f32 0.5, %v3537_v25  ;;  %v3153_v25 = vld [vmem:[%s5872_s1 + $0x1d8] sm:$0xff] }
 0x106   :  { %v3541_v21 = vpop.eup %3540  ;;  %v570_v19 = vmul.f32 0.5, %v3539_v33 }
 0x107   :  { %v3543_v11 = vpop.eup %3542  ;;  %v575_v16 = vadd.f32 0.5, %v569_v60  ;;  %v572_v17 = vmul.f32 0.5, %v3541_v21 }
 0x108   :  { %v576_v18 = vadd.f32 0.5, %v570_v19  ;;  %v573_v20 = vmul.f32 0.5, %v3543_v11  ;;  %v3545_v31 = vpop.eup %3544  ;;  %v603_v19 = vunpack.c.h.bf16 %v3154_v24 }
 0x109   :  { %v578_v14 = vadd.f32 0.5, %v572_v17  ;;  %v585_v15 = vmul.f32 %v3545_v31, %v575_v16  ;;  %v3547_v22 = vpop.eup %3546  ;;  %v3155_v16 = vld [vmem:[%s5872_s1 + $0x1f8] sm:$0xff] }
 0x10a   :  { %v583_v12 = vmul.f32 0.0, %v576_v18  ;;  %v579_v13 = vadd.f32 0.5, %v573_v20  ;;  %v3549_v11 = vpop.eup %3548  ;;  %v601_v20 = vunpack.c.h.bf16 %v3153_v25  ;;  %v605_v32 = vunpack.c.h.bf16 %v3155_v16 }
 0x10b   :  { %v586_v28 = vmul.f32 %v3547_v22, %v578_v14  ;;  %v3551_v29 = vpop.eup %3550  ;;  %v571_v33 = vmul.f32 0.5, %v3549_v11 }
 0x10c   :  { %v584_v10 = vmul.f32 0.0, %v579_v13  ;;  %v4451_v34 = vadd.f32 %v585_v15, %v583_v12  ;;  %v574_v60 = vmul.f32 0.5, %v3551_v29 }
 0x10d   :  { %v577_v11 = vadd.f32 0.5, %v571_v33 }
 0x10e   :  { %6012 = vst [vmem:[#allocation37_spill] sm:$0xff] %v4451_v34  ;;  %3552 = vtanh.f32 %v4451_v34  ;;  %v4454_v27 = vadd.f32 %v586_v28, %v584_v10  ;;  %v580_v29 = vadd.f32 0.5, %v574_v60 }
 0x110   :  { %6013 = vst [vmem:[#allocation38_spill] sm:$0xff] %v4454_v27  ;;  %3554 = vtanh.f32 %v4454_v27 }
 0x115   :  { %v801_v21 = vpop.f32.mrb[4].mxu0 }
 0x116   :  { %v853_v17 = vadd.f32 %v801_v21, %v598_v23  ;;  %v803_v18 = vpop.f32.mrb[5].mxu0  ;;  %v600_v23 = vunpack.c.l.bf16 %v3153_v25 }
 0x117   :  { %v854_v31 = vadd.f32 %v803_v18, %v599_v26  ;;  %v805_v14 = vpop.f32.mrb[6].mxu0  ;;  %v844_v12 = vpop.f32.mrb[4].mxu1 }
 0x118   :  { %v3553_v13 = vpop.eup %3552  ;;  %v861_v15 = vmul.f32 0.5, %v853_v17  ;;  %v857_v22 = vadd.f32 %v805_v14, %v602_v30  ;;  %v807_v10 = vpop.f32.mrb[7].mxu0  ;;  %v604_v30 = vunpack.c.l.bf16 %v3155_v16  ;;  %v855_v33 = vadd.f32 %v844_v12, %v600_v23 }
 0x119   :  { %v846_v28 = vpop.f32.mrb[5].mxu1  ;;  %v862_v27 = vmul.f32 0.5, %v854_v31  ;;  %v858_v24 = vadd.f32 %v807_v10, %v603_v19  ;;  %v591_v18 = vmul.f32 %v3553_v13, %v577_v11 }
 0x11a   :  { %v848_v34 = vpop.f32.mrb[6].mxu1  ;;  %v3555_v8 = vpop.eup %3554  ;;  %3556 = vtanh.f32 %v861_v15  ;;  %v864_v9 = vmul.f32 0.5, %v857_v22  ;;  %v856_v21 = vadd.f32 %v846_v28, %v601_v20 }
 0x11b   :  { %v850_v6 = vpop.f32.mrb[7].mxu1  ;;  %3558 = vtanh.f32 %v862_v27  ;;  %v865_v26 = vmul.f32 0.5, %v858_v24  ;;  %v592_v7 = vmul.f32 %v3555_v8, %v580_v29  ;;  %v859_v25 = vadd.f32 %v848_v34, %v604_v30 }
 0x11c   :  { %3560 = vtanh.f32 %v864_v9  ;;  %v860_v17 = vadd.f32 %v850_v6, %v605_v32  ;;  %v863_v6 = vmul.f32 0.5, %v855_v33 }
 0x11d   :  { %3562 = vtanh.f32 %v865_v26  ;;  %v897_v14 = vpack.c.bf16 %v592_v7, %v591_v18  ;;  %v866_v8 = vmul.f32 0.5, %v859_v25 }
 0x11e   :  { %3564 = vtanh.f32 %v856_v21 }
 0x11f   :  { %3348 = vst [vmem:[%s5874_s3] sm:$0xff] %v897_v14   ;;  %964 = vmatmul.mubr.bf16.vlgmr.msra.gmra.mrb[8].mxu0 %v897_v14  ;;  %1007 = vmatmul.mubr.bf16.vlgmr.msra.gmra.mrb[8].mxu1 %v897_v14  ;;  %3566 = vtanh.f32 %v860_v17  ;;  %v6014_v14 = vld [vmem:[#allocation35_spill] sm:$0xff] }
 0x120   :  { %1075 = vmatpush1.bf16.msra.mxu0 %v4217_v35  ;;  %1118 = vmatpush1.bf16.msra.mxu1 %v4229_v37  ;;  %3568 = vtanh.f32 %v863_v6  ;;  %v6015_v6 = vld [vmem:[#allocation36_spill] sm:$0xff] }
 0x121   :  { %1076 = vmatprep.subr.bf16.mxu0 %v4223_v36  ;;  %1119 = vmatprep.subr.bf16.mxu1 %v4236_v39  ;;  %3570 = vtanh.f32 %v866_v8 }
 0x122   :  { %1106 = vmatprep.mubr.bf16.mxu0 %v6011_v61  ;;  %1149 = vmatprep.mubr.bf16.mxu1 %v6011_v61 }
 0x124   :  { %v3557_v7 = vpop.eup %3556  ;;  %1077 = vmatpush1.bf16.msra.mxu0 %v4242_v40  ;;  %1120 = vmatpush1.bf16.msra.mxu1 %v4256_v42 }
 0x125   :  { %v3559_v9 = vpop.eup %3558  ;;  %v873_v34 = vmul.f32 0.5, %v3557_v7  ;;  %1078 = vmatprep.subr.bf16.mxu0 %v4250_v41  ;;  %1121 = vmatprep.subr.bf16.mxu1 %v4263_v43 }
 0x126   :  { %v3561_v27 = vpop.eup %3560  ;;  %v874_v60 = vmul.f32 0.5, %v3559_v9 }
 0x127   :  { %v3563_v19 = vpop.eup %3562  ;;  %v879_v16 = vadd.f32 0.5, %v873_v34  ;;  %v876_v20 = vmul.f32 0.5, %v3561_v27  ;;  %v6016_v27 = vld [vmem:[#allocation7_spill] sm:$0xff] }
 0x128   :  { %v880_v31 = vadd.f32 0.5, %v874_v60  ;;  %v877_v12 = vmul.f32 0.5, %v3563_v19  ;;  %1079 = vmatpush1.bf16.msra.mxu0 %v4269_v44  ;;  %1122 = vmatpush1.bf16.msra.mxu1 %v4281_v46  ;;  %v3565_v13 = vpop.eup %3564  ;;  %v6019_v60 = vld [vmem:[#allocation8_spill] sm:$0xff]  ;;  %v6020_v19 = vld [vmem:[#allocation11_spill] sm:$0xff] }
 0x129   :  { %v882_v15 = vadd.f32 0.5, %v876_v20  ;;  %1080 = vmatprep.subr.bf16.mxu0 %v4275_v45  ;;  %1123 = vmatprep.subr.bf16.mxu1 %v4287_v47  ;;  %v889_v28 = vmul.f32 %v3565_v13, %v879_v16  ;;  %v3567_v32 = vpop.eup %3566  ;;  %v6021_v16 = vld [vmem:[#allocation10_spill] sm:$0xff]  ;;  %v6025_v20 = vld [vmem:[#allocation15_spill] sm:$0xff] }
 0x12a   :  { %v887_v22 = vmul.f32 0.0, %v880_v31  ;;  %v883_v10 = vadd.f32 0.5, %v877_v12  ;;  %v3569_v21 = vpop.eup %3568  ;;  %v6026_v31 = vld [vmem:[#allocation17_spill] sm:$0xff]  ;;  %v6027_v12 = vld [vmem:[#allocation16_spill] sm:$0xff]  ;;  %v6028_v13 = vld [vmem:[#allocation18_spill] sm:$0xff] }
 0x12b   :  { %v890_v24 = vmul.f32 %v3567_v32, %v882_v15  ;;  %v3571_v26 = vpop.eup %3570  ;;  %v875_v18 = vmul.f32 0.5, %v3569_v21  ;;  %v6029_v15 = vld [vmem:[#allocation19_spill] sm:$0xff]  ;;  %v6036_v21 = vld [vmem:[#allocation26_spill] sm:$0xff] }
 0x12c   :  { %v888_v11 = vmul.f32 0.0, %v883_v10  ;;  %v4486_v29 = vadd.f32 %v889_v28, %v887_v22  ;;  %1081 = vmatpush1.bf16.msra.mxu0 %v4293_v48  ;;  %1124 = vmatpush1.bf16.msra.mxu1 %v4305_v50  ;;  %v878_v30 = vmul.f32 0.5, %v3571_v26  ;;  %v6030_v22 = vld [vmem:[#allocation21_spill] sm:$0xff]  ;;  %v6031_v10 = vld [vmem:[#allocation20_spill] sm:$0xff]  ;;  %v6032_v28 = vld [vmem:[#allocation22_spill] sm:$0xff] }
 0x12d   :  { %1082 = vmatprep.subr.bf16.mxu0 %v4299_v49  ;;  %1125 = vmatprep.subr.bf16.mxu1 %v4311_v51  ;;  %v881_v33 = vadd.f32 0.5, %v875_v18  ;;  %v6033_v32 = vld [vmem:[#allocation23_spill] sm:$0xff]  ;;  %v6038_v18 = vld [vmem:[#allocation29_spill] sm:$0xff] }
 0x12e   :  { %3572 = vtanh.f32 %v4486_v29  ;;  %v4493_v23 = vadd.f32 %v890_v24, %v888_v11  ;;  %v884_v25 = vadd.f32 0.5, %v878_v30  ;;  %v6034_v11 = vld [vmem:[#allocation25_spill] sm:$0xff]  ;;  %v6035_v24 = vld [vmem:[#allocation24_spill] sm:$0xff]  ;;  %v6037_v26 = vld [vmem:[#allocation27_spill] sm:$0xff] }
 0x12f   :  { %v6039_v30 = vld [vmem:[#allocation28_spill] sm:$0xff] }
 0x130   :  { %3574 = vtanh.f32 %v4493_v23  ;;  %1083 = vmatpush1.bf16.msra.mxu0 %v4317_v52  ;;  %1126 = vmatpush1.bf16.msra.mxu1 %v4329_v54 }
 0x131   :  { %1084 = vmatprep.subr.bf16.mxu0 %v4323_v53  ;;  %1127 = vmatprep.subr.bf16.mxu1 %v4335_v55 }
 0x134   :  { %1085 = vmatpush1.bf16.msra.mxu0 %v4341_v56  ;;  %1128 = vmatpush1.bf16.msra.mxu1 %v4353_v58 }
 0x135   :  { %1086 = vmatprep.subr.bf16.mxu0 %v4347_v57  ;;  %1129 = vmatprep.subr.bf16.mxu1 %v4359_v59 }
 0x138   :  { %v3573_v17 = vpop.eup %3572  ;;  %1087 = vmatpush1.bf16.msra.mxu0 %v6014_v14  ;;  %1130 = vmatpush1.bf16.msra.mxu1 %v4377_v62 }
 0x139   :  { %1088 = vmatprep.subr.bf16.mxu0 %v6015_v6  ;;  %1131 = vmatprep.subr.bf16.mxu1 %v4383_v63  ;;  %v895_v8 = vmul.f32 %v3573_v17, %v881_v33  ;;  %v6040_v17 = vld [vmem:[#allocation30_spill] sm:$0xff]  ;;  %v6041_v33 = vld [vmem:[#allocation31_spill] sm:$0xff] }
 0x13a   :  { %v3575_v7 = vpop.eup %3574 }
 0x13b   :  { %v896_v9 = vmul.f32 %v3575_v7, %v884_v25  ;;  %v6042_v25 = vld [vmem:[#allocation33_spill] sm:$0xff]  ;;  %v6043_v7 = vld [vmem:[#allocation32_spill] sm:$0xff] }
 0x13c   :  { %1089 = vmatpush1.bf16.msra.mxu0 %v4389_v2  ;;  %1132 = vmatpush1.bf16.msra.mxu1 %v4396_v38 }
 0x13d   :  { %v907_v34 = vpack.c.bf16 %v896_v9, %v895_v8  ;;  %1239 = vmatprep.subr.bf16.mxu0 %v4014_v0  ;;  %1282 = vmatprep.subr.bf16.mxu1 %v4027_v3  ;;  %v6017_v0 = vld [vmem:[#allocation6_spill] sm:$0xff]  ;;  %v6018_v3 = vld [vmem:[#allocation9_spill] sm:$0xff] }
 0x13e   :  { %v6044_v8 = vld [vmem:[#allocation34_spill] sm:$0xff] }
 0x13f   :  { %3424 = vst [vmem:[%s5875_s4 + $0x38] sm:$0xff] %v907_v34   ;;  %1107 = vmatmul.mubr.bf16.vlgmr.msra.gmra.mrb[12].mxu0 %v907_v34  ;;  %1150 = vmatmul.mubr.bf16.vlgmr.msra.gmra.mrb[12].mxu1 %v907_v34  ;;  %v32_v9 = vld [vmem:[%s5871_s0 + $0x40] sm:$0xff] }
 0x140   :  { %1240 = vmatpush1.bf16.msra.mxu0 %v4019_v1  ;;  %1283 = vmatpush1.bf16.msra.mxu1 %v4038_v5  ;;  %v6022_v1 = vld [vmem:[#allocation13_spill] sm:$0xff]  ;;  %v6023_v5 = vld [vmem:[#allocation12_spill] sm:$0xff]  ;;  %v36_v34 = vld [vmem:[%s5871_s0 + $0x60] sm:$0xff] }
 0x141   :  { %1241 = vmatprep.subr.bf16.mxu0 %v4033_v4  ;;  %1284 = vmatprep.subr.bf16.mxu1 %v6016_v27  ;;  %v6024_v4 = vld [vmem:[#allocation14_spill] sm:$0xff]  ;;  %v923_v27 = vunpack.c.l.bf16 %v32_v9 }
 0x142   :  { %1271 = vmatprep.mubr.bf16.mxu0 %v6011_v61  ;;  %1314 = vmatprep.mubr.bf16.mxu1 %v6011_v61 }
 0x144   :  { %1242 = vmatpush1.bf16.msra.mxu0 %v6017_v0  ;;  %1285 = vmatpush1.bf16.msra.mxu1 %v6018_v3  ;;  %v34_v0 = vld [vmem:[%s5871_s0 + $0x48] sm:$0xff]  ;;  %v924_v3 = vunpack.c.h.bf16 %v32_v9 }
 0x145   :  { %1243 = vmatprep.subr.bf16.mxu0 %v6019_v60  ;;  %1286 = vmatprep.subr.bf16.mxu1 %v6020_v19  ;;  %v927_v60 = vunpack.c.l.bf16 %v36_v34 }
 0x148   :  { %1244 = vmatpush1.bf16.msra.mxu0 %v6021_v16  ;;  %1287 = vmatpush1.bf16.msra.mxu1 %v6022_v1  ;;  %v928_v1 = vunpack.c.h.bf16 %v36_v34 }
 0x149   :  { %1245 = vmatprep.subr.bf16.mxu0 %v6023_v5  ;;  %1288 = vmatprep.subr.bf16.mxu1 %v6024_v4 }
 0x14c   :  { %1246 = vmatpush1.bf16.msra.mxu0 %v6025_v20  ;;  %1289 = vmatpush1.bf16.msra.mxu1 %v6026_v31  ;;  %v926_v20 = vunpack.c.h.bf16 %v34_v0 }
 0x14d   :  { %1247 = vmatprep.subr.bf16.mxu0 %v6027_v12  ;;  %1290 = vmatprep.subr.bf16.mxu1 %v6028_v13  ;;  %v38_v12 = vld [vmem:[%s5871_s0 + $0x68] sm:$0xff] }
 0x150   :  { %1248 = vmatpush1.bf16.msra.mxu0 %v6029_v15  ;;  %1291 = vmatpush1.bf16.msra.mxu1 %v6030_v22 }
 0x151   :  { %1249 = vmatprep.subr.bf16.mxu0 %v6031_v10  ;;  %1292 = vmatprep.subr.bf16.mxu1 %v6032_v28 }
 0x154   :  { %1250 = vmatpush1.bf16.msra.mxu0 %v6033_v32  ;;  %1293 = vmatpush1.bf16.msra.mxu1 %v6034_v11 }
 0x155   :  { %1251 = vmatprep.subr.bf16.mxu0 %v6035_v24  ;;  %1294 = vmatprep.subr.bf16.mxu1 %v6036_v21 }
 0x158   :  { %1252 = vmatpush1.bf16.msra.mxu0 %v6037_v26  ;;  %1295 = vmatpush1.bf16.msra.mxu1 %v6038_v18  ;;  %v930_v26 = vunpack.c.h.bf16 %v38_v12 }
 0x159   :  { %1253 = vmatprep.subr.bf16.mxu0 %v6039_v30  ;;  %1296 = vmatprep.subr.bf16.mxu1 %v6040_v17 }
 0x15c   :  { %1254 = vmatpush1.bf16.msra.mxu0 %v6041_v33  ;;  %1297 = vmatpush1.bf16.msra.mxu1 %v6042_v25  ;;  %v925_v33 = vunpack.c.l.bf16 %v34_v0 }
 0x15d   :  { %1382 = vmatprep.subr.bf16.mxu0 %v6043_v7  ;;  %1425 = vmatprep.subr.bf16.mxu1 %v6044_v8  ;;  %v929_v7 = vunpack.c.l.bf16 %v38_v12 }
 0x1f2   :  { %v965_v19 = vpop.f32.mrb[8].mxu0  ;;  %v1008_v16 = vpop.f32.mrb[8].mxu1 }
 0x1f3   :  { %v1017_v5 = vadd.f32 %v965_v19, %v923_v27  ;;  %v967_v4 = vpop.f32.mrb[9].mxu0  ;;  %v1010_v31 = vpop.f32.mrb[9].mxu1  ;;  %v1019_v8 = vadd.f32 %v1008_v16, %v925_v33 }
 0x1f4   :  { %v1018_v13 = vadd.f32 %v967_v4, %v924_v3  ;;  %v969_v15 = vpop.f32.mrb[10].mxu0  ;;  %v1012_v22 = vpop.f32.mrb[10].mxu1  ;;  %v1020_v18 = vadd.f32 %v1010_v31, %v926_v20 }
 0x1f5   :  { %v1025_v10 = vmul.f32 0.5, %v1017_v5  ;;  %v1021_v28 = vadd.f32 %v969_v15, %v927_v60  ;;  %v971_v32 = vpop.f32.mrb[11].mxu0  ;;  %v1014_v11 = vpop.f32.mrb[11].mxu1  ;;  %v1023_v9 = vadd.f32 %v1012_v22, %v929_v7  ;;  %v1027_v3 = vmul.f32 0.5, %v1019_v8  ;;  %v3149_v7 = vld [vmem:[%s5872_s1 + $0x198] sm:$0xff] }
 0x1f6   :  { %v1026_v24 = vmul.f32 0.5, %v1018_v13  ;;  %v1022_v21 = vadd.f32 %v971_v32, %v928_v1  ;;  %v1024_v25 = vadd.f32 %v1014_v11, %v930_v26 }
 0x1f7   :  { %3576 = vtanh.f32 %v1025_v10  ;;  %v1028_v30 = vmul.f32 0.5, %v1021_v28  ;;  %v1030_v19 = vmul.f32 0.5, %v1023_v9  ;;  %v6045_v28 = vld [vmem:[#allocation37_spill] sm:$0xff] }
 0x1f8   :  { %v1029_v17 = vmul.f32 0.5, %v1022_v21  ;;  %3578 = vtanh.f32 %v1026_v24  ;;  %v6047_v21 = vld [vmem:[#allocation38_spill] sm:$0xff] }
 0x1f9   :  { %3580 = vtanh.f32 %v1028_v30 }
 0x1fa   :  { %3582 = vtanh.f32 %v1020_v18  ;;  %v3148_v18 = vld [vmem:[%s5872_s1 + $0x190] sm:$0xff] }
 0x1fb   :  { %3584 = vtanh.f32 %v1029_v17  ;;  %v3150_v17 = vld [vmem:[%s5872_s1 + $0x1b0] sm:$0xff]  ;;  %v1066_v33 = vunpack.c.l.bf16 %v3148_v18  ;;  %v1067_v8 = vunpack.c.h.bf16 %v3148_v18 }
 0x1fc   :  { %3586 = vtanh.f32 %v1024_v25 }
 0x1fd   :  { %3588 = vtanh.f32 %v1027_v3 }
 0x1fe   :  { %3590 = vtanh.f32 %v1030_v19 }
 0x201   :  { %v3577_v34 = vpop.eup %3576 }
 0x202   :  { %v1037_v27 = vmul.f32 0.5, %v3577_v34  ;;  %v3579_v60 = vpop.eup %3578  ;;  %v1070_v34 = vunpack.c.l.bf16 %v3150_v17 }
 0x203   :  { %v3581_v1 = vpop.eup %3580  ;;  %v1038_v4 = vmul.f32 0.5, %v3579_v60  ;;  %v1071_v60 = vunpack.c.h.bf16 %v3150_v17 }
 0x204   :  { %v1043_v5 = vadd.f32 0.5, %v1037_v27  ;;  %v3583_v20 = vpop.eup %3582  ;;  %v1040_v31 = vmul.f32 0.5, %v3581_v1 }
 0x205   :  { %v3585_v13 = vpop.eup %3584  ;;  %v1044_v0 = vadd.f32 0.5, %v1038_v4 }
 0x206   :  { %v1053_v15 = vmul.f32 %v3583_v20, %v1043_v5  ;;  %v1046_v10 = vadd.f32 0.5, %v1040_v31  ;;  %v1041_v12 = vmul.f32 0.5, %v3585_v13  ;;  %v3587_v16 = vpop.eup %3586  ;;  %v1069_v5 = vunpack.c.h.bf16 %v3149_v7  ;;  %v3151_v20 = vld [vmem:[%s5872_s1 + $0x1b8] sm:$0xff] }
 0x207   :  { %v1051_v22 = vmul.f32 %v1044_v0, %v6045_v28  ;;  %v3589_v25 = vpop.eup %3588 }
 0x208   :  { %v1047_v32 = vadd.f32 0.5, %v1041_v12  ;;  %v1054_v11 = vmul.f32 %v3587_v16, %v1046_v10  ;;  %v3591_v9 = vpop.eup %3590  ;;  %v1039_v31 = vmul.f32 0.5, %v3589_v25  ;;  %v1068_v25 = vunpack.c.l.bf16 %v3149_v7 }
 0x209   :  { %v4562_v24 = vadd.f32 %v1053_v15, %v1051_v22  ;;  %v1042_v13 = vmul.f32 0.5, %v3591_v9 }
 0x20a   :  { %v1052_v26 = vmul.f32 %v1047_v32, %v6047_v21  ;;  %v1073_v21 = vunpack.c.h.bf16 %v3151_v20 }
 0x20b   :  { %6046 = vst [vmem:[#allocation35_spill] sm:$0xff] %v4562_v24  ;;  %3592 = vtanh.f32 %v4562_v24 }
 0x20c   :  { %v4569_v30 = vadd.f32 %v1054_v11, %v1052_v26 }
 0x20e   :  { %6048 = vst [vmem:[#allocation36_spill] sm:$0xff] %v4569_v30  ;;  %3594 = vtanh.f32 %v4569_v30 }
 0x212   :  { %v1108_v27 = vpop.f32.mrb[12].mxu0  ;;  %v1151_v3 = vpop.f32.mrb[12].mxu1 }
 0x213   :  { %v1160_v19 = vadd.f32 %v1108_v27, %v1066_v33  ;;  %v1110_v1 = vpop.f32.mrb[13].mxu0  ;;  %v1153_v4 = vpop.f32.mrb[13].mxu1  ;;  %v1045_v33 = vadd.f32 0.5, %v1039_v31  ;;  %v1048_v27 = vadd.f32 0.5, %v1042_v13 }
 0x214   :  { %v1161_v0 = vadd.f32 %v1110_v1, %v1067_v8  ;;  %v1112_v15 = vpop.f32.mrb[14].mxu0  ;;  %v1155_v10 = vpop.f32.mrb[14].mxu1  ;;  %v1163_v18 = vadd.f32 %v1153_v4, %v1069_v5 }
 0x215   :  { %v1168_v12 = vmul.f32 0.5, %v1160_v19  ;;  %v1164_v16 = vadd.f32 %v1112_v15, %v1070_v34  ;;  %v1114_v28 = vpop.f32.mrb[15].mxu0  ;;  %v1157_v22 = vpop.f32.mrb[15].mxu1  ;;  %v1072_v34 = vunpack.c.l.bf16 %v3151_v20 }
 0x216   :  { %v1169_v32 = vmul.f32 0.5, %v1161_v0  ;;  %v1165_v11 = vadd.f32 %v1114_v28, %v1071_v60  ;;  %v3593_v26 = vpop.eup %3592  ;;  %v1167_v8 = vadd.f32 %v1157_v22, %v1073_v21  ;;  %v1162_v60 = vadd.f32 %v1151_v3, %v1068_v25  ;;  %v4704_v28 = vld [vmem:[%s5873_s2 + $0x64] ss:$16 sps:$4 sm:$0xff]   ;;  %v4710_v22 = vld [vmem:[%s5873_s2 + $0x6c] ss:$16 sps:$4 sm:$0xff]  }
 0x217   :  { %3596 = vtanh.f32 %v1168_v12  ;;  %v1171_v17 = vmul.f32 0.5, %v1164_v16  ;;  %v1059_v9 = vmul.f32 %v3593_v26, %v1045_v33  ;;  %v1166_v5 = vadd.f32 %v1155_v10, %v1072_v34  ;;  %6055 = vst [vmem:[#allocation13_spill] sm:$0xff] %v4704_v28  ;;  %6056 = vst [vmem:[#allocation12_spill] sm:$0xff] %v4710_v22  ;;  %v4728_v21 = vld [vmem:[%s5873_s2 + $0x84] ss:$16 sps:$4 sm:$0xff]  }
 0x218   :  { %v1172_v30 = vmul.f32 0.5, %v1165_v11  ;;  %v3595_v24 = vpop.eup %3594  ;;  %3598 = vtanh.f32 %v1169_v32  ;;  %v1170_v7 = vmul.f32 0.5, %v1162_v60  ;;  %v4716_v32 = vld [vmem:[%s5873_s2 + $0x60] ss:$16 sps:$4 sm:$0xff]   ;;  %v4722_v11 = vld [vmem:[%s5873_s2 + $0x68] ss:$16 sps:$4 sm:$0xff]  }
 0x219   :  { %3600 = vtanh.f32 %v1171_v17  ;;  %v1060_v19 = vmul.f32 %v3595_v24, %v1048_v27  ;;  %v1173_v4 = vmul.f32 0.5, %v1166_v5  ;;  %6057 = vst [vmem:[#allocation14_spill] sm:$0xff] %v4716_v32  ;;  %6058 = vst [vmem:[#allocation15_spill] sm:$0xff] %v4722_v11  ;;  %v4734_v26 = vld [vmem:[%s5873_s2 + $0x8c] ss:$16 sps:$4 sm:$0xff]  }
 0x21a   :  { %3602 = vtanh.f32 %v1163_v18  ;;  %6059 = vst [vmem:[#allocation17_spill] sm:$0xff] %v4728_v21  ;;  %6060 = vst [vmem:[#allocation16_spill] sm:$0xff] %v4734_v26  ;;  %v4740_v18 = vld [vmem:[%s5873_s2 + $0x80] ss:$16 sps:$4 sm:$0xff]   ;;  %v4746_v17 = vld [vmem:[%s5873_s2 + $0x88] ss:$16 sps:$4 sm:$0xff]  }
 0x21b   :  { %3604 = vtanh.f32 %v1172_v30  ;;  %v1204_v1 = vpack.c.bf16 %v1060_v19, %v1059_v9  ;;  %6061 = vst [vmem:[#allocation18_spill] sm:$0xff] %v4740_v18  ;;  %6062 = vst [vmem:[#allocation19_spill] sm:$0xff] %v4746_v17  ;;  %v4752_v33 = vld [vmem:[%s5873_s2 + $0xa4] ss:$16 sps:$4 sm:$0xff]   ;;  %v4758_v27 = vld [vmem:[%s5873_s2 + $0xac] ss:$16 sps:$4 sm:$0xff]  }
 0x21c   :  { %3606 = vtanh.f32 %v1167_v8  ;;  %6063 = vst [vmem:[#allocation21_spill] sm:$0xff] %v4752_v33  ;;  %6064 = vst [vmem:[#allocation20_spill] sm:$0xff] %v4758_v27  ;;  %v4764_v25 = vld [vmem:[%s5873_s2 + $0xa0] ss:$16 sps:$4 sm:$0xff]   ;;  %v4770_v8 = vld [vmem:[%s5873_s2 + $0xa8] ss:$16 sps:$4 sm:$0xff]  }
 0x21d   :  { %3425 = vst [vmem:[%s5874_s3 + $0x8] sm:$0xff] %v1204_v1   ;;  %1272 = vmatmul.mubr.bf16.vlgmr.msra.gmra.mrb[16].mxu0 %v1204_v1  ;;  %1315 = vmatmul.mubr.bf16.vlgmr.msra.gmra.mrb[16].mxu1 %v1204_v1  ;;  %3608 = vtanh.f32 %v1170_v7  ;;  %6065 = vst [vmem:[#allocation22_spill] sm:$0xff] %v4764_v25  ;;  %v4776_v9 = vld [vmem:[%s5873_s2 + $0xc4] ss:$16 sps:$4 sm:$0xff]   ;;  %v4782_v19 = vld [vmem:[%s5873_s2 + $0xcc] ss:$16 sps:$4 sm:$0xff]  }
 0x21e   :  { %1383 = vmatpush1.bf16.msra.mxu0 %v4217_v35  ;;  %1426 = vmatpush1.bf16.msra.mxu1 %v4229_v37  ;;  %3610 = vtanh.f32 %v1173_v4  ;;  %6066 = vst [vmem:[#allocation23_spill] sm:$0xff] %v4770_v8  ;;  %6067 = vst [vmem:[#allocation25_spill] sm:$0xff] %v4776_v9  ;;  %v4788_v34 = vld [vmem:[%s5873_s2 + $0xc0] ss:$16 sps:$4 sm:$0xff]   ;;  %v4794_v1 = vld [vmem:[%s5873_s2 + $0xc8] ss:$16 sps:$4 sm:$0xff]  }
 0x21f   :  { %1384 = vmatprep.subr.bf16.mxu0 %v4223_v36  ;;  %1427 = vmatprep.subr.bf16.mxu1 %v4236_v39  ;;  %6068 = vst [vmem:[#allocation24_spill] sm:$0xff] %v4782_v19  ;;  %6069 = vst [vmem:[#allocation26_spill] sm:$0xff] %v4788_v34  ;;  %v4800_v60 = vld [vmem:[%s5873_s2 + $0xe4] ss:$16 sps:$4 sm:$0xff]   ;;  %v4806_v5 = vld [vmem:[%s5873_s2 + $0xec] ss:$16 sps:$4 sm:$0xff]  }
 0x220   :  { %1414 = vmatprep.mubr.bf16.mxu0 %v6011_v61  ;;  %1457 = vmatprep.mubr.bf16.mxu1 %v6011_v61  ;;  %6070 = vst [vmem:[#allocation27_spill] sm:$0xff] %v4794_v1  ;;  %6071 = vst [vmem:[#allocation29_spill] sm:$0xff] %v4800_v60  ;;  %v4824_v7 = vld [vmem:[%s5873_s2 + $0x104] ss:$16 sps:$4 sm:$0xff]  }
 0x221   :  { %v3597_v24 = vpop.eup %3596  ;;  %6072 = vst [vmem:[#allocation28_spill] sm:$0xff] %v4806_v5  ;;  %6075 = vst [vmem:[#allocation33_spill] sm:$0xff] %v4824_v7  ;;  %v40_v4 = vld [vmem:[%s5871_s0 + $0x80] sm:$0xff] }
 0x222   :  { %v1180_v30 = vmul.f32 0.5, %v3597_v24  ;;  %v3599_v3 = vpop.eup %3598  ;;  %1385 = vmatpush1.bf16.msra.mxu0 %v4242_v40  ;;  %1428 = vmatpush1.bf16.msra.mxu1 %v4256_v42  ;;  %v4812_v24 = vld [vmem:[%s5873_s2 + $0xe0] ss:$16 sps:$4 sm:$0xff]  }
 0x223   :  { %v3601_v35 = vpop.eup %3600  ;;  %v1181_v37 = vmul.f32 0.5, %v3599_v3  ;;  %1386 = vmatprep.subr.bf16.mxu0 %v4250_v41  ;;  %1429 = vmatprep.subr.bf16.mxu1 %v4263_v43  ;;  %6073 = vst [vmem:[#allocation30_spill] sm:$0xff] %v4812_v24  ;;  %v4830_v3 = vld [vmem:[%s5873_s2 + $0x10c] ss:$16 sps:$4 sm:$0xff]  }
 0x224   :  { %v1186_v20 = vadd.f32 0.5, %v1180_v30  ;;  %v3603_v36 = vpop.eup %3602  ;;  %v1183_v39 = vmul.f32 0.5, %v3601_v35  ;;  %v4818_v30 = vld [vmem:[%s5873_s2 + $0xe8] ss:$16 sps:$4 sm:$0xff]   ;;  %6076 = vst [vmem:[#allocation32_spill] sm:$0xff] %v4830_v3  ;;  %v44_v35 = vld [vmem:[%s5871_s0 + $0xa0] sm:$0xff] }
 0x225   :  { %v3605_v31 = vpop.eup %3604  ;;  %v1187_v13 = vadd.f32 0.5, %v1181_v37  ;;  %6074 = vst [vmem:[#allocation31_spill] sm:$0xff] %v4818_v30  ;;  %v42_v37 = vld [vmem:[%s5871_s0 + $0x88] sm:$0xff] }
 0x226   :  { %v1196_v0 = vmul.f32 %v3603_v36, %v1186_v20  ;;  %v1189_v15 = vadd.f32 0.5, %v1183_v39  ;;  %v1184_v10 = vmul.f32 0.5, %v3605_v31  ;;  %1387 = vmatpush1.bf16.msra.mxu0 %v4269_v44  ;;  %1430 = vmatpush1.bf16.msra.mxu1 %v4281_v46  ;;  %v3607_v40 = vpop.eup %3606  ;;  %v1231_v20 = vunpack.c.l.bf16 %v40_v4 }
 0x227   :  { %v1194_v42 = vmul.f32 %v1187_v13, %v4486_v29  ;;  %1388 = vmatprep.subr.bf16.mxu0 %v4275_v45  ;;  %1431 = vmatprep.subr.bf16.mxu1 %v4287_v47  ;;  %v3609_v45 = vpop.eup %3608  ;;  %v4680_v29 = vld [vmem:[%s5873_s2 + $0x44] ss:$16 sps:$4 sm:$0xff]   ;;  %v1232_v36 = vunpack.c.h.bf16 %v40_v4  ;;  %v1235_v39 = vunpack.c.l.bf16 %v44_v35  ;;  %v1233_v4 = vunpack.c.l.bf16 %v42_v37 }
 0x228   :  { %v1190_v41 = vadd.f32 0.5, %v1184_v10  ;;  %v1197_v43 = vmul.f32 %v3607_v40, %v1189_v15  ;;  %v3611_v46 = vpop.eup %3610  ;;  %v1182_v47 = vmul.f32 0.5, %v3609_v45  ;;  %6051 = vst [vmem:[#allocation9_spill] sm:$0xff] %v4680_v29  ;;  %v1234_v40 = vunpack.c.h.bf16 %v42_v37 }
 0x229   :  { %v4599_v12 = vadd.f32 %v1196_v0, %v1194_v42  ;;  %v1236_v0 = vunpack.c.h.bf16 %v44_v35 }
 0x22a   :  { %v1195_v16 = vmul.f32 %v1190_v41, %v4493_v23  ;;  %1389 = vmatpush1.bf16.msra.mxu0 %v4293_v48  ;;  %1432 = vmatpush1.bf16.msra.mxu1 %v4305_v50  ;;  %v1185_v48 = vmul.f32 0.5, %v3611_v46  ;;  %v1188_v50 = vadd.f32 0.5, %v1182_v47  ;;  %v4686_v23 = vld [vmem:[%s5873_s2 + $0x4c] ss:$16 sps:$4 sm:$0xff]  }
 0x22b   :  { %1390 = vmatprep.subr.bf16.mxu0 %v4299_v49  ;;  %1433 = vmatprep.subr.bf16.mxu1 %v4311_v51  ;;  %3612 = vtanh.f32 %v4599_v12  ;;  %6052 = vst [vmem:[#allocation8_spill] sm:$0xff] %v4686_v23  ;;  %v46_v41 = vld [vmem:[%s5871_s0 + $0xa8] sm:$0xff] }
 0x22c   :  { %v4607_v44 = vadd.f32 %v1197_v43, %v1195_v16  ;;  %v1191_v51 = vadd.f32 0.5, %v1185_v48 }
 0x22e   :  { %3614 = vtanh.f32 %v4607_v44  ;;  %1391 = vmatpush1.bf16.msra.mxu0 %v4317_v52  ;;  %1434 = vmatpush1.bf16.msra.mxu1 %v4329_v54 }
 0x22f   :  { %1392 = vmatprep.subr.bf16.mxu0 %v4323_v53  ;;  %1435 = vmatprep.subr.bf16.mxu1 %v4335_v55 }
 0x232   :  { %1393 = vmatpush1.bf16.msra.mxu0 %v4341_v56  ;;  %1436 = vmatpush1.bf16.msra.mxu1 %v4353_v58  ;;  %v4627_v56 = vld [vmem:[%s5873_s2 + $0x4] ss:$16 sps:$4 sm:$0xff]  }
 0x233   :  { %1394 = vmatprep.subr.bf16.mxu0 %v4347_v57  ;;  %1437 = vmatprep.subr.bf16.mxu1 %v4359_v59  ;;  %v4633_v57 = vld [vmem:[%s5873_s2 + $0xc] ss:$16 sps:$4 sm:$0xff]   ;;  %v4654_v58 = vld [vmem:[%s5873_s2 + $0x24] ss:$16 sps:$4 sm:$0xff]  }
 0x234   :  { %v4660_v59 = vld [vmem:[%s5873_s2 + $0x2c] ss:$16 sps:$4 sm:$0xff]  }
 0x235   :  { %v3613_v49 = vpop.eup %3612 }
 0x236   :  { %1395 = vmatpush1.bf16.msra.mxu0 %v6014_v14  ;;  %1438 = vmatpush1.bf16.msra.mxu1 %v4377_v62  ;;  %v1202_v53 = vmul.f32 %v3613_v49, %v1188_v50  ;;  %v4668_v62 = vld [vmem:[%s5873_s2 + $0x20] ss:$16 sps:$4 sm:$0xff]  }
 0x237   :  { %1396 = vmatprep.subr.bf16.mxu0 %v6015_v6  ;;  %1439 = vmatprep.subr.bf16.mxu1 %v4383_v63  ;;  %6049 = vst [vmem:[#allocation7_spill] sm:$0xff] %v4668_v62  ;;  %v4674_v63 = vld [vmem:[%s5873_s2 + $0x28] ss:$16 sps:$4 sm:$0xff]   ;;  %v4692_v14 = vld [vmem:[%s5873_s2 + $0x40] ss:$16 sps:$4 sm:$0xff]  }
 0x238   :  { %v3615_v52 = vpop.eup %3614  ;;  %6050 = vst [vmem:[#allocation6_spill] sm:$0xff] %v4674_v63  ;;  %6053 = vst [vmem:[#allocation11_spill] sm:$0xff] %v4692_v14  ;;  %v4698_v6 = vld [vmem:[%s5873_s2 + $0x48] ss:$16 sps:$4 sm:$0xff]  }
 0x239   :  { %v1203_v54 = vmul.f32 %v3615_v52, %v1191_v51  ;;  %6054 = vst [vmem:[#allocation10_spill] sm:$0xff] %v4698_v6  ;;  %v1238_v52 = vunpack.c.h.bf16 %v46_v41 }
 0x23a   :  { %1397 = vmatpush1.bf16.msra.mxu0 %v4389_v2  ;;  %1440 = vmatpush1.bf16.msra.mxu1 %v4396_v38  ;;  %v4642_v2 = vld [vmem:[%s5873_s2] ss:$16 sps:$4 sm:$0xff]   ;;  %v4648_v38 = vld [vmem:[%s5873_s2 + $0x8] ss:$16 sps:$4 sm:$0xff]  }
 0x23b   :  { %v1215_v55 = vpack.c.bf16 %v1203_v54, %v1202_v53  ;;  %1547 = vmatprep.subr.bf16.mxu0 %v4627_v56  ;;  %1590 = vmatprep.subr.bf16.mxu1 %v4633_v57 }
 0x23d   :  { %3426 = vst [vmem:[%s5875_s4 + $0x30] sm:$0xff] %v1215_v55   ;;  %1415 = vmatmul.mubr.bf16.vlgmr.msra.gmra.mrb[20].mxu0 %v1215_v55  ;;  %1458 = vmatmul.mubr.bf16.vlgmr.msra.gmra.mrb[20].mxu1 %v1215_v55 }
 0x23e   :  { %1548 = vmatpush1.bf16.msra.mxu0 %v4642_v2  ;;  %1591 = vmatpush1.bf16.msra.mxu1 %v4648_v38 }
 0x23f   :  { %1549 = vmatprep.subr.bf16.mxu0 %v4654_v58  ;;  %1592 = vmatprep.subr.bf16.mxu1 %v4660_v59 }
 0x240   :  { %1579 = vmatprep.mubr.bf16.mxu0 %v6011_v61  ;;  %1622 = vmatprep.mubr.bf16.mxu1 %v6011_v61 }
 0x242   :  { %1550 = vmatpush1.bf16.msra.mxu0 %v4668_v62  ;;  %1593 = vmatpush1.bf16.msra.mxu1 %v4674_v63 }
 0x243   :  { %1551 = vmatprep.subr.bf16.mxu0 %v4680_v29  ;;  %1594 = vmatprep.subr.bf16.mxu1 %v4686_v23 }
 0x246   :  { %1552 = vmatpush1.bf16.msra.mxu0 %v4692_v14  ;;  %1595 = vmatpush1.bf16.msra.mxu1 %v4698_v6 }
 0x247   :  { %1553 = vmatprep.subr.bf16.mxu0 %v4704_v28  ;;  %1596 = vmatprep.subr.bf16.mxu1 %v4710_v22 }
 0x24a   :  { %1554 = vmatpush1.bf16.msra.mxu0 %v4716_v32  ;;  %1597 = vmatpush1.bf16.msra.mxu1 %v4722_v11 }
 0x24b   :  { %1555 = vmatprep.subr.bf16.mxu0 %v4728_v21  ;;  %1598 = vmatprep.subr.bf16.mxu1 %v4734_v26 }
 0x24e   :  { %1556 = vmatpush1.bf16.msra.mxu0 %v4740_v18  ;;  %1599 = vmatpush1.bf16.msra.mxu1 %v4746_v17 }
 0x24f   :  { %1557 = vmatprep.subr.bf16.mxu0 %v4752_v33  ;;  %1600 = vmatprep.subr.bf16.mxu1 %v4758_v27 }
 0x252   :  { %1558 = vmatpush1.bf16.msra.mxu0 %v4764_v25  ;;  %1601 = vmatpush1.bf16.msra.mxu1 %v4770_v8 }
 0x253   :  { %1559 = vmatprep.subr.bf16.mxu0 %v4776_v9  ;;  %1602 = vmatprep.subr.bf16.mxu1 %v4782_v19 }
 0x256   :  { %1560 = vmatpush1.bf16.msra.mxu0 %v4788_v34  ;;  %1603 = vmatpush1.bf16.msra.mxu1 %v4794_v1 }
 0x257   :  { %1561 = vmatprep.subr.bf16.mxu0 %v4800_v60  ;;  %1604 = vmatprep.subr.bf16.mxu1 %v4806_v5 }
 0x25a   :  { %1562 = vmatpush1.bf16.msra.mxu0 %v4812_v24  ;;  %1605 = vmatpush1.bf16.msra.mxu1 %v4818_v30 }
 0x25b   :  { %1690 = vmatprep.subr.bf16.mxu0 %v4824_v7  ;;  %1733 = vmatprep.subr.bf16.mxu1 %v4830_v3 }
 0x2f0   :  { %v1273_v31 = vpop.f32.mrb[16].mxu0  ;;  %v1316_v13 = vpop.f32.mrb[16].mxu1 }
 0x2f1   :  { %v1325_v15 = vadd.f32 %v1273_v31, %v1231_v20  ;;  %v1275_v10 = vpop.f32.mrb[17].mxu0  ;;  %v1318_v42 = vpop.f32.mrb[17].mxu1  ;;  %v1237_v20 = vunpack.c.l.bf16 %v46_v41 }
 0x2f2   :  { %v1326_v43 = vadd.f32 %v1275_v10, %v1232_v36  ;;  %v1277_v16 = vpop.f32.mrb[18].mxu0  ;;  %v1320_v45 = vpop.f32.mrb[18].mxu1  ;;  %v1328_v53 = vadd.f32 %v1318_v42, %v1234_v40  ;;  %v1327_v36 = vadd.f32 %v1316_v13, %v1233_v4 }
 0x2f3   :  { %v1333_v46 = vmul.f32 0.5, %v1325_v15  ;;  %v1329_v47 = vadd.f32 %v1277_v16, %v1235_v39  ;;  %v1279_v48 = vpop.f32.mrb[19].mxu0  ;;  %v1322_v49 = vpop.f32.mrb[19].mxu1  ;;  %v1331_v31 = vadd.f32 %v1320_v45, %v1237_v20 }
 0x2f4   :  { %v1334_v50 = vmul.f32 0.5, %v1326_v43  ;;  %v1330_v51 = vadd.f32 %v1279_v48, %v1236_v0  ;;  %v1332_v35 = vadd.f32 %v1322_v49, %v1238_v52  ;;  %v1335_v10 = vmul.f32 0.5, %v1327_v36  ;;  %v3146_v36 = vld [vmem:[%s5872_s1 + $0x170] sm:$0xff] }
 0x2f5   :  { %3616 = vtanh.f32 %v1333_v46  ;;  %v1336_v54 = vmul.f32 0.5, %v1329_v47  ;;  %v1338_v0 = vmul.f32 0.5, %v1331_v31 }
 0x2f6   :  { %v1337_v55 = vmul.f32 0.5, %v1330_v51  ;;  %3618 = vtanh.f32 %v1334_v50  ;;  %v6077_v51 = vld [vmem:[#allocation35_spill] sm:$0xff] }
 0x2f7   :  { %3620 = vtanh.f32 %v1336_v54 }
 0x2f8   :  { %3622 = vtanh.f32 %v1328_v53 }
 0x2f9   :  { %3624 = vtanh.f32 %v1337_v55  ;;  %v6079_v55 = vld [vmem:[#allocation36_spill] sm:$0xff] }
 0x2fa   :  { %3626 = vtanh.f32 %v1332_v35  ;;  %v3144_v35 = vld [vmem:[%s5872_s1 + $0x150] sm:$0xff] }
 0x2fb   :  { %3628 = vtanh.f32 %v1335_v10  ;;  %v1374_v31 = vunpack.c.l.bf16 %v3144_v35  ;;  %v1375_v10 = vunpack.c.h.bf16 %v3144_v35 }
 0x2fc   :  { %3630 = vtanh.f32 %v1338_v0  ;;  %v1378_v0 = vunpack.c.l.bf16 %v3146_v36 }
 0x2ff   :  { %v3617_v39 = vpop.eup %3616 }
 0x300   :  { %v1345_v15 = vmul.f32 0.5, %v3617_v39  ;;  %v3619_v43 = vpop.eup %3618 }
 0x301   :  { %v3621_v16 = vpop.eup %3620  ;;  %v1346_v40 = vmul.f32 0.5, %v3619_v43 }
 0x302   :  { %v1351_v46 = vadd.f32 0.5, %v1345_v15  ;;  %v3623_v42 = vpop.eup %3622  ;;  %v1348_v47 = vmul.f32 0.5, %v3621_v16  ;;  %v3145_v15 = vld [vmem:[%s5872_s1 + $0x158] sm:$0xff] }
 0x303   :  { %v3625_v48 = vpop.eup %3624  ;;  %v1352_v37 = vadd.f32 0.5, %v1346_v40  ;;  %v1379_v40 = vunpack.c.h.bf16 %v3146_v36 }
 0x304   :  { %v1361_v49 = vmul.f32 %v3623_v42, %v1351_v46  ;;  %v1354_v50 = vadd.f32 0.5, %v1348_v47  ;;  %v1349_v41 = vmul.f32 0.5, %v3625_v48  ;;  %v3627_v13 = vpop.eup %3626  ;;  %v1377_v48 = vunpack.c.h.bf16 %v3145_v15 }
 0x305   :  { %v1359_v45 = vmul.f32 %v1352_v37, %v6077_v51  ;;  %v3629_v39 = vpop.eup %3628 }
 0x306   :  { %v1355_v52 = vadd.f32 0.5, %v1349_v41  ;;  %v1362_v53 = vmul.f32 %v3627_v13, %v1354_v50  ;;  %v3631_v43 = vpop.eup %3630  ;;  %v1347_v50 = vmul.f32 0.5, %v3629_v39  ;;  %v1376_v39 = vunpack.c.l.bf16 %v3145_v15 }
 0x307   :  { %v4846_v54 = vadd.f32 %v1361_v49, %v1359_v45  ;;  %v3147_v49 = vld [vmem:[%s5872_s1 + $0x178] sm:$0xff]  ;;  %v1350_v41 = vmul.f32 0.5, %v3631_v43 }
 0x308   :  { %v1360_v4 = vmul.f32 %v1355_v52, %v6079_v55  ;;  %v1381_v36 = vunpack.c.h.bf16 %v3147_v49  ;;  %v1353_v3 = vadd.f32 0.5, %v1347_v50  ;;  %v4903_v50 = vld [vmem:[%s5873_s2 + $0x128] ss:$16 sps:$4 sm:$0xff]  }
 0x309   :  { %6078 = vst [vmem:[#allocation34_spill] sm:$0xff] %v4846_v54  ;;  %3632 = vtanh.f32 %v4846_v54  ;;  %v1356_v7 = vadd.f32 0.5, %v1350_v41 }
 0x30a   :  { %v4853_v20 = vadd.f32 %v1362_v53, %v1360_v4 }
 0x30c   :  { %6080 = vst [vmem:[#allocation37_spill] sm:$0xff] %v4853_v20  ;;  %3634 = vtanh.f32 %v4853_v20 }
 0x310   :  { %v1416_v16 = vpop.f32.mrb[20].mxu0  ;;  %v1459_v46 = vpop.f32.mrb[20].mxu1 }
 0x311   :  { %v1468_v42 = vadd.f32 %v1416_v16, %v1374_v31  ;;  %v1418_v47 = vpop.f32.mrb[21].mxu0  ;;  %v1461_v37 = vpop.f32.mrb[21].mxu1 }
 0x312   :  { %v1469_v13 = vadd.f32 %v1418_v47, %v1375_v10  ;;  %v1420_v51 = vpop.f32.mrb[22].mxu0  ;;  %v1463_v45 = vpop.f32.mrb[22].mxu1  ;;  %v1471_v16 = vadd.f32 %v1461_v37, %v1377_v48 }
 0x313   :  { %v1476_v52 = vmul.f32 0.5, %v1468_v42  ;;  %v1472_v53 = vadd.f32 %v1420_v51, %v1378_v0  ;;  %v1422_v55 = vpop.f32.mrb[23].mxu0  ;;  %v1465_v4 = vpop.f32.mrb[23].mxu1  ;;  %v1380_v0 = vunpack.c.l.bf16 %v3147_v49  ;;  %v4897_v49 = vld [vmem:[%s5873_s2 + $0x120] ss:$16 sps:$4 sm:$0xff]  }
 0x314   :  { %v1477_v35 = vmul.f32 0.5, %v1469_v13  ;;  %v1473_v20 = vadd.f32 %v1422_v55, %v1379_v40  ;;  %v3633_v31 = vpop.eup %3632  ;;  %v1475_v10 = vadd.f32 %v1465_v4, %v1381_v36  ;;  %v1470_v40 = vadd.f32 %v1459_v46, %v1376_v39  ;;  %v4921_v39 = vld [vmem:[%s5873_s2 + $0x140] ss:$16 sps:$4 sm:$0xff]  }
 0x315   :  { %3636 = vtanh.f32 %v1476_v52  ;;  %v1479_v54 = vmul.f32 0.5, %v1472_v53  ;;  %v1367_v43 = vmul.f32 %v3633_v31, %v1353_v3  ;;  %v4915_v52 = vld [vmem:[%s5873_s2 + $0x14c] ss:$16 sps:$4 sm:$0xff]  }
 0x316   :  { %v1480_v30 = vmul.f32 0.5, %v1473_v20  ;;  %v3635_v24 = vpop.eup %3634  ;;  %3638 = vtanh.f32 %v1477_v35  ;;  %v1474_v20 = vadd.f32 %v1463_v45, %v1380_v0  ;;  %v1478_v46 = vmul.f32 0.5, %v1470_v40  ;;  %v4909_v45 = vld [vmem:[%s5873_s2 + $0x144] ss:$16 sps:$4 sm:$0xff]  }
 0x317   :  { %3640 = vtanh.f32 %v1479_v54  ;;  %v1368_v42 = vmul.f32 %v3635_v24, %v1356_v7  ;;  %v4871_v54 = vld [vmem:[%s5873_s2 + $0x100] ss:$16 sps:$4 sm:$0xff]   ;;  %v4877_v24 = vld [vmem:[%s5873_s2 + $0x108] ss:$16 sps:$4 sm:$0xff]   ;;  %v4889_v7 = vld [vmem:[%s5873_s2 + $0x12c] ss:$16 sps:$4 sm:$0xff]  }
 0x318   :  { %3642 = vtanh.f32 %v1471_v16  ;;  %v1481_v37 = vmul.f32 0.5, %v1474_v20  ;;  %v4934_v0 = vld [vmem:[%s5873_s2 + $0x164] ss:$16 sps:$4 sm:$0xff]  }
 0x319   :  { %3644 = vtanh.f32 %v1480_v30  ;;  %v1512_v47 = vpack.c.bf16 %v1368_v42, %v1367_v43  ;;  %v4883_v30 = vld [vmem:[%s5873_s2 + $0x124] ss:$16 sps:$4 sm:$0xff]  }
 0x31a   :  { %3646 = vtanh.f32 %v1475_v10  ;;  %v4927_v10 = vld [vmem:[%s5873_s2 + $0x148] ss:$16 sps:$4 sm:$0xff]  }
 0x31b   :  { %3427 = vst [vmem:[%s5874_s3 + $0x10] sm:$0xff] %v1512_v47   ;;  %1580 = vmatmul.mubr.bf16.vlgmr.msra.gmra.mrb[24].mxu0 %v1512_v47  ;;  %1623 = vmatmul.mubr.bf16.vlgmr.msra.gmra.mrb[24].mxu1 %v1512_v47  ;;  %3648 = vtanh.f32 %v1478_v46  ;;  %v4940_v47 = vld [vmem:[%s5873_s2 + $0x16c] ss:$16 sps:$4 sm:$0xff]   ;;  %v4955_v46 = vld [vmem:[%s5873_s2 + $0x168] ss:$16 sps:$4 sm:$0xff]  }
 0x31c   :  { %1691 = vmatpush1.bf16.msra.mxu0 %v4871_v54  ;;  %1734 = vmatpush1.bf16.msra.mxu1 %v4877_v24  ;;  %3650 = vtanh.f32 %v1481_v37 }
 0x31d   :  { %1692 = vmatprep.subr.bf16.mxu0 %v4883_v30  ;;  %1735 = vmatprep.subr.bf16.mxu1 %v4889_v7 }
 0x31e   :  { %1722 = vmatprep.mubr.bf16.mxu0 %v6011_v61  ;;  %1765 = vmatprep.mubr.bf16.mxu1 %v6011_v61 }
 0x31f   :  { %v3637_v3 = vpop.eup %3636 }
 0x320   :  { %v1488_v15 = vmul.f32 0.5, %v3637_v3  ;;  %v3639_v48 = vpop.eup %3638  ;;  %1693 = vmatpush1.bf16.msra.mxu0 %v4897_v49  ;;  %1736 = vmatpush1.bf16.msra.mxu1 %v4903_v50 }
 0x321   :  { %v3641_v41 = vpop.eup %3640  ;;  %v1489_v51 = vmul.f32 0.5, %v3639_v48  ;;  %1694 = vmatprep.subr.bf16.mxu0 %v4909_v45  ;;  %1737 = vmatprep.subr.bf16.mxu1 %v4915_v52  ;;  %v4961_v48 = vld [vmem:[%s5873_s2 + $0x184] ss:$16 sps:$4 sm:$0xff]  }
 0x322   :  { %v1494_v13 = vadd.f32 0.5, %v1488_v15  ;;  %v3643_v53 = vpop.eup %3642  ;;  %v1491_v55 = vmul.f32 0.5, %v3641_v41  ;;  %v4949_v15 = vld [vmem:[%s5873_s2 + $0x160] ss:$16 sps:$4 sm:$0xff]  }
 0x323   :  { %v3645_v4 = vpop.eup %3644  ;;  %v1495_v35 = vadd.f32 0.5, %v1489_v51  ;;  %v4977_v41 = vld [vmem:[%s5873_s2 + $0x180] ss:$16 sps:$4 sm:$0xff]  }
 0x324   :  { %v1504_v36 = vmul.f32 %v3643_v53, %v1494_v13  ;;  %v1497_v31 = vadd.f32 0.5, %v1491_v55  ;;  %v1492_v16 = vmul.f32 0.5, %v3645_v4  ;;  %1695 = vmatpush1.bf16.msra.mxu0 %v4921_v39  ;;  %1738 = vmatpush1.bf16.msra.mxu1 %v4927_v10  ;;  %v3647_v43 = vpop.eup %3646  ;;  %v4983_v13 = vld [vmem:[%s5873_s2 + $0x188] ss:$16 sps:$4 sm:$0xff]   ;;  %v4989_v53 = vld [vmem:[%s5873_s2 + $0x1a4] ss:$16 sps:$4 sm:$0xff]  }
 0x325   :  { %v1502_v42 = vmul.f32 %v1495_v35, %v4599_v12  ;;  %1696 = vmatprep.subr.bf16.mxu0 %v4934_v0  ;;  %1739 = vmatprep.subr.bf16.mxu1 %v4940_v47  ;;  %v3649_v51 = vpop.eup %3648  ;;  %v4995_v55 = vld [vmem:[%s5873_s2 + $0x1ac] ss:$16 sps:$4 sm:$0xff]   ;;  %v5001_v35 = vld [vmem:[%s5873_s2 + $0x1a0] ss:$16 sps:$4 sm:$0xff]  }
 0x326   :  { %v1498_v40 = vadd.f32 0.5, %v1492_v16  ;;  %v1505_v20 = vmul.f32 %v3647_v43, %v1497_v31  ;;  %v3651_v4 = vpop.eup %3650  ;;  %6081 = vst [vmem:[#allocation38_spill] sm:$0xff] %v5001_v35  ;;  %v1490_v31 = vmul.f32 0.5, %v3649_v51  ;;  %v5013_v43 = vld [vmem:[%s5873_s2 + $0x1c4] ss:$16 sps:$4 sm:$0xff]  }
 0x327   :  { %v4943_v3 = vadd.f32 %v1504_v36, %v1502_v42  ;;  %v5007_v36 = vld [vmem:[%s5873_s2 + $0x1a8] ss:$16 sps:$4 sm:$0xff]   ;;  %v1493_v16 = vmul.f32 0.5, %v3651_v4  ;;  %6083 = vst [vmem:[#allocation36_spill] sm:$0xff] %v5013_v43  ;;  %v5019_v42 = vld [vmem:[%s5873_s2 + $0x1cc] ss:$16 sps:$4 sm:$0xff]  }
 0x328   :  { %v1503_v12 = vmul.f32 %v1498_v40, %v4607_v44  ;;  %1697 = vmatpush1.bf16.msra.mxu0 %v4949_v15  ;;  %1740 = vmatpush1.bf16.msra.mxu1 %v4955_v46  ;;  %v4967_v44 = vld [vmem:[%s5873_s2 + $0x18c] ss:$16 sps:$4 sm:$0xff]   ;;  %6082 = vst [vmem:[#allocation35_spill] sm:$0xff] %v5007_v36  ;;  %6084 = vst [vmem:[#allocation39_spill] sm:$0xff] %v5019_v42  ;;  %v1496_v51 = vadd.f32 0.5, %v1490_v31 }
 0x329   :  { %1698 = vmatprep.subr.bf16.mxu0 %v4961_v48  ;;  %1741 = vmatprep.subr.bf16.mxu1 %v4967_v44  ;;  %3652 = vtanh.f32 %v4943_v3  ;;  %v1499_v4 = vadd.f32 0.5, %v1493_v16  ;;  %v5049_v31 = vld [vmem:[%s5873_s2 + $0x1e0] ss:$16 sps:$4 sm:$0xff]   ;;  %v5055_v16 = vld [vmem:[%s5873_s2 + $0x1e8] ss:$16 sps:$4 sm:$0xff]  }
 0x32a   :  { %v4971_v37 = vadd.f32 %v1505_v20, %v1503_v12  ;;  %v5025_v20 = vld [vmem:[%s5873_s2 + $0x1c0] ss:$16 sps:$4 sm:$0xff]   ;;  %v5031_v12 = vld [vmem:[%s5873_s2 + $0x1c8] ss:$16 sps:$4 sm:$0xff]  }
 0x32b   :  { %6085 = vst [vmem:[#allocation40_spill] sm:$0xff] %v5025_v20 }
 0x32c   :  { %3654 = vtanh.f32 %v4971_v37  ;;  %1699 = vmatpush1.bf16.msra.mxu0 %v4977_v41  ;;  %1742 = vmatpush1.bf16.msra.mxu1 %v4983_v13 }
 0x32d   :  { %1700 = vmatprep.subr.bf16.mxu0 %v4989_v53  ;;  %1743 = vmatprep.subr.bf16.mxu1 %v4995_v55 }
 0x330   :  { %1701 = vmatpush1.bf16.msra.mxu0 %v5001_v35  ;;  %1744 = vmatpush1.bf16.msra.mxu1 %v5007_v36 }
 0x331   :  { %1702 = vmatprep.subr.bf16.mxu0 %v5013_v43  ;;  %1745 = vmatprep.subr.bf16.mxu1 %v5019_v42  ;;  %v5037_v42 = vld [vmem:[%s5873_s2 + $0x1e4] ss:$16 sps:$4 sm:$0xff]  }
 0x332   :  { %6086 = vst [vmem:[#allocation41_spill] sm:$0xff] %v5037_v42 }
 0x333   :  { %v3653_v40 = vpop.eup %3652 }
 0x334   :  { %1703 = vmatpush1.bf16.msra.mxu0 %v5025_v20  ;;  %1746 = vmatpush1.bf16.msra.mxu1 %v5031_v12  ;;  %v5043_v20 = vld [vmem:[%s5873_s2 + $0x1ec] ss:$16 sps:$4 sm:$0xff]   ;;  %v1510_v36 = vmul.f32 %v3653_v40, %v1496_v51  ;;  %v48_v40 = vld [vmem:[%s5871_s0 + $0xc0] sm:$0xff] }
 0x335   :  { %1704 = vmatprep.subr.bf16.mxu0 %v5037_v42  ;;  %1747 = vmatprep.subr.bf16.mxu1 %v5043_v20  ;;  %v52_v51 = vld [vmem:[%s5871_s0 + $0xe0] sm:$0xff] }
 0x336   :  { %v3655_v43 = vpop.eup %3654 }
 0x337   :  { %v1511_v35 = vmul.f32 %v3655_v43, %v1499_v4  ;;  %v6089_v43 = vld [vmem:[#allocation33_spill] sm:$0xff]  ;;  %v1539_v4 = vunpack.c.l.bf16 %v48_v40 }
 0x338   :  { %1705 = vmatpush1.bf16.msra.mxu0 %v5049_v31  ;;  %1748 = vmatpush1.bf16.msra.mxu1 %v5055_v16 }
 0x339   :  { %v1523_v42 = vpack.c.bf16 %v1511_v35, %v1510_v36  ;;  %1855 = vmatprep.subr.bf16.mxu0 %v4627_v56  ;;  %1898 = vmatprep.subr.bf16.mxu1 %v4633_v57  ;;  %v6087_v35 = vld [vmem:[#allocation30_spill] sm:$0xff]  ;;  %v6088_v36 = vld [vmem:[#allocation31_spill] sm:$0xff] }
 0x33b   :  { %3428 = vst [vmem:[%s5875_s4 + $0x28] sm:$0xff] %v1523_v42   ;;  %1723 = vmatmul.mubr.bf16.vlgmr.msra.gmra.mrb[28].mxu0 %v1523_v42  ;;  %1766 = vmatmul.mubr.bf16.vlgmr.msra.gmra.mrb[28].mxu1 %v1523_v42  ;;  %v6090_v42 = vld [vmem:[#allocation32_spill] sm:$0xff] }
 0x33c   :  { %1856 = vmatpush1.bf16.msra.mxu0 %v4642_v2  ;;  %1899 = vmatpush1.bf16.msra.mxu1 %v4648_v38 }
 0x33d   :  { %1857 = vmatprep.subr.bf16.mxu0 %v4654_v58  ;;  %1900 = vmatprep.subr.bf16.mxu1 %v4660_v59 }
 0x33e   :  { %1887 = vmatprep.mubr.bf16.mxu0 %v6011_v61  ;;  %1930 = vmatprep.mubr.bf16.mxu1 %v6011_v61 }
 0x340   :  { %1858 = vmatpush1.bf16.msra.mxu0 %v4668_v62  ;;  %1901 = vmatpush1.bf16.msra.mxu1 %v4674_v63 }
 0x341   :  { %1859 = vmatprep.subr.bf16.mxu0 %v4680_v29  ;;  %1902 = vmatprep.subr.bf16.mxu1 %v4686_v23 }
 0x344   :  { %1860 = vmatpush1.bf16.msra.mxu0 %v4692_v14  ;;  %1903 = vmatpush1.bf16.msra.mxu1 %v4698_v6 }
 0x345   :  { %1861 = vmatprep.subr.bf16.mxu0 %v4704_v28  ;;  %1904 = vmatprep.subr.bf16.mxu1 %v4710_v22 }
 0x348   :  { %1862 = vmatpush1.bf16.msra.mxu0 %v4716_v32  ;;  %1905 = vmatpush1.bf16.msra.mxu1 %v4722_v11 }
 0x349   :  { %1863 = vmatprep.subr.bf16.mxu0 %v4728_v21  ;;  %1906 = vmatprep.subr.bf16.mxu1 %v4734_v26 }
 0x34c   :  { %1864 = vmatpush1.bf16.msra.mxu0 %v4740_v18  ;;  %1907 = vmatpush1.bf16.msra.mxu1 %v4746_v17 }
 0x34d   :  { %1865 = vmatprep.subr.bf16.mxu0 %v4752_v33  ;;  %1908 = vmatprep.subr.bf16.mxu1 %v4758_v27 }
 0x350   :  { %1866 = vmatpush1.bf16.msra.mxu0 %v4764_v25  ;;  %1909 = vmatpush1.bf16.msra.mxu1 %v4770_v8  ;;  %v54_v8 = vld [vmem:[%s5871_s0 + $0xe8] sm:$0xff] }
 0x351   :  { %1867 = vmatprep.subr.bf16.mxu0 %v4776_v9  ;;  %1910 = vmatprep.subr.bf16.mxu1 %v4782_v19  ;;  %v1546_v32 = vunpack.c.h.bf16 %v54_v8  ;;  %v1545_v6 = vunpack.c.l.bf16 %v54_v8 }
 0x354   :  { %1868 = vmatpush1.bf16.msra.mxu0 %v4788_v34  ;;  %1911 = vmatpush1.bf16.msra.mxu1 %v4794_v1 }
 0x355   :  { %1869 = vmatprep.subr.bf16.mxu0 %v4800_v60  ;;  %1912 = vmatprep.subr.bf16.mxu1 %v4806_v5  ;;  %v50_v5 = vld [vmem:[%s5871_s0 + $0xc8] sm:$0xff]  ;;  %v1543_v60 = vunpack.c.l.bf16 %v52_v51 }
 0x356   :  { %v1542_v19 = vunpack.c.h.bf16 %v50_v5  ;;  %v1541_v22 = vunpack.c.l.bf16 %v50_v5 }
 0x358   :  { %1870 = vmatpush1.bf16.msra.mxu0 %v6087_v35  ;;  %1913 = vmatpush1.bf16.msra.mxu1 %v6088_v36  ;;  %v1540_v35 = vunpack.c.h.bf16 %v48_v40 }
 0x359   :  { %1998 = vmatprep.subr.bf16.mxu0 %v6089_v43  ;;  %2041 = vmatprep.subr.bf16.mxu1 %v6090_v42  ;;  %v1544_v43 = vunpack.c.h.bf16 %v52_v51 }
 0x3ee   :  { %v1581_v36 = vpop.f32.mrb[24].mxu0  ;;  %v1624_v1 = vpop.f32.mrb[24].mxu1 }
 0x3ef   :  { %v1633_v34 = vadd.f32 %v1581_v36, %v1539_v4  ;;  %v1583_v42 = vpop.f32.mrb[25].mxu0  ;;  %v1626_v9 = vpop.f32.mrb[25].mxu1 }
 0x3f0   :  { %v1634_v25 = vadd.f32 %v1583_v42, %v1540_v35  ;;  %v1585_v27 = vpop.f32.mrb[26].mxu0  ;;  %v1628_v33 = vpop.f32.mrb[26].mxu1  ;;  %v1636_v51 = vadd.f32 %v1626_v9, %v1542_v19  ;;  %v1635_v35 = vadd.f32 %v1624_v1, %v1541_v22 }
 0x3f1   :  { %v1641_v17 = vmul.f32 0.5, %v1633_v34  ;;  %v1637_v18 = vadd.f32 %v1585_v27, %v1543_v60  ;;  %v1587_v26 = vpop.f32.mrb[27].mxu0  ;;  %v1630_v21 = vpop.f32.mrb[27].mxu1  ;;  %v1639_v34 = vadd.f32 %v1628_v33, %v1545_v6 }
 0x3f2   :  { %v1642_v40 = vmul.f32 0.5, %v1634_v25  ;;  %v1638_v11 = vadd.f32 %v1587_v26, %v1544_v43  ;;  %v1640_v28 = vadd.f32 %v1630_v21, %v1546_v32  ;;  %v1643_v42 = vmul.f32 0.5, %v1635_v35 }
 0x3f3   :  { %3656 = vtanh.f32 %v1641_v17  ;;  %v1644_v36 = vmul.f32 0.5, %v1637_v18  ;;  %v1646_v26 = vmul.f32 0.5, %v1639_v34  ;;  %v3142_v34 = vld [vmem:[%s5872_s1 + $0x130] sm:$0xff] }
 0x3f4   :  { %v1645_v4 = vmul.f32 0.5, %v1638_v11  ;;  %3658 = vtanh.f32 %v1642_v40 }
 0x3f5   :  { %3660 = vtanh.f32 %v1644_v36 }
 0x3f6   :  { %3662 = vtanh.f32 %v1636_v51  ;;  %v6093_v51 = vld [vmem:[#allocation37_spill] sm:$0xff] }
 0x3f7   :  { %3664 = vtanh.f32 %v1645_v4  ;;  %v3140_v4 = vld [vmem:[%s5872_s1 + $0x110] sm:$0xff] }
 0x3f8   :  { %3666 = vtanh.f32 %v1640_v28  ;;  %v6091_v28 = vld [vmem:[#allocation34_spill] sm:$0xff] }
 0x3f9   :  { %3668 = vtanh.f32 %v1643_v42  ;;  %v3141_v42 = vld [vmem:[%s5872_s1 + $0x118] sm:$0xff] }
 0x3fa   :  { %3670 = vtanh.f32 %v1646_v26 }
 0x3fd   :  { %v3657_v27 = vpop.eup %3656 }
 0x3fe   :  { %v1653_v60 = vmul.f32 0.5, %v3657_v27  ;;  %v3659_v25 = vpop.eup %3658  ;;  %v1682_v27 = vunpack.c.l.bf16 %v3140_v4 }
 0x3ff   :  { %v3661_v43 = vpop.eup %3660  ;;  %v1654_v9 = vmul.f32 0.5, %v3659_v25  ;;  %v1683_v25 = vunpack.c.h.bf16 %v3140_v4 }
 0x400   :  { %v1659_v17 = vadd.f32 0.5, %v1653_v60  ;;  %v3663_v18 = vpop.eup %3662  ;;  %v1656_v11 = vmul.f32 0.5, %v3661_v43  ;;  %v1686_v43 = vunpack.c.l.bf16 %v3142_v34 }
 0x401   :  { %v3665_v19 = vpop.eup %3664  ;;  %v1660_v5 = vadd.f32 0.5, %v1654_v9 }
 0x402   :  { %v1669_v32 = vmul.f32 %v3663_v18, %v1659_v17  ;;  %v1662_v21 = vadd.f32 0.5, %v1656_v11  ;;  %v1657_v8 = vmul.f32 0.5, %v3665_v19  ;;  %v3667_v22 = vpop.eup %3666  ;;  %v1687_v18 = vunpack.c.h.bf16 %v3142_v34 }
 0x403   :  { %v1667_v6 = vmul.f32 %v1660_v5, %v6091_v28  ;;  %v3669_v60 = vpop.eup %3668  ;;  %v1685_v5 = vunpack.c.h.bf16 %v3141_v42 }
 0x404   :  { %v1663_v33 = vadd.f32 0.5, %v1657_v8  ;;  %v1670_v1 = vmul.f32 %v3667_v22, %v1662_v21  ;;  %v3671_v26 = vpop.eup %3670  ;;  %v3143_v21 = vld [vmem:[%s5872_s1 + $0x138] sm:$0xff]  ;;  %v1655_v8 = vmul.f32 0.5, %v3669_v60  ;;  %v1684_v60 = vunpack.c.l.bf16 %v3141_v42 }
 0x405   :  { %v5110_v40 = vadd.f32 %v1669_v32, %v1667_v6  ;;  %v1658_v22 = vmul.f32 0.5, %v3671_v26  ;;  %v1689_v34 = vunpack.c.h.bf16 %v3143_v21 }
 0x406   :  { %v1668_v36 = vmul.f32 %v1663_v33, %v6093_v51  ;;  %v1661_v23 = vadd.f32 0.5, %v1655_v8 }
 0x407   :  { %6092 = vst [vmem:[#allocation34_spill] sm:$0xff] %v5110_v40  ;;  %3672 = vtanh.f32 %v5110_v40  ;;  %v1664_v29 = vadd.f32 0.5, %v1658_v22 }
 0x408   :  { %v5117_v35 = vadd.f32 %v1670_v1, %v1668_v36 }
 0x40a   :  { %6094 = vst [vmem:[#allocation37_spill] sm:$0xff] %v5117_v35  ;;  %3674 = vtanh.f32 %v5117_v35 }
 0x40e   :  { %v1724_v17 = vpop.f32.mrb[28].mxu0  ;;  %v1767_v9 = vpop.f32.mrb[28].mxu1 }
 0x40f   :  { %v1776_v11 = vadd.f32 %v1724_v17, %v1682_v27  ;;  %v1726_v19 = vpop.f32.mrb[29].mxu0  ;;  %v1769_v32 = vpop.f32.mrb[29].mxu1 }
 0x410   :  { %v1777_v28 = vadd.f32 %v1726_v19, %v1683_v25  ;;  %v1728_v6 = vpop.f32.mrb[30].mxu0  ;;  %v1771_v33 = vpop.f32.mrb[30].mxu1  ;;  %v1779_v17 = vadd.f32 %v1769_v32, %v1685_v5 }
 0x411   :  { %v1784_v1 = vmul.f32 0.5, %v1776_v11  ;;  %v1780_v51 = vadd.f32 %v1728_v6, %v1686_v43  ;;  %v1730_v36 = vpop.f32.mrb[31].mxu0  ;;  %v1773_v4 = vpop.f32.mrb[31].mxu1  ;;  %v1688_v43 = vunpack.c.l.bf16 %v3143_v21 }
 0x412   :  { %v1785_v35 = vmul.f32 0.5, %v1777_v28  ;;  %v1781_v40 = vadd.f32 %v1730_v36, %v1687_v18  ;;  %v3673_v27 = vpop.eup %3672  ;;  %v1783_v25 = vadd.f32 %v1773_v4, %v1689_v34  ;;  %v1778_v18 = vadd.f32 %v1767_v9, %v1684_v60  ;;  %v6096_v60 = vld [vmem:[#allocation35_spill] sm:$0xff] }
 0x413   :  { %3676 = vtanh.f32 %v1784_v1  ;;  %v1787_v14 = vmul.f32 0.5, %v1780_v51  ;;  %v1675_v26 = vmul.f32 %v3673_v27, %v1661_v23 }
 0x414   :  { %v1788_v63 = vmul.f32 0.5, %v1781_v40  ;;  %v3675_v62 = vpop.eup %3674  ;;  %3678 = vtanh.f32 %v1785_v35  ;;  %v1782_v40 = vadd.f32 %v1771_v33, %v1688_v43  ;;  %v6098_v43 = vld [vmem:[#allocation39_spill] sm:$0xff] }
 0x415   :  { %3680 = vtanh.f32 %v1787_v14  ;;  %v1676_v11 = vmul.f32 %v3675_v62, %v1664_v29  ;;  %v1786_v29 = vmul.f32 0.5, %v1778_v18  ;;  %v6099_v18 = vld [vmem:[#allocation40_spill] sm:$0xff] }
 0x416   :  { %3682 = vtanh.f32 %v1779_v17  ;;  %v1789_v14 = vmul.f32 0.5, %v1782_v40  ;;  %v6095_v17 = vld [vmem:[#allocation38_spill] sm:$0xff] }
 0x417   :  { %3684 = vtanh.f32 %v1788_v63  ;;  %v1820_v19 = vpack.c.bf16 %v1676_v11, %v1675_v26  ;;  %v6097_v11 = vld [vmem:[#allocation36_spill] sm:$0xff] }
 0x418   :  { %3686 = vtanh.f32 %v1783_v25 }
 0x419   :  { %3429 = vst [vmem:[%s5874_s3 + $0x18] sm:$0xff] %v1820_v19   ;;  %1888 = vmatmul.mubr.bf16.vlgmr.msra.gmra.mrb[32].mxu0 %v1820_v19  ;;  %1931 = vmatmul.mubr.bf16.vlgmr.msra.gmra.mrb[32].mxu1 %v1820_v19  ;;  %3688 = vtanh.f32 %v1786_v29 }
 0x41a   :  { %1999 = vmatpush1.bf16.msra.mxu0 %v4871_v54  ;;  %2042 = vmatpush1.bf16.msra.mxu1 %v4877_v24  ;;  %3690 = vtanh.f32 %v1789_v14 }
 0x41b   :  { %2000 = vmatprep.subr.bf16.mxu0 %v4883_v30  ;;  %2043 = vmatprep.subr.bf16.mxu1 %v4889_v7 }
 0x41c   :  { %2030 = vmatprep.mubr.bf16.mxu0 %v6011_v61  ;;  %2073 = vmatprep.mubr.bf16.mxu1 %v6011_v61 }
 0x41d   :  { %v3677_v62 = vpop.eup %3676 }
 0x41e   :  { %v1796_v63 = vmul.f32 0.5, %v3677_v62  ;;  %v3679_v23 = vpop.eup %3678  ;;  %2001 = vmatpush1.bf16.msra.mxu0 %v4897_v49  ;;  %2044 = vmatpush1.bf16.msra.mxu1 %v4903_v50 }
 0x41f   :  { %v3681_v35 = vpop.eup %3680  ;;  %v1797_v9 = vmul.f32 0.5, %v3679_v23  ;;  %2002 = vmatprep.subr.bf16.mxu0 %v4909_v45  ;;  %2045 = vmatprep.subr.bf16.mxu1 %v4915_v52 }
 0x420   :  { %v1802_v42 = vadd.f32 0.5, %v1796_v63  ;;  %v3683_v5 = vpop.eup %3682  ;;  %v1799_v32 = vmul.f32 0.5, %v3681_v35  ;;  %v6100_v63 = vld [vmem:[#allocation41_spill] sm:$0xff] }
 0x421   :  { %v3685_v21 = vpop.eup %3684  ;;  %v1803_v8 = vadd.f32 0.5, %v1797_v9  ;;  %v6104_v9 = vld [vmem:[#allocation8_spill] sm:$0xff] }
 0x422   :  { %v1812_v22 = vmul.f32 %v3683_v5, %v1802_v42  ;;  %v1805_v28 = vadd.f32 0.5, %v1799_v32  ;;  %v1800_v6 = vmul.f32 0.5, %v3685_v21  ;;  %2003 = vmatpush1.bf16.msra.mxu0 %v4921_v39  ;;  %2046 = vmatpush1.bf16.msra.mxu1 %v4927_v10  ;;  %v3687_v33 = vpop.eup %3686  ;;  %v6103_v42 = vld [vmem:[#allocation9_spill] sm:$0xff]  ;;  %v6105_v5 = vld [vmem:[#allocation11_spill] sm:$0xff] }
 0x423   :  { %v1810_v1 = vmul.f32 %v1803_v8, %v4943_v3  ;;  %2004 = vmatprep.subr.bf16.mxu0 %v4934_v0  ;;  %2047 = vmatprep.subr.bf16.mxu1 %v4940_v47  ;;  %v3689_v27 = vpop.eup %3688  ;;  %v6110_v32 = vld [vmem:[#allocation15_spill] sm:$0xff]  ;;  %v6111_v21 = vld [vmem:[#allocation17_spill] sm:$0xff]  ;;  %v6112_v8 = vld [vmem:[#allocation16_spill] sm:$0xff] }
 0x424   :  { %v1806_v51 = vadd.f32 0.5, %v1800_v6  ;;  %v1813_v36 = vmul.f32 %v3687_v33, %v1805_v28  ;;  %v1798_v25 = vmul.f32 0.5, %v3689_v27  ;;  %v6114_v28 = vld [vmem:[#allocation19_spill] sm:$0xff]  ;;  %v6115_v6 = vld [vmem:[#allocation21_spill] sm:$0xff]  ;;  %v6116_v33 = vld [vmem:[#allocation20_spill] sm:$0xff] }
 0x425   :  { %v5147_v4 = vadd.f32 %v1812_v22, %v1810_v1  ;;  %v6113_v22 = vld [vmem:[#allocation18_spill] sm:$0xff] }
 0x426   :  { %v1811_v34 = vmul.f32 %v1806_v51, %v4971_v37  ;;  %2005 = vmatpush1.bf16.msra.mxu0 %v4949_v15  ;;  %2048 = vmatpush1.bf16.msra.mxu1 %v4955_v46  ;;  %v3691_v37 = vpop.eup %3690  ;;  %v1804_v40 = vadd.f32 0.5, %v1798_v25  ;;  %v6117_v1 = vld [vmem:[#allocation22_spill] sm:$0xff]  ;;  %v6118_v51 = vld [vmem:[#allocation23_spill] sm:$0xff]  ;;  %v6123_v25 = vld [vmem:[#allocation29_spill] sm:$0xff] }
 0x427   :  { %2006 = vmatprep.subr.bf16.mxu0 %v4961_v48  ;;  %2049 = vmatprep.subr.bf16.mxu1 %v4967_v44  ;;  %3692 = vtanh.f32 %v5147_v4  ;;  %v1801_v26 = vmul.f32 0.5, %v3691_v37  ;;  %v6121_v27 = vld [vmem:[#allocation26_spill] sm:$0xff]  ;;  %v6122_v37 = vld [vmem:[#allocation27_spill] sm:$0xff] }
 0x428   :  { %v5155_v3 = vadd.f32 %v1813_v36, %v1811_v34  ;;  %v6119_v36 = vld [vmem:[#allocation25_spill] sm:$0xff]  ;;  %v6120_v34 = vld [vmem:[#allocation24_spill] sm:$0xff] }
 0x429   :  { %v1807_v62 = vadd.f32 0.5, %v1801_v26  ;;  %v6124_v26 = vld [vmem:[#allocation28_spill] sm:$0xff] }
 0x42a   :  { %3694 = vtanh.f32 %v5155_v3  ;;  %2007 = vmatpush1.bf16.msra.mxu0 %v4977_v41  ;;  %2050 = vmatpush1.bf16.msra.mxu1 %v4983_v13 }
 0x42b   :  { %2008 = vmatprep.subr.bf16.mxu0 %v4989_v53  ;;  %2051 = vmatprep.subr.bf16.mxu1 %v4995_v55 }
 0x42e   :  { %2009 = vmatpush1.bf16.msra.mxu0 %v6095_v17  ;;  %2052 = vmatpush1.bf16.msra.mxu1 %v6096_v60 }
 0x42f   :  { %2010 = vmatprep.subr.bf16.mxu0 %v6097_v11  ;;  %2053 = vmatprep.subr.bf16.mxu1 %v6098_v43 }
 0x431   :  { %v3693_v19 = vpop.eup %3692 }
 0x432   :  { %2011 = vmatpush1.bf16.msra.mxu0 %v6099_v18  ;;  %2054 = vmatpush1.bf16.msra.mxu1 %v5031_v12  ;;  %v1818_v23 = vmul.f32 %v3693_v19, %v1804_v40  ;;  %v6125_v19 = vld [vmem:[#allocation30_spill] sm:$0xff]  ;;  %v6126_v40 = vld [vmem:[#allocation31_spill] sm:$0xff] }
 0x433   :  { %2012 = vmatprep.subr.bf16.mxu0 %v6100_v63  ;;  %2055 = vmatprep.subr.bf16.mxu1 %v5043_v20 }
 0x434   :  { %v3695_v29 = vpop.eup %3694 }
 0x435   :  { %v1819_v14 = vmul.f32 %v3695_v29, %v1807_v62  ;;  %v6127_v62 = vld [vmem:[#allocation33_spill] sm:$0xff]  ;;  %v6128_v29 = vld [vmem:[#allocation32_spill] sm:$0xff] }
 0x436   :  { %2013 = vmatpush1.bf16.msra.mxu0 %v5049_v31  ;;  %2056 = vmatpush1.bf16.msra.mxu1 %v5055_v16 }
 0x437   :  { %v1831_v35 = vpack.c.bf16 %v1819_v14, %v1818_v23  ;;  %2163 = vmatprep.subr.bf16.mxu0 %v4627_v56  ;;  %2206 = vmatprep.subr.bf16.mxu1 %v4633_v57  ;;  %v6101_v56 = vld [vmem:[#allocation7_spill] sm:$0xff]  ;;  %v6102_v57 = vld [vmem:[#allocation6_spill] sm:$0xff] }
 0x438   :  { %v56_v23 = vld [vmem:[%s5871_s0 + $0x100] sm:$0xff] }
 0x439   :  { %3430 = vst [vmem:[%s5875_s4 + $0x20] sm:$0xff] %v1831_v35   ;;  %2031 = vmatmul.mubr.bf16.vlgmr.msra.gmra.mrb[36].mxu0 %v1831_v35  ;;  %2074 = vmatmul.mubr.bf16.vlgmr.msra.gmra.mrb[36].mxu1 %v1831_v35  ;;  %v60_v14 = vld [vmem:[%s5871_s0 + $0x120] sm:$0xff]  ;;  %v1847_v35 = vunpack.c.l.bf16 %v56_v23 }
 0x43a   :  { %2164 = vmatpush1.bf16.msra.mxu0 %v4642_v2  ;;  %2207 = vmatpush1.bf16.msra.mxu1 %v4648_v38  ;;  %v6106_v2 = vld [vmem:[#allocation10_spill] sm:$0xff]  ;;  %v6107_v38 = vld [vmem:[#allocation13_spill] sm:$0xff] }
 0x43b   :  { %2165 = vmatprep.subr.bf16.mxu0 %v4654_v58  ;;  %2208 = vmatprep.subr.bf16.mxu1 %v4660_v59  ;;  %v6108_v58 = vld [vmem:[#allocation12_spill] sm:$0xff]  ;;  %v6109_v59 = vld [vmem:[#allocation14_spill] sm:$0xff] }
 0x43c   :  { %2195 = vmatprep.mubr.bf16.mxu0 %v6011_v61  ;;  %2238 = vmatprep.mubr.bf16.mxu1 %v6011_v61 }
 0x43e   :  { %2166 = vmatpush1.bf16.msra.mxu0 %v6101_v56  ;;  %2209 = vmatpush1.bf16.msra.mxu1 %v6102_v57  ;;  %v58_v56 = vld [vmem:[%s5871_s0 + $0x108] sm:$0xff]  ;;  %v1848_v57 = vunpack.c.h.bf16 %v56_v23 }
 0x43f   :  { %2167 = vmatprep.subr.bf16.mxu0 %v6103_v42  ;;  %2210 = vmatprep.subr.bf16.mxu1 %v6104_v9  ;;  %v1851_v42 = vunpack.c.l.bf16 %v60_v14 }
 0x442   :  { %2168 = vmatpush1.bf16.msra.mxu0 %v6105_v5  ;;  %2211 = vmatpush1.bf16.msra.mxu1 %v6106_v2  ;;  %v1852_v2 = vunpack.c.h.bf16 %v60_v14 }
 0x443   :  { %2169 = vmatprep.subr.bf16.mxu0 %v6107_v38  ;;  %2212 = vmatprep.subr.bf16.mxu1 %v6108_v58 }
 0x446   :  { %2170 = vmatpush1.bf16.msra.mxu0 %v6109_v59  ;;  %2213 = vmatpush1.bf16.msra.mxu1 %v6110_v32  ;;  %v1850_v59 = vunpack.c.h.bf16 %v58_v56 }
 0x447   :  { %2171 = vmatprep.subr.bf16.mxu0 %v6111_v21  ;;  %2214 = vmatprep.subr.bf16.mxu1 %v6112_v8  ;;  %v62_v21 = vld [vmem:[%s5871_s0 + $0x128] sm:$0xff] }
 0x44a   :  { %2172 = vmatpush1.bf16.msra.mxu0 %v6113_v22  ;;  %2215 = vmatpush1.bf16.msra.mxu1 %v6114_v28 }
 0x44b   :  { %2173 = vmatprep.subr.bf16.mxu0 %v6115_v6  ;;  %2216 = vmatprep.subr.bf16.mxu1 %v6116_v33 }
 0x44e   :  { %2174 = vmatpush1.bf16.msra.mxu0 %v6117_v1  ;;  %2217 = vmatpush1.bf16.msra.mxu1 %v6118_v51 }
 0x44f   :  { %2175 = vmatprep.subr.bf16.mxu0 %v6119_v36  ;;  %2218 = vmatprep.subr.bf16.mxu1 %v6120_v34 }
 0x452   :  { %2176 = vmatpush1.bf16.msra.mxu0 %v6121_v27  ;;  %2219 = vmatpush1.bf16.msra.mxu1 %v6122_v37  ;;  %v1854_v27 = vunpack.c.h.bf16 %v62_v21 }
 0x453   :  { %2177 = vmatprep.subr.bf16.mxu0 %v6123_v25  ;;  %2220 = vmatprep.subr.bf16.mxu1 %v6124_v26 }
 0x456   :  { %2178 = vmatpush1.bf16.msra.mxu0 %v6125_v19  ;;  %2221 = vmatpush1.bf16.msra.mxu1 %v6126_v40  ;;  %v1849_v19 = vunpack.c.l.bf16 %v58_v56 }
 0x457   :  { %2306 = vmatprep.subr.bf16.mxu0 %v6127_v62  ;;  %2349 = vmatprep.subr.bf16.mxu1 %v6128_v29  ;;  %v1853_v62 = vunpack.c.l.bf16 %v62_v21 }
 0x4ec   :  { %v1889_v9 = vpop.f32.mrb[32].mxu0  ;;  %v1932_v5 = vpop.f32.mrb[32].mxu1 }
 0x4ed   :  { %v1941_v38 = vadd.f32 %v1889_v9, %v1847_v35  ;;  %v1891_v58 = vpop.f32.mrb[33].mxu0  ;;  %v1934_v32 = vpop.f32.mrb[33].mxu1  ;;  %v1943_v29 = vadd.f32 %v1932_v5, %v1849_v19 }
 0x4ee   :  { %v1942_v8 = vadd.f32 %v1891_v58, %v1848_v57  ;;  %v1893_v22 = vpop.f32.mrb[34].mxu0  ;;  %v1936_v28 = vpop.f32.mrb[34].mxu1  ;;  %v1944_v37 = vadd.f32 %v1934_v32, %v1850_v59 }
 0x4ef   :  { %v1949_v6 = vmul.f32 0.5, %v1941_v38  ;;  %v1945_v33 = vadd.f32 %v1893_v22, %v1851_v42  ;;  %v1895_v1 = vpop.f32.mrb[35].mxu0  ;;  %v1938_v51 = vpop.f32.mrb[35].mxu1  ;;  %v1947_v23 = vadd.f32 %v1936_v28, %v1853_v62  ;;  %v1951_v57 = vmul.f32 0.5, %v1943_v29  ;;  %v3137_v62 = vld [vmem:[%s5872_s1 + $0xd8] sm:$0xff] }
 0x4f0   :  { %v1950_v36 = vmul.f32 0.5, %v1942_v8  ;;  %v1946_v34 = vadd.f32 %v1895_v1, %v1852_v2  ;;  %v1948_v40 = vadd.f32 %v1938_v51, %v1854_v27 }
 0x4f1   :  { %3696 = vtanh.f32 %v1949_v6  ;;  %v1952_v25 = vmul.f32 0.5, %v1945_v33  ;;  %v1954_v9 = vmul.f32 0.5, %v1947_v23  ;;  %v6129_v33 = vld [vmem:[#allocation34_spill] sm:$0xff] }
 0x4f2   :  { %v1953_v26 = vmul.f32 0.5, %v1946_v34  ;;  %3698 = vtanh.f32 %v1950_v36  ;;  %v6131_v34 = vld [vmem:[#allocation37_spill] sm:$0xff] }
 0x4f3   :  { %3700 = vtanh.f32 %v1952_v25 }
 0x4f4   :  { %3702 = vtanh.f32 %v1944_v37  ;;  %v3136_v37 = vld [vmem:[%s5872_s1 + $0xd0] sm:$0xff] }
 0x4f5   :  { %3704 = vtanh.f32 %v1953_v26  ;;  %v3138_v26 = vld [vmem:[%s5872_s1 + $0xf0] sm:$0xff]  ;;  %v1990_v19 = vunpack.c.l.bf16 %v3136_v37  ;;  %v1991_v29 = vunpack.c.h.bf16 %v3136_v37 }
 0x4f6   :  { %3706 = vtanh.f32 %v1948_v40 }
 0x4f7   :  { %3708 = vtanh.f32 %v1951_v57 }
 0x4f8   :  { %3710 = vtanh.f32 %v1954_v9 }
 0x4fb   :  { %v3697_v14 = vpop.eup %3696 }
 0x4fc   :  { %v1961_v35 = vmul.f32 0.5, %v3697_v14  ;;  %v3699_v42 = vpop.eup %3698  ;;  %v1994_v14 = vunpack.c.l.bf16 %v3138_v26 }
 0x4fd   :  { %v3701_v2 = vpop.eup %3700  ;;  %v1962_v58 = vmul.f32 0.5, %v3699_v42  ;;  %v1995_v42 = vunpack.c.h.bf16 %v3138_v26 }
 0x4fe   :  { %v1967_v38 = vadd.f32 0.5, %v1961_v35  ;;  %v3703_v59 = vpop.eup %3702  ;;  %v1964_v32 = vmul.f32 0.5, %v3701_v2 }
 0x4ff   :  { %v3705_v8 = vpop.eup %3704  ;;  %v1968_v56 = vadd.f32 0.5, %v1962_v58 }
 0x500   :  { %v1977_v22 = vmul.f32 %v3703_v59, %v1967_v38  ;;  %v1970_v6 = vadd.f32 0.5, %v1964_v32  ;;  %v1965_v21 = vmul.f32 0.5, %v3705_v8  ;;  %v3707_v5 = vpop.eup %3706  ;;  %v1993_v38 = vunpack.c.h.bf16 %v3137_v62  ;;  %v3139_v59 = vld [vmem:[%s5872_s1 + $0xf8] sm:$0xff] }
 0x501   :  { %v1975_v28 = vmul.f32 %v1968_v56, %v6129_v33  ;;  %v3709_v40 = vpop.eup %3708 }
 0x502   :  { %v1971_v1 = vadd.f32 0.5, %v1965_v21  ;;  %v1978_v51 = vmul.f32 %v3707_v5, %v1970_v6  ;;  %v3711_v23 = vpop.eup %3710  ;;  %v1963_v32 = vmul.f32 0.5, %v3709_v40  ;;  %v1992_v40 = vunpack.c.l.bf16 %v3137_v62 }
 0x503   :  { %v5224_v36 = vadd.f32 %v1977_v22, %v1975_v28  ;;  %v1966_v8 = vmul.f32 0.5, %v3711_v23 }
 0x504   :  { %v1976_v27 = vmul.f32 %v1971_v1, %v6131_v34  ;;  %v1997_v34 = vunpack.c.h.bf16 %v3139_v59 }
 0x505   :  { %6130 = vst [vmem:[#allocation38_spill] sm:$0xff] %v5224_v36  ;;  %3712 = vtanh.f32 %v5224_v36 }
 0x506   :  { %v5231_v25 = vadd.f32 %v1978_v51, %v1976_v27 }
 0x508   :  { %6132 = vst [vmem:[#allocation35_spill] sm:$0xff] %v5231_v25  ;;  %3714 = vtanh.f32 %v5231_v25 }
 0x50c   :  { %v2032_v35 = vpop.f32.mrb[36].mxu0  ;;  %v2075_v57 = vpop.f32.mrb[36].mxu1 }
 0x50d   :  { %v2084_v9 = vadd.f32 %v2032_v35, %v1990_v19  ;;  %v2034_v2 = vpop.f32.mrb[37].mxu0  ;;  %v2077_v58 = vpop.f32.mrb[37].mxu1  ;;  %v1969_v19 = vadd.f32 0.5, %v1963_v32  ;;  %v1972_v35 = vadd.f32 0.5, %v1966_v8 }
 0x50e   :  { %v2085_v56 = vadd.f32 %v2034_v2, %v1991_v29  ;;  %v2036_v22 = vpop.f32.mrb[38].mxu0  ;;  %v2079_v6 = vpop.f32.mrb[38].mxu1  ;;  %v2087_v37 = vadd.f32 %v2077_v58, %v1993_v38 }
 0x50f   :  { %v2092_v21 = vmul.f32 0.5, %v2084_v9  ;;  %v2088_v5 = vadd.f32 %v2036_v22, %v1994_v14  ;;  %v2038_v33 = vpop.f32.mrb[39].mxu0  ;;  %v2081_v28 = vpop.f32.mrb[39].mxu1  ;;  %v1996_v14 = vunpack.c.l.bf16 %v3139_v59 }
 0x510   :  { %v2093_v1 = vmul.f32 0.5, %v2085_v56  ;;  %v2089_v51 = vadd.f32 %v2038_v33, %v1995_v42  ;;  %v3713_v27 = vpop.eup %3712  ;;  %v2091_v29 = vadd.f32 %v2081_v28, %v1997_v34  ;;  %v2086_v42 = vadd.f32 %v2075_v57, %v1992_v40  ;;  %v5366_v33 = vld [vmem:[%s5873_s2 + $0x64] ss:$16 sps:$4 sm:$0xff]   ;;  %v5372_v28 = vld [vmem:[%s5873_s2 + $0x6c] ss:$16 sps:$4 sm:$0xff]  }
 0x511   :  { %3716 = vtanh.f32 %v2092_v21  ;;  %v2095_v26 = vmul.f32 0.5, %v2088_v5  ;;  %v1983_v23 = vmul.f32 %v3713_v27, %v1969_v19  ;;  %v2090_v38 = vadd.f32 %v2079_v6, %v1996_v14  ;;  %v5390_v34 = vld [vmem:[%s5873_s2 + $0x84] ss:$16 sps:$4 sm:$0xff]   ;;  %v5396_v27 = vld [vmem:[%s5873_s2 + $0x8c] ss:$16 sps:$4 sm:$0xff]  }
 0x512   :  { %v2096_v25 = vmul.f32 0.5, %v2089_v51  ;;  %v3715_v36 = vpop.eup %3714  ;;  %3718 = vtanh.f32 %v2093_v1  ;;  %v2094_v62 = vmul.f32 0.5, %v2086_v42  ;;  %v5378_v1 = vld [vmem:[%s5873_s2 + $0x60] ss:$16 sps:$4 sm:$0xff]   ;;  %v5384_v51 = vld [vmem:[%s5873_s2 + $0x68] ss:$16 sps:$4 sm:$0xff]  }
 0x513   :  { %3720 = vtanh.f32 %v2095_v26  ;;  %v1984_v9 = vmul.f32 %v3715_v36, %v1972_v35  ;;  %v2097_v58 = vmul.f32 0.5, %v2090_v38  ;;  %v5408_v26 = vld [vmem:[%s5873_s2 + $0x88] ss:$16 sps:$4 sm:$0xff]   ;;  %v5414_v19 = vld [vmem:[%s5873_s2 + $0xa4] ss:$16 sps:$4 sm:$0xff]  }
 0x514   :  { %3722 = vtanh.f32 %v2087_v37  ;;  %v5402_v37 = vld [vmem:[%s5873_s2 + $0x80] ss:$16 sps:$4 sm:$0xff]   ;;  %v5420_v35 = vld [vmem:[%s5873_s2 + $0xac] ss:$16 sps:$4 sm:$0xff]   ;;  %v5462_v42 = vld [vmem:[%s5873_s2 + $0xe4] ss:$16 sps:$4 sm:$0xff]  }
 0x515   :  { %3724 = vtanh.f32 %v2096_v25  ;;  %v2128_v2 = vpack.c.bf16 %v1984_v9, %v1983_v23  ;;  %v5426_v40 = vld [vmem:[%s5873_s2 + $0xa0] ss:$16 sps:$4 sm:$0xff]   ;;  %v5438_v23 = vld [vmem:[%s5873_s2 + $0xc4] ss:$16 sps:$4 sm:$0xff]   ;;  %v5444_v9 = vld [vmem:[%s5873_s2 + $0xcc] ss:$16 sps:$4 sm:$0xff]  }
 0x516   :  { %3726 = vtanh.f32 %v2091_v29  ;;  %v5432_v29 = vld [vmem:[%s5873_s2 + $0xa8] ss:$16 sps:$4 sm:$0xff]   ;;  %v5450_v14 = vld [vmem:[%s5873_s2 + $0xc0] ss:$16 sps:$4 sm:$0xff]   ;;  %v5468_v38 = vld [vmem:[%s5873_s2 + $0xec] ss:$16 sps:$4 sm:$0xff]  }
 0x517   :  { %3431 = vst [vmem:[%s5874_s3 + $0x20] sm:$0xff] %v2128_v2   ;;  %2196 = vmatmul.mubr.bf16.vlgmr.msra.gmra.mrb[40].mxu0 %v2128_v2  ;;  %2239 = vmatmul.mubr.bf16.vlgmr.msra.gmra.mrb[40].mxu1 %v2128_v2  ;;  %3728 = vtanh.f32 %v2094_v62  ;;  %v5456_v2 = vld [vmem:[%s5873_s2 + $0xc8] ss:$16 sps:$4 sm:$0xff]   ;;  %v5486_v62 = vld [vmem:[%s5873_s2 + $0x104] ss:$16 sps:$4 sm:$0xff]  }
 0x518   :  { %2307 = vmatpush1.bf16.msra.mxu0 %v4871_v54  ;;  %2350 = vmatpush1.bf16.msra.mxu1 %v4877_v24  ;;  %3730 = vtanh.f32 %v2097_v58  ;;  %6135 = vst [vmem:[#allocation40_spill] sm:$0xff] %v5486_v62  ;;  %v64_v58 = vld [vmem:[%s5871_s0 + $0x140] sm:$0xff] }
 0x519   :  { %2308 = vmatprep.subr.bf16.mxu0 %v4883_v30  ;;  %2351 = vmatprep.subr.bf16.mxu1 %v4889_v7 }
 0x51a   :  { %2338 = vmatprep.mubr.bf16.mxu0 %v6011_v61  ;;  %2381 = vmatprep.mubr.bf16.mxu1 %v6011_v61 }
 0x51b   :  { %v3717_v36 = vpop.eup %3716 }
 0x51c   :  { %v2104_v25 = vmul.f32 0.5, %v3717_v36  ;;  %v3719_v57 = vpop.eup %3718  ;;  %2309 = vmatpush1.bf16.msra.mxu0 %v4897_v49  ;;  %2352 = vmatpush1.bf16.msra.mxu1 %v4903_v50  ;;  %v5474_v36 = vld [vmem:[%s5873_s2 + $0xe0] ss:$16 sps:$4 sm:$0xff]  }
 0x51d   :  { %v3721_v54 = vpop.eup %3720  ;;  %v2105_v24 = vmul.f32 0.5, %v3719_v57  ;;  %2310 = vmatprep.subr.bf16.mxu0 %v4909_v45  ;;  %2353 = vmatprep.subr.bf16.mxu1 %v4915_v52  ;;  %6133 = vst [vmem:[#allocation36_spill] sm:$0xff] %v5474_v36  ;;  %v5492_v57 = vld [vmem:[%s5873_s2 + $0x10c] ss:$16 sps:$4 sm:$0xff]  }
 0x51e   :  { %v2110_v59 = vadd.f32 0.5, %v2104_v25  ;;  %v3723_v30 = vpop.eup %3722  ;;  %v2107_v7 = vmul.f32 0.5, %v3721_v54  ;;  %v5480_v25 = vld [vmem:[%s5873_s2 + $0xe8] ss:$16 sps:$4 sm:$0xff]   ;;  %6136 = vst [vmem:[#allocation41_spill] sm:$0xff] %v5492_v57  ;;  %v68_v54 = vld [vmem:[%s5871_s0 + $0x160] sm:$0xff] }
 0x51f   :  { %v3725_v32 = vpop.eup %3724  ;;  %v2111_v8 = vadd.f32 0.5, %v2105_v24  ;;  %6134 = vst [vmem:[#allocation39_spill] sm:$0xff] %v5480_v25  ;;  %v66_v24 = vld [vmem:[%s5871_s0 + $0x148] sm:$0xff] }
 0x520   :  { %v2120_v56 = vmul.f32 %v3723_v30, %v2110_v59  ;;  %v2113_v22 = vadd.f32 0.5, %v2107_v7  ;;  %v2108_v6 = vmul.f32 0.5, %v3725_v32  ;;  %2311 = vmatpush1.bf16.msra.mxu0 %v4921_v39  ;;  %2354 = vmatpush1.bf16.msra.mxu1 %v4927_v10  ;;  %v3727_v49 = vpop.eup %3726  ;;  %v2155_v59 = vunpack.c.l.bf16 %v64_v58 }
 0x521   :  { %v2118_v50 = vmul.f32 %v2111_v8, %v5147_v4  ;;  %2312 = vmatprep.subr.bf16.mxu0 %v4934_v0  ;;  %2355 = vmatprep.subr.bf16.mxu1 %v4940_v47  ;;  %v3729_v10 = vpop.eup %3728  ;;  %v5289_v4 = vld [vmem:[%s5873_s2 + $0x4] ss:$16 sps:$4 sm:$0xff]   ;;  %v2156_v30 = vunpack.c.h.bf16 %v64_v58  ;;  %v2159_v7 = vunpack.c.l.bf16 %v68_v54  ;;  %v2157_v58 = vunpack.c.l.bf16 %v66_v24 }
 0x522   :  { %v2114_v45 = vadd.f32 0.5, %v2108_v6  ;;  %v2121_v52 = vmul.f32 %v3727_v49, %v2113_v22  ;;  %v3731_v0 = vpop.eup %3730  ;;  %v2106_v47 = vmul.f32 0.5, %v3729_v10  ;;  %v2158_v49 = vunpack.c.h.bf16 %v66_v24 }
 0x523   :  { %v5261_v21 = vadd.f32 %v2120_v56, %v2118_v50  ;;  %v2160_v56 = vunpack.c.h.bf16 %v68_v54 }
 0x524   :  { %v2119_v5 = vmul.f32 %v2114_v45, %v5155_v3  ;;  %2313 = vmatpush1.bf16.msra.mxu0 %v4949_v15  ;;  %2356 = vmatpush1.bf16.msra.mxu1 %v4955_v46  ;;  %v2109_v15 = vmul.f32 0.5, %v3731_v0  ;;  %v5322_v3 = vld [vmem:[%s5873_s2 + $0x2c] ss:$16 sps:$4 sm:$0xff]  }
 0x525   :  { %2314 = vmatprep.subr.bf16.mxu0 %v4961_v48  ;;  %2357 = vmatprep.subr.bf16.mxu1 %v4967_v44  ;;  %3732 = vtanh.f32 %v5261_v21  ;;  %v2112_v48 = vadd.f32 0.5, %v2106_v47  ;;  %v70_v45 = vld [vmem:[%s5871_s0 + $0x168] sm:$0xff] }
 0x526   :  { %v5269_v39 = vadd.f32 %v2121_v52, %v2119_v5  ;;  %v2115_v44 = vadd.f32 0.5, %v2109_v15 }
 0x528   :  { %3734 = vtanh.f32 %v5269_v39  ;;  %2315 = vmatpush1.bf16.msra.mxu0 %v4977_v41  ;;  %2358 = vmatpush1.bf16.msra.mxu1 %v4983_v13 }
 0x529   :  { %2316 = vmatprep.subr.bf16.mxu0 %v4989_v53  ;;  %2359 = vmatprep.subr.bf16.mxu1 %v4995_v55 }
 0x52c   :  { %2317 = vmatpush1.bf16.msra.mxu0 %v6095_v17  ;;  %2360 = vmatpush1.bf16.msra.mxu1 %v6096_v60  ;;  %v5330_v17 = vld [vmem:[%s5873_s2 + $0x20] ss:$16 sps:$4 sm:$0xff]   ;;  %v5336_v60 = vld [vmem:[%s5873_s2 + $0x28] ss:$16 sps:$4 sm:$0xff]  }
 0x52d   :  { %2318 = vmatprep.subr.bf16.mxu0 %v6097_v11  ;;  %2361 = vmatprep.subr.bf16.mxu1 %v6098_v43  ;;  %v5342_v11 = vld [vmem:[%s5873_s2 + $0x44] ss:$16 sps:$4 sm:$0xff]   ;;  %v5348_v43 = vld [vmem:[%s5873_s2 + $0x4c] ss:$16 sps:$4 sm:$0xff]  }
 0x52f   :  { %v3733_v46 = vpop.eup %3732 }
 0x530   :  { %2319 = vmatpush1.bf16.msra.mxu0 %v6099_v18  ;;  %2362 = vmatpush1.bf16.msra.mxu1 %v5031_v12  ;;  %v2126_v13 = vmul.f32 %v3733_v46, %v2112_v48  ;;  %v5295_v12 = vld [vmem:[%s5873_s2 + $0xc] ss:$16 sps:$4 sm:$0xff]   ;;  %v5354_v18 = vld [vmem:[%s5873_s2 + $0x40] ss:$16 sps:$4 sm:$0xff]  }
 0x531   :  { %2320 = vmatprep.subr.bf16.mxu0 %v6100_v63  ;;  %2363 = vmatprep.subr.bf16.mxu1 %v5043_v20  ;;  %v5304_v20 = vld [vmem:[%s5873_s2] ss:$16 sps:$4 sm:$0xff]   ;;  %v5360_v63 = vld [vmem:[%s5873_s2 + $0x48] ss:$16 sps:$4 sm:$0xff]  }
 0x532   :  { %v3735_v41 = vpop.eup %3734 }
 0x533   :  { %v2127_v53 = vmul.f32 %v3735_v41, %v2115_v44  ;;  %v2162_v41 = vunpack.c.h.bf16 %v70_v45 }
 0x534   :  { %2321 = vmatpush1.bf16.msra.mxu0 %v5049_v31  ;;  %2364 = vmatpush1.bf16.msra.mxu1 %v5055_v16  ;;  %v5310_v31 = vld [vmem:[%s5873_s2 + $0x8] ss:$16 sps:$4 sm:$0xff]   ;;  %v5316_v16 = vld [vmem:[%s5873_s2 + $0x24] ss:$16 sps:$4 sm:$0xff]  }
 0x535   :  { %v2139_v55 = vpack.c.bf16 %v2127_v53, %v2126_v13  ;;  %2471 = vmatprep.subr.bf16.mxu0 %v5289_v4  ;;  %2514 = vmatprep.subr.bf16.mxu1 %v5295_v12 }
 0x537   :  { %3432 = vst [vmem:[%s5875_s4 + $0x18] sm:$0xff] %v2139_v55   ;;  %2339 = vmatmul.mubr.bf16.vlgmr.msra.gmra.mrb[44].mxu0 %v2139_v55  ;;  %2382 = vmatmul.mubr.bf16.vlgmr.msra.gmra.mrb[44].mxu1 %v2139_v55 }
 0x538   :  { %2472 = vmatpush1.bf16.msra.mxu0 %v5304_v20  ;;  %2515 = vmatpush1.bf16.msra.mxu1 %v5310_v31 }
 0x539   :  { %2473 = vmatprep.subr.bf16.mxu0 %v5316_v16  ;;  %2516 = vmatprep.subr.bf16.mxu1 %v5322_v3 }
 0x53a   :  { %2503 = vmatprep.mubr.bf16.mxu0 %v6011_v61  ;;  %2546 = vmatprep.mubr.bf16.mxu1 %v6011_v61 }
 0x53c   :  { %2474 = vmatpush1.bf16.msra.mxu0 %v5330_v17  ;;  %2517 = vmatpush1.bf16.msra.mxu1 %v5336_v60 }
 0x53d   :  { %2475 = vmatprep.subr.bf16.mxu0 %v5342_v11  ;;  %2518 = vmatprep.subr.bf16.mxu1 %v5348_v43 }
 0x540   :  { %2476 = vmatpush1.bf16.msra.mxu0 %v5354_v18  ;;  %2519 = vmatpush1.bf16.msra.mxu1 %v5360_v63 }
 0x541   :  { %2477 = vmatprep.subr.bf16.mxu0 %v5366_v33  ;;  %2520 = vmatprep.subr.bf16.mxu1 %v5372_v28 }
 0x544   :  { %2478 = vmatpush1.bf16.msra.mxu0 %v5378_v1  ;;  %2521 = vmatpush1.bf16.msra.mxu1 %v5384_v51 }
 0x545   :  { %2479 = vmatprep.subr.bf16.mxu0 %v5390_v34  ;;  %2522 = vmatprep.subr.bf16.mxu1 %v5396_v27 }
 0x548   :  { %2480 = vmatpush1.bf16.msra.mxu0 %v5402_v37  ;;  %2523 = vmatpush1.bf16.msra.mxu1 %v5408_v26 }
 0x549   :  { %2481 = vmatprep.subr.bf16.mxu0 %v5414_v19  ;;  %2524 = vmatprep.subr.bf16.mxu1 %v5420_v35 }
 0x54c   :  { %2482 = vmatpush1.bf16.msra.mxu0 %v5426_v40  ;;  %2525 = vmatpush1.bf16.msra.mxu1 %v5432_v29 }
 0x54d   :  { %2483 = vmatprep.subr.bf16.mxu0 %v5438_v23  ;;  %2526 = vmatprep.subr.bf16.mxu1 %v5444_v9 }
 0x550   :  { %2484 = vmatpush1.bf16.msra.mxu0 %v5450_v14  ;;  %2527 = vmatpush1.bf16.msra.mxu1 %v5456_v2 }
 0x551   :  { %2485 = vmatprep.subr.bf16.mxu0 %v5462_v42  ;;  %2528 = vmatprep.subr.bf16.mxu1 %v5468_v38 }
 0x554   :  { %2486 = vmatpush1.bf16.msra.mxu0 %v5474_v36  ;;  %2529 = vmatpush1.bf16.msra.mxu1 %v5480_v25 }
 0x555   :  { %2614 = vmatprep.subr.bf16.mxu0 %v5486_v62  ;;  %2657 = vmatprep.subr.bf16.mxu1 %v5492_v57 }
 0x5ea   :  { %v2197_v32 = vpop.f32.mrb[40].mxu0  ;;  %v2240_v8 = vpop.f32.mrb[40].mxu1 }
 0x5eb   :  { %v2249_v22 = vadd.f32 %v2197_v32, %v2155_v59  ;;  %v2199_v6 = vpop.f32.mrb[41].mxu0  ;;  %v2242_v50 = vpop.f32.mrb[41].mxu1  ;;  %v2161_v59 = vunpack.c.l.bf16 %v70_v45 }
 0x5ec   :  { %v2250_v52 = vadd.f32 %v2199_v6, %v2156_v30  ;;  %v2201_v5 = vpop.f32.mrb[42].mxu0  ;;  %v2244_v10 = vpop.f32.mrb[42].mxu1  ;;  %v2252_v13 = vadd.f32 %v2242_v50, %v2158_v49  ;;  %v2251_v30 = vadd.f32 %v2240_v8, %v2157_v58 }
 0x5ed   :  { %v2257_v0 = vmul.f32 0.5, %v2249_v22  ;;  %v2253_v47 = vadd.f32 %v2201_v5, %v2159_v7  ;;  %v2203_v15 = vpop.f32.mrb[43].mxu0  ;;  %v2246_v46 = vpop.f32.mrb[43].mxu1  ;;  %v2255_v32 = vadd.f32 %v2244_v10, %v2161_v59 }
 0x5ee   :  { %v2258_v48 = vmul.f32 0.5, %v2250_v52  ;;  %v2254_v44 = vadd.f32 %v2203_v15, %v2160_v56  ;;  %v2256_v54 = vadd.f32 %v2246_v46, %v2162_v41  ;;  %v2259_v6 = vmul.f32 0.5, %v2251_v30  ;;  %v3134_v30 = vld [vmem:[%s5872_s1 + $0xb0] sm:$0xff] }
 0x5ef   :  { %3736 = vtanh.f32 %v2257_v0  ;;  %v2260_v53 = vmul.f32 0.5, %v2253_v47  ;;  %v2262_v56 = vmul.f32 0.5, %v2255_v32 }
 0x5f0   :  { %v2261_v55 = vmul.f32 0.5, %v2254_v44  ;;  %3738 = vtanh.f32 %v2258_v48  ;;  %v6137_v44 = vld [vmem:[#allocation38_spill] sm:$0xff] }
 0x5f1   :  { %3740 = vtanh.f32 %v2260_v53 }
 0x5f2   :  { %3742 = vtanh.f32 %v2252_v13 }
 0x5f3   :  { %3744 = vtanh.f32 %v2261_v55  ;;  %v6139_v55 = vld [vmem:[#allocation35_spill] sm:$0xff] }
 0x5f4   :  { %3746 = vtanh.f32 %v2256_v54  ;;  %v3132_v54 = vld [vmem:[%s5872_s1 + $0x90] sm:$0xff] }
 0x5f5   :  { %3748 = vtanh.f32 %v2259_v6  ;;  %v2298_v32 = vunpack.c.l.bf16 %v3132_v54  ;;  %v2299_v6 = vunpack.c.h.bf16 %v3132_v54 }
 0x5f6   :  { %3750 = vtanh.f32 %v2262_v56  ;;  %v2302_v56 = vunpack.c.l.bf16 %v3134_v30 }
 0x5f9   :  { %v3737_v7 = vpop.eup %3736 }
 0x5fa   :  { %v2269_v22 = vmul.f32 0.5, %v3737_v7  ;;  %v3739_v52 = vpop.eup %3738 }
 0x5fb   :  { %v3741_v5 = vpop.eup %3740  ;;  %v2270_v49 = vmul.f32 0.5, %v3739_v52 }
 0x5fc   :  { %v2275_v0 = vadd.f32 0.5, %v2269_v22  ;;  %v3743_v50 = vpop.eup %3742  ;;  %v2272_v47 = vmul.f32 0.5, %v3741_v5  ;;  %v3133_v22 = vld [vmem:[%s5872_s1 + $0x98] sm:$0xff] }
 0x5fd   :  { %v3745_v15 = vpop.eup %3744  ;;  %v2276_v24 = vadd.f32 0.5, %v2270_v49  ;;  %v2303_v49 = vunpack.c.h.bf16 %v3134_v30 }
 0x5fe   :  { %v2285_v46 = vmul.f32 %v3743_v50, %v2275_v0  ;;  %v2278_v48 = vadd.f32 0.5, %v2272_v47  ;;  %v2273_v45 = vmul.f32 0.5, %v3745_v15  ;;  %v3747_v8 = vpop.eup %3746  ;;  %v2301_v15 = vunpack.c.h.bf16 %v3133_v22 }
 0x5ff   :  { %v2283_v10 = vmul.f32 %v2276_v24, %v6137_v44  ;;  %v3749_v7 = vpop.eup %3748 }
 0x600   :  { %v2279_v41 = vadd.f32 0.5, %v2273_v45  ;;  %v2286_v13 = vmul.f32 %v3747_v8, %v2278_v48  ;;  %v3751_v52 = vpop.eup %3750  ;;  %v2271_v48 = vmul.f32 0.5, %v3749_v7  ;;  %v2300_v7 = vunpack.c.l.bf16 %v3133_v22 }
 0x601   :  { %v5508_v53 = vadd.f32 %v2285_v46, %v2283_v10  ;;  %v3135_v46 = vld [vmem:[%s5872_s1 + $0xb8] sm:$0xff]  ;;  %v2274_v45 = vmul.f32 0.5, %v3751_v52 }
 0x602   :  { %v2284_v58 = vmul.f32 %v2279_v41, %v6139_v55  ;;  %v2305_v30 = vunpack.c.h.bf16 %v3135_v46  ;;  %v2277_v57 = vadd.f32 0.5, %v2271_v48  ;;  %v5565_v48 = vld [vmem:[%s5873_s2 + $0x128] ss:$16 sps:$4 sm:$0xff]  }
 0x603   :  { %6138 = vst [vmem:[#allocation7_spill] sm:$0xff] %v5508_v53  ;;  %3752 = vtanh.f32 %v5508_v53  ;;  %v2280_v62 = vadd.f32 0.5, %v2274_v45 }
 0x604   :  { %v5515_v59 = vadd.f32 %v2286_v13, %v2284_v58 }
 0x606   :  { %6140 = vst [vmem:[#allocation6_spill] sm:$0xff] %v5515_v59  ;;  %3754 = vtanh.f32 %v5515_v59 }
 0x60a   :  { %v2340_v5 = vpop.f32.mrb[44].mxu0  ;;  %v2383_v0 = vpop.f32.mrb[44].mxu1 }
 0x60b   :  { %v2392_v50 = vadd.f32 %v2340_v5, %v2298_v32  ;;  %v2342_v47 = vpop.f32.mrb[45].mxu0  ;;  %v2385_v24 = vpop.f32.mrb[45].mxu1 }
 0x60c   :  { %v2393_v8 = vadd.f32 %v2342_v47, %v2299_v6  ;;  %v2344_v44 = vpop.f32.mrb[46].mxu0  ;;  %v2387_v10 = vpop.f32.mrb[46].mxu1  ;;  %v2395_v5 = vadd.f32 %v2385_v24, %v2301_v15 }
 0x60d   :  { %v2400_v41 = vmul.f32 0.5, %v2392_v50  ;;  %v2396_v13 = vadd.f32 %v2344_v44, %v2302_v56  ;;  %v2346_v55 = vpop.f32.mrb[47].mxu0  ;;  %v2389_v58 = vpop.f32.mrb[47].mxu1  ;;  %v2304_v56 = vunpack.c.l.bf16 %v3135_v46  ;;  %v5559_v46 = vld [vmem:[%s5873_s2 + $0x120] ss:$16 sps:$4 sm:$0xff]  }
 0x60e   :  { %v2401_v54 = vmul.f32 0.5, %v2393_v8  ;;  %v2397_v59 = vadd.f32 %v2346_v55, %v2303_v49  ;;  %v3753_v32 = vpop.eup %3752  ;;  %v2399_v6 = vadd.f32 %v2389_v58, %v2305_v30  ;;  %v2394_v49 = vadd.f32 %v2383_v0, %v2300_v7  ;;  %v5583_v7 = vld [vmem:[%s5873_s2 + $0x140] ss:$16 sps:$4 sm:$0xff]  }
 0x60f   :  { %3756 = vtanh.f32 %v2400_v41  ;;  %v2403_v53 = vmul.f32 0.5, %v2396_v13  ;;  %v2291_v52 = vmul.f32 %v3753_v32, %v2277_v57  ;;  %v5577_v41 = vld [vmem:[%s5873_s2 + $0x14c] ss:$16 sps:$4 sm:$0xff]  }
 0x610   :  { %v2404_v25 = vmul.f32 0.5, %v2397_v59  ;;  %v3755_v36 = vpop.eup %3754  ;;  %3758 = vtanh.f32 %v2401_v54  ;;  %v2398_v59 = vadd.f32 %v2387_v10, %v2304_v56  ;;  %v2402_v0 = vmul.f32 0.5, %v2394_v49  ;;  %v5571_v10 = vld [vmem:[%s5873_s2 + $0x144] ss:$16 sps:$4 sm:$0xff]  }
 0x611   :  { %3760 = vtanh.f32 %v2403_v53  ;;  %v2292_v50 = vmul.f32 %v3755_v36, %v2280_v62  ;;  %v5533_v53 = vld [vmem:[%s5873_s2 + $0x100] ss:$16 sps:$4 sm:$0xff]   ;;  %v5539_v36 = vld [vmem:[%s5873_s2 + $0x108] ss:$16 sps:$4 sm:$0xff]   ;;  %v5551_v62 = vld [vmem:[%s5873_s2 + $0x12c] ss:$16 sps:$4 sm:$0xff]  }
 0x612   :  { %3762 = vtanh.f32 %v2395_v5  ;;  %v2405_v24 = vmul.f32 0.5, %v2398_v59  ;;  %v5596_v56 = vld [vmem:[%s5873_s2 + $0x164] ss:$16 sps:$4 sm:$0xff]  }
 0x613   :  { %3764 = vtanh.f32 %v2404_v25  ;;  %v2436_v47 = vpack.c.bf16 %v2292_v50, %v2291_v52  ;;  %v5545_v25 = vld [vmem:[%s5873_s2 + $0x124] ss:$16 sps:$4 sm:$0xff]  }
 0x614   :  { %3766 = vtanh.f32 %v2399_v6  ;;  %v5589_v6 = vld [vmem:[%s5873_s2 + $0x148] ss:$16 sps:$4 sm:$0xff]  }
 0x615   :  { %3433 = vst [vmem:[%s5874_s3 + $0x28] sm:$0xff] %v2436_v47   ;;  %2504 = vmatmul.mubr.bf16.vlgmr.msra.gmra.mrb[48].mxu0 %v2436_v47  ;;  %2547 = vmatmul.mubr.bf16.vlgmr.msra.gmra.mrb[48].mxu1 %v2436_v47  ;;  %3768 = vtanh.f32 %v2402_v0  ;;  %v5602_v47 = vld [vmem:[%s5873_s2 + $0x16c] ss:$16 sps:$4 sm:$0xff]   ;;  %v5617_v0 = vld [vmem:[%s5873_s2 + $0x168] ss:$16 sps:$4 sm:$0xff]  }
 0x616   :  { %2615 = vmatpush1.bf16.msra.mxu0 %v5533_v53  ;;  %2658 = vmatpush1.bf16.msra.mxu1 %v5539_v36  ;;  %3770 = vtanh.f32 %v2405_v24 }
 0x617   :  { %2616 = vmatprep.subr.bf16.mxu0 %v5545_v25  ;;  %2659 = vmatprep.subr.bf16.mxu1 %v5551_v62 }
 0x618   :  { %2646 = vmatprep.mubr.bf16.mxu0 %v6011_v61  ;;  %2689 = vmatprep.mubr.bf16.mxu1 %v6011_v61 }
 0x619   :  { %v3757_v57 = vpop.eup %3756 }
 0x61a   :  { %v2412_v22 = vmul.f32 0.5, %v3757_v57  ;;  %v3759_v15 = vpop.eup %3758  ;;  %2617 = vmatpush1.bf16.msra.mxu0 %v5559_v46  ;;  %2660 = vmatpush1.bf16.msra.mxu1 %v5565_v48 }
 0x61b   :  { %v3761_v45 = vpop.eup %3760  ;;  %v2413_v44 = vmul.f32 0.5, %v3759_v15  ;;  %2618 = vmatprep.subr.bf16.mxu0 %v5571_v10  ;;  %2661 = vmatprep.subr.bf16.mxu1 %v5577_v41  ;;  %v5623_v15 = vld [vmem:[%s5873_s2 + $0x184] ss:$16 sps:$4 sm:$0xff]  }
 0x61c   :  { %v2418_v8 = vadd.f32 0.5, %v2412_v22  ;;  %v3763_v13 = vpop.eup %3762  ;;  %v2415_v55 = vmul.f32 0.5, %v3761_v45  ;;  %v5611_v22 = vld [vmem:[%s5873_s2 + $0x160] ss:$16 sps:$4 sm:$0xff]  }
 0x61d   :  { %v3765_v58 = vpop.eup %3764  ;;  %v2419_v54 = vadd.f32 0.5, %v2413_v44  ;;  %v5639_v45 = vld [vmem:[%s5873_s2 + $0x180] ss:$16 sps:$4 sm:$0xff]  }
 0x61e   :  { %v2428_v30 = vmul.f32 %v3763_v13, %v2418_v8  ;;  %v2421_v32 = vadd.f32 0.5, %v2415_v55  ;;  %v2416_v5 = vmul.f32 0.5, %v3765_v58  ;;  %2619 = vmatpush1.bf16.msra.mxu0 %v5583_v7  ;;  %2662 = vmatpush1.bf16.msra.mxu1 %v5589_v6  ;;  %v3767_v52 = vpop.eup %3766  ;;  %v5645_v8 = vld [vmem:[%s5873_s2 + $0x188] ss:$16 sps:$4 sm:$0xff]   ;;  %v5651_v13 = vld [vmem:[%s5873_s2 + $0x1a4] ss:$16 sps:$4 sm:$0xff]  }
 0x61f   :  { %v2426_v50 = vmul.f32 %v2419_v54, %v5261_v21  ;;  %2620 = vmatprep.subr.bf16.mxu0 %v5596_v56  ;;  %2663 = vmatprep.subr.bf16.mxu1 %v5602_v47  ;;  %v3769_v44 = vpop.eup %3768  ;;  %v5657_v55 = vld [vmem:[%s5873_s2 + $0x1ac] ss:$16 sps:$4 sm:$0xff]   ;;  %v5663_v54 = vld [vmem:[%s5873_s2 + $0x1a0] ss:$16 sps:$4 sm:$0xff]  }
 0x620   :  { %v2422_v49 = vadd.f32 0.5, %v2416_v5  ;;  %v2429_v59 = vmul.f32 %v3767_v52, %v2421_v32  ;;  %v3771_v58 = vpop.eup %3770  ;;  %6141 = vst [vmem:[#allocation9_spill] sm:$0xff] %v5663_v54  ;;  %v2414_v32 = vmul.f32 0.5, %v3769_v44  ;;  %v5675_v52 = vld [vmem:[%s5873_s2 + $0x1c4] ss:$16 sps:$4 sm:$0xff]  }
 0x621   :  { %v5605_v57 = vadd.f32 %v2428_v30, %v2426_v50  ;;  %v5669_v30 = vld [vmem:[%s5873_s2 + $0x1a8] ss:$16 sps:$4 sm:$0xff]   ;;  %v2417_v5 = vmul.f32 0.5, %v3771_v58  ;;  %6143 = vst [vmem:[#allocation11_spill] sm:$0xff] %v5675_v52  ;;  %v5681_v50 = vld [vmem:[%s5873_s2 + $0x1cc] ss:$16 sps:$4 sm:$0xff]  }
 0x622   :  { %v2427_v21 = vmul.f32 %v2422_v49, %v5269_v39  ;;  %2621 = vmatpush1.bf16.msra.mxu0 %v5611_v22  ;;  %2664 = vmatpush1.bf16.msra.mxu1 %v5617_v0  ;;  %v5629_v39 = vld [vmem:[%s5873_s2 + $0x18c] ss:$16 sps:$4 sm:$0xff]   ;;  %6142 = vst [vmem:[#allocation8_spill] sm:$0xff] %v5669_v30  ;;  %6144 = vst [vmem:[#allocation10_spill] sm:$0xff] %v5681_v50  ;;  %v2420_v44 = vadd.f32 0.5, %v2414_v32 }
 0x623   :  { %2622 = vmatprep.subr.bf16.mxu0 %v5623_v15  ;;  %2665 = vmatprep.subr.bf16.mxu1 %v5629_v39  ;;  %3772 = vtanh.f32 %v5605_v57  ;;  %v2423_v58 = vadd.f32 0.5, %v2417_v5  ;;  %v5711_v32 = vld [vmem:[%s5873_s2 + $0x1e0] ss:$16 sps:$4 sm:$0xff]   ;;  %v5717_v5 = vld [vmem:[%s5873_s2 + $0x1e8] ss:$16 sps:$4 sm:$0xff]  }
 0x624   :  { %v5633_v24 = vadd.f32 %v2429_v59, %v2427_v21  ;;  %v5687_v59 = vld [vmem:[%s5873_s2 + $0x1c0] ss:$16 sps:$4 sm:$0xff]   ;;  %v5693_v21 = vld [vmem:[%s5873_s2 + $0x1c8] ss:$16 sps:$4 sm:$0xff]  }
 0x625   :  { %6145 = vst [vmem:[#allocation13_spill] sm:$0xff] %v5687_v59 }
 0x626   :  { %3774 = vtanh.f32 %v5633_v24  ;;  %2623 = vmatpush1.bf16.msra.mxu0 %v5639_v45  ;;  %2666 = vmatpush1.bf16.msra.mxu1 %v5645_v8 }
 0x627   :  { %2624 = vmatprep.subr.bf16.mxu0 %v5651_v13  ;;  %2667 = vmatprep.subr.bf16.mxu1 %v5657_v55 }
 0x62a   :  { %2625 = vmatpush1.bf16.msra.mxu0 %v5663_v54  ;;  %2668 = vmatpush1.bf16.msra.mxu1 %v5669_v30 }
 0x62b   :  { %2626 = vmatprep.subr.bf16.mxu0 %v5675_v52  ;;  %2669 = vmatprep.subr.bf16.mxu1 %v5681_v50  ;;  %v5699_v50 = vld [vmem:[%s5873_s2 + $0x1e4] ss:$16 sps:$4 sm:$0xff]  }
 0x62c   :  { %6146 = vst [vmem:[#allocation12_spill] sm:$0xff] %v5699_v50 }
 0x62d   :  { %v3773_v49 = vpop.eup %3772 }
 0x62e   :  { %2627 = vmatpush1.bf16.msra.mxu0 %v5687_v59  ;;  %2670 = vmatpush1.bf16.msra.mxu1 %v5693_v21  ;;  %v5705_v59 = vld [vmem:[%s5873_s2 + $0x1ec] ss:$16 sps:$4 sm:$0xff]   ;;  %v2434_v30 = vmul.f32 %v3773_v49, %v2420_v44 }
 0x62f   :  { %2628 = vmatprep.subr.bf16.mxu0 %v5699_v50  ;;  %2671 = vmatprep.subr.bf16.mxu1 %v5705_v59 }
 0x630   :  { %v3775_v52 = vpop.eup %3774 }
 0x631   :  { %v2435_v54 = vmul.f32 %v3775_v52, %v2423_v58 }
 0x632   :  { %2629 = vmatpush1.bf16.msra.mxu0 %v5711_v32  ;;  %2672 = vmatpush1.bf16.msra.mxu1 %v5717_v5 }
 0x633   :  { %v2447_v50 = vpack.c.bf16 %v2435_v54, %v2434_v30  ;;  %2779 = vmatprep.subr.bf16.mxu0 %v5289_v4  ;;  %2822 = vmatprep.subr.bf16.mxu1 %v5295_v12  ;;  %v6147_v4 = vld [vmem:[#allocation36_spill] sm:$0xff]  ;;  %v6148_v12 = vld [vmem:[#allocation39_spill] sm:$0xff] }
 0x635   :  { %3434 = vst [vmem:[%s5875_s4 + $0x10] sm:$0xff] %v2447_v50   ;;  %2647 = vmatmul.mubr.bf16.vlgmr.msra.gmra.mrb[52].mxu0 %v2447_v50  ;;  %2690 = vmatmul.mubr.bf16.vlgmr.msra.gmra.mrb[52].mxu1 %v2447_v50 }
 0x636   :  { %2780 = vmatpush1.bf16.msra.mxu0 %v5304_v20  ;;  %2823 = vmatpush1.bf16.msra.mxu1 %v5310_v31  ;;  %v6149_v20 = vld [vmem:[#allocation40_spill] sm:$0xff]  ;;  %v6150_v31 = vld [vmem:[#allocation41_spill] sm:$0xff] }
 0x637   :  { %2781 = vmatprep.subr.bf16.mxu0 %v5316_v16  ;;  %2824 = vmatprep.subr.bf16.mxu1 %v5322_v3  ;;  %v72_v16 = vld [vmem:[%s5871_s0 + $0x180] sm:$0xff] }
 0x638   :  { %2811 = vmatprep.mubr.bf16.mxu0 %v6011_v61  ;;  %2854 = vmatprep.mubr.bf16.mxu1 %v6011_v61  ;;  %v76_v3 = vld [vmem:[%s5871_s0 + $0x1a0] sm:$0xff] }
 0x63a   :  { %2782 = vmatpush1.bf16.msra.mxu0 %v5330_v17  ;;  %2825 = vmatpush1.bf16.msra.mxu1 %v5336_v60  ;;  %v2463_v17 = vunpack.c.l.bf16 %v72_v16  ;;  %v74_v60 = vld [vmem:[%s5871_s0 + $0x188] sm:$0xff] }
 0x63b   :  { %2783 = vmatprep.subr.bf16.mxu0 %v5342_v11  ;;  %2826 = vmatprep.subr.bf16.mxu1 %v5348_v43  ;;  %v2464_v11 = vunpack.c.h.bf16 %v72_v16  ;;  %v2467_v43 = vunpack.c.l.bf16 %v76_v3  ;;  %v2465_v30 = vunpack.c.l.bf16 %v74_v60 }
 0x63e   :  { %2784 = vmatpush1.bf16.msra.mxu0 %v5354_v18  ;;  %2827 = vmatpush1.bf16.msra.mxu1 %v5360_v63 }
 0x63f   :  { %2785 = vmatprep.subr.bf16.mxu0 %v5366_v33  ;;  %2828 = vmatprep.subr.bf16.mxu1 %v5372_v28  ;;  %v2468_v33 = vunpack.c.h.bf16 %v76_v3 }
 0x642   :  { %2786 = vmatpush1.bf16.msra.mxu0 %v5378_v1  ;;  %2829 = vmatpush1.bf16.msra.mxu1 %v5384_v51  ;;  %v2466_v51 = vunpack.c.h.bf16 %v74_v60 }
 0x643   :  { %2787 = vmatprep.subr.bf16.mxu0 %v5390_v34  ;;  %2830 = vmatprep.subr.bf16.mxu1 %v5396_v27  ;;  %v78_v27 = vld [vmem:[%s5871_s0 + $0x1a8] sm:$0xff] }
 0x644   :  { %v2469_v50 = vunpack.c.l.bf16 %v78_v27 }
 0x646   :  { %2788 = vmatpush1.bf16.msra.mxu0 %v5402_v37  ;;  %2831 = vmatpush1.bf16.msra.mxu1 %v5408_v26 }
 0x647   :  { %2789 = vmatprep.subr.bf16.mxu0 %v5414_v19  ;;  %2832 = vmatprep.subr.bf16.mxu1 %v5420_v35 }
 0x64a   :  { %2790 = vmatpush1.bf16.msra.mxu0 %v5426_v40  ;;  %2833 = vmatpush1.bf16.msra.mxu1 %v5432_v29 }
 0x64b   :  { %2791 = vmatprep.subr.bf16.mxu0 %v5438_v23  ;;  %2834 = vmatprep.subr.bf16.mxu1 %v5444_v9 }
 0x64e   :  { %2792 = vmatpush1.bf16.msra.mxu0 %v5450_v14  ;;  %2835 = vmatpush1.bf16.msra.mxu1 %v5456_v2  ;;  %v2470_v2 = vunpack.c.h.bf16 %v78_v27 }
 0x64f   :  { %2793 = vmatprep.subr.bf16.mxu0 %v5462_v42  ;;  %2836 = vmatprep.subr.bf16.mxu1 %v5468_v38 }
 0x652   :  { %2794 = vmatpush1.bf16.msra.mxu0 %v6147_v4  ;;  %2837 = vmatpush1.bf16.msra.mxu1 %v6148_v12 }
 0x653   :  { %2921 = vmatprep.subr.bf16.mxu0 %v6149_v20  ;;  %2964 = vmatprep.subr.bf16.mxu1 %v6150_v31 }
 0x6e8   :  { %v2505_v18 = vpop.f32.mrb[48].mxu0  ;;  %v2548_v63 = vpop.f32.mrb[48].mxu1 }
 0x6e9   :  { %v2557_v28 = vadd.f32 %v2505_v18, %v2463_v17  ;;  %v2507_v1 = vpop.f32.mrb[49].mxu0  ;;  %v2550_v34 = vpop.f32.mrb[49].mxu1  ;;  %v2559_v49 = vadd.f32 %v2548_v63, %v2465_v30 }
 0x6ea   :  { %v2558_v37 = vadd.f32 %v2507_v1, %v2464_v11  ;;  %v2509_v26 = vpop.f32.mrb[50].mxu0  ;;  %v2552_v19 = vpop.f32.mrb[50].mxu1  ;;  %v2560_v42 = vadd.f32 %v2550_v34, %v2466_v51  ;;  %v6151_v51 = vld [vmem:[#allocation7_spill] sm:$0xff] }
 0x6eb   :  { %v2565_v35 = vmul.f32 0.5, %v2557_v28  ;;  %v2561_v40 = vadd.f32 %v2509_v26, %v2467_v43  ;;  %v2511_v29 = vpop.f32.mrb[51].mxu0  ;;  %v2554_v23 = vpop.f32.mrb[51].mxu1  ;;  %v2563_v44 = vadd.f32 %v2552_v19, %v2469_v50  ;;  %v2567_v12 = vmul.f32 0.5, %v2559_v49  ;;  %v6152_v19 = vld [vmem:[#allocation6_spill] sm:$0xff] }
 0x6ec   :  { %v2566_v9 = vmul.f32 0.5, %v2558_v37  ;;  %v2562_v14 = vadd.f32 %v2511_v29, %v2468_v33  ;;  %v2564_v52 = vadd.f32 %v2554_v23, %v2470_v2  ;;  %v3130_v23 = vld [vmem:[%s5872_s1 + $0x70] sm:$0xff]  ;;  %v3129_v2 = vld [vmem:[%s5872_s1 + $0x58] sm:$0xff] }
 0x6ed   :  { %3776 = vtanh.f32 %v2565_v35  ;;  %v2568_v38 = vmul.f32 0.5, %v2561_v40  ;;  %v2570_v31 = vmul.f32 0.5, %v2563_v44  ;;  %v3128_v40 = vld [vmem:[%s5872_s1 + $0x50] sm:$0xff]  ;;  %v2611_v50 = vunpack.c.h.bf16 %v3130_v23 }
 0x6ee   :  { %v2569_v54 = vmul.f32 0.5, %v2562_v14  ;;  %3778 = vtanh.f32 %v2566_v9  ;;  %v2606_v9 = vunpack.c.l.bf16 %v3128_v40 }
 0x6ef   :  { %3780 = vtanh.f32 %v2568_v38 }
 0x6f0   :  { %3782 = vtanh.f32 %v2560_v42  ;;  %v2607_v42 = vunpack.c.h.bf16 %v3128_v40  ;;  %v2608_v40 = vunpack.c.l.bf16 %v3129_v2 }
 0x6f1   :  { %3784 = vtanh.f32 %v2569_v54  ;;  %v2610_v54 = vunpack.c.l.bf16 %v3130_v23 }
 0x6f2   :  { %3786 = vtanh.f32 %v2564_v52 }
 0x6f3   :  { %3788 = vtanh.f32 %v2567_v12  ;;  %v3131_v12 = vld [vmem:[%s5872_s1 + $0x78] sm:$0xff] }
 0x6f4   :  { %3790 = vtanh.f32 %v2570_v31 }
 0x6f7   :  { %v3777_v58 = vpop.eup %3776 }
 0x6f8   :  { %v2577_v4 = vmul.f32 0.5, %v3777_v58  ;;  %v3779_v20 = vpop.eup %3778  ;;  %v2609_v58 = vunpack.c.h.bf16 %v3129_v2 }
 0x6f9   :  { %v3781_v16 = vpop.eup %3780  ;;  %v2578_v17 = vmul.f32 0.5, %v3779_v20 }
 0x6fa   :  { %v2583_v3 = vadd.f32 0.5, %v2577_v4  ;;  %v3783_v11 = vpop.eup %3782  ;;  %v2580_v43 = vmul.f32 0.5, %v3781_v16 }
 0x6fb   :  { %v3785_v18 = vpop.eup %3784  ;;  %v2584_v60 = vadd.f32 0.5, %v2578_v17 }
 0x6fc   :  { %v2593_v33 = vmul.f32 %v3783_v11, %v2583_v3  ;;  %v2586_v28 = vadd.f32 0.5, %v2580_v43  ;;  %v2581_v1 = vmul.f32 0.5, %v3785_v18  ;;  %v3787_v63 = vpop.eup %3786 }
 0x6fd   :  { %v2591_v34 = vmul.f32 %v2584_v60, %v6151_v51  ;;  %v3789_v14 = vpop.eup %3788 }
 0x6fe   :  { %v2587_v27 = vadd.f32 0.5, %v2581_v1  ;;  %v2594_v37 = vmul.f32 %v3787_v63, %v2586_v28  ;;  %v3791_v38 = vpop.eup %3790  ;;  %v2579_v20 = vmul.f32 0.5, %v3789_v14  ;;  %v2613_v1 = vunpack.c.h.bf16 %v3131_v12 }
 0x6ff   :  { %v5772_v26 = vadd.f32 %v2593_v33, %v2591_v34  ;;  %v2582_v31 = vmul.f32 0.5, %v3791_v38 }
 0x700   :  { %v2592_v35 = vmul.f32 %v2587_v27, %v6152_v19  ;;  %v2585_v27 = vadd.f32 0.5, %v2579_v20 }
 0x701   :  { %3792 = vtanh.f32 %v5772_v26 }
 0x702   :  { %v5779_v29 = vadd.f32 %v2594_v37, %v2592_v35  ;;  %v2588_v37 = vadd.f32 0.5, %v2582_v31 }
 0x704   :  { %3794 = vtanh.f32 %v5779_v29 }
 0x708   :  { %v2648_v30 = vpop.f32.mrb[52].mxu0  ;;  %v2691_v52 = vpop.f32.mrb[52].mxu1 }
 0x709   :  { %v2700_v49 = vadd.f32 %v2648_v30, %v2606_v9  ;;  %v2650_v44 = vpop.f32.mrb[53].mxu0  ;;  %v2693_v4 = vpop.f32.mrb[53].mxu1 }
 0x70a   :  { %v2701_v16 = vadd.f32 %v2650_v44, %v2607_v42  ;;  %v2652_v3 = vpop.f32.mrb[54].mxu0  ;;  %v2695_v17 = vpop.f32.mrb[54].mxu1  ;;  %v2703_v51 = vadd.f32 %v2693_v4, %v2609_v58  ;;  %v2612_v42 = vunpack.c.l.bf16 %v3131_v12 }
 0x70b   :  { %v2708_v11 = vmul.f32 0.5, %v2700_v49  ;;  %v2704_v43 = vadd.f32 %v2652_v3, %v2610_v54  ;;  %v2654_v18 = vpop.f32.mrb[55].mxu0  ;;  %v2697_v60 = vpop.f32.mrb[55].mxu1  ;;  %v2702_v54 = vadd.f32 %v2691_v52, %v2608_v40 }
 0x70c   :  { %v2709_v33 = vmul.f32 0.5, %v2701_v16  ;;  %v2705_v28 = vadd.f32 %v2654_v18, %v2611_v50  ;;  %v3793_v63 = vpop.eup %3792  ;;  %v2707_v23 = vadd.f32 %v2697_v60, %v2613_v1  ;;  %v2706_v30 = vadd.f32 %v2695_v17, %v2612_v42  ;;  %v6158_v17 = vld [vmem:[#allocation12_spill] sm:$0xff] }
 0x70d   :  { %3796 = vtanh.f32 %v2708_v11  ;;  %v2711_v34 = vmul.f32 0.5, %v2704_v43  ;;  %v2599_v9 = vmul.f32 %v3793_v63, %v2585_v27  ;;  %v2710_v50 = vmul.f32 0.5, %v2702_v54 }
 0x70e   :  { %v2712_v19 = vmul.f32 0.5, %v2705_v28  ;;  %v3795_v35 = vpop.eup %3794  ;;  %3798 = vtanh.f32 %v2709_v33  ;;  %v2713_v44 = vmul.f32 0.5, %v2706_v30 }
 0x70f   :  { %3800 = vtanh.f32 %v2711_v34  ;;  %v2600_v14 = vmul.f32 %v3795_v35, %v2588_v37 }
 0x710   :  { %3802 = vtanh.f32 %v2703_v51 }
 0x711   :  { %3804 = vtanh.f32 %v2712_v19  ;;  %v2744_v38 = vpack.c.bf16 %v2600_v14, %v2599_v9  ;;  %v86_v19 = vld [vmem:[%s5871_s0 + $0x1e8] sm:$0xff] }
 0x712   :  { %3806 = vtanh.f32 %v2707_v23 }
 0x713   :  { %3435 = vst [vmem:[%s5874_s3 + $0x30] sm:$0xff] %v2744_v38   ;;  %2812 = vmatmul.mubr.bf16.vlgmr.msra.gmra.mrb[56].mxu0 %v2744_v38  ;;  %2855 = vmatmul.mubr.bf16.vlgmr.msra.gmra.mrb[56].mxu1 %v2744_v38  ;;  %3808 = vtanh.f32 %v2710_v50 }
 0x714   :  { %2922 = vmatpush1.bf16.msra.mxu0 %v5533_v53  ;;  %2965 = vmatpush1.bf16.msra.mxu1 %v5539_v36  ;;  %3810 = vtanh.f32 %v2713_v44 }
 0x715   :  { %2923 = vmatprep.subr.bf16.mxu0 %v5545_v25  ;;  %2966 = vmatprep.subr.bf16.mxu1 %v5551_v62 }
 0x716   :  { %2953 = vmatprep.mubr.bf16.mxu0 %v6011_v61  ;;  %2996 = vmatprep.mubr.bf16.mxu1 %v6011_v61 }
 0x717   :  { %v3797_v2 = vpop.eup %3796 }
 0x718   :  { %v2720_v52 = vmul.f32 0.5, %v3797_v2  ;;  %v3799_v49 = vpop.eup %3798  ;;  %2924 = vmatpush1.bf16.msra.mxu0 %v5559_v46  ;;  %2967 = vmatpush1.bf16.msra.mxu1 %v5565_v48  ;;  %v2778_v2 = vunpack.c.h.bf16 %v86_v19 }
 0x719   :  { %v3801_v53 = vpop.eup %3800  ;;  %v2721_v36 = vmul.f32 0.5, %v3799_v49  ;;  %2925 = vmatprep.subr.bf16.mxu0 %v5571_v10  ;;  %2968 = vmatprep.subr.bf16.mxu1 %v5577_v41 }
 0x71a   :  { %v2726_v58 = vadd.f32 0.5, %v2720_v52  ;;  %v3803_v25 = vpop.eup %3802  ;;  %v2723_v62 = vmul.f32 0.5, %v3801_v53 }
 0x71b   :  { %v3805_v4 = vpop.eup %3804  ;;  %v2727_v61 = vadd.f32 0.5, %v2721_v36 }
 0x71c   :  { %v2736_v12 = vmul.f32 %v3803_v25, %v2726_v58  ;;  %v2729_v20 = vadd.f32 0.5, %v2723_v62  ;;  %v2724_v31 = vmul.f32 0.5, %v3805_v4  ;;  %2926 = vmatpush1.bf16.msra.mxu0 %v5583_v7  ;;  %2969 = vmatpush1.bf16.msra.mxu1 %v5589_v6  ;;  %v3807_v46 = vpop.eup %3806  ;;  %v2777_v58 = vunpack.c.l.bf16 %v86_v19 }
 0x71d   :  { %v2734_v48 = vmul.f32 %v2727_v61, %v5605_v57  ;;  %2927 = vmatprep.subr.bf16.mxu0 %v5596_v56  ;;  %2970 = vmatprep.subr.bf16.mxu1 %v5602_v47  ;;  %v3809_v6 = vpop.eup %3808  ;;  %v6153_v47 = vld [vmem:[#allocation9_spill] sm:$0xff]  ;;  %v6154_v57 = vld [vmem:[#allocation8_spill] sm:$0xff] }
 0x71e   :  { %v2730_v10 = vadd.f32 0.5, %v2724_v31  ;;  %v2737_v41 = vmul.f32 %v3807_v46, %v2729_v20  ;;  %v3811_v56 = vpop.eup %3810 }
 0x71f   :  { %v5809_v16 = vadd.f32 %v2736_v12, %v2734_v48 }
 0x720   :  { %v2735_v3 = vmul.f32 %v2730_v10, %v5633_v24  ;;  %2928 = vmatpush1.bf16.msra.mxu0 %v5611_v22  ;;  %2971 = vmatpush1.bf16.msra.mxu1 %v5617_v0  ;;  %v2722_v22 = vmul.f32 0.5, %v3809_v6  ;;  %v2725_v0 = vmul.f32 0.5, %v3811_v56 }
 0x721   :  { %2929 = vmatprep.subr.bf16.mxu0 %v5623_v15  ;;  %2972 = vmatprep.subr.bf16.mxu1 %v5629_v39  ;;  %3812 = vtanh.f32 %v5809_v16  ;;  %v6155_v15 = vld [vmem:[#allocation11_spill] sm:$0xff]  ;;  %v6156_v39 = vld [vmem:[#allocation10_spill] sm:$0xff] }
 0x722   :  { %v5817_v7 = vadd.f32 %v2737_v41, %v2735_v3 }
 0x724   :  { %3814 = vtanh.f32 %v5817_v7  ;;  %2930 = vmatpush1.bf16.msra.mxu0 %v5639_v45  ;;  %2973 = vmatpush1.bf16.msra.mxu1 %v5645_v8  ;;  %v6157_v45 = vld [vmem:[#allocation13_spill] sm:$0xff]  ;;  %v2728_v8 = vadd.f32 0.5, %v2722_v22 }
 0x725   :  { %2931 = vmatprep.subr.bf16.mxu0 %v5651_v13  ;;  %2974 = vmatprep.subr.bf16.mxu1 %v5657_v55  ;;  %v2731_v13 = vadd.f32 0.5, %v2725_v0 }
 0x728   :  { %2932 = vmatpush1.bf16.msra.mxu0 %v6153_v47  ;;  %2975 = vmatpush1.bf16.msra.mxu1 %v6154_v57 }
 0x729   :  { %2933 = vmatprep.subr.bf16.mxu0 %v6155_v15  ;;  %2976 = vmatprep.subr.bf16.mxu1 %v6156_v39 }
 0x72b   :  { %v3813_v24 = vpop.eup %3812 }
 0x72c   :  { %2934 = vmatpush1.bf16.msra.mxu0 %v6157_v45  ;;  %2977 = vmatpush1.bf16.msra.mxu1 %v5693_v21  ;;  %v2742_v11 = vmul.f32 %v3813_v24, %v2728_v8  ;;  %v80_v21 = vld [vmem:[%s5871_s0 + $0x1c0] sm:$0xff]  ;;  %v3124_v8 = vld [vmem:[%s5872_s1 + $0x10] sm:$0xff] }
 0x72d   :  { %2935 = vmatprep.subr.bf16.mxu0 %v6158_v17  ;;  %2978 = vmatprep.subr.bf16.mxu1 %v5705_v59  ;;  %v84_v59 = vld [vmem:[%s5871_s0 + $0x1e0] sm:$0xff]  ;;  %v2771_v60 = vunpack.c.l.bf16 %v80_v21 }
 0x72e   :  { %v3815_v55 = vpop.eup %3814  ;;  %v2775_v33 = vunpack.c.l.bf16 %v84_v59  ;;  %v2776_v63 = vunpack.c.h.bf16 %v84_v59 }
 0x72f   :  { %v2743_v43 = vmul.f32 %v3815_v55, %v2731_v13  ;;  %v3126_v55 = vld [vmem:[%s5872_s1 + $0x30] sm:$0xff] }
 0x730   :  { %2936 = vmatpush1.bf16.msra.mxu0 %v5711_v32  ;;  %2979 = vmatpush1.bf16.msra.mxu1 %v5717_v5  ;;  %v82_v32 = vld [vmem:[%s5871_s0 + $0x1c8] sm:$0xff]  ;;  %v2772_v5 = vunpack.c.h.bf16 %v80_v21  ;;  %v2917_v21 = vunpack.c.l.bf16 %v3126_v55 }
 0x731   :  { %v2755_v18 = vpack.c.bf16 %v2743_v43, %v2742_v11  ;;  %v2774_v27 = vunpack.c.h.bf16 %v82_v32  ;;  %v2773_v49 = vunpack.c.l.bf16 %v82_v32  ;;  %v2913_v11 = vunpack.c.l.bf16 %v3124_v8 }
 0x732   :  { %v2914_v43 = vunpack.c.h.bf16 %v3124_v8  ;;  %v2918_v32 = vunpack.c.h.bf16 %v3126_v55 }
 0x733   :  { %3436 = vst [vmem:[%s5875_s4 + $0x8] sm:$0xff] %v2755_v18   ;;  %2954 = vmatmul.mubr.bf16.vlgmr.msra.gmra.mrb[60].mxu0 %v2755_v18  ;;  %2997 = vmatmul.mubr.bf16.vlgmr.msra.gmra.mrb[60].mxu1 %v2755_v18 }
 0x7e6   :  { %v2813_v28 = vpop.f32.mrb[56].mxu0  ;;  %v2856_v1 = vpop.f32.mrb[56].mxu1 }
 0x7e7   :  { %v2865_v51 = vadd.f32 %v2813_v28, %v2771_v60  ;;  %v2815_v34 = vpop.f32.mrb[57].mxu0  ;;  %v2858_v37 = vpop.f32.mrb[57].mxu1  ;;  %v2867_v36 = vadd.f32 %v2856_v1, %v2773_v49 }
 0x7e8   :  { %v2866_v35 = vadd.f32 %v2815_v34, %v2772_v5  ;;  %v2817_v40 = vpop.f32.mrb[58].mxu0  ;;  %v2860_v23 = vpop.f32.mrb[58].mxu1  ;;  %v2868_v52 = vadd.f32 %v2858_v37, %v2774_v27 }
 0x7e9   :  { %v2873_v9 = vmul.f32 0.5, %v2865_v51  ;;  %v2869_v14 = vadd.f32 %v2817_v40, %v2775_v33  ;;  %v2819_v42 = vpop.f32.mrb[59].mxu0  ;;  %v2862_v38 = vpop.f32.mrb[59].mxu1  ;;  %v2871_v25 = vadd.f32 %v2860_v23, %v2777_v58  ;;  %v2875_v62 = vmul.f32 0.5, %v2867_v36 }
 0x7ea   :  { %v2874_v54 = vmul.f32 0.5, %v2866_v35  ;;  %v2870_v30 = vadd.f32 %v2819_v42, %v2776_v63  ;;  %v2872_v53 = vadd.f32 %v2862_v38, %v2778_v2  ;;  %v3127_v63 = vld [vmem:[%s5872_s1 + $0x38] sm:$0xff] }
 0x7eb   :  { %3816 = vtanh.f32 %v2873_v9  ;;  %v2876_v50 = vmul.f32 0.5, %v2869_v14  ;;  %v2878_v20 = vmul.f32 0.5, %v2871_v25  ;;  %v2919_v25 = vunpack.c.l.bf16 %v3127_v63 }
 0x7ec   :  { %v2877_v44 = vmul.f32 0.5, %v2870_v30  ;;  %3818 = vtanh.f32 %v2874_v54  ;;  %v2920_v54 = vunpack.c.h.bf16 %v3127_v63 }
 0x7ed   :  { %3820 = vtanh.f32 %v2876_v50 }
 0x7ee   :  { %3822 = vtanh.f32 %v2868_v52 }
 0x7ef   :  { %3824 = vtanh.f32 %v2877_v44 }
 0x7f0   :  { %3826 = vtanh.f32 %v2872_v53 }
 0x7f1   :  { %3828 = vtanh.f32 %v2875_v62 }
 0x7f2   :  { %3830 = vtanh.f32 %v2878_v20 }
 0x7f5   :  { %v3817_v4 = vpop.eup %3816 }
 0x7f6   :  { %v2885_v61 = vmul.f32 0.5, %v3817_v4  ;;  %v3819_v12 = vpop.eup %3818 }
 0x7f7   :  { %v3821_v31 = vpop.eup %3820  ;;  %v2886_v48 = vmul.f32 0.5, %v3819_v12 }
 0x7f8   :  { %v2891_v46 = vadd.f32 0.5, %v2885_v61  ;;  %v3823_v10 = vpop.eup %3822  ;;  %v2888_v41 = vmul.f32 0.5, %v3821_v31 }
 0x7f9   :  { %v3825_v3 = vpop.eup %3824  ;;  %v2892_v6 = vadd.f32 0.5, %v2886_v48 }
 0x7fa   :  { %v2901_v56 = vmul.f32 %v3823_v10, %v2891_v46  ;;  %v2894_v47 = vadd.f32 0.5, %v2888_v41  ;;  %v2889_v57 = vmul.f32 0.5, %v3825_v3  ;;  %v3827_v22 = vpop.eup %3826 }
 0x7fb   :  { %v2899_v0 = vmul.f32 %v2892_v6, %v5772_v26  ;;  %v3829_v17 = vpop.eup %3828  ;;  %v3125_v26 = vld [vmem:[%s5872_s1 + $0x18] sm:$0xff] }
 0x7fc   :  { %v2895_v15 = vadd.f32 0.5, %v2889_v57  ;;  %v2902_v39 = vmul.f32 %v3827_v22, %v2894_v47  ;;  %v3831_v18 = vpop.eup %3830  ;;  %v2916_v28 = vunpack.c.h.bf16 %v3125_v26  ;;  %v2915_v49 = vunpack.c.l.bf16 %v3125_v26 }
 0x7fd   :  { %v2903_v24 = vadd.f32 %v2901_v56, %v2899_v0  ;;  %v2890_v51 = vmul.f32 0.5, %v3831_v18 }
 0x7fe   :  { %v2900_v45 = vmul.f32 %v2895_v15, %v5779_v29  ;;  %v2887_v29 = vmul.f32 0.5, %v3829_v17 }
 0x7ff   :  { %3832 = vtanh.f32 %v2903_v24  ;;  %v2896_v50 = vadd.f32 0.5, %v2890_v51 }
 0x800   :  { %v2904_v13 = vadd.f32 %v2902_v39, %v2900_v45  ;;  %v2893_v19 = vadd.f32 0.5, %v2887_v29 }
 0x802   :  { %3834 = vtanh.f32 %v2904_v13 }
 0x806   :  { %v2955_v59 = vpop.f32.mrb[60].mxu0  ;;  %v2998_v60 = vpop.f32.mrb[60].mxu1 }
 0x807   :  { %v3007_v5 = vadd.f32 %v2955_v59, %v2913_v11  ;;  %v2957_v33 = vpop.f32.mrb[61].mxu0  ;;  %v3000_v1 = vpop.f32.mrb[61].mxu1  ;;  %v3009_v4 = vadd.f32 %v2998_v60, %v2915_v49 }
 0x808   :  { %v3008_v34 = vadd.f32 %v2957_v33, %v2914_v43  ;;  %v2959_v27 = vpop.f32.mrb[62].mxu0  ;;  %v3002_v37 = vpop.f32.mrb[62].mxu1  ;;  %v3010_v2 = vadd.f32 %v3000_v1, %v2916_v28 }
 0x809   :  { %v3015_v35 = vmul.f32 0.5, %v3007_v5  ;;  %v3011_v40 = vadd.f32 %v2959_v27, %v2917_v21  ;;  %v2961_v23 = vpop.f32.mrb[63].mxu0  ;;  %v3004_v9 = vpop.f32.mrb[63].mxu1  ;;  %v3013_v61 = vadd.f32 %v3002_v37, %v2919_v25  ;;  %v3017_v12 = vmul.f32 0.5, %v3009_v4 }
 0x80a   :  { %v3833_v14 = vpop.eup %3832  ;;  %v3016_v42 = vmul.f32 0.5, %v3008_v34  ;;  %v3012_v38 = vadd.f32 %v2961_v23, %v2918_v32  ;;  %v3014_v36 = vadd.f32 %v3004_v9, %v2920_v54 }
 0x80b   :  { %v2907_v30 = vmul.f32 %v3833_v14, %v2893_v19  ;;  %3836 = vtanh.f32 %v3015_v35  ;;  %v3018_v52 = vmul.f32 0.5, %v3011_v40  ;;  %v3020_v48 = vmul.f32 0.5, %v3013_v61 }
 0x80c   :  { %v3019_v44 = vmul.f32 0.5, %v3012_v38  ;;  %v3835_v53 = vpop.eup %3834  ;;  %3838 = vtanh.f32 %v3016_v42 }
 0x80d   :  { %v2908_v58 = vmul.f32 %v3835_v53, %v2896_v50  ;;  %3840 = vtanh.f32 %v3018_v52 }
 0x80e   :  { %3842 = vtanh.f32 %v3010_v2 }
 0x80f   :  { %v3417_v62 = vpack.c.bf16 %v2908_v58, %v2907_v30  ;;  %3844 = vtanh.f32 %v3019_v44 }
 0x810   :  { %3846 = vtanh.f32 %v3014_v36 }
 0x811   :  { %3437 = vst [vmem:[%s5874_s3 + $0x38] sm:$0xff] %v3417_v62   ;;  %3848 = vtanh.f32 %v3017_v12 }
 0x812   :  { %3850 = vtanh.f32 %v3020_v48 }
 0x815   :  { %v3837_v20 = vpop.eup %3836 }
 0x816   :  { %v3027_v31 = vmul.f32 0.5, %v3837_v20  ;;  %v3839_v46 = vpop.eup %3838 }
 0x817   :  { %v3841_v10 = vpop.eup %3840  ;;  %v3028_v3 = vmul.f32 0.5, %v3839_v46 }
 0x818   :  { %v3033_v41 = vadd.f32 0.5, %v3027_v31  ;;  %v3843_v6 = vpop.eup %3842  ;;  %v3030_v56 = vmul.f32 0.5, %v3841_v10 }
 0x819   :  { %v3845_v47 = vpop.eup %3844  ;;  %v3034_v57 = vadd.f32 0.5, %v3028_v3 }
 0x81a   :  { %v3043_v22 = vmul.f32 %v3843_v6, %v3033_v41  ;;  %v3036_v0 = vadd.f32 0.5, %v3030_v56  ;;  %v3031_v15 = vmul.f32 0.5, %v3845_v47  ;;  %v3847_v39 = vpop.eup %3846 }
 0x81b   :  { %v3041_v24 = vmul.f32 %v3034_v57, %v5809_v16  ;;  %v3849_v11 = vpop.eup %3848 }
 0x81c   :  { %v3037_v45 = vadd.f32 0.5, %v3031_v15  ;;  %v3044_v8 = vmul.f32 %v3847_v39, %v3036_v0  ;;  %v3851_v26 = vpop.eup %3850  ;;  %v3029_v43 = vmul.f32 0.5, %v3849_v11 }
 0x81d   :  { %v3045_v13 = vadd.f32 %v3043_v22, %v3041_v24  ;;  %v3032_v18 = vmul.f32 0.5, %v3851_v26 }
 0x81e   :  { %v3042_v17 = vmul.f32 %v3037_v45, %v5817_v7  ;;  %v3035_v29 = vadd.f32 0.5, %v3029_v43 }
 0x81f   :  { %3852 = vtanh.f32 %v3045_v13  ;;  %v3038_v60 = vadd.f32 0.5, %v3032_v18 }
 0x820   :  { %v3046_v55 = vadd.f32 %v3044_v8, %v3042_v17 }
 0x822   :  { %3854 = vtanh.f32 %v3046_v55 }
 0x829   :  { %v3853_v21 = vpop.eup %3852 }
 0x82a   :  { %v3049_v59 = vmul.f32 %v3853_v21, %v3035_v29 }
 0x82c   :  { %v3855_v32 = vpop.eup %3854 }
 0x82d   :  { %v3050_v5 = vmul.f32 %v3855_v32, %v3038_v60 }
 0x82f   :  { %v3422_v33 = vpack.c.bf16 %v3050_v5, %v3049_v59 }
 0x831   :  { %3423 = vst [vmem:[%s5875_s4] sm:$0xff] %v3422_v33  }

</bundles_post_ra>
